<compile_context>
chip_gen: v7x
topology: tpu7x:2x2x1
jax: 0.10.0
libtpu: 0.0.40
codegen_flags: <defaults>
</compile_context>

<pallas_src>
import functools
import math

import jax
import jax.numpy as jnp
from jax.experimental import pallas as pl
from jax.experimental.pallas import tpu as pltpu


# --------------------------- fused forward kernel ---------------------------

def _fused_forward_kernel(xq_ref, w1_ref, t1_ref, w2_ref, t2_ref,
                          fcw_ref, fcb_ref, inw_ref, inb_ref,
                          outw_ref, outb_ref, ln1g_ref, ln1b_ref,
                          lin1w_ref, lin1b_ref, lin2w_ref, lin2b_ref,
                          ln2g_ref, ln2b_ref, regw_ref, regb_ref,
                          o_ref, *, nhead, eps):
    f32 = jnp.float32
    S = xq_ref.shape[2]              # n_segs (sequence length)
    Uh = xq_ref.shape[3] - 1         # conv2 output rows (= conv1 rows / 2)
    Uw = xq_ref.shape[4] - 1         # conv2 output cols
    C = w1_ref.shape[0]              # cnn_channels
    D = fcw_ref.shape[1]             # dim_transformer
    L = inw_ref.shape[0]             # num_encoder_layers
    OC = regw_ref.shape[0]           # out_classes
    Dh = D // nhead
    qscale = 1.0 / math.sqrt(Dh)

    # ---------- ConvBlock1: 3x3 stride-2 stencil as scalar*vector VPU FMAs.
    # Computed directly in output-parity-split form so ConvBlock2's stride-2
    # sampling becomes static slices (no strided / gather access anywhere).
    slabs = [[xq_ref[0, 4 * r + c] for c in range(4)] for r in range(4)]

    zrow = jnp.zeros((S, 1, Uw), f32)
    zcol = jnp.zeros((S, Uh + 1, 1), f32)
    # Y[A][B][ch]: conv1 output at rows == A, cols == B (mod 2), with one
    # leading zero row/col (== conv2's spatial zero padding).  Shape (S, Uh+1, Uw+1).
    Y = [[[None] * C for _ in range(2)] for _ in range(2)]
    for A in range(2):
        for B in range(2):
            taps = []
            for kh in range(3):
                e = 2 * A + kh
                for kw in range(3):
                    f = 2 * B + kw
                    taps.append(slabs[e % 4][f % 4]
                                [:, e // 4:e // 4 + Uh, f // 4:f // 4 + Uw])
            for ch in range(C):
                acc = taps[0] * w1_ref[ch, 0]
                for k in range(1, 9):
                    acc = acc + taps[k] * w1_ref[ch, k]
                y = jnp.maximum(acc + t1_ref[ch], 0.0)   # folded BN + bias + ReLU
                Y[A][B][ch] = jnp.concatenate(
                    [zcol, jnp.concatenate([zrow, y], axis=1)], axis=2)

    # ---------- ConvBlock2: 3x3 stride-2, C -> 1 channel, static slices of Y.
    acc2 = None
    for kh in range(3):
        A, r0 = (kh + 1) % 2, (0 if kh == 0 else 1)
        for kw in range(3):
            B, c0 = (kw + 1) % 2, (0 if kw == 0 else 1)
            for ch in range(C):
                t = Y[A][B][ch][:, r0:r0 + Uh, c0:c0 + Uw] * w2_ref[ch, 3 * kh + kw]
                acc2 = t if acc2 is None else acc2 + t
    feat = jnp.maximum(acc2 + t2_ref[0], 0.0).reshape(S, Uh * Uw)   # (S, fc_in)

    # ---------- fc + transformer encoder layers (post-norm, ReLU FFN).
    def _mm(a, w_bf16):              # bf16 MXU operands, f32 accumulation
        return jnp.dot(a.astype(jnp.bfloat16), w_bf16,
                       preferred_element_type=f32)

    def _ln(z, g, b):
        mu = jnp.mean(z, axis=-1, keepdims=True)
        var = jnp.mean(jnp.square(z - mu), axis=-1, keepdims=True)
        return (z - mu) * jax.lax.rsqrt(var + eps) * g + b

    h = _mm(feat, fcw_ref[...]) + fcb_ref[...]                      # (S, D) f32

    for l in range(L):                                              # unrolled
        qkv = _mm(h, inw_ref[l]) + inb_ref[l]                       # (S, 3D)
        q = (qkv[:, :D] * qscale).reshape(S, nhead, Dh).transpose(1, 0, 2)
        k = qkv[:, D:2 * D].reshape(S, nhead, Dh).transpose(1, 0, 2)
        v = qkv[:, 2 * D:].reshape(S, nhead, Dh).transpose(1, 0, 2)
        s = jnp.einsum("nqd,nkd->nqk", q, k, preferred_element_type=f32)
        s = s - jnp.max(s, axis=-1, keepdims=True)
        p = jnp.exp(s)
        p = p * pl.reciprocal(jnp.sum(p, axis=-1, keepdims=True), approx=True)
        ctx = jnp.einsum("nqk,nkd->nqd", p, v, preferred_element_type=f32)
        attn = _mm(ctx.transpose(1, 0, 2).reshape(S, D), outw_ref[l]) + outb_ref[l]
        h = _ln(h + attn, ln1g_ref[l], ln1b_ref[l])                 # norm1
        ff = jnp.maximum(_mm(h, lin1w_ref[l]) + lin1b_ref[l], 0.0)
        ff = _mm(ff, lin2w_ref[l]) + lin2b_ref[l]
        h = _ln(h + ff, ln2g_ref[l], ln2b_ref[l])                   # norm2

    # ---------- aggregation + regression: VPU multiply + reduce (OC tiny).
    vals = [jnp.sum(h * regw_ref[oc], axis=(0, 1), keepdims=True)   # (1, 1)
            for oc in range(OC)]
    out_vec = vals[0] if OC == 1 else jnp.concatenate(vals, axis=-1)
    o_ref[0] = out_vec + regb_ref[...]


# --------------------------------- wrapper ----------------------------------

def audio_cnn_transformer_forward(x, params, cfg):
    """x: (batch, n_segs, seq_len, emb_dim) -> (batch,)"""
    B, S, H, W = x.shape
    K, stride, padding = cfg["kernel_size"], cfg["stride"], cfg["padding"]
    if (K, stride, padding) != (3, 2, 1):
        raise NotImplementedError("fused conv stencil assumes kernel=3, stride=2, pad=1")
    Ho1 = (H + 2 * padding - K) // stride + 1
    Wo1 = (W + 2 * padding - K) // stride + 1
    Ho2 = (Ho1 + 2 * padding - K) // stride + 1
    Wo2 = (Wo1 + 2 * padding - K) // stride + 1
    assert Ho1 == 2 * Ho2 and Wo1 == 2 * Wo2, "parity split needs even conv1 output"

    D = cfg["dim_transformer"]
    F = cfg["dim_feedforward"]
    L = cfg["num_encoder_layers"]
    OC = cfg["out_classes"]
    nh = cfg["nhead"]
    C = cfg["cnn_channels"]
    bf = jnp.bfloat16
    eps_bn = 1e-5

    # Input-side layout plumbing only: zero-pad the raw input and split it
    # into its 16 (row%4, col%4) residue slabs.  Everything downstream stays
    # inside the single fused kernel / VMEM.
    rows, cols = 4 * (Ho2 + 1), 4 * (Wo2 + 1)
    xp = jnp.pad(x.astype(jnp.float32),
                 ((0, 0), (0, 0),
                  (padding, rows - H - padding),
                  (padding, cols - W - padding)))
    slabs = jnp.stack([xp[:, :, r::4, c::4] for r in range(4) for c in range(4)],
                      axis=1)                               # (B, 16, S, Ho2+1, Wo2+1)

    # Fold eval-mode BatchNorm (+ conv bias) into conv weights / shifts.
    def _fold(p):
        sc = p["bn_gamma"] * jax.lax.rsqrt(p["bn_var"] + eps_bn)
        sh = p["bn_beta"] + (p["b"] - p["bn_mean"]) * sc
        return sc, sh

    s1, t1 = _fold(params["conv1"])
    s2, t2 = _fold(params["conv2"])
    w1f = (params["conv1"]["w"][:, 0] * s1[:, None, None]).reshape(C, K * K)  # (C, 9)
    w2f = (params["conv2"]["w"][0] * s2[0]).reshape(C, K * K)                 # (C, 9)

    def stacked(name):
        return jnp.stack([lp[name] for lp in params["layers"]], axis=0)

    fcw = params["fc_w"].astype(bf)                    # (fc_in, D)
    fcb = params["fc_b"].reshape(1, D)
    inw = stacked("in_proj_w").astype(bf)              # (L, D, 3D)
    inb = stacked("in_proj_b").reshape(L, 1, 3 * D)
    outw = stacked("out_proj_w").astype(bf)            # (L, D, D)
    outb = stacked("out_proj_b").reshape(L, 1, D)
    ln1g = stacked("ln1_g").reshape(L, 1, D)
    ln1b = stacked("ln1_b").reshape(L, 1, D)
    lin1w = stacked("lin1_w").astype(bf)               # (L, D, F)
    lin1b = stacked("lin1_b").reshape(L, 1, F)
    lin2w = stacked("lin2_w").astype(bf)               # (L, F, D)
    lin2b = stacked("lin2_b").reshape(L, 1, D)
    ln2g = stacked("ln2_g").reshape(L, 1, D)
    ln2b = stacked("ln2_b").reshape(L, 1, D)
    # reg_w rows are (s-major, d-minor), matching transpose(0,1).reshape(B, S*D).
    regw = params["reg_w"].reshape(S, D, OC).transpose(2, 0, 1).astype(jnp.float32)
    regb = params["reg_b"].reshape(1, OC)

    vmem_weights = (fcw, fcb, inw, inb, outw, outb, ln1g, ln1b,
                    lin1w, lin1b, lin2w, lin2b, ln2g, ln2b, regw, regb)

    def _smem():
        return pl.BlockSpec(memory_space=pltpu.MemorySpace.SMEM)

    def _resident(arr):   # full-array block, constant across the batch grid
        zeros = (0,) * arr.ndim
        return pl.BlockSpec(arr.shape, lambda b, _z=zeros: _z)

    out = pl.pallas_call(
        functools.partial(_fused_forward_kernel, nhead=nh, eps=1e-5),
        out_shape=jax.ShapeDtypeStruct((B, 1, OC), jnp.float32),
        grid=(B,),
        in_specs=([pl.BlockSpec((1, 16, S, Ho2 + 1, Wo2 + 1),
                                lambda b: (b, 0, 0, 0, 0))]
                  + [_smem(), _smem(), _smem(), _smem()]
                  + [_resident(a) for a in vmem_weights]),
        out_specs=pl.BlockSpec((1, 1, OC), lambda b: (b, 0, 0)),
        compiler_params=pltpu.CompilerParams(
            # Batch elements are independent -> megacore split on v7x; on
            # single-core v5e/v6e the extra grid step is ~0.35us (negligible).
            dimension_semantics=("parallel",),
        ),
    )(slabs, w1f, t1, w2f, t2, *vmem_weights)
    return out.reshape(B, OC)[:, 0]                     # .squeeze(-1)


# ------------------------------ parameter init ------------------------------

def conv_output_shape(input_dim, kernel_size, stride, padding, n=1):
    for _ in range(n):
        input_dim = (input_dim - kernel_size + 2 * padding) / stride + 1
    return int(input_dim)


def _dense(key, fan_in, fan_out):
    lim = 1.0 / math.sqrt(fan_in)
    return jax.random.uniform(key, (fan_in, fan_out), jnp.float32, -lim, lim)


def init_params(cfg, key):
    K = cfg["kernel_size"]
    C = cfg["cnn_channels"]
    D = cfg["dim_transformer"]
    F = cfg["dim_feedforward"]
    S = cfg["n_segs"]

    conv_out_h = conv_output_shape(cfg["h"], K, cfg["stride"], cfg["padding"], 2)
    conv_out_w = conv_output_shape(cfg["w"], K, cfg["stride"], cfg["padding"], 2)
    fc_in = conv_out_h * conv_out_w

    keys = jax.random.split(key, 8 + cfg["num_encoder_layers"])

    def conv_block(kk, cin, cout):
        k1, k2, k3, k4 = jax.random.split(kk, 4)
        lim = 1.0 / math.sqrt(cin * K * K)
        return dict(
            w=jax.random.uniform(k1, (cout, cin, K, K), jnp.float32, -lim, lim),
            b=jax.random.uniform(k2, (cout,), jnp.float32, -lim, lim),
            bn_gamma=1.0 + 0.1 * jax.random.normal(k3, (cout,), jnp.float32),
            bn_beta=0.1 * jax.random.normal(k4, (cout,), jnp.float32),
            bn_mean=jnp.zeros((cout,), jnp.float32),   # eval-mode running stats
            bn_var=jnp.ones((cout,), jnp.float32),
        )

    def enc_layer(kk):
        k = jax.random.split(kk, 7)
        return dict(
            in_proj_w=_dense(k[0], D, 3 * D),
            in_proj_b=0.01 * jax.random.normal(k[1], (3 * D,), jnp.float32),
            out_proj_w=_dense(k[2], D, D),
            out_proj_b=jnp.zeros((D,), jnp.float32),
            ln1_g=jnp.ones((D,), jnp.float32), ln1_b=jnp.zeros((D,), jnp.float32),
            lin1_w=_dense(k[3], D, F),
            lin1_b=0.01 * jax.random.normal(k[4], (F,), jnp.float32),
            lin2_w=_dense(k[5], F, D),
            lin2_b=0.01 * jax.random.normal(k[6], (D,), jnp.float32),
            ln2_g=jnp.ones((D,), jnp.float32), ln2_b=jnp.zeros((D,), jnp.float32),
        )

    params = dict(
        conv1=conv_block(keys[0], 1, C),
        conv2=conv_block(keys[1], C, 1),
        fc_w=_dense(keys[2], fc_in, D),
        fc_b=0.01 * jax.random.normal(keys[3], (D,), jnp.float32),
        layers=[enc_layer(keys[8 + i]) for i in range(cfg["num_encoder_layers"])],
        reg_w=_dense(keys[4], D * S, cfg["out_classes"]),
        reg_b=0.01 * jax.random.normal(keys[5], (cfg["out_classes"],), jnp.float32),
    )
    return params


# ----------------------------------- main -----------------------------------

if __name__ == "__main__":
    cfg = dict(
        h=16, w=16, n_segs=4, nhead=4, num_encoder_layers=2,
        dim_feedforward=64, dim_transformer=32, cnn_channels=4,
        kernel_size=3, dropout=0.1, padding=1, stride=2, out_classes=1,
    )

    key = jax.random.PRNGKey(0)
    k_param, k_x = jax.random.split(key)
    params = init_params(cfg, k_param)

    batch = 2
    x = jax.random.normal(k_x, (batch, cfg["n_segs"], cfg["h"], cfg["w"]), jnp.float32)

    fwd = jax.jit(lambda xx, pp: audio_cnn_transformer_forward(xx, pp, cfg))
    out = jax.block_until_ready(fwd(x, params))
    assert out.shape == (batch,), out.shape
    assert bool(jnp.all(jnp.isfinite(out))), out
    print("KERNEL_OK")
</pallas_src>

<mosaic_0001>
module attributes {stable_mosaic.version = 11 : i64} {
  func.func @_fused_forward_kernel(%arg0: i32, %arg1: memref<1x16x4x5x5xf32, #tpu.memory_space<vmem>>, %arg2: memref<4x9xf32, #tpu.memory_space<smem>>, %arg3: memref<4xf32, #tpu.memory_space<smem>>, %arg4: memref<4x9xf32, #tpu.memory_space<smem>>, %arg5: memref<1xf32, #tpu.memory_space<smem>>, %arg6: memref<16x32xbf16, #tpu.memory_space<vmem>>, %arg7: memref<1x32xf32, #tpu.memory_space<vmem>>, %arg8: memref<2x32x96xbf16, #tpu.memory_space<vmem>>, %arg9: memref<2x1x96xf32, #tpu.memory_space<vmem>>, %arg10: memref<2x32x32xbf16, #tpu.memory_space<vmem>>, %arg11: memref<2x1x32xf32, #tpu.memory_space<vmem>>, %arg12: memref<2x1x32xf32, #tpu.memory_space<vmem>>, %arg13: memref<2x1x32xf32, #tpu.memory_space<vmem>>, %arg14: memref<2x32x64xbf16, #tpu.memory_space<vmem>>, %arg15: memref<2x1x64xf32, #tpu.memory_space<vmem>>, %arg16: memref<2x64x32xbf16, #tpu.memory_space<vmem>>, %arg17: memref<2x1x32xf32, #tpu.memory_space<vmem>>, %arg18: memref<2x1x32xf32, #tpu.memory_space<vmem>>, %arg19: memref<2x1x32xf32, #tpu.memory_space<vmem>>, %arg20: memref<1x4x32xf32, #tpu.memory_space<vmem>>, %arg21: memref<1x1xf32, #tpu.memory_space<vmem>>, %arg22: memref<1x1x1xf32, #tpu.memory_space<vmem>>) attributes {dimension_semantics = [#tpu.dimension_semantics<parallel>], iteration_bounds = array<i64: 2>, scalar_prefetch = 0 : i64, scratch_operands = 0 : i64, tpu.core_type = #tpu.core_type<tc>, window_params = [{transform_indices = @transform_0, window_bounds = array<i64: 1, 16, 4, 5, 5>}, {transform_indices = @transform_1, window_bounds = array<i64: 4, 9>}, {transform_indices = @transform_2, window_bounds = array<i64: 4>}, {transform_indices = @transform_3, window_bounds = array<i64: 4, 9>}, {transform_indices = @transform_4, window_bounds = array<i64: 1>}, {pipeline_mode = #tpu.pipeline_mode<synchronous>, transform_indices = @transform_5, window_bounds = array<i64: 16, 32>}, {pipeline_mode = #tpu.pipeline_mode<synchronous>, transform_indices = @transform_6, window_bounds = array<i64: 1, 32>}, {pipeline_mode = #tpu.pipeline_mode<synchronous>, transform_indices = @transform_7, window_bounds = array<i64: 2, 32, 96>}, {pipeline_mode = #tpu.pipeline_mode<synchronous>, transform_indices = @transform_8, window_bounds = array<i64: 2, 1, 96>}, {pipeline_mode = #tpu.pipeline_mode<synchronous>, transform_indices = @transform_9, window_bounds = array<i64: 2, 32, 32>}, {pipeline_mode = #tpu.pipeline_mode<synchronous>, transform_indices = @transform_10, window_bounds = array<i64: 2, 1, 32>}, {pipeline_mode = #tpu.pipeline_mode<synchronous>, transform_indices = @transform_11, window_bounds = array<i64: 2, 1, 32>}, {pipeline_mode = #tpu.pipeline_mode<synchronous>, transform_indices = @transform_12, window_bounds = array<i64: 2, 1, 32>}, {pipeline_mode = #tpu.pipeline_mode<synchronous>, transform_indices = @transform_13, window_bounds = array<i64: 2, 32, 64>}, {pipeline_mode = #tpu.pipeline_mode<synchronous>, transform_indices = @transform_14, window_bounds = array<i64: 2, 1, 64>}, {pipeline_mode = #tpu.pipeline_mode<synchronous>, transform_indices = @transform_15, window_bounds = array<i64: 2, 64, 32>}, {pipeline_mode = #tpu.pipeline_mode<synchronous>, transform_indices = @transform_16, window_bounds = array<i64: 2, 1, 32>}, {pipeline_mode = #tpu.pipeline_mode<synchronous>, transform_indices = @transform_17, window_bounds = array<i64: 2, 1, 32>}, {pipeline_mode = #tpu.pipeline_mode<synchronous>, transform_indices = @transform_18, window_bounds = array<i64: 2, 1, 32>}, {pipeline_mode = #tpu.pipeline_mode<synchronous>, transform_indices = @transform_19, window_bounds = array<i64: 1, 4, 32>}, {pipeline_mode = #tpu.pipeline_mode<synchronous>, transform_indices = @transform_20, window_bounds = array<i64: 1, 1>}, {transform_indices = @transform_21, window_bounds = array<i64: 1, 1, 1>}]} {
    %c0 = arith.constant 0 : index
    %c0_0 = arith.constant 0 : index
    %c0_1 = arith.constant 0 : index
    %c0_2 = arith.constant 0 : index
    %c0_3 = arith.constant 0 : index
    %0 = vector.load %arg1[%c0, %c0_0, %c0_1, %c0_2, %c0_3] : memref<1x16x4x5x5xf32, #tpu.memory_space<vmem>>, vector<1x1x4x5x5xf32>
    %1 = vector.shape_cast %0 : vector<1x1x4x5x5xf32> to vector<4x5x5xf32>
    %c0_4 = arith.constant 0 : index
    %c1 = arith.constant 1 : index
    %c0_5 = arith.constant 0 : index
    %c0_6 = arith.constant 0 : index
    %c0_7 = arith.constant 0 : index
    %2 = vector.load %arg1[%c0_4, %c1, %c0_5, %c0_6, %c0_7] : memref<1x16x4x5x5xf32, #tpu.memory_space<vmem>>, vector<1x1x4x5x5xf32>
    %3 = vector.shape_cast %2 : vector<1x1x4x5x5xf32> to vector<4x5x5xf32>
    %c0_8 = arith.constant 0 : index
    %c2 = arith.constant 2 : index
    %c0_9 = arith.constant 0 : index
    %c0_10 = arith.constant 0 : index
    %c0_11 = arith.constant 0 : index
    %4 = vector.load %arg1[%c0_8, %c2, %c0_9, %c0_10, %c0_11] : memref<1x16x4x5x5xf32, #tpu.memory_space<vmem>>, vector<1x1x4x5x5xf32>
    %5 = vector.shape_cast %4 : vector<1x1x4x5x5xf32> to vector<4x5x5xf32>
    %c0_12 = arith.constant 0 : index
    %c3 = arith.constant 3 : index
    %c0_13 = arith.constant 0 : index
    %c0_14 = arith.constant 0 : index
    %c0_15 = arith.constant 0 : index
    %6 = vector.load %arg1[%c0_12, %c3, %c0_13, %c0_14, %c0_15] : memref<1x16x4x5x5xf32, #tpu.memory_space<vmem>>, vector<1x1x4x5x5xf32>
    %7 = vector.shape_cast %6 : vector<1x1x4x5x5xf32> to vector<4x5x5xf32>
    %c0_16 = arith.constant 0 : index
    %c4 = arith.constant 4 : index
    %c0_17 = arith.constant 0 : index
    %c0_18 = arith.constant 0 : index
    %c0_19 = arith.constant 0 : index
    %8 = vector.load %arg1[%c0_16, %c4, %c0_17, %c0_18, %c0_19] : memref<1x16x4x5x5xf32, #tpu.memory_space<vmem>>, vector<1x1x4x5x5xf32>
    %9 = vector.shape_cast %8 : vector<1x1x4x5x5xf32> to vector<4x5x5xf32>
    %c0_20 = arith.constant 0 : index
    %c5 = arith.constant 5 : index
    %c0_21 = arith.constant 0 : index
    %c0_22 = arith.constant 0 : index
    %c0_23 = arith.constant 0 : index
    %10 = vector.load %arg1[%c0_20, %c5, %c0_21, %c0_22, %c0_23] : memref<1x16x4x5x5xf32, #tpu.memory_space<vmem>>, vector<1x1x4x5x5xf32>
    %11 = vector.shape_cast %10 : vector<1x1x4x5x5xf32> to vector<4x5x5xf32>
    %c0_24 = arith.constant 0 : index
    %c6 = arith.constant 6 : index
    %c0_25 = arith.constant 0 : index
    %c0_26 = arith.constant 0 : index
    %c0_27 = arith.constant 0 : index
    %12 = vector.load %arg1[%c0_24, %c6, %c0_25, %c0_26, %c0_27] : memref<1x16x4x5x5xf32, #tpu.memory_space<vmem>>, vector<1x1x4x5x5xf32>
    %13 = vector.shape_cast %12 : vector<1x1x4x5x5xf32> to vector<4x5x5xf32>
    %c0_28 = arith.constant 0 : index
    %c7 = arith.constant 7 : index
    %c0_29 = arith.constant 0 : index
    %c0_30 = arith.constant 0 : index
    %c0_31 = arith.constant 0 : index
    %14 = vector.load %arg1[%c0_28, %c7, %c0_29, %c0_30, %c0_31] : memref<1x16x4x5x5xf32, #tpu.memory_space<vmem>>, vector<1x1x4x5x5xf32>
    %15 = vector.shape_cast %14 : vector<1x1x4x5x5xf32> to vector<4x5x5xf32>
    %c0_32 = arith.constant 0 : index
    %c8 = arith.constant 8 : index
    %c0_33 = arith.constant 0 : index
    %c0_34 = arith.constant 0 : index
    %c0_35 = arith.constant 0 : index
    %16 = vector.load %arg1[%c0_32, %c8, %c0_33, %c0_34, %c0_35] : memref<1x16x4x5x5xf32, #tpu.memory_space<vmem>>, vector<1x1x4x5x5xf32>
    %17 = vector.shape_cast %16 : vector<1x1x4x5x5xf32> to vector<4x5x5xf32>
    %c0_36 = arith.constant 0 : index
    %c9 = arith.constant 9 : index
    %c0_37 = arith.constant 0 : index
    %c0_38 = arith.constant 0 : index
    %c0_39 = arith.constant 0 : index
    %18 = vector.load %arg1[%c0_36, %c9, %c0_37, %c0_38, %c0_39] : memref<1x16x4x5x5xf32, #tpu.memory_space<vmem>>, vector<1x1x4x5x5xf32>
    %19 = vector.shape_cast %18 : vector<1x1x4x5x5xf32> to vector<4x5x5xf32>
    %c0_40 = arith.constant 0 : index
    %c10 = arith.constant 10 : index
    %c0_41 = arith.constant 0 : index
    %c0_42 = arith.constant 0 : index
    %c0_43 = arith.constant 0 : index
    %20 = vector.load %arg1[%c0_40, %c10, %c0_41, %c0_42, %c0_43] : memref<1x16x4x5x5xf32, #tpu.memory_space<vmem>>, vector<1x1x4x5x5xf32>
    %21 = vector.shape_cast %20 : vector<1x1x4x5x5xf32> to vector<4x5x5xf32>
    %c0_44 = arith.constant 0 : index
    %c11 = arith.constant 11 : index
    %c0_45 = arith.constant 0 : index
    %c0_46 = arith.constant 0 : index
    %c0_47 = arith.constant 0 : index
    %22 = vector.load %arg1[%c0_44, %c11, %c0_45, %c0_46, %c0_47] : memref<1x16x4x5x5xf32, #tpu.memory_space<vmem>>, vector<1x1x4x5x5xf32>
    %23 = vector.shape_cast %22 : vector<1x1x4x5x5xf32> to vector<4x5x5xf32>
    %c0_48 = arith.constant 0 : index
    %c12 = arith.constant 12 : index
    %c0_49 = arith.constant 0 : index
    %c0_50 = arith.constant 0 : index
    %c0_51 = arith.constant 0 : index
    %24 = vector.load %arg1[%c0_48, %c12, %c0_49, %c0_50, %c0_51] : memref<1x16x4x5x5xf32, #tpu.memory_space<vmem>>, vector<1x1x4x5x5xf32>
    %25 = vector.shape_cast %24 : vector<1x1x4x5x5xf32> to vector<4x5x5xf32>
    %c0_52 = arith.constant 0 : index
    %c13 = arith.constant 13 : index
    %c0_53 = arith.constant 0 : index
    %c0_54 = arith.constant 0 : index
    %c0_55 = arith.constant 0 : index
    %26 = vector.load %arg1[%c0_52, %c13, %c0_53, %c0_54, %c0_55] : memref<1x16x4x5x5xf32, #tpu.memory_space<vmem>>, vector<1x1x4x5x5xf32>
    %27 = vector.shape_cast %26 : vector<1x1x4x5x5xf32> to vector<4x5x5xf32>
    %c0_56 = arith.constant 0 : index
    %c14 = arith.constant 14 : index
    %c0_57 = arith.constant 0 : index
    %c0_58 = arith.constant 0 : index
    %c0_59 = arith.constant 0 : index
    %28 = vector.load %arg1[%c0_56, %c14, %c0_57, %c0_58, %c0_59] : memref<1x16x4x5x5xf32, #tpu.memory_space<vmem>>, vector<1x1x4x5x5xf32>
    %29 = vector.shape_cast %28 : vector<1x1x4x5x5xf32> to vector<4x5x5xf32>
    %c0_60 = arith.constant 0 : index
    %c15 = arith.constant 15 : index
    %c0_61 = arith.constant 0 : index
    %c0_62 = arith.constant 0 : index
    %c0_63 = arith.constant 0 : index
    %30 = vector.load %arg1[%c0_60, %c15, %c0_61, %c0_62, %c0_63] : memref<1x16x4x5x5xf32, #tpu.memory_space<vmem>>, vector<1x1x4x5x5xf32>
    %31 = vector.shape_cast %30 : vector<1x1x4x5x5xf32> to vector<4x5x5xf32>
    %cst = arith.constant 0.000000e+00 : f32
    %32 = vector.broadcast %cst : f32 to vector<4x1x4xf32>
    %cst_64 = arith.constant 0.000000e+00 : f32
    %33 = vector.broadcast %cst_64 : f32 to vector<4x5x1xf32>
    %34 = vector.extract_strided_slice %1 {offsets = [0, 0, 0], sizes = [4, 4, 4], strides = [1, 1, 1]} : vector<4x5x5xf32> to vector<4x4x4xf32>
    %35 = vector.extract_strided_slice %3 {offsets = [0, 0, 0], sizes = [4, 4, 4], strides = [1, 1, 1]} : vector<4x5x5xf32> to vector<4x4x4xf32>
    %36 = vector.extract_strided_slice %5 {offsets = [0, 0, 0], sizes = [4, 4, 4], strides = [1, 1, 1]} : vector<4x5x5xf32> to vector<4x4x4xf32>
    %37 = vector.extract_strided_slice %9 {offsets = [0, 0, 0], sizes = [4, 4, 4], strides = [1, 1, 1]} : vector<4x5x5xf32> to vector<4x4x4xf32>
    %38 = vector.extract_strided_slice %11 {offsets = [0, 0, 0], sizes = [4, 4, 4], strides = [1, 1, 1]} : vector<4x5x5xf32> to vector<4x4x4xf32>
    %39 = vector.extract_strided_slice %13 {offsets = [0, 0, 0], sizes = [4, 4, 4], strides = [1, 1, 1]} : vector<4x5x5xf32> to vector<4x4x4xf32>
    %40 = vector.extract_strided_slice %17 {offsets = [0, 0, 0], sizes = [4, 4, 4], strides = [1, 1, 1]} : vector<4x5x5xf32> to vector<4x4x4xf32>
    %41 = vector.extract_strided_slice %19 {offsets = [0, 0, 0], sizes = [4, 4, 4], strides = [1, 1, 1]} : vector<4x5x5xf32> to vector<4x4x4xf32>
    %42 = vector.extract_strided_slice %21 {offsets = [0, 0, 0], sizes = [4, 4, 4], strides = [1, 1, 1]} : vector<4x5x5xf32> to vector<4x4x4xf32>
    %c0_65 = arith.constant 0 : index
    %c0_66 = arith.constant 0 : index
    %43 = memref.load %arg2[%c0_65, %c0_66] : memref<4x9xf32, #tpu.memory_space<smem>>
    %44 = vector.broadcast %43 : f32 to vector<4x4x4xf32>
    %45 = arith.mulf %34, %44 : vector<4x4x4xf32>
    %c0_67 = arith.constant 0 : index
    %c1_68 = arith.constant 1 : index
    %46 = memref.load %arg2[%c0_67, %c1_68] : memref<4x9xf32, #tpu.memory_space<smem>>
    %47 = vector.broadcast %46 : f32 to vector<4x4x4xf32>
    %48 = arith.mulf %35, %47 : vector<4x4x4xf32>
    %49 = arith.addf %45, %48 : vector<4x4x4xf32>
    %c0_69 = arith.constant 0 : index
    %c2_70 = arith.constant 2 : index
    %50 = memref.load %arg2[%c0_69, %c2_70] : memref<4x9xf32, #tpu.memory_space<smem>>
    %51 = vector.broadcast %50 : f32 to vector<4x4x4xf32>
    %52 = arith.mulf %36, %51 : vector<4x4x4xf32>
    %53 = arith.addf %49, %52 : vector<4x4x4xf32>
    %c0_71 = arith.constant 0 : index
    %c3_72 = arith.constant 3 : index
    %54 = memref.load %arg2[%c0_71, %c3_72] : memref<4x9xf32, #tpu.memory_space<smem>>
    %55 = vector.broadcast %54 : f32 to vector<4x4x4xf32>
    %56 = arith.mulf %37, %55 : vector<4x4x4xf32>
    %57 = arith.addf %53, %56 : vector<4x4x4xf32>
    %c0_73 = arith.constant 0 : index
    %c4_74 = arith.constant 4 : index
    %58 = memref.load %arg2[%c0_73, %c4_74] : memref<4x9xf32, #tpu.memory_space<smem>>
    %59 = vector.broadcast %58 : f32 to vector<4x4x4xf32>
    %60 = arith.mulf %38, %59 : vector<4x4x4xf32>
    %61 = arith.addf %57, %60 : vector<4x4x4xf32>
    %c0_75 = arith.constant 0 : index
    %c5_76 = arith.constant 5 : index
    %62 = memref.load %arg2[%c0_75, %c5_76] : memref<4x9xf32, #tpu.memory_space<smem>>
    %63 = vector.broadcast %62 : f32 to vector<4x4x4xf32>
    %64 = arith.mulf %39, %63 : vector<4x4x4xf32>
    %65 = arith.addf %61, %64 : vector<4x4x4xf32>
    %c0_77 = arith.constant 0 : index
    %c6_78 = arith.constant 6 : index
    %66 = memref.load %arg2[%c0_77, %c6_78] : memref<4x9xf32, #tpu.memory_space<smem>>
    %67 = vector.broadcast %66 : f32 to vector<4x4x4xf32>
    %68 = arith.mulf %40, %67 : vector<4x4x4xf32>
    %69 = arith.addf %65, %68 : vector<4x4x4xf32>
    %c0_79 = arith.constant 0 : index
    %c7_80 = arith.constant 7 : index
    %70 = memref.load %arg2[%c0_79, %c7_80] : memref<4x9xf32, #tpu.memory_space<smem>>
    %71 = vector.broadcast %70 : f32 to vector<4x4x4xf32>
    %72 = arith.mulf %41, %71 : vector<4x4x4xf32>
    %73 = arith.addf %69, %72 : vector<4x4x4xf32>
    %c0_81 = arith.constant 0 : index
    %c8_82 = arith.constant 8 : index
    %74 = memref.load %arg2[%c0_81, %c8_82] : memref<4x9xf32, #tpu.memory_space<smem>>
    %75 = vector.broadcast %74 : f32 to vector<4x4x4xf32>
    %76 = arith.mulf %42, %75 : vector<4x4x4xf32>
    %77 = arith.addf %73, %76 : vector<4x4x4xf32>
    %c0_83 = arith.constant 0 : index
    %78 = memref.load %arg3[%c0_83] : memref<4xf32, #tpu.memory_space<smem>>
    %79 = vector.broadcast %78 : f32 to vector<4x4x4xf32>
    %80 = arith.addf %77, %79 : vector<4x4x4xf32>
    %cst_84 = arith.constant 0.000000e+00 : f32
    %81 = vector.broadcast %cst_84 : f32 to vector<4x4x4xf32>
    %82 = arith.maximumf %80, %81 : vector<4x4x4xf32>
    %83 = tpu.concatenate %32, %82 in 1 : vector<4x1x4xf32>, vector<4x4x4xf32> -> vector<4x5x4xf32>
    %84 = tpu.concatenate %33, %83 in 2 : vector<4x5x1xf32>, vector<4x5x4xf32> -> vector<4x5x5xf32>
    %c1_85 = arith.constant 1 : index
    %c0_86 = arith.constant 0 : index
    %85 = memref.load %arg2[%c1_85, %c0_86] : memref<4x9xf32, #tpu.memory_space<smem>>
    %86 = vector.broadcast %85 : f32 to vector<4x4x4xf32>
    %87 = arith.mulf %34, %86 : vector<4x4x4xf32>
    %c1_87 = arith.constant 1 : index
    %c1_88 = arith.constant 1 : index
    %88 = memref.load %arg2[%c1_87, %c1_88] : memref<4x9xf32, #tpu.memory_space<smem>>
    %89 = vector.broadcast %88 : f32 to vector<4x4x4xf32>
    %90 = arith.mulf %35, %89 : vector<4x4x4xf32>
    %91 = arith.addf %87, %90 : vector<4x4x4xf32>
    %c1_89 = arith.constant 1 : index
    %c2_90 = arith.constant 2 : index
    %92 = memref.load %arg2[%c1_89, %c2_90] : memref<4x9xf32, #tpu.memory_space<smem>>
    %93 = vector.broadcast %92 : f32 to vector<4x4x4xf32>
    %94 = arith.mulf %36, %93 : vector<4x4x4xf32>
    %95 = arith.addf %91, %94 : vector<4x4x4xf32>
    %c1_91 = arith.constant 1 : index
    %c3_92 = arith.constant 3 : index
    %96 = memref.load %arg2[%c1_91, %c3_92] : memref<4x9xf32, #tpu.memory_space<smem>>
    %97 = vector.broadcast %96 : f32 to vector<4x4x4xf32>
    %98 = arith.mulf %37, %97 : vector<4x4x4xf32>
    %99 = arith.addf %95, %98 : vector<4x4x4xf32>
    %c1_93 = arith.constant 1 : index
    %c4_94 = arith.constant 4 : index
    %100 = memref.load %arg2[%c1_93, %c4_94] : memref<4x9xf32, #tpu.memory_space<smem>>
    %101 = vector.broadcast %100 : f32 to vector<4x4x4xf32>
    %102 = arith.mulf %38, %101 : vector<4x4x4xf32>
    %103 = arith.addf %99, %102 : vector<4x4x4xf32>
    %c1_95 = arith.constant 1 : index
    %c5_96 = arith.constant 5 : index
    %104 = memref.load %arg2[%c1_95, %c5_96] : memref<4x9xf32, #tpu.memory_space<smem>>
    %105 = vector.broadcast %104 : f32 to vector<4x4x4xf32>
    %106 = arith.mulf %39, %105 : vector<4x4x4xf32>
    %107 = arith.addf %103, %106 : vector<4x4x4xf32>
    %c1_97 = arith.constant 1 : index
    %c6_98 = arith.constant 6 : index
    %108 = memref.load %arg2[%c1_97, %c6_98] : memref<4x9xf32, #tpu.memory_space<smem>>
    %109 = vector.broadcast %108 : f32 to vector<4x4x4xf32>
    %110 = arith.mulf %40, %109 : vector<4x4x4xf32>
    %111 = arith.addf %107, %110 : vector<4x4x4xf32>
    %c1_99 = arith.constant 1 : index
    %c7_100 = arith.constant 7 : index
    %112 = memref.load %arg2[%c1_99, %c7_100] : memref<4x9xf32, #tpu.memory_space<smem>>
    %113 = vector.broadcast %112 : f32 to vector<4x4x4xf32>
    %114 = arith.mulf %41, %113 : vector<4x4x4xf32>
    %115 = arith.addf %111, %114 : vector<4x4x4xf32>
    %c1_101 = arith.constant 1 : index
    %c8_102 = arith.constant 8 : index
    %116 = memref.load %arg2[%c1_101, %c8_102] : memref<4x9xf32, #tpu.memory_space<smem>>
    %117 = vector.broadcast %116 : f32 to vector<4x4x4xf32>
    %118 = arith.mulf %42, %117 : vector<4x4x4xf32>
    %119 = arith.addf %115, %118 : vector<4x4x4xf32>
    %c1_103 = arith.constant 1 : index
    %120 = memref.load %arg3[%c1_103] : memref<4xf32, #tpu.memory_space<smem>>
    %121 = vector.broadcast %120 : f32 to vector<4x4x4xf32>
    %122 = arith.addf %119, %121 : vector<4x4x4xf32>
    %cst_104 = arith.constant 0.000000e+00 : f32
    %123 = vector.broadcast %cst_104 : f32 to vector<4x4x4xf32>
    %124 = arith.maximumf %122, %123 : vector<4x4x4xf32>
    %125 = tpu.concatenate %32, %124 in 1 : vector<4x1x4xf32>, vector<4x4x4xf32> -> vector<4x5x4xf32>
    %126 = tpu.concatenate %33, %125 in 2 : vector<4x5x1xf32>, vector<4x5x4xf32> -> vector<4x5x5xf32>
    %c2_105 = arith.constant 2 : index
    %c0_106 = arith.constant 0 : index
    %127 = memref.load %arg2[%c2_105, %c0_106] : memref<4x9xf32, #tpu.memory_space<smem>>
    %128 = vector.broadcast %127 : f32 to vector<4x4x4xf32>
    %129 = arith.mulf %34, %128 : vector<4x4x4xf32>
    %c2_107 = arith.constant 2 : index
    %c1_108 = arith.constant 1 : index
    %130 = memref.load %arg2[%c2_107, %c1_108] : memref<4x9xf32, #tpu.memory_space<smem>>
    %131 = vector.broadcast %130 : f32 to vector<4x4x4xf32>
    %132 = arith.mulf %35, %131 : vector<4x4x4xf32>
    %133 = arith.addf %129, %132 : vector<4x4x4xf32>
    %c2_109 = arith.constant 2 : index
    %c2_110 = arith.constant 2 : index
    %134 = memref.load %arg2[%c2_109, %c2_110] : memref<4x9xf32, #tpu.memory_space<smem>>
    %135 = vector.broadcast %134 : f32 to vector<4x4x4xf32>
    %136 = arith.mulf %36, %135 : vector<4x4x4xf32>
    %137 = arith.addf %133, %136 : vector<4x4x4xf32>
    %c2_111 = arith.constant 2 : index
    %c3_112 = arith.constant 3 : index
    %138 = memref.load %arg2[%c2_111, %c3_112] : memref<4x9xf32, #tpu.memory_space<smem>>
    %139 = vector.broadcast %138 : f32 to vector<4x4x4xf32>
    %140 = arith.mulf %37, %139 : vector<4x4x4xf32>
    %141 = arith.addf %137, %140 : vector<4x4x4xf32>
    %c2_113 = arith.constant 2 : index
    %c4_114 = arith.constant 4 : index
    %142 = memref.load %arg2[%c2_113, %c4_114] : memref<4x9xf32, #tpu.memory_space<smem>>
    %143 = vector.broadcast %142 : f32 to vector<4x4x4xf32>
    %144 = arith.mulf %38, %143 : vector<4x4x4xf32>
    %145 = arith.addf %141, %144 : vector<4x4x4xf32>
    %c2_115 = arith.constant 2 : index
    %c5_116 = arith.constant 5 : index
    %146 = memref.load %arg2[%c2_115, %c5_116] : memref<4x9xf32, #tpu.memory_space<smem>>
    %147 = vector.broadcast %146 : f32 to vector<4x4x4xf32>
    %148 = arith.mulf %39, %147 : vector<4x4x4xf32>
    %149 = arith.addf %145, %148 : vector<4x4x4xf32>
    %c2_117 = arith.constant 2 : index
    %c6_118 = arith.constant 6 : index
    %150 = memref.load %arg2[%c2_117, %c6_118] : memref<4x9xf32, #tpu.memory_space<smem>>
    %151 = vector.broadcast %150 : f32 to vector<4x4x4xf32>
    %152 = arith.mulf %40, %151 : vector<4x4x4xf32>
    %153 = arith.addf %149, %152 : vector<4x4x4xf32>
    %c2_119 = arith.constant 2 : index
    %c7_120 = arith.constant 7 : index
    %154 = memref.load %arg2[%c2_119, %c7_120] : memref<4x9xf32, #tpu.memory_space<smem>>
    %155 = vector.broadcast %154 : f32 to vector<4x4x4xf32>
    %156 = arith.mulf %41, %155 : vector<4x4x4xf32>
    %157 = arith.addf %153, %156 : vector<4x4x4xf32>
    %c2_121 = arith.constant 2 : index
    %c8_122 = arith.constant 8 : index
    %158 = memref.load %arg2[%c2_121, %c8_122] : memref<4x9xf32, #tpu.memory_space<smem>>
    %159 = vector.broadcast %158 : f32 to vector<4x4x4xf32>
    %160 = arith.mulf %42, %159 : vector<4x4x4xf32>
    %161 = arith.addf %157, %160 : vector<4x4x4xf32>
    %c2_123 = arith.constant 2 : index
    %162 = memref.load %arg3[%c2_123] : memref<4xf32, #tpu.memory_space<smem>>
    %163 = vector.broadcast %162 : f32 to vector<4x4x4xf32>
    %164 = arith.addf %161, %163 : vector<4x4x4xf32>
    %cst_124 = arith.constant 0.000000e+00 : f32
    %165 = vector.broadcast %cst_124 : f32 to vector<4x4x4xf32>
    %166 = arith.maximumf %164, %165 : vector<4x4x4xf32>
    %167 = tpu.concatenate %32, %166 in 1 : vector<4x1x4xf32>, vector<4x4x4xf32> -> vector<4x5x4xf32>
    %168 = tpu.concatenate %33, %167 in 2 : vector<4x5x1xf32>, vector<4x5x4xf32> -> vector<4x5x5xf32>
    %c3_125 = arith.constant 3 : index
    %c0_126 = arith.constant 0 : index
    %169 = memref.load %arg2[%c3_125, %c0_126] : memref<4x9xf32, #tpu.memory_space<smem>>
    %170 = vector.broadcast %169 : f32 to vector<4x4x4xf32>
    %171 = arith.mulf %34, %170 : vector<4x4x4xf32>
    %c3_127 = arith.constant 3 : index
    %c1_128 = arith.constant 1 : index
    %172 = memref.load %arg2[%c3_127, %c1_128] : memref<4x9xf32, #tpu.memory_space<smem>>
    %173 = vector.broadcast %172 : f32 to vector<4x4x4xf32>
    %174 = arith.mulf %35, %173 : vector<4x4x4xf32>
    %175 = arith.addf %171, %174 : vector<4x4x4xf32>
    %c3_129 = arith.constant 3 : index
    %c2_130 = arith.constant 2 : index
    %176 = memref.load %arg2[%c3_129, %c2_130] : memref<4x9xf32, #tpu.memory_space<smem>>
    %177 = vector.broadcast %176 : f32 to vector<4x4x4xf32>
    %178 = arith.mulf %36, %177 : vector<4x4x4xf32>
    %179 = arith.addf %175, %178 : vector<4x4x4xf32>
    %c3_131 = arith.constant 3 : index
    %c3_132 = arith.constant 3 : index
    %180 = memref.load %arg2[%c3_131, %c3_132] : memref<4x9xf32, #tpu.memory_space<smem>>
    %181 = vector.broadcast %180 : f32 to vector<4x4x4xf32>
    %182 = arith.mulf %37, %181 : vector<4x4x4xf32>
    %183 = arith.addf %179, %182 : vector<4x4x4xf32>
    %c3_133 = arith.constant 3 : index
    %c4_134 = arith.constant 4 : index
    %184 = memref.load %arg2[%c3_133, %c4_134] : memref<4x9xf32, #tpu.memory_space<smem>>
    %185 = vector.broadcast %184 : f32 to vector<4x4x4xf32>
    %186 = arith.mulf %38, %185 : vector<4x4x4xf32>
    %187 = arith.addf %183, %186 : vector<4x4x4xf32>
    %c3_135 = arith.constant 3 : index
    %c5_136 = arith.constant 5 : index
    %188 = memref.load %arg2[%c3_135, %c5_136] : memref<4x9xf32, #tpu.memory_space<smem>>
    %189 = vector.broadcast %188 : f32 to vector<4x4x4xf32>
    %190 = arith.mulf %39, %189 : vector<4x4x4xf32>
    %191 = arith.addf %187, %190 : vector<4x4x4xf32>
    %c3_137 = arith.constant 3 : index
    %c6_138 = arith.constant 6 : index
    %192 = memref.load %arg2[%c3_137, %c6_138] : memref<4x9xf32, #tpu.memory_space<smem>>
    %193 = vector.broadcast %192 : f32 to vector<4x4x4xf32>
    %194 = arith.mulf %40, %193 : vector<4x4x4xf32>
    %195 = arith.addf %191, %194 : vector<4x4x4xf32>
    %c3_139 = arith.constant 3 : index
    %c7_140 = arith.constant 7 : index
    %196 = memref.load %arg2[%c3_139, %c7_140] : memref<4x9xf32, #tpu.memory_space<smem>>
    %197 = vector.broadcast %196 : f32 to vector<4x4x4xf32>
    %198 = arith.mulf %41, %197 : vector<4x4x4xf32>
    %199 = arith.addf %195, %198 : vector<4x4x4xf32>
    %c3_141 = arith.constant 3 : index
    %c8_142 = arith.constant 8 : index
    %200 = memref.load %arg2[%c3_141, %c8_142] : memref<4x9xf32, #tpu.memory_space<smem>>
    %201 = vector.broadcast %200 : f32 to vector<4x4x4xf32>
    %202 = arith.mulf %42, %201 : vector<4x4x4xf32>
    %203 = arith.addf %199, %202 : vector<4x4x4xf32>
    %c3_143 = arith.constant 3 : index
    %204 = memref.load %arg3[%c3_143] : memref<4xf32, #tpu.memory_space<smem>>
    %205 = vector.broadcast %204 : f32 to vector<4x4x4xf32>
    %206 = arith.addf %203, %205 : vector<4x4x4xf32>
    %cst_144 = arith.constant 0.000000e+00 : f32
    %207 = vector.broadcast %cst_144 : f32 to vector<4x4x4xf32>
    %208 = arith.maximumf %206, %207 : vector<4x4x4xf32>
    %209 = tpu.concatenate %32, %208 in 1 : vector<4x1x4xf32>, vector<4x4x4xf32> -> vector<4x5x4xf32>
    %210 = tpu.concatenate %33, %209 in 2 : vector<4x5x1xf32>, vector<4x5x4xf32> -> vector<4x5x5xf32>
    %211 = vector.extract_strided_slice %5 {offsets = [0, 0, 0], sizes = [4, 4, 4], strides = [1, 1, 1]} : vector<4x5x5xf32> to vector<4x4x4xf32>
    %212 = vector.extract_strided_slice %7 {offsets = [0, 0, 0], sizes = [4, 4, 4], strides = [1, 1, 1]} : vector<4x5x5xf32> to vector<4x4x4xf32>
    %213 = vector.extract_strided_slice %1 {offsets = [0, 0, 1], sizes = [4, 4, 4], strides = [1, 1, 1]} : vector<4x5x5xf32> to vector<4x4x4xf32>
    %214 = vector.extract_strided_slice %13 {offsets = [0, 0, 0], sizes = [4, 4, 4], strides = [1, 1, 1]} : vector<4x5x5xf32> to vector<4x4x4xf32>
    %215 = vector.extract_strided_slice %15 {offsets = [0, 0, 0], sizes = [4, 4, 4], strides = [1, 1, 1]} : vector<4x5x5xf32> to vector<4x4x4xf32>
    %216 = vector.extract_strided_slice %9 {offsets = [0, 0, 1], sizes = [4, 4, 4], strides = [1, 1, 1]} : vector<4x5x5xf32> to vector<4x4x4xf32>
    %217 = vector.extract_strided_slice %21 {offsets = [0, 0, 0], sizes = [4, 4, 4], strides = [1, 1, 1]} : vector<4x5x5xf32> to vector<4x4x4xf32>
    %218 = vector.extract_strided_slice %23 {offsets = [0, 0, 0], sizes = [4, 4, 4], strides = [1, 1, 1]} : vector<4x5x5xf32> to vector<4x4x4xf32>
    %219 = vector.extract_strided_slice %17 {offsets = [0, 0, 1], sizes = [4, 4, 4], strides = [1, 1, 1]} : vector<4x5x5xf32> to vector<4x4x4xf32>
    %c0_145 = arith.constant 0 : index
    %c0_146 = arith.constant 0 : index
    %220 = memref.load %arg2[%c0_145, %c0_146] : memref<4x9xf32, #tpu.memory_space<smem>>
    %221 = vector.broadcast %220 : f32 to vector<4x4x4xf32>
    %222 = arith.mulf %211, %221 : vector<4x4x4xf32>
    %c0_147 = arith.constant 0 : index
    %c1_148 = arith.constant 1 : index
    %223 = memref.load %arg2[%c0_147, %c1_148] : memref<4x9xf32, #tpu.memory_space<smem>>
    %224 = vector.broadcast %223 : f32 to vector<4x4x4xf32>
    %225 = arith.mulf %212, %224 : vector<4x4x4xf32>
    %226 = arith.addf %222, %225 : vector<4x4x4xf32>
    %c0_149 = arith.constant 0 : index
    %c2_150 = arith.constant 2 : index
    %227 = memref.load %arg2[%c0_149, %c2_150] : memref<4x9xf32, #tpu.memory_space<smem>>
    %228 = vector.broadcast %227 : f32 to vector<4x4x4xf32>
    %229 = arith.mulf %213, %228 : vector<4x4x4xf32>
    %230 = arith.addf %226, %229 : vector<4x4x4xf32>
    %c0_151 = arith.constant 0 : index
    %c3_152 = arith.constant 3 : index
    %231 = memref.load %arg2[%c0_151, %c3_152] : memref<4x9xf32, #tpu.memory_space<smem>>
    %232 = vector.broadcast %231 : f32 to vector<4x4x4xf32>
    %233 = arith.mulf %214, %232 : vector<4x4x4xf32>
    %234 = arith.addf %230, %233 : vector<4x4x4xf32>
    %c0_153 = arith.constant 0 : index
    %c4_154 = arith.constant 4 : index
    %235 = memref.load %arg2[%c0_153, %c4_154] : memref<4x9xf32, #tpu.memory_space<smem>>
    %236 = vector.broadcast %235 : f32 to vector<4x4x4xf32>
    %237 = arith.mulf %215, %236 : vector<4x4x4xf32>
    %238 = arith.addf %234, %237 : vector<4x4x4xf32>
    %c0_155 = arith.constant 0 : index
    %c5_156 = arith.constant 5 : index
    %239 = memref.load %arg2[%c0_155, %c5_156] : memref<4x9xf32, #tpu.memory_space<smem>>
    %240 = vector.broadcast %239 : f32 to vector<4x4x4xf32>
    %241 = arith.mulf %216, %240 : vector<4x4x4xf32>
    %242 = arith.addf %238, %241 : vector<4x4x4xf32>
    %c0_157 = arith.constant 0 : index
    %c6_158 = arith.constant 6 : index
    %243 = memref.load %arg2[%c0_157, %c6_158] : memref<4x9xf32, #tpu.memory_space<smem>>
    %244 = vector.broadcast %243 : f32 to vector<4x4x4xf32>
    %245 = arith.mulf %217, %244 : vector<4x4x4xf32>
    %246 = arith.addf %242, %245 : vector<4x4x4xf32>
    %c0_159 = arith.constant 0 : index
    %c7_160 = arith.constant 7 : index
    %247 = memref.load %arg2[%c0_159, %c7_160] : memref<4x9xf32, #tpu.memory_space<smem>>
    %248 = vector.broadcast %247 : f32 to vector<4x4x4xf32>
    %249 = arith.mulf %218, %248 : vector<4x4x4xf32>
    %250 = arith.addf %246, %249 : vector<4x4x4xf32>
    %c0_161 = arith.constant 0 : index
    %c8_162 = arith.constant 8 : index
    %251 = memref.load %arg2[%c0_161, %c8_162] : memref<4x9xf32, #tpu.memory_space<smem>>
    %252 = vector.broadcast %251 : f32 to vector<4x4x4xf32>
    %253 = arith.mulf %219, %252 : vector<4x4x4xf32>
    %254 = arith.addf %250, %253 : vector<4x4x4xf32>
    %c0_163 = arith.constant 0 : index
    %255 = memref.load %arg3[%c0_163] : memref<4xf32, #tpu.memory_space<smem>>
    %256 = vector.broadcast %255 : f32 to vector<4x4x4xf32>
    %257 = arith.addf %254, %256 : vector<4x4x4xf32>
    %cst_164 = arith.constant 0.000000e+00 : f32
    %258 = vector.broadcast %cst_164 : f32 to vector<4x4x4xf32>
    %259 = arith.maximumf %257, %258 : vector<4x4x4xf32>
    %260 = tpu.concatenate %32, %259 in 1 : vector<4x1x4xf32>, vector<4x4x4xf32> -> vector<4x5x4xf32>
    %261 = tpu.concatenate %33, %260 in 2 : vector<4x5x1xf32>, vector<4x5x4xf32> -> vector<4x5x5xf32>
    %c1_165 = arith.constant 1 : index
    %c0_166 = arith.constant 0 : index
    %262 = memref.load %arg2[%c1_165, %c0_166] : memref<4x9xf32, #tpu.memory_space<smem>>
    %263 = vector.broadcast %262 : f32 to vector<4x4x4xf32>
    %264 = arith.mulf %211, %263 : vector<4x4x4xf32>
    %c1_167 = arith.constant 1 : index
    %c1_168 = arith.constant 1 : index
    %265 = memref.load %arg2[%c1_167, %c1_168] : memref<4x9xf32, #tpu.memory_space<smem>>
    %266 = vector.broadcast %265 : f32 to vector<4x4x4xf32>
    %267 = arith.mulf %212, %266 : vector<4x4x4xf32>
    %268 = arith.addf %264, %267 : vector<4x4x4xf32>
    %c1_169 = arith.constant 1 : index
    %c2_170 = arith.constant 2 : index
    %269 = memref.load %arg2[%c1_169, %c2_170] : memref<4x9xf32, #tpu.memory_space<smem>>
    %270 = vector.broadcast %269 : f32 to vector<4x4x4xf32>
    %271 = arith.mulf %213, %270 : vector<4x4x4xf32>
    %272 = arith.addf %268, %271 : vector<4x4x4xf32>
    %c1_171 = arith.constant 1 : index
    %c3_172 = arith.constant 3 : index
    %273 = memref.load %arg2[%c1_171, %c3_172] : memref<4x9xf32, #tpu.memory_space<smem>>
    %274 = vector.broadcast %273 : f32 to vector<4x4x4xf32>
    %275 = arith.mulf %214, %274 : vector<4x4x4xf32>
    %276 = arith.addf %272, %275 : vector<4x4x4xf32>
    %c1_173 = arith.constant 1 : index
    %c4_174 = arith.constant 4 : index
    %277 = memref.load %arg2[%c1_173, %c4_174] : memref<4x9xf32, #tpu.memory_space<smem>>
    %278 = vector.broadcast %277 : f32 to vector<4x4x4xf32>
    %279 = arith.mulf %215, %278 : vector<4x4x4xf32>
    %280 = arith.addf %276, %279 : vector<4x4x4xf32>
    %c1_175 = arith.constant 1 : index
    %c5_176 = arith.constant 5 : index
    %281 = memref.load %arg2[%c1_175, %c5_176] : memref<4x9xf32, #tpu.memory_space<smem>>
    %282 = vector.broadcast %281 : f32 to vector<4x4x4xf32>
    %283 = arith.mulf %216, %282 : vector<4x4x4xf32>
    %284 = arith.addf %280, %283 : vector<4x4x4xf32>
    %c1_177 = arith.constant 1 : index
    %c6_178 = arith.constant 6 : index
    %285 = memref.load %arg2[%c1_177, %c6_178] : memref<4x9xf32, #tpu.memory_space<smem>>
    %286 = vector.broadcast %285 : f32 to vector<4x4x4xf32>
    %287 = arith.mulf %217, %286 : vector<4x4x4xf32>
    %288 = arith.addf %284, %287 : vector<4x4x4xf32>
    %c1_179 = arith.constant 1 : index
    %c7_180 = arith.constant 7 : index
    %289 = memref.load %arg2[%c1_179, %c7_180] : memref<4x9xf32, #tpu.memory_space<smem>>
    %290 = vector.broadcast %289 : f32 to vector<4x4x4xf32>
    %291 = arith.mulf %218, %290 : vector<4x4x4xf32>
    %292 = arith.addf %288, %291 : vector<4x4x4xf32>
    %c1_181 = arith.constant 1 : index
    %c8_182 = arith.constant 8 : index
    %293 = memref.load %arg2[%c1_181, %c8_182] : memref<4x9xf32, #tpu.memory_space<smem>>
    %294 = vector.broadcast %293 : f32 to vector<4x4x4xf32>
    %295 = arith.mulf %219, %294 : vector<4x4x4xf32>
    %296 = arith.addf %292, %295 : vector<4x4x4xf32>
    %c1_183 = arith.constant 1 : index
    %297 = memref.load %arg3[%c1_183] : memref<4xf32, #tpu.memory_space<smem>>
    %298 = vector.broadcast %297 : f32 to vector<4x4x4xf32>
    %299 = arith.addf %296, %298 : vector<4x4x4xf32>
    %cst_184 = arith.constant 0.000000e+00 : f32
    %300 = vector.broadcast %cst_184 : f32 to vector<4x4x4xf32>
    %301 = arith.maximumf %299, %300 : vector<4x4x4xf32>
    %302 = tpu.concatenate %32, %301 in 1 : vector<4x1x4xf32>, vector<4x4x4xf32> -> vector<4x5x4xf32>
    %303 = tpu.concatenate %33, %302 in 2 : vector<4x5x1xf32>, vector<4x5x4xf32> -> vector<4x5x5xf32>
    %c2_185 = arith.constant 2 : index
    %c0_186 = arith.constant 0 : index
    %304 = memref.load %arg2[%c2_185, %c0_186] : memref<4x9xf32, #tpu.memory_space<smem>>
    %305 = vector.broadcast %304 : f32 to vector<4x4x4xf32>
    %306 = arith.mulf %211, %305 : vector<4x4x4xf32>
    %c2_187 = arith.constant 2 : index
    %c1_188 = arith.constant 1 : index
    %307 = memref.load %arg2[%c2_187, %c1_188] : memref<4x9xf32, #tpu.memory_space<smem>>
    %308 = vector.broadcast %307 : f32 to vector<4x4x4xf32>
    %309 = arith.mulf %212, %308 : vector<4x4x4xf32>
    %310 = arith.addf %306, %309 : vector<4x4x4xf32>
    %c2_189 = arith.constant 2 : index
    %c2_190 = arith.constant 2 : index
    %311 = memref.load %arg2[%c2_189, %c2_190] : memref<4x9xf32, #tpu.memory_space<smem>>
    %312 = vector.broadcast %311 : f32 to vector<4x4x4xf32>
    %313 = arith.mulf %213, %312 : vector<4x4x4xf32>
    %314 = arith.addf %310, %313 : vector<4x4x4xf32>
    %c2_191 = arith.constant 2 : index
    %c3_192 = arith.constant 3 : index
    %315 = memref.load %arg2[%c2_191, %c3_192] : memref<4x9xf32, #tpu.memory_space<smem>>
    %316 = vector.broadcast %315 : f32 to vector<4x4x4xf32>
    %317 = arith.mulf %214, %316 : vector<4x4x4xf32>
    %318 = arith.addf %314, %317 : vector<4x4x4xf32>
    %c2_193 = arith.constant 2 : index
    %c4_194 = arith.constant 4 : index
    %319 = memref.load %arg2[%c2_193, %c4_194] : memref<4x9xf32, #tpu.memory_space<smem>>
    %320 = vector.broadcast %319 : f32 to vector<4x4x4xf32>
    %321 = arith.mulf %215, %320 : vector<4x4x4xf32>
    %322 = arith.addf %318, %321 : vector<4x4x4xf32>
    %c2_195 = arith.constant 2 : index
    %c5_196 = arith.constant 5 : index
    %323 = memref.load %arg2[%c2_195, %c5_196] : memref<4x9xf32, #tpu.memory_space<smem>>
    %324 = vector.broadcast %323 : f32 to vector<4x4x4xf32>
    %325 = arith.mulf %216, %324 : vector<4x4x4xf32>
    %326 = arith.addf %322, %325 : vector<4x4x4xf32>
    %c2_197 = arith.constant 2 : index
    %c6_198 = arith.constant 6 : index
    %327 = memref.load %arg2[%c2_197, %c6_198] : memref<4x9xf32, #tpu.memory_space<smem>>
    %328 = vector.broadcast %327 : f32 to vector<4x4x4xf32>
    %329 = arith.mulf %217, %328 : vector<4x4x4xf32>
    %330 = arith.addf %326, %329 : vector<4x4x4xf32>
    %c2_199 = arith.constant 2 : index
    %c7_200 = arith.constant 7 : index
    %331 = memref.load %arg2[%c2_199, %c7_200] : memref<4x9xf32, #tpu.memory_space<smem>>
    %332 = vector.broadcast %331 : f32 to vector<4x4x4xf32>
    %333 = arith.mulf %218, %332 : vector<4x4x4xf32>
    %334 = arith.addf %330, %333 : vector<4x4x4xf32>
    %c2_201 = arith.constant 2 : index
    %c8_202 = arith.constant 8 : index
    %335 = memref.load %arg2[%c2_201, %c8_202] : memref<4x9xf32, #tpu.memory_space<smem>>
    %336 = vector.broadcast %335 : f32 to vector<4x4x4xf32>
    %337 = arith.mulf %219, %336 : vector<4x4x4xf32>
    %338 = arith.addf %334, %337 : vector<4x4x4xf32>
    %c2_203 = arith.constant 2 : index
    %339 = memref.load %arg3[%c2_203] : memref<4xf32, #tpu.memory_space<smem>>
    %340 = vector.broadcast %339 : f32 to vector<4x4x4xf32>
    %341 = arith.addf %338, %340 : vector<4x4x4xf32>
    %cst_204 = arith.constant 0.000000e+00 : f32
    %342 = vector.broadcast %cst_204 : f32 to vector<4x4x4xf32>
    %343 = arith.maximumf %341, %342 : vector<4x4x4xf32>
    %344 = tpu.concatenate %32, %343 in 1 : vector<4x1x4xf32>, vector<4x4x4xf32> -> vector<4x5x4xf32>
    %345 = tpu.concatenate %33, %344 in 2 : vector<4x5x1xf32>, vector<4x5x4xf32> -> vector<4x5x5xf32>
    %c3_205 = arith.constant 3 : index
    %c0_206 = arith.constant 0 : index
    %346 = memref.load %arg2[%c3_205, %c0_206] : memref<4x9xf32, #tpu.memory_space<smem>>
    %347 = vector.broadcast %346 : f32 to vector<4x4x4xf32>
    %348 = arith.mulf %211, %347 : vector<4x4x4xf32>
    %c3_207 = arith.constant 3 : index
    %c1_208 = arith.constant 1 : index
    %349 = memref.load %arg2[%c3_207, %c1_208] : memref<4x9xf32, #tpu.memory_space<smem>>
    %350 = vector.broadcast %349 : f32 to vector<4x4x4xf32>
    %351 = arith.mulf %212, %350 : vector<4x4x4xf32>
    %352 = arith.addf %348, %351 : vector<4x4x4xf32>
    %c3_209 = arith.constant 3 : index
    %c2_210 = arith.constant 2 : index
    %353 = memref.load %arg2[%c3_209, %c2_210] : memref<4x9xf32, #tpu.memory_space<smem>>
    %354 = vector.broadcast %353 : f32 to vector<4x4x4xf32>
    %355 = arith.mulf %213, %354 : vector<4x4x4xf32>
    %356 = arith.addf %352, %355 : vector<4x4x4xf32>
    %c3_211 = arith.constant 3 : index
    %c3_212 = arith.constant 3 : index
    %357 = memref.load %arg2[%c3_211, %c3_212] : memref<4x9xf32, #tpu.memory_space<smem>>
    %358 = vector.broadcast %357 : f32 to vector<4x4x4xf32>
    %359 = arith.mulf %214, %358 : vector<4x4x4xf32>
    %360 = arith.addf %356, %359 : vector<4x4x4xf32>
    %c3_213 = arith.constant 3 : index
    %c4_214 = arith.constant 4 : index
    %361 = memref.load %arg2[%c3_213, %c4_214] : memref<4x9xf32, #tpu.memory_space<smem>>
    %362 = vector.broadcast %361 : f32 to vector<4x4x4xf32>
    %363 = arith.mulf %215, %362 : vector<4x4x4xf32>
    %364 = arith.addf %360, %363 : vector<4x4x4xf32>
    %c3_215 = arith.constant 3 : index
    %c5_216 = arith.constant 5 : index
    %365 = memref.load %arg2[%c3_215, %c5_216] : memref<4x9xf32, #tpu.memory_space<smem>>
    %366 = vector.broadcast %365 : f32 to vector<4x4x4xf32>
    %367 = arith.mulf %216, %366 : vector<4x4x4xf32>
    %368 = arith.addf %364, %367 : vector<4x4x4xf32>
    %c3_217 = arith.constant 3 : index
    %c6_218 = arith.constant 6 : index
    %369 = memref.load %arg2[%c3_217, %c6_218] : memref<4x9xf32, #tpu.memory_space<smem>>
    %370 = vector.broadcast %369 : f32 to vector<4x4x4xf32>
    %371 = arith.mulf %217, %370 : vector<4x4x4xf32>
    %372 = arith.addf %368, %371 : vector<4x4x4xf32>
    %c3_219 = arith.constant 3 : index
    %c7_220 = arith.constant 7 : index
    %373 = memref.load %arg2[%c3_219, %c7_220] : memref<4x9xf32, #tpu.memory_space<smem>>
    %374 = vector.broadcast %373 : f32 to vector<4x4x4xf32>
    %375 = arith.mulf %218, %374 : vector<4x4x4xf32>
    %376 = arith.addf %372, %375 : vector<4x4x4xf32>
    %c3_221 = arith.constant 3 : index
    %c8_222 = arith.constant 8 : index
    %377 = memref.load %arg2[%c3_221, %c8_222] : memref<4x9xf32, #tpu.memory_space<smem>>
    %378 = vector.broadcast %377 : f32 to vector<4x4x4xf32>
    %379 = arith.mulf %219, %378 : vector<4x4x4xf32>
    %380 = arith.addf %376, %379 : vector<4x4x4xf32>
    %c3_223 = arith.constant 3 : index
    %381 = memref.load %arg3[%c3_223] : memref<4xf32, #tpu.memory_space<smem>>
    %382 = vector.broadcast %381 : f32 to vector<4x4x4xf32>
    %383 = arith.addf %380, %382 : vector<4x4x4xf32>
    %cst_224 = arith.constant 0.000000e+00 : f32
    %384 = vector.broadcast %cst_224 : f32 to vector<4x4x4xf32>
    %385 = arith.maximumf %383, %384 : vector<4x4x4xf32>
    %386 = tpu.concatenate %32, %385 in 1 : vector<4x1x4xf32>, vector<4x4x4xf32> -> vector<4x5x4xf32>
    %387 = tpu.concatenate %33, %386 in 2 : vector<4x5x1xf32>, vector<4x5x4xf32> -> vector<4x5x5xf32>
    %388 = vector.extract_strided_slice %17 {offsets = [0, 0, 0], sizes = [4, 4, 4], strides = [1, 1, 1]} : vector<4x5x5xf32> to vector<4x4x4xf32>
    %389 = vector.extract_strided_slice %19 {offsets = [0, 0, 0], sizes = [4, 4, 4], strides = [1, 1, 1]} : vector<4x5x5xf32> to vector<4x4x4xf32>
    %390 = vector.extract_strided_slice %21 {offsets = [0, 0, 0], sizes = [4, 4, 4], strides = [1, 1, 1]} : vector<4x5x5xf32> to vector<4x4x4xf32>
    %391 = vector.extract_strided_slice %25 {offsets = [0, 0, 0], sizes = [4, 4, 4], strides = [1, 1, 1]} : vector<4x5x5xf32> to vector<4x4x4xf32>
    %392 = vector.extract_strided_slice %27 {offsets = [0, 0, 0], sizes = [4, 4, 4], strides = [1, 1, 1]} : vector<4x5x5xf32> to vector<4x4x4xf32>
    %393 = vector.extract_strided_slice %29 {offsets = [0, 0, 0], sizes = [4, 4, 4], strides = [1, 1, 1]} : vector<4x5x5xf32> to vector<4x4x4xf32>
    %394 = vector.extract_strided_slice %1 {offsets = [0, 1, 0], sizes = [4, 4, 4], strides = [1, 1, 1]} : vector<4x5x5xf32> to vector<4x4x4xf32>
    %395 = vector.extract_strided_slice %3 {offsets = [0, 1, 0], sizes = [4, 4, 4], strides = [1, 1, 1]} : vector<4x5x5xf32> to vector<4x4x4xf32>
    %396 = vector.extract_strided_slice %5 {offsets = [0, 1, 0], sizes = [4, 4, 4], strides = [1, 1, 1]} : vector<4x5x5xf32> to vector<4x4x4xf32>
    %c0_225 = arith.constant 0 : index
    %c0_226 = arith.constant 0 : index
    %397 = memref.load %arg2[%c0_225, %c0_226] : memref<4x9xf32, #tpu.memory_space<smem>>
    %398 = vector.broadcast %397 : f32 to vector<4x4x4xf32>
    %399 = arith.mulf %388, %398 : vector<4x4x4xf32>
    %c0_227 = arith.constant 0 : index
    %c1_228 = arith.constant 1 : index
    %400 = memref.load %arg2[%c0_227, %c1_228] : memref<4x9xf32, #tpu.memory_space<smem>>
    %401 = vector.broadcast %400 : f32 to vector<4x4x4xf32>
    %402 = arith.mulf %389, %401 : vector<4x4x4xf32>
    %403 = arith.addf %399, %402 : vector<4x4x4xf32>
    %c0_229 = arith.constant 0 : index
    %c2_230 = arith.constant 2 : index
    %404 = memref.load %arg2[%c0_229, %c2_230] : memref<4x9xf32, #tpu.memory_space<smem>>
    %405 = vector.broadcast %404 : f32 to vector<4x4x4xf32>
    %406 = arith.mulf %390, %405 : vector<4x4x4xf32>
    %407 = arith.addf %403, %406 : vector<4x4x4xf32>
    %c0_231 = arith.constant 0 : index
    %c3_232 = arith.constant 3 : index
    %408 = memref.load %arg2[%c0_231, %c3_232] : memref<4x9xf32, #tpu.memory_space<smem>>
    %409 = vector.broadcast %408 : f32 to vector<4x4x4xf32>
    %410 = arith.mulf %391, %409 : vector<4x4x4xf32>
    %411 = arith.addf %407, %410 : vector<4x4x4xf32>
    %c0_233 = arith.constant 0 : index
    %c4_234 = arith.constant 4 : index
    %412 = memref.load %arg2[%c0_233, %c4_234] : memref<4x9xf32, #tpu.memory_space<smem>>
    %413 = vector.broadcast %412 : f32 to vector<4x4x4xf32>
    %414 = arith.mulf %392, %413 : vector<4x4x4xf32>
    %415 = arith.addf %411, %414 : vector<4x4x4xf32>
    %c0_235 = arith.constant 0 : index
    %c5_236 = arith.constant 5 : index
    %416 = memref.load %arg2[%c0_235, %c5_236] : memref<4x9xf32, #tpu.memory_space<smem>>
    %417 = vector.broadcast %416 : f32 to vector<4x4x4xf32>
    %418 = arith.mulf %393, %417 : vector<4x4x4xf32>
    %419 = arith.addf %415, %418 : vector<4x4x4xf32>
    %c0_237 = arith.constant 0 : index
    %c6_238 = arith.constant 6 : index
    %420 = memref.load %arg2[%c0_237, %c6_238] : memref<4x9xf32, #tpu.memory_space<smem>>
    %421 = vector.broadcast %420 : f32 to vector<4x4x4xf32>
    %422 = arith.mulf %394, %421 : vector<4x4x4xf32>
    %423 = arith.addf %419, %422 : vector<4x4x4xf32>
    %c0_239 = arith.constant 0 : index
    %c7_240 = arith.constant 7 : index
    %424 = memref.load %arg2[%c0_239, %c7_240] : memref<4x9xf32, #tpu.memory_space<smem>>
    %425 = vector.broadcast %424 : f32 to vector<4x4x4xf32>
    %426 = arith.mulf %395, %425 : vector<4x4x4xf32>
    %427 = arith.addf %423, %426 : vector<4x4x4xf32>
    %c0_241 = arith.constant 0 : index
    %c8_242 = arith.constant 8 : index
    %428 = memref.load %arg2[%c0_241, %c8_242] : memref<4x9xf32, #tpu.memory_space<smem>>
    %429 = vector.broadcast %428 : f32 to vector<4x4x4xf32>
    %430 = arith.mulf %396, %429 : vector<4x4x4xf32>
    %431 = arith.addf %427, %430 : vector<4x4x4xf32>
    %c0_243 = arith.constant 0 : index
    %432 = memref.load %arg3[%c0_243] : memref<4xf32, #tpu.memory_space<smem>>
    %433 = vector.broadcast %432 : f32 to vector<4x4x4xf32>
    %434 = arith.addf %431, %433 : vector<4x4x4xf32>
    %cst_244 = arith.constant 0.000000e+00 : f32
    %435 = vector.broadcast %cst_244 : f32 to vector<4x4x4xf32>
    %436 = arith.maximumf %434, %435 : vector<4x4x4xf32>
    %437 = tpu.concatenate %32, %436 in 1 : vector<4x1x4xf32>, vector<4x4x4xf32> -> vector<4x5x4xf32>
    %438 = tpu.concatenate %33, %437 in 2 : vector<4x5x1xf32>, vector<4x5x4xf32> -> vector<4x5x5xf32>
    %c1_245 = arith.constant 1 : index
    %c0_246 = arith.constant 0 : index
    %439 = memref.load %arg2[%c1_245, %c0_246] : memref<4x9xf32, #tpu.memory_space<smem>>
    %440 = vector.broadcast %439 : f32 to vector<4x4x4xf32>
    %441 = arith.mulf %388, %440 : vector<4x4x4xf32>
    %c1_247 = arith.constant 1 : index
    %c1_248 = arith.constant 1 : index
    %442 = memref.load %arg2[%c1_247, %c1_248] : memref<4x9xf32, #tpu.memory_space<smem>>
    %443 = vector.broadcast %442 : f32 to vector<4x4x4xf32>
    %444 = arith.mulf %389, %443 : vector<4x4x4xf32>
    %445 = arith.addf %441, %444 : vector<4x4x4xf32>
    %c1_249 = arith.constant 1 : index
    %c2_250 = arith.constant 2 : index
    %446 = memref.load %arg2[%c1_249, %c2_250] : memref<4x9xf32, #tpu.memory_space<smem>>
    %447 = vector.broadcast %446 : f32 to vector<4x4x4xf32>
    %448 = arith.mulf %390, %447 : vector<4x4x4xf32>
    %449 = arith.addf %445, %448 : vector<4x4x4xf32>
    %c1_251 = arith.constant 1 : index
    %c3_252 = arith.constant 3 : index
    %450 = memref.load %arg2[%c1_251, %c3_252] : memref<4x9xf32, #tpu.memory_space<smem>>
    %451 = vector.broadcast %450 : f32 to vector<4x4x4xf32>
    %452 = arith.mulf %391, %451 : vector<4x4x4xf32>
    %453 = arith.addf %449, %452 : vector<4x4x4xf32>
    %c1_253 = arith.constant 1 : index
    %c4_254 = arith.constant 4 : index
    %454 = memref.load %arg2[%c1_253, %c4_254] : memref<4x9xf32, #tpu.memory_space<smem>>
    %455 = vector.broadcast %454 : f32 to vector<4x4x4xf32>
    %456 = arith.mulf %392, %455 : vector<4x4x4xf32>
    %457 = arith.addf %453, %456 : vector<4x4x4xf32>
    %c1_255 = arith.constant 1 : index
    %c5_256 = arith.constant 5 : index
    %458 = memref.load %arg2[%c1_255, %c5_256] : memref<4x9xf32, #tpu.memory_space<smem>>
    %459 = vector.broadcast %458 : f32 to vector<4x4x4xf32>
    %460 = arith.mulf %393, %459 : vector<4x4x4xf32>
    %461 = arith.addf %457, %460 : vector<4x4x4xf32>
    %c1_257 = arith.constant 1 : index
    %c6_258 = arith.constant 6 : index
    %462 = memref.load %arg2[%c1_257, %c6_258] : memref<4x9xf32, #tpu.memory_space<smem>>
    %463 = vector.broadcast %462 : f32 to vector<4x4x4xf32>
    %464 = arith.mulf %394, %463 : vector<4x4x4xf32>
    %465 = arith.addf %461, %464 : vector<4x4x4xf32>
    %c1_259 = arith.constant 1 : index
    %c7_260 = arith.constant 7 : index
    %466 = memref.load %arg2[%c1_259, %c7_260] : memref<4x9xf32, #tpu.memory_space<smem>>
    %467 = vector.broadcast %466 : f32 to vector<4x4x4xf32>
    %468 = arith.mulf %395, %467 : vector<4x4x4xf32>
    %469 = arith.addf %465, %468 : vector<4x4x4xf32>
    %c1_261 = arith.constant 1 : index
    %c8_262 = arith.constant 8 : index
    %470 = memref.load %arg2[%c1_261, %c8_262] : memref<4x9xf32, #tpu.memory_space<smem>>
    %471 = vector.broadcast %470 : f32 to vector<4x4x4xf32>
    %472 = arith.mulf %396, %471 : vector<4x4x4xf32>
    %473 = arith.addf %469, %472 : vector<4x4x4xf32>
    %c1_263 = arith.constant 1 : index
    %474 = memref.load %arg3[%c1_263] : memref<4xf32, #tpu.memory_space<smem>>
    %475 = vector.broadcast %474 : f32 to vector<4x4x4xf32>
    %476 = arith.addf %473, %475 : vector<4x4x4xf32>
    %cst_264 = arith.constant 0.000000e+00 : f32
    %477 = vector.broadcast %cst_264 : f32 to vector<4x4x4xf32>
    %478 = arith.maximumf %476, %477 : vector<4x4x4xf32>
    %479 = tpu.concatenate %32, %478 in 1 : vector<4x1x4xf32>, vector<4x4x4xf32> -> vector<4x5x4xf32>
    %480 = tpu.concatenate %33, %479 in 2 : vector<4x5x1xf32>, vector<4x5x4xf32> -> vector<4x5x5xf32>
    %c2_265 = arith.constant 2 : index
    %c0_266 = arith.constant 0 : index
    %481 = memref.load %arg2[%c2_265, %c0_266] : memref<4x9xf32, #tpu.memory_space<smem>>
    %482 = vector.broadcast %481 : f32 to vector<4x4x4xf32>
    %483 = arith.mulf %388, %482 : vector<4x4x4xf32>
    %c2_267 = arith.constant 2 : index
    %c1_268 = arith.constant 1 : index
    %484 = memref.load %arg2[%c2_267, %c1_268] : memref<4x9xf32, #tpu.memory_space<smem>>
    %485 = vector.broadcast %484 : f32 to vector<4x4x4xf32>
    %486 = arith.mulf %389, %485 : vector<4x4x4xf32>
    %487 = arith.addf %483, %486 : vector<4x4x4xf32>
    %c2_269 = arith.constant 2 : index
    %c2_270 = arith.constant 2 : index
    %488 = memref.load %arg2[%c2_269, %c2_270] : memref<4x9xf32, #tpu.memory_space<smem>>
    %489 = vector.broadcast %488 : f32 to vector<4x4x4xf32>
    %490 = arith.mulf %390, %489 : vector<4x4x4xf32>
    %491 = arith.addf %487, %490 : vector<4x4x4xf32>
    %c2_271 = arith.constant 2 : index
    %c3_272 = arith.constant 3 : index
    %492 = memref.load %arg2[%c2_271, %c3_272] : memref<4x9xf32, #tpu.memory_space<smem>>
    %493 = vector.broadcast %492 : f32 to vector<4x4x4xf32>
    %494 = arith.mulf %391, %493 : vector<4x4x4xf32>
    %495 = arith.addf %491, %494 : vector<4x4x4xf32>
    %c2_273 = arith.constant 2 : index
    %c4_274 = arith.constant 4 : index
    %496 = memref.load %arg2[%c2_273, %c4_274] : memref<4x9xf32, #tpu.memory_space<smem>>
    %497 = vector.broadcast %496 : f32 to vector<4x4x4xf32>
    %498 = arith.mulf %392, %497 : vector<4x4x4xf32>
    %499 = arith.addf %495, %498 : vector<4x4x4xf32>
    %c2_275 = arith.constant 2 : index
    %c5_276 = arith.constant 5 : index
    %500 = memref.load %arg2[%c2_275, %c5_276] : memref<4x9xf32, #tpu.memory_space<smem>>
    %501 = vector.broadcast %500 : f32 to vector<4x4x4xf32>
    %502 = arith.mulf %393, %501 : vector<4x4x4xf32>
    %503 = arith.addf %499, %502 : vector<4x4x4xf32>
    %c2_277 = arith.constant 2 : index
    %c6_278 = arith.constant 6 : index
    %504 = memref.load %arg2[%c2_277, %c6_278] : memref<4x9xf32, #tpu.memory_space<smem>>
    %505 = vector.broadcast %504 : f32 to vector<4x4x4xf32>
    %506 = arith.mulf %394, %505 : vector<4x4x4xf32>
    %507 = arith.addf %503, %506 : vector<4x4x4xf32>
    %c2_279 = arith.constant 2 : index
    %c7_280 = arith.constant 7 : index
    %508 = memref.load %arg2[%c2_279, %c7_280] : memref<4x9xf32, #tpu.memory_space<smem>>
    %509 = vector.broadcast %508 : f32 to vector<4x4x4xf32>
    %510 = arith.mulf %395, %509 : vector<4x4x4xf32>
    %511 = arith.addf %507, %510 : vector<4x4x4xf32>
    %c2_281 = arith.constant 2 : index
    %c8_282 = arith.constant 8 : index
    %512 = memref.load %arg2[%c2_281, %c8_282] : memref<4x9xf32, #tpu.memory_space<smem>>
    %513 = vector.broadcast %512 : f32 to vector<4x4x4xf32>
    %514 = arith.mulf %396, %513 : vector<4x4x4xf32>
    %515 = arith.addf %511, %514 : vector<4x4x4xf32>
    %c2_283 = arith.constant 2 : index
    %516 = memref.load %arg3[%c2_283] : memref<4xf32, #tpu.memory_space<smem>>
    %517 = vector.broadcast %516 : f32 to vector<4x4x4xf32>
    %518 = arith.addf %515, %517 : vector<4x4x4xf32>
    %cst_284 = arith.constant 0.000000e+00 : f32
    %519 = vector.broadcast %cst_284 : f32 to vector<4x4x4xf32>
    %520 = arith.maximumf %518, %519 : vector<4x4x4xf32>
    %521 = tpu.concatenate %32, %520 in 1 : vector<4x1x4xf32>, vector<4x4x4xf32> -> vector<4x5x4xf32>
    %522 = tpu.concatenate %33, %521 in 2 : vector<4x5x1xf32>, vector<4x5x4xf32> -> vector<4x5x5xf32>
    %c3_285 = arith.constant 3 : index
    %c0_286 = arith.constant 0 : index
    %523 = memref.load %arg2[%c3_285, %c0_286] : memref<4x9xf32, #tpu.memory_space<smem>>
    %524 = vector.broadcast %523 : f32 to vector<4x4x4xf32>
    %525 = arith.mulf %388, %524 : vector<4x4x4xf32>
    %c3_287 = arith.constant 3 : index
    %c1_288 = arith.constant 1 : index
    %526 = memref.load %arg2[%c3_287, %c1_288] : memref<4x9xf32, #tpu.memory_space<smem>>
    %527 = vector.broadcast %526 : f32 to vector<4x4x4xf32>
    %528 = arith.mulf %389, %527 : vector<4x4x4xf32>
    %529 = arith.addf %525, %528 : vector<4x4x4xf32>
    %c3_289 = arith.constant 3 : index
    %c2_290 = arith.constant 2 : index
    %530 = memref.load %arg2[%c3_289, %c2_290] : memref<4x9xf32, #tpu.memory_space<smem>>
    %531 = vector.broadcast %530 : f32 to vector<4x4x4xf32>
    %532 = arith.mulf %390, %531 : vector<4x4x4xf32>
    %533 = arith.addf %529, %532 : vector<4x4x4xf32>
    %c3_291 = arith.constant 3 : index
    %c3_292 = arith.constant 3 : index
    %534 = memref.load %arg2[%c3_291, %c3_292] : memref<4x9xf32, #tpu.memory_space<smem>>
    %535 = vector.broadcast %534 : f32 to vector<4x4x4xf32>
    %536 = arith.mulf %391, %535 : vector<4x4x4xf32>
    %537 = arith.addf %533, %536 : vector<4x4x4xf32>
    %c3_293 = arith.constant 3 : index
    %c4_294 = arith.constant 4 : index
    %538 = memref.load %arg2[%c3_293, %c4_294] : memref<4x9xf32, #tpu.memory_space<smem>>
    %539 = vector.broadcast %538 : f32 to vector<4x4x4xf32>
    %540 = arith.mulf %392, %539 : vector<4x4x4xf32>
    %541 = arith.addf %537, %540 : vector<4x4x4xf32>
    %c3_295 = arith.constant 3 : index
    %c5_296 = arith.constant 5 : index
    %542 = memref.load %arg2[%c3_295, %c5_296] : memref<4x9xf32, #tpu.memory_space<smem>>
    %543 = vector.broadcast %542 : f32 to vector<4x4x4xf32>
    %544 = arith.mulf %393, %543 : vector<4x4x4xf32>
    %545 = arith.addf %541, %544 : vector<4x4x4xf32>
    %c3_297 = arith.constant 3 : index
    %c6_298 = arith.constant 6 : index
    %546 = memref.load %arg2[%c3_297, %c6_298] : memref<4x9xf32, #tpu.memory_space<smem>>
    %547 = vector.broadcast %546 : f32 to vector<4x4x4xf32>
    %548 = arith.mulf %394, %547 : vector<4x4x4xf32>
    %549 = arith.addf %545, %548 : vector<4x4x4xf32>
    %c3_299 = arith.constant 3 : index
    %c7_300 = arith.constant 7 : index
    %550 = memref.load %arg2[%c3_299, %c7_300] : memref<4x9xf32, #tpu.memory_space<smem>>
    %551 = vector.broadcast %550 : f32 to vector<4x4x4xf32>
    %552 = arith.mulf %395, %551 : vector<4x4x4xf32>
    %553 = arith.addf %549, %552 : vector<4x4x4xf32>
    %c3_301 = arith.constant 3 : index
    %c8_302 = arith.constant 8 : index
    %554 = memref.load %arg2[%c3_301, %c8_302] : memref<4x9xf32, #tpu.memory_space<smem>>
    %555 = vector.broadcast %554 : f32 to vector<4x4x4xf32>
    %556 = arith.mulf %396, %555 : vector<4x4x4xf32>
    %557 = arith.addf %553, %556 : vector<4x4x4xf32>
    %c3_303 = arith.constant 3 : index
    %558 = memref.load %arg3[%c3_303] : memref<4xf32, #tpu.memory_space<smem>>
    %559 = vector.broadcast %558 : f32 to vector<4x4x4xf32>
    %560 = arith.addf %557, %559 : vector<4x4x4xf32>
    %cst_304 = arith.constant 0.000000e+00 : f32
    %561 = vector.broadcast %cst_304 : f32 to vector<4x4x4xf32>
    %562 = arith.maximumf %560, %561 : vector<4x4x4xf32>
    %563 = tpu.concatenate %32, %562 in 1 : vector<4x1x4xf32>, vector<4x4x4xf32> -> vector<4x5x4xf32>
    %564 = tpu.concatenate %33, %563 in 2 : vector<4x5x1xf32>, vector<4x5x4xf32> -> vector<4x5x5xf32>
    %565 = vector.extract_strided_slice %21 {offsets = [0, 0, 0], sizes = [4, 4, 4], strides = [1, 1, 1]} : vector<4x5x5xf32> to vector<4x4x4xf32>
    %566 = vector.extract_strided_slice %23 {offsets = [0, 0, 0], sizes = [4, 4, 4], strides = [1, 1, 1]} : vector<4x5x5xf32> to vector<4x4x4xf32>
    %567 = vector.extract_strided_slice %17 {offsets = [0, 0, 1], sizes = [4, 4, 4], strides = [1, 1, 1]} : vector<4x5x5xf32> to vector<4x4x4xf32>
    %568 = vector.extract_strided_slice %29 {offsets = [0, 0, 0], sizes = [4, 4, 4], strides = [1, 1, 1]} : vector<4x5x5xf32> to vector<4x4x4xf32>
    %569 = vector.extract_strided_slice %31 {offsets = [0, 0, 0], sizes = [4, 4, 4], strides = [1, 1, 1]} : vector<4x5x5xf32> to vector<4x4x4xf32>
    %570 = vector.extract_strided_slice %25 {offsets = [0, 0, 1], sizes = [4, 4, 4], strides = [1, 1, 1]} : vector<4x5x5xf32> to vector<4x4x4xf32>
    %571 = vector.extract_strided_slice %5 {offsets = [0, 1, 0], sizes = [4, 4, 4], strides = [1, 1, 1]} : vector<4x5x5xf32> to vector<4x4x4xf32>
    %572 = vector.extract_strided_slice %7 {offsets = [0, 1, 0], sizes = [4, 4, 4], strides = [1, 1, 1]} : vector<4x5x5xf32> to vector<4x4x4xf32>
    %573 = vector.extract_strided_slice %1 {offsets = [0, 1, 1], sizes = [4, 4, 4], strides = [1, 1, 1]} : vector<4x5x5xf32> to vector<4x4x4xf32>
    %c0_305 = arith.constant 0 : index
    %c0_306 = arith.constant 0 : index
    %574 = memref.load %arg2[%c0_305, %c0_306] : memref<4x9xf32, #tpu.memory_space<smem>>
    %575 = vector.broadcast %574 : f32 to vector<4x4x4xf32>
    %576 = arith.mulf %565, %575 : vector<4x4x4xf32>
    %c0_307 = arith.constant 0 : index
    %c1_308 = arith.constant 1 : index
    %577 = memref.load %arg2[%c0_307, %c1_308] : memref<4x9xf32, #tpu.memory_space<smem>>
    %578 = vector.broadcast %577 : f32 to vector<4x4x4xf32>
    %579 = arith.mulf %566, %578 : vector<4x4x4xf32>
    %580 = arith.addf %576, %579 : vector<4x4x4xf32>
    %c0_309 = arith.constant 0 : index
    %c2_310 = arith.constant 2 : index
    %581 = memref.load %arg2[%c0_309, %c2_310] : memref<4x9xf32, #tpu.memory_space<smem>>
    %582 = vector.broadcast %581 : f32 to vector<4x4x4xf32>
    %583 = arith.mulf %567, %582 : vector<4x4x4xf32>
    %584 = arith.addf %580, %583 : vector<4x4x4xf32>
    %c0_311 = arith.constant 0 : index
    %c3_312 = arith.constant 3 : index
    %585 = memref.load %arg2[%c0_311, %c3_312] : memref<4x9xf32, #tpu.memory_space<smem>>
    %586 = vector.broadcast %585 : f32 to vector<4x4x4xf32>
    %587 = arith.mulf %568, %586 : vector<4x4x4xf32>
    %588 = arith.addf %584, %587 : vector<4x4x4xf32>
    %c0_313 = arith.constant 0 : index
    %c4_314 = arith.constant 4 : index
    %589 = memref.load %arg2[%c0_313, %c4_314] : memref<4x9xf32, #tpu.memory_space<smem>>
    %590 = vector.broadcast %589 : f32 to vector<4x4x4xf32>
    %591 = arith.mulf %569, %590 : vector<4x4x4xf32>
    %592 = arith.addf %588, %591 : vector<4x4x4xf32>
    %c0_315 = arith.constant 0 : index
    %c5_316 = arith.constant 5 : index
    %593 = memref.load %arg2[%c0_315, %c5_316] : memref<4x9xf32, #tpu.memory_space<smem>>
    %594 = vector.broadcast %593 : f32 to vector<4x4x4xf32>
    %595 = arith.mulf %570, %594 : vector<4x4x4xf32>
    %596 = arith.addf %592, %595 : vector<4x4x4xf32>
    %c0_317 = arith.constant 0 : index
    %c6_318 = arith.constant 6 : index
    %597 = memref.load %arg2[%c0_317, %c6_318] : memref<4x9xf32, #tpu.memory_space<smem>>
    %598 = vector.broadcast %597 : f32 to vector<4x4x4xf32>
    %599 = arith.mulf %571, %598 : vector<4x4x4xf32>
    %600 = arith.addf %596, %599 : vector<4x4x4xf32>
    %c0_319 = arith.constant 0 : index
    %c7_320 = arith.constant 7 : index
    %601 = memref.load %arg2[%c0_319, %c7_320] : memref<4x9xf32, #tpu.memory_space<smem>>
    %602 = vector.broadcast %601 : f32 to vector<4x4x4xf32>
    %603 = arith.mulf %572, %602 : vector<4x4x4xf32>
    %604 = arith.addf %600, %603 : vector<4x4x4xf32>
    %c0_321 = arith.constant 0 : index
    %c8_322 = arith.constant 8 : index
    %605 = memref.load %arg2[%c0_321, %c8_322] : memref<4x9xf32, #tpu.memory_space<smem>>
    %606 = vector.broadcast %605 : f32 to vector<4x4x4xf32>
    %607 = arith.mulf %573, %606 : vector<4x4x4xf32>
    %608 = arith.addf %604, %607 : vector<4x4x4xf32>
    %c0_323 = arith.constant 0 : index
    %609 = memref.load %arg3[%c0_323] : memref<4xf32, #tpu.memory_space<smem>>
    %610 = vector.broadcast %609 : f32 to vector<4x4x4xf32>
    %611 = arith.addf %608, %610 : vector<4x4x4xf32>
    %cst_324 = arith.constant 0.000000e+00 : f32
    %612 = vector.broadcast %cst_324 : f32 to vector<4x4x4xf32>
    %613 = arith.maximumf %611, %612 : vector<4x4x4xf32>
    %614 = tpu.concatenate %32, %613 in 1 : vector<4x1x4xf32>, vector<4x4x4xf32> -> vector<4x5x4xf32>
    %615 = tpu.concatenate %33, %614 in 2 : vector<4x5x1xf32>, vector<4x5x4xf32> -> vector<4x5x5xf32>
    %c1_325 = arith.constant 1 : index
    %c0_326 = arith.constant 0 : index
    %616 = memref.load %arg2[%c1_325, %c0_326] : memref<4x9xf32, #tpu.memory_space<smem>>
    %617 = vector.broadcast %616 : f32 to vector<4x4x4xf32>
    %618 = arith.mulf %565, %617 : vector<4x4x4xf32>
    %c1_327 = arith.constant 1 : index
    %c1_328 = arith.constant 1 : index
    %619 = memref.load %arg2[%c1_327, %c1_328] : memref<4x9xf32, #tpu.memory_space<smem>>
    %620 = vector.broadcast %619 : f32 to vector<4x4x4xf32>
    %621 = arith.mulf %566, %620 : vector<4x4x4xf32>
    %622 = arith.addf %618, %621 : vector<4x4x4xf32>
    %c1_329 = arith.constant 1 : index
    %c2_330 = arith.constant 2 : index
    %623 = memref.load %arg2[%c1_329, %c2_330] : memref<4x9xf32, #tpu.memory_space<smem>>
    %624 = vector.broadcast %623 : f32 to vector<4x4x4xf32>
    %625 = arith.mulf %567, %624 : vector<4x4x4xf32>
    %626 = arith.addf %622, %625 : vector<4x4x4xf32>
    %c1_331 = arith.constant 1 : index
    %c3_332 = arith.constant 3 : index
    %627 = memref.load %arg2[%c1_331, %c3_332] : memref<4x9xf32, #tpu.memory_space<smem>>
    %628 = vector.broadcast %627 : f32 to vector<4x4x4xf32>
    %629 = arith.mulf %568, %628 : vector<4x4x4xf32>
    %630 = arith.addf %626, %629 : vector<4x4x4xf32>
    %c1_333 = arith.constant 1 : index
    %c4_334 = arith.constant 4 : index
    %631 = memref.load %arg2[%c1_333, %c4_334] : memref<4x9xf32, #tpu.memory_space<smem>>
    %632 = vector.broadcast %631 : f32 to vector<4x4x4xf32>
    %633 = arith.mulf %569, %632 : vector<4x4x4xf32>
    %634 = arith.addf %630, %633 : vector<4x4x4xf32>
    %c1_335 = arith.constant 1 : index
    %c5_336 = arith.constant 5 : index
    %635 = memref.load %arg2[%c1_335, %c5_336] : memref<4x9xf32, #tpu.memory_space<smem>>
    %636 = vector.broadcast %635 : f32 to vector<4x4x4xf32>
    %637 = arith.mulf %570, %636 : vector<4x4x4xf32>
    %638 = arith.addf %634, %637 : vector<4x4x4xf32>
    %c1_337 = arith.constant 1 : index
    %c6_338 = arith.constant 6 : index
    %639 = memref.load %arg2[%c1_337, %c6_338] : memref<4x9xf32, #tpu.memory_space<smem>>
    %640 = vector.broadcast %639 : f32 to vector<4x4x4xf32>
    %641 = arith.mulf %571, %640 : vector<4x4x4xf32>
    %642 = arith.addf %638, %641 : vector<4x4x4xf32>
    %c1_339 = arith.constant 1 : index
    %c7_340 = arith.constant 7 : index
    %643 = memref.load %arg2[%c1_339, %c7_340] : memref<4x9xf32, #tpu.memory_space<smem>>
    %644 = vector.broadcast %643 : f32 to vector<4x4x4xf32>
    %645 = arith.mulf %572, %644 : vector<4x4x4xf32>
    %646 = arith.addf %642, %645 : vector<4x4x4xf32>
    %c1_341 = arith.constant 1 : index
    %c8_342 = arith.constant 8 : index
    %647 = memref.load %arg2[%c1_341, %c8_342] : memref<4x9xf32, #tpu.memory_space<smem>>
    %648 = vector.broadcast %647 : f32 to vector<4x4x4xf32>
    %649 = arith.mulf %573, %648 : vector<4x4x4xf32>
    %650 = arith.addf %646, %649 : vector<4x4x4xf32>
    %c1_343 = arith.constant 1 : index
    %651 = memref.load %arg3[%c1_343] : memref<4xf32, #tpu.memory_space<smem>>
    %652 = vector.broadcast %651 : f32 to vector<4x4x4xf32>
    %653 = arith.addf %650, %652 : vector<4x4x4xf32>
    %cst_344 = arith.constant 0.000000e+00 : f32
    %654 = vector.broadcast %cst_344 : f32 to vector<4x4x4xf32>
    %655 = arith.maximumf %653, %654 : vector<4x4x4xf32>
    %656 = tpu.concatenate %32, %655 in 1 : vector<4x1x4xf32>, vector<4x4x4xf32> -> vector<4x5x4xf32>
    %657 = tpu.concatenate %33, %656 in 2 : vector<4x5x1xf32>, vector<4x5x4xf32> -> vector<4x5x5xf32>
    %c2_345 = arith.constant 2 : index
    %c0_346 = arith.constant 0 : index
    %658 = memref.load %arg2[%c2_345, %c0_346] : memref<4x9xf32, #tpu.memory_space<smem>>
    %659 = vector.broadcast %658 : f32 to vector<4x4x4xf32>
    %660 = arith.mulf %565, %659 : vector<4x4x4xf32>
    %c2_347 = arith.constant 2 : index
    %c1_348 = arith.constant 1 : index
    %661 = memref.load %arg2[%c2_347, %c1_348] : memref<4x9xf32, #tpu.memory_space<smem>>
    %662 = vector.broadcast %661 : f32 to vector<4x4x4xf32>
    %663 = arith.mulf %566, %662 : vector<4x4x4xf32>
    %664 = arith.addf %660, %663 : vector<4x4x4xf32>
    %c2_349 = arith.constant 2 : index
    %c2_350 = arith.constant 2 : index
    %665 = memref.load %arg2[%c2_349, %c2_350] : memref<4x9xf32, #tpu.memory_space<smem>>
    %666 = vector.broadcast %665 : f32 to vector<4x4x4xf32>
    %667 = arith.mulf %567, %666 : vector<4x4x4xf32>
    %668 = arith.addf %664, %667 : vector<4x4x4xf32>
    %c2_351 = arith.constant 2 : index
    %c3_352 = arith.constant 3 : index
    %669 = memref.load %arg2[%c2_351, %c3_352] : memref<4x9xf32, #tpu.memory_space<smem>>
    %670 = vector.broadcast %669 : f32 to vector<4x4x4xf32>
    %671 = arith.mulf %568, %670 : vector<4x4x4xf32>
    %672 = arith.addf %668, %671 : vector<4x4x4xf32>
    %c2_353 = arith.constant 2 : index
    %c4_354 = arith.constant 4 : index
    %673 = memref.load %arg2[%c2_353, %c4_354] : memref<4x9xf32, #tpu.memory_space<smem>>
    %674 = vector.broadcast %673 : f32 to vector<4x4x4xf32>
    %675 = arith.mulf %569, %674 : vector<4x4x4xf32>
    %676 = arith.addf %672, %675 : vector<4x4x4xf32>
    %c2_355 = arith.constant 2 : index
    %c5_356 = arith.constant 5 : index
    %677 = memref.load %arg2[%c2_355, %c5_356] : memref<4x9xf32, #tpu.memory_space<smem>>
    %678 = vector.broadcast %677 : f32 to vector<4x4x4xf32>
    %679 = arith.mulf %570, %678 : vector<4x4x4xf32>
    %680 = arith.addf %676, %679 : vector<4x4x4xf32>
    %c2_357 = arith.constant 2 : index
    %c6_358 = arith.constant 6 : index
    %681 = memref.load %arg2[%c2_357, %c6_358] : memref<4x9xf32, #tpu.memory_space<smem>>
    %682 = vector.broadcast %681 : f32 to vector<4x4x4xf32>
    %683 = arith.mulf %571, %682 : vector<4x4x4xf32>
    %684 = arith.addf %680, %683 : vector<4x4x4xf32>
    %c2_359 = arith.constant 2 : index
    %c7_360 = arith.constant 7 : index
    %685 = memref.load %arg2[%c2_359, %c7_360] : memref<4x9xf32, #tpu.memory_space<smem>>
    %686 = vector.broadcast %685 : f32 to vector<4x4x4xf32>
    %687 = arith.mulf %572, %686 : vector<4x4x4xf32>
    %688 = arith.addf %684, %687 : vector<4x4x4xf32>
    %c2_361 = arith.constant 2 : index
    %c8_362 = arith.constant 8 : index
    %689 = memref.load %arg2[%c2_361, %c8_362] : memref<4x9xf32, #tpu.memory_space<smem>>
    %690 = vector.broadcast %689 : f32 to vector<4x4x4xf32>
    %691 = arith.mulf %573, %690 : vector<4x4x4xf32>
    %692 = arith.addf %688, %691 : vector<4x4x4xf32>
    %c2_363 = arith.constant 2 : index
    %693 = memref.load %arg3[%c2_363] : memref<4xf32, #tpu.memory_space<smem>>
    %694 = vector.broadcast %693 : f32 to vector<4x4x4xf32>
    %695 = arith.addf %692, %694 : vector<4x4x4xf32>
    %cst_364 = arith.constant 0.000000e+00 : f32
    %696 = vector.broadcast %cst_364 : f32 to vector<4x4x4xf32>
    %697 = arith.maximumf %695, %696 : vector<4x4x4xf32>
    %698 = tpu.concatenate %32, %697 in 1 : vector<4x1x4xf32>, vector<4x4x4xf32> -> vector<4x5x4xf32>
    %699 = tpu.concatenate %33, %698 in 2 : vector<4x5x1xf32>, vector<4x5x4xf32> -> vector<4x5x5xf32>
    %c3_365 = arith.constant 3 : index
    %c0_366 = arith.constant 0 : index
    %700 = memref.load %arg2[%c3_365, %c0_366] : memref<4x9xf32, #tpu.memory_space<smem>>
    %701 = vector.broadcast %700 : f32 to vector<4x4x4xf32>
    %702 = arith.mulf %565, %701 : vector<4x4x4xf32>
    %c3_367 = arith.constant 3 : index
    %c1_368 = arith.constant 1 : index
    %703 = memref.load %arg2[%c3_367, %c1_368] : memref<4x9xf32, #tpu.memory_space<smem>>
    %704 = vector.broadcast %703 : f32 to vector<4x4x4xf32>
    %705 = arith.mulf %566, %704 : vector<4x4x4xf32>
    %706 = arith.addf %702, %705 : vector<4x4x4xf32>
    %c3_369 = arith.constant 3 : index
    %c2_370 = arith.constant 2 : index
    %707 = memref.load %arg2[%c3_369, %c2_370] : memref<4x9xf32, #tpu.memory_space<smem>>
    %708 = vector.broadcast %707 : f32 to vector<4x4x4xf32>
    %709 = arith.mulf %567, %708 : vector<4x4x4xf32>
    %710 = arith.addf %706, %709 : vector<4x4x4xf32>
    %c3_371 = arith.constant 3 : index
    %c3_372 = arith.constant 3 : index
    %711 = memref.load %arg2[%c3_371, %c3_372] : memref<4x9xf32, #tpu.memory_space<smem>>
    %712 = vector.broadcast %711 : f32 to vector<4x4x4xf32>
    %713 = arith.mulf %568, %712 : vector<4x4x4xf32>
    %714 = arith.addf %710, %713 : vector<4x4x4xf32>
    %c3_373 = arith.constant 3 : index
    %c4_374 = arith.constant 4 : index
    %715 = memref.load %arg2[%c3_373, %c4_374] : memref<4x9xf32, #tpu.memory_space<smem>>
    %716 = vector.broadcast %715 : f32 to vector<4x4x4xf32>
    %717 = arith.mulf %569, %716 : vector<4x4x4xf32>
    %718 = arith.addf %714, %717 : vector<4x4x4xf32>
    %c3_375 = arith.constant 3 : index
    %c5_376 = arith.constant 5 : index
    %719 = memref.load %arg2[%c3_375, %c5_376] : memref<4x9xf32, #tpu.memory_space<smem>>
    %720 = vector.broadcast %719 : f32 to vector<4x4x4xf32>
    %721 = arith.mulf %570, %720 : vector<4x4x4xf32>
    %722 = arith.addf %718, %721 : vector<4x4x4xf32>
    %c3_377 = arith.constant 3 : index
    %c6_378 = arith.constant 6 : index
    %723 = memref.load %arg2[%c3_377, %c6_378] : memref<4x9xf32, #tpu.memory_space<smem>>
    %724 = vector.broadcast %723 : f32 to vector<4x4x4xf32>
    %725 = arith.mulf %571, %724 : vector<4x4x4xf32>
    %726 = arith.addf %722, %725 : vector<4x4x4xf32>
    %c3_379 = arith.constant 3 : index
    %c7_380 = arith.constant 7 : index
    %727 = memref.load %arg2[%c3_379, %c7_380] : memref<4x9xf32, #tpu.memory_space<smem>>
    %728 = vector.broadcast %727 : f32 to vector<4x4x4xf32>
    %729 = arith.mulf %572, %728 : vector<4x4x4xf32>
    %730 = arith.addf %726, %729 : vector<4x4x4xf32>
    %c3_381 = arith.constant 3 : index
    %c8_382 = arith.constant 8 : index
    %731 = memref.load %arg2[%c3_381, %c8_382] : memref<4x9xf32, #tpu.memory_space<smem>>
    %732 = vector.broadcast %731 : f32 to vector<4x4x4xf32>
    %733 = arith.mulf %573, %732 : vector<4x4x4xf32>
    %734 = arith.addf %730, %733 : vector<4x4x4xf32>
    %c3_383 = arith.constant 3 : index
    %735 = memref.load %arg3[%c3_383] : memref<4xf32, #tpu.memory_space<smem>>
    %736 = vector.broadcast %735 : f32 to vector<4x4x4xf32>
    %737 = arith.addf %734, %736 : vector<4x4x4xf32>
    %cst_384 = arith.constant 0.000000e+00 : f32
    %738 = vector.broadcast %cst_384 : f32 to vector<4x4x4xf32>
    %739 = arith.maximumf %737, %738 : vector<4x4x4xf32>
    %740 = tpu.concatenate %32, %739 in 1 : vector<4x1x4xf32>, vector<4x4x4xf32> -> vector<4x5x4xf32>
    %741 = tpu.concatenate %33, %740 in 2 : vector<4x5x1xf32>, vector<4x5x4xf32> -> vector<4x5x5xf32>
    %742 = vector.extract_strided_slice %615 {offsets = [0, 0, 0], sizes = [4, 4, 4], strides = [1, 1, 1]} : vector<4x5x5xf32> to vector<4x4x4xf32>
    %c0_385 = arith.constant 0 : index
    %c0_386 = arith.constant 0 : index
    %743 = memref.load %arg4[%c0_385, %c0_386] : memref<4x9xf32, #tpu.memory_space<smem>>
    %744 = vector.broadcast %743 : f32 to vector<4x4x4xf32>
    %745 = arith.mulf %742, %744 : vector<4x4x4xf32>
    %746 = vector.extract_strided_slice %657 {offsets = [0, 0, 0], sizes = [4, 4, 4], strides = [1, 1, 1]} : vector<4x5x5xf32> to vector<4x4x4xf32>
    %c1_387 = arith.constant 1 : index
    %c0_388 = arith.constant 0 : index
    %747 = memref.load %arg4[%c1_387, %c0_388] : memref<4x9xf32, #tpu.memory_space<smem>>
    %748 = vector.broadcast %747 : f32 to vector<4x4x4xf32>
    %749 = arith.mulf %746, %748 : vector<4x4x4xf32>
    %750 = arith.addf %745, %749 : vector<4x4x4xf32>
    %751 = vector.extract_strided_slice %699 {offsets = [0, 0, 0], sizes = [4, 4, 4], strides = [1, 1, 1]} : vector<4x5x5xf32> to vector<4x4x4xf32>
    %c2_389 = arith.constant 2 : index
    %c0_390 = arith.constant 0 : index
    %752 = memref.load %arg4[%c2_389, %c0_390] : memref<4x9xf32, #tpu.memory_space<smem>>
    %753 = vector.broadcast %752 : f32 to vector<4x4x4xf32>
    %754 = arith.mulf %751, %753 : vector<4x4x4xf32>
    %755 = arith.addf %750, %754 : vector<4x4x4xf32>
    %756 = vector.extract_strided_slice %741 {offsets = [0, 0, 0], sizes = [4, 4, 4], strides = [1, 1, 1]} : vector<4x5x5xf32> to vector<4x4x4xf32>
    %c3_391 = arith.constant 3 : index
    %c0_392 = arith.constant 0 : index
    %757 = memref.load %arg4[%c3_391, %c0_392] : memref<4x9xf32, #tpu.memory_space<smem>>
    %758 = vector.broadcast %757 : f32 to vector<4x4x4xf32>
    %759 = arith.mulf %756, %758 : vector<4x4x4xf32>
    %760 = arith.addf %755, %759 : vector<4x4x4xf32>
    %761 = vector.extract_strided_slice %438 {offsets = [0, 0, 1], sizes = [4, 4, 4], strides = [1, 1, 1]} : vector<4x5x5xf32> to vector<4x4x4xf32>
    %c0_393 = arith.constant 0 : index
    %c1_394 = arith.constant 1 : index
    %762 = memref.load %arg4[%c0_393, %c1_394] : memref<4x9xf32, #tpu.memory_space<smem>>
    %763 = vector.broadcast %762 : f32 to vector<4x4x4xf32>
    %764 = arith.mulf %761, %763 : vector<4x4x4xf32>
    %765 = arith.addf %760, %764 : vector<4x4x4xf32>
    %766 = vector.extract_strided_slice %480 {offsets = [0, 0, 1], sizes = [4, 4, 4], strides = [1, 1, 1]} : vector<4x5x5xf32> to vector<4x4x4xf32>
    %c1_395 = arith.constant 1 : index
    %c1_396 = arith.constant 1 : index
    %767 = memref.load %arg4[%c1_395, %c1_396] : memref<4x9xf32, #tpu.memory_space<smem>>
    %768 = vector.broadcast %767 : f32 to vector<4x4x4xf32>
    %769 = arith.mulf %766, %768 : vector<4x4x4xf32>
    %770 = arith.addf %765, %769 : vector<4x4x4xf32>
    %771 = vector.extract_strided_slice %522 {offsets = [0, 0, 1], sizes = [4, 4, 4], strides = [1, 1, 1]} : vector<4x5x5xf32> to vector<4x4x4xf32>
    %c2_397 = arith.constant 2 : index
    %c1_398 = arith.constant 1 : index
    %772 = memref.load %arg4[%c2_397, %c1_398] : memref<4x9xf32, #tpu.memory_space<smem>>
    %773 = vector.broadcast %772 : f32 to vector<4x4x4xf32>
    %774 = arith.mulf %771, %773 : vector<4x4x4xf32>
    %775 = arith.addf %770, %774 : vector<4x4x4xf32>
    %776 = vector.extract_strided_slice %564 {offsets = [0, 0, 1], sizes = [4, 4, 4], strides = [1, 1, 1]} : vector<4x5x5xf32> to vector<4x4x4xf32>
    %c3_399 = arith.constant 3 : index
    %c1_400 = arith.constant 1 : index
    %777 = memref.load %arg4[%c3_399, %c1_400] : memref<4x9xf32, #tpu.memory_space<smem>>
    %778 = vector.broadcast %777 : f32 to vector<4x4x4xf32>
    %779 = arith.mulf %776, %778 : vector<4x4x4xf32>
    %780 = arith.addf %775, %779 : vector<4x4x4xf32>
    %781 = vector.extract_strided_slice %615 {offsets = [0, 0, 1], sizes = [4, 4, 4], strides = [1, 1, 1]} : vector<4x5x5xf32> to vector<4x4x4xf32>
    %c0_401 = arith.constant 0 : index
    %c2_402 = arith.constant 2 : index
    %782 = memref.load %arg4[%c0_401, %c2_402] : memref<4x9xf32, #tpu.memory_space<smem>>
    %783 = vector.broadcast %782 : f32 to vector<4x4x4xf32>
    %784 = arith.mulf %781, %783 : vector<4x4x4xf32>
    %785 = arith.addf %780, %784 : vector<4x4x4xf32>
    %786 = vector.extract_strided_slice %657 {offsets = [0, 0, 1], sizes = [4, 4, 4], strides = [1, 1, 1]} : vector<4x5x5xf32> to vector<4x4x4xf32>
    %c1_403 = arith.constant 1 : index
    %c2_404 = arith.constant 2 : index
    %787 = memref.load %arg4[%c1_403, %c2_404] : memref<4x9xf32, #tpu.memory_space<smem>>
    %788 = vector.broadcast %787 : f32 to vector<4x4x4xf32>
    %789 = arith.mulf %786, %788 : vector<4x4x4xf32>
    %790 = arith.addf %785, %789 : vector<4x4x4xf32>
    %791 = vector.extract_strided_slice %699 {offsets = [0, 0, 1], sizes = [4, 4, 4], strides = [1, 1, 1]} : vector<4x5x5xf32> to vector<4x4x4xf32>
    %c2_405 = arith.constant 2 : index
    %c2_406 = arith.constant 2 : index
    %792 = memref.load %arg4[%c2_405, %c2_406] : memref<4x9xf32, #tpu.memory_space<smem>>
    %793 = vector.broadcast %792 : f32 to vector<4x4x4xf32>
    %794 = arith.mulf %791, %793 : vector<4x4x4xf32>
    %795 = arith.addf %790, %794 : vector<4x4x4xf32>
    %796 = vector.extract_strided_slice %741 {offsets = [0, 0, 1], sizes = [4, 4, 4], strides = [1, 1, 1]} : vector<4x5x5xf32> to vector<4x4x4xf32>
    %c3_407 = arith.constant 3 : index
    %c2_408 = arith.constant 2 : index
    %797 = memref.load %arg4[%c3_407, %c2_408] : memref<4x9xf32, #tpu.memory_space<smem>>
    %798 = vector.broadcast %797 : f32 to vector<4x4x4xf32>
    %799 = arith.mulf %796, %798 : vector<4x4x4xf32>
    %800 = arith.addf %795, %799 : vector<4x4x4xf32>
    %801 = vector.extract_strided_slice %261 {offsets = [0, 1, 0], sizes = [4, 4, 4], strides = [1, 1, 1]} : vector<4x5x5xf32> to vector<4x4x4xf32>
    %c0_409 = arith.constant 0 : index
    %c3_410 = arith.constant 3 : index
    %802 = memref.load %arg4[%c0_409, %c3_410] : memref<4x9xf32, #tpu.memory_space<smem>>
    %803 = vector.broadcast %802 : f32 to vector<4x4x4xf32>
    %804 = arith.mulf %801, %803 : vector<4x4x4xf32>
    %805 = arith.addf %800, %804 : vector<4x4x4xf32>
    %806 = vector.extract_strided_slice %303 {offsets = [0, 1, 0], sizes = [4, 4, 4], strides = [1, 1, 1]} : vector<4x5x5xf32> to vector<4x4x4xf32>
    %c1_411 = arith.constant 1 : index
    %c3_412 = arith.constant 3 : index
    %807 = memref.load %arg4[%c1_411, %c3_412] : memref<4x9xf32, #tpu.memory_space<smem>>
    %808 = vector.broadcast %807 : f32 to vector<4x4x4xf32>
    %809 = arith.mulf %806, %808 : vector<4x4x4xf32>
    %810 = arith.addf %805, %809 : vector<4x4x4xf32>
    %811 = vector.extract_strided_slice %345 {offsets = [0, 1, 0], sizes = [4, 4, 4], strides = [1, 1, 1]} : vector<4x5x5xf32> to vector<4x4x4xf32>
    %c2_413 = arith.constant 2 : index
    %c3_414 = arith.constant 3 : index
    %812 = memref.load %arg4[%c2_413, %c3_414] : memref<4x9xf32, #tpu.memory_space<smem>>
    %813 = vector.broadcast %812 : f32 to vector<4x4x4xf32>
    %814 = arith.mulf %811, %813 : vector<4x4x4xf32>
    %815 = arith.addf %810, %814 : vector<4x4x4xf32>
    %816 = vector.extract_strided_slice %387 {offsets = [0, 1, 0], sizes = [4, 4, 4], strides = [1, 1, 1]} : vector<4x5x5xf32> to vector<4x4x4xf32>
    %c3_415 = arith.constant 3 : index
    %c3_416 = arith.constant 3 : index
    %817 = memref.load %arg4[%c3_415, %c3_416] : memref<4x9xf32, #tpu.memory_space<smem>>
    %818 = vector.broadcast %817 : f32 to vector<4x4x4xf32>
    %819 = arith.mulf %816, %818 : vector<4x4x4xf32>
    %820 = arith.addf %815, %819 : vector<4x4x4xf32>
    %821 = vector.extract_strided_slice %84 {offsets = [0, 1, 1], sizes = [4, 4, 4], strides = [1, 1, 1]} : vector<4x5x5xf32> to vector<4x4x4xf32>
    %c0_417 = arith.constant 0 : index
    %c4_418 = arith.constant 4 : index
    %822 = memref.load %arg4[%c0_417, %c4_418] : memref<4x9xf32, #tpu.memory_space<smem>>
    %823 = vector.broadcast %822 : f32 to vector<4x4x4xf32>
    %824 = arith.mulf %821, %823 : vector<4x4x4xf32>
    %825 = arith.addf %820, %824 : vector<4x4x4xf32>
    %826 = vector.extract_strided_slice %126 {offsets = [0, 1, 1], sizes = [4, 4, 4], strides = [1, 1, 1]} : vector<4x5x5xf32> to vector<4x4x4xf32>
    %c1_419 = arith.constant 1 : index
    %c4_420 = arith.constant 4 : index
    %827 = memref.load %arg4[%c1_419, %c4_420] : memref<4x9xf32, #tpu.memory_space<smem>>
    %828 = vector.broadcast %827 : f32 to vector<4x4x4xf32>
    %829 = arith.mulf %826, %828 : vector<4x4x4xf32>
    %830 = arith.addf %825, %829 : vector<4x4x4xf32>
    %831 = vector.extract_strided_slice %168 {offsets = [0, 1, 1], sizes = [4, 4, 4], strides = [1, 1, 1]} : vector<4x5x5xf32> to vector<4x4x4xf32>
    %c2_421 = arith.constant 2 : index
    %c4_422 = arith.constant 4 : index
    %832 = memref.load %arg4[%c2_421, %c4_422] : memref<4x9xf32, #tpu.memory_space<smem>>
    %833 = vector.broadcast %832 : f32 to vector<4x4x4xf32>
    %834 = arith.mulf %831, %833 : vector<4x4x4xf32>
    %835 = arith.addf %830, %834 : vector<4x4x4xf32>
    %836 = vector.extract_strided_slice %210 {offsets = [0, 1, 1], sizes = [4, 4, 4], strides = [1, 1, 1]} : vector<4x5x5xf32> to vector<4x4x4xf32>
    %c3_423 = arith.constant 3 : index
    %c4_424 = arith.constant 4 : index
    %837 = memref.load %arg4[%c3_423, %c4_424] : memref<4x9xf32, #tpu.memory_space<smem>>
    %838 = vector.broadcast %837 : f32 to vector<4x4x4xf32>
    %839 = arith.mulf %836, %838 : vector<4x4x4xf32>
    %840 = arith.addf %835, %839 : vector<4x4x4xf32>
    %841 = vector.extract_strided_slice %261 {offsets = [0, 1, 1], sizes = [4, 4, 4], strides = [1, 1, 1]} : vector<4x5x5xf32> to vector<4x4x4xf32>
    %c0_425 = arith.constant 0 : index
    %c5_426 = arith.constant 5 : index
    %842 = memref.load %arg4[%c0_425, %c5_426] : memref<4x9xf32, #tpu.memory_space<smem>>
    %843 = vector.broadcast %842 : f32 to vector<4x4x4xf32>
    %844 = arith.mulf %841, %843 : vector<4x4x4xf32>
    %845 = arith.addf %840, %844 : vector<4x4x4xf32>
    %846 = vector.extract_strided_slice %303 {offsets = [0, 1, 1], sizes = [4, 4, 4], strides = [1, 1, 1]} : vector<4x5x5xf32> to vector<4x4x4xf32>
    %c1_427 = arith.constant 1 : index
    %c5_428 = arith.constant 5 : index
    %847 = memref.load %arg4[%c1_427, %c5_428] : memref<4x9xf32, #tpu.memory_space<smem>>
    %848 = vector.broadcast %847 : f32 to vector<4x4x4xf32>
    %849 = arith.mulf %846, %848 : vector<4x4x4xf32>
    %850 = arith.addf %845, %849 : vector<4x4x4xf32>
    %851 = vector.extract_strided_slice %345 {offsets = [0, 1, 1], sizes = [4, 4, 4], strides = [1, 1, 1]} : vector<4x5x5xf32> to vector<4x4x4xf32>
    %c2_429 = arith.constant 2 : index
    %c5_430 = arith.constant 5 : index
    %852 = memref.load %arg4[%c2_429, %c5_430] : memref<4x9xf32, #tpu.memory_space<smem>>
    %853 = vector.broadcast %852 : f32 to vector<4x4x4xf32>
    %854 = arith.mulf %851, %853 : vector<4x4x4xf32>
    %855 = arith.addf %850, %854 : vector<4x4x4xf32>
    %856 = vector.extract_strided_slice %387 {offsets = [0, 1, 1], sizes = [4, 4, 4], strides = [1, 1, 1]} : vector<4x5x5xf32> to vector<4x4x4xf32>
    %c3_431 = arith.constant 3 : index
    %c5_432 = arith.constant 5 : index
    %857 = memref.load %arg4[%c3_431, %c5_432] : memref<4x9xf32, #tpu.memory_space<smem>>
    %858 = vector.broadcast %857 : f32 to vector<4x4x4xf32>
    %859 = arith.mulf %856, %858 : vector<4x4x4xf32>
    %860 = arith.addf %855, %859 : vector<4x4x4xf32>
    %861 = vector.extract_strided_slice %615 {offsets = [0, 1, 0], sizes = [4, 4, 4], strides = [1, 1, 1]} : vector<4x5x5xf32> to vector<4x4x4xf32>
    %c0_433 = arith.constant 0 : index
    %c6_434 = arith.constant 6 : index
    %862 = memref.load %arg4[%c0_433, %c6_434] : memref<4x9xf32, #tpu.memory_space<smem>>
    %863 = vector.broadcast %862 : f32 to vector<4x4x4xf32>
    %864 = arith.mulf %861, %863 : vector<4x4x4xf32>
    %865 = arith.addf %860, %864 : vector<4x4x4xf32>
    %866 = vector.extract_strided_slice %657 {offsets = [0, 1, 0], sizes = [4, 4, 4], strides = [1, 1, 1]} : vector<4x5x5xf32> to vector<4x4x4xf32>
    %c1_435 = arith.constant 1 : index
    %c6_436 = arith.constant 6 : index
    %867 = memref.load %arg4[%c1_435, %c6_436] : memref<4x9xf32, #tpu.memory_space<smem>>
    %868 = vector.broadcast %867 : f32 to vector<4x4x4xf32>
    %869 = arith.mulf %866, %868 : vector<4x4x4xf32>
    %870 = arith.addf %865, %869 : vector<4x4x4xf32>
    %871 = vector.extract_strided_slice %699 {offsets = [0, 1, 0], sizes = [4, 4, 4], strides = [1, 1, 1]} : vector<4x5x5xf32> to vector<4x4x4xf32>
    %c2_437 = arith.constant 2 : index
    %c6_438 = arith.constant 6 : index
    %872 = memref.load %arg4[%c2_437, %c6_438] : memref<4x9xf32, #tpu.memory_space<smem>>
    %873 = vector.broadcast %872 : f32 to vector<4x4x4xf32>
    %874 = arith.mulf %871, %873 : vector<4x4x4xf32>
    %875 = arith.addf %870, %874 : vector<4x4x4xf32>
    %876 = vector.extract_strided_slice %741 {offsets = [0, 1, 0], sizes = [4, 4, 4], strides = [1, 1, 1]} : vector<4x5x5xf32> to vector<4x4x4xf32>
    %c3_439 = arith.constant 3 : index
    %c6_440 = arith.constant 6 : index
    %877 = memref.load %arg4[%c3_439, %c6_440] : memref<4x9xf32, #tpu.memory_space<smem>>
    %878 = vector.broadcast %877 : f32 to vector<4x4x4xf32>
    %879 = arith.mulf %876, %878 : vector<4x4x4xf32>
    %880 = arith.addf %875, %879 : vector<4x4x4xf32>
    %881 = vector.extract_strided_slice %438 {offsets = [0, 1, 1], sizes = [4, 4, 4], strides = [1, 1, 1]} : vector<4x5x5xf32> to vector<4x4x4xf32>
    %c0_441 = arith.constant 0 : index
    %c7_442 = arith.constant 7 : index
    %882 = memref.load %arg4[%c0_441, %c7_442] : memref<4x9xf32, #tpu.memory_space<smem>>
    %883 = vector.broadcast %882 : f32 to vector<4x4x4xf32>
    %884 = arith.mulf %881, %883 : vector<4x4x4xf32>
    %885 = arith.addf %880, %884 : vector<4x4x4xf32>
    %886 = vector.extract_strided_slice %480 {offsets = [0, 1, 1], sizes = [4, 4, 4], strides = [1, 1, 1]} : vector<4x5x5xf32> to vector<4x4x4xf32>
    %c1_443 = arith.constant 1 : index
    %c7_444 = arith.constant 7 : index
    %887 = memref.load %arg4[%c1_443, %c7_444] : memref<4x9xf32, #tpu.memory_space<smem>>
    %888 = vector.broadcast %887 : f32 to vector<4x4x4xf32>
    %889 = arith.mulf %886, %888 : vector<4x4x4xf32>
    %890 = arith.addf %885, %889 : vector<4x4x4xf32>
    %891 = vector.extract_strided_slice %522 {offsets = [0, 1, 1], sizes = [4, 4, 4], strides = [1, 1, 1]} : vector<4x5x5xf32> to vector<4x4x4xf32>
    %c2_445 = arith.constant 2 : index
    %c7_446 = arith.constant 7 : index
    %892 = memref.load %arg4[%c2_445, %c7_446] : memref<4x9xf32, #tpu.memory_space<smem>>
    %893 = vector.broadcast %892 : f32 to vector<4x4x4xf32>
    %894 = arith.mulf %891, %893 : vector<4x4x4xf32>
    %895 = arith.addf %890, %894 : vector<4x4x4xf32>
    %896 = vector.extract_strided_slice %564 {offsets = [0, 1, 1], sizes = [4, 4, 4], strides = [1, 1, 1]} : vector<4x5x5xf32> to vector<4x4x4xf32>
    %c3_447 = arith.constant 3 : index
    %c7_448 = arith.constant 7 : index
    %897 = memref.load %arg4[%c3_447, %c7_448] : memref<4x9xf32, #tpu.memory_space<smem>>
    %898 = vector.broadcast %897 : f32 to vector<4x4x4xf32>
    %899 = arith.mulf %896, %898 : vector<4x4x4xf32>
    %900 = arith.addf %895, %899 : vector<4x4x4xf32>
    %901 = vector.extract_strided_slice %615 {offsets = [0, 1, 1], sizes = [4, 4, 4], strides = [1, 1, 1]} : vector<4x5x5xf32> to vector<4x4x4xf32>
    %c0_449 = arith.constant 0 : index
    %c8_450 = arith.constant 8 : index
    %902 = memref.load %arg4[%c0_449, %c8_450] : memref<4x9xf32, #tpu.memory_space<smem>>
    %903 = vector.broadcast %902 : f32 to vector<4x4x4xf32>
    %904 = arith.mulf %901, %903 : vector<4x4x4xf32>
    %905 = arith.addf %900, %904 : vector<4x4x4xf32>
    %906 = vector.extract_strided_slice %657 {offsets = [0, 1, 1], sizes = [4, 4, 4], strides = [1, 1, 1]} : vector<4x5x5xf32> to vector<4x4x4xf32>
    %c1_451 = arith.constant 1 : index
    %c8_452 = arith.constant 8 : index
    %907 = memref.load %arg4[%c1_451, %c8_452] : memref<4x9xf32, #tpu.memory_space<smem>>
    %908 = vector.broadcast %907 : f32 to vector<4x4x4xf32>
    %909 = arith.mulf %906, %908 : vector<4x4x4xf32>
    %910 = arith.addf %905, %909 : vector<4x4x4xf32>
    %911 = vector.extract_strided_slice %699 {offsets = [0, 1, 1], sizes = [4, 4, 4], strides = [1, 1, 1]} : vector<4x5x5xf32> to vector<4x4x4xf32>
    %c2_453 = arith.constant 2 : index
    %c8_454 = arith.constant 8 : index
    %912 = memref.load %arg4[%c2_453, %c8_454] : memref<4x9xf32, #tpu.memory_space<smem>>
    %913 = vector.broadcast %912 : f32 to vector<4x4x4xf32>
    %914 = arith.mulf %911, %913 : vector<4x4x4xf32>
    %915 = arith.addf %910, %914 : vector<4x4x4xf32>
    %916 = vector.extract_strided_slice %741 {offsets = [0, 1, 1], sizes = [4, 4, 4], strides = [1, 1, 1]} : vector<4x5x5xf32> to vector<4x4x4xf32>
    %c3_455 = arith.constant 3 : index
    %c8_456 = arith.constant 8 : index
    %917 = memref.load %arg4[%c3_455, %c8_456] : memref<4x9xf32, #tpu.memory_space<smem>>
    %918 = vector.broadcast %917 : f32 to vector<4x4x4xf32>
    %919 = arith.mulf %916, %918 : vector<4x4x4xf32>
    %920 = arith.addf %915, %919 : vector<4x4x4xf32>
    %c0_457 = arith.constant 0 : index
    %921 = memref.load %arg5[%c0_457] : memref<1xf32, #tpu.memory_space<smem>>
    %922 = vector.broadcast %921 : f32 to vector<4x4x4xf32>
    %923 = arith.addf %920, %922 : vector<4x4x4xf32>
    %cst_458 = arith.constant 0.000000e+00 : f32
    %924 = vector.broadcast %cst_458 : f32 to vector<4x4x4xf32>
    %925 = arith.maximumf %923, %924 : vector<4x4x4xf32>
    %926 = vector.shape_cast %925 : vector<4x4x4xf32> to vector<4x16xf32>
    %c0_459 = arith.constant 0 : index
    %c0_460 = arith.constant 0 : index
    %927 = vector.load %arg6[%c0_459, %c0_460] : memref<16x32xbf16, #tpu.memory_space<vmem>>, vector<16x32xbf16>
    %928 = arith.truncf %926 : vector<4x16xf32> to vector<4x16xbf16>
    %cst_461 = arith.constant dense<0.000000e+00> : vector<4x32xf32>
    %929 = tpu.matmul %928, %927, %cst_461 {dimension_numbers = #tpu.dot_dimension_numbers<[1], [0], [0], [1], [0, 0, 1, 1], [], []>} : vector<4x16xbf16>, vector<16x32xbf16>, vector<4x32xf32> -> vector<4x32xf32>
    %c0_462 = arith.constant 0 : index
    %c0_463 = arith.constant 0 : index
    %930 = vector.load %arg7[%c0_462, %c0_463] : memref<1x32xf32, #tpu.memory_space<vmem>>, vector<1x32xf32>
    %931 = vector.broadcast %930 : vector<1x32xf32> to vector<4x32xf32>
    %932 = arith.addf %929, %931 : vector<4x32xf32>
    %c0_464 = arith.constant 0 : index
    %c0_465 = arith.constant 0 : index
    %c0_466 = arith.constant 0 : index
    %933 = vector.load %arg8[%c0_464, %c0_465, %c0_466] : memref<2x32x96xbf16, #tpu.memory_space<vmem>>, vector<1x32x96xbf16>
    %934 = vector.shape_cast %933 : vector<1x32x96xbf16> to vector<32x96xbf16>
    %935 = arith.truncf %932 : vector<4x32xf32> to vector<4x32xbf16>
    %cst_467 = arith.constant dense<0.000000e+00> : vector<4x96xf32>
    %936 = tpu.matmul %935, %934, %cst_467 {dimension_numbers = #tpu.dot_dimension_numbers<[1], [0], [0], [1], [0, 0, 1, 1], [], []>} : vector<4x32xbf16>, vector<32x96xbf16>, vector<4x96xf32> -> vector<4x96xf32>
    %c0_468 = arith.constant 0 : index
    %c0_469 = arith.constant 0 : index
    %c0_470 = arith.constant 0 : index
    %937 = vector.load %arg9[%c0_468, %c0_469, %c0_470] : memref<2x1x96xf32, #tpu.memory_space<vmem>>, vector<1x1x96xf32>
    %938 = vector.shape_cast %937 : vector<1x1x96xf32> to vector<1x96xf32>
    %939 = vector.broadcast %938 : vector<1x96xf32> to vector<4x96xf32>
    %940 = arith.addf %936, %939 : vector<4x96xf32>
    %941 = vector.extract_strided_slice %940 {offsets = [0, 0], sizes = [4, 32], strides = [1, 1]} : vector<4x96xf32> to vector<4x32xf32>
    %cst_471 = arith.constant 0.353553385 : f32
    %942 = vector.broadcast %cst_471 : f32 to vector<4x32xf32>
    %943 = arith.mulf %941, %942 : vector<4x32xf32>
    %944 = vector.shape_cast %943 : vector<4x32xf32> to vector<4x4x8xf32>
    %945 = tpu.transpose %944, [1, 0, 2] : vector<4x4x8xf32> -> vector<4x4x8xf32>
    %946 = vector.extract_strided_slice %940 {offsets = [0, 32], sizes = [4, 32], strides = [1, 1]} : vector<4x96xf32> to vector<4x32xf32>
    %947 = vector.shape_cast %946 : vector<4x32xf32> to vector<4x4x8xf32>
    %948 = tpu.transpose %947, [1, 0, 2] : vector<4x4x8xf32> -> vector<4x4x8xf32>
    %949 = vector.extract_strided_slice %940 {offsets = [0, 64], sizes = [4, 32], strides = [1, 1]} : vector<4x96xf32> to vector<4x32xf32>
    %950 = vector.shape_cast %949 : vector<4x32xf32> to vector<4x4x8xf32>
    %951 = tpu.transpose %950, [1, 0, 2] : vector<4x4x8xf32> -> vector<4x4x8xf32>
    "tpu.trace_start"() <{level = 10 : i32, message = "nqd,nkd->nqk"}> : () -> ()
    %cst_472 = arith.constant dense<0.000000e+00> : vector<4x4x4xf32>
    %952 = tpu.matmul %945, %948, %cst_472 {dimension_numbers = #tpu.dot_dimension_numbers<[2], [2], [1], [1], [0, 0, 0, 1, 1, 1], [0], [0]>} : vector<4x4x8xf32>, vector<4x4x8xf32>, vector<4x4x4xf32> -> vector<4x4x4xf32>
    "tpu.trace_stop"() : () -> ()
    %cst_473 = arith.constant dense<0xFF800000> : vector<4x4xf32>
    %953 = vector.multi_reduction <maximumf>, %952, %cst_473 [2] : vector<4x4x4xf32> to vector<4x4xf32>
    %954 = vector.shape_cast %953 : vector<4x4xf32> to vector<4x4x1xf32>
    %955 = vector.broadcast %954 : vector<4x4x1xf32> to vector<4x4x4xf32>
    %956 = arith.subf %952, %955 : vector<4x4x4xf32>
    %957 = math.exp %956 : vector<4x4x4xf32>
    %cst_474 = arith.constant dense<0.000000e+00> : vector<4x4xf32>
    %958 = vector.multi_reduction <add>, %957, %cst_474 [2] : vector<4x4x4xf32> to vector<4x4xf32>
    %959 = vector.shape_cast %958 : vector<4x4xf32> to vector<4x4x1xf32>
    %960 = tpu.reciprocal %959 {approx = true} : vector<4x4x1xf32> -> vector<4x4x1xf32>
    %961 = vector.broadcast %960 : vector<4x4x1xf32> to vector<4x4x4xf32>
    %962 = arith.mulf %957, %961 : vector<4x4x4xf32>
    "tpu.trace_start"() <{level = 10 : i32, message = "nqk,nkd->nqd"}> : () -> ()
    %cst_475 = arith.constant dense<0.000000e+00> : vector<4x4x8xf32>
    %963 = tpu.matmul %962, %951, %cst_475 {dimension_numbers = #tpu.dot_dimension_numbers<[2], [1], [1], [2], [0, 0, 0, 1, 1, 2], [0], [0]>} : vector<4x4x4xf32>, vector<4x4x8xf32>, vector<4x4x8xf32> -> vector<4x4x8xf32>
    "tpu.trace_stop"() : () -> ()
    %964 = tpu.transpose %963, [1, 0, 2] : vector<4x4x8xf32> -> vector<4x4x8xf32>
    %965 = vector.shape_cast %964 : vector<4x4x8xf32> to vector<4x32xf32>
    %c0_476 = arith.constant 0 : index
    %c0_477 = arith.constant 0 : index
    %c0_478 = arith.constant 0 : index
    %966 = vector.load %arg10[%c0_476, %c0_477, %c0_478] : memref<2x32x32xbf16, #tpu.memory_space<vmem>>, vector<1x32x32xbf16>
    %967 = vector.shape_cast %966 : vector<1x32x32xbf16> to vector<32x32xbf16>
    %968 = arith.truncf %965 : vector<4x32xf32> to vector<4x32xbf16>
    %cst_479 = arith.constant dense<0.000000e+00> : vector<4x32xf32>
    %969 = tpu.matmul %968, %967, %cst_479 {dimension_numbers = #tpu.dot_dimension_numbers<[1], [0], [0], [1], [0, 0, 1, 1], [], []>} : vector<4x32xbf16>, vector<32x32xbf16>, vector<4x32xf32> -> vector<4x32xf32>
    %c0_480 = arith.constant 0 : index
    %c0_481 = arith.constant 0 : index
    %c0_482 = arith.constant 0 : index
    %970 = vector.load %arg11[%c0_480, %c0_481, %c0_482] : memref<2x1x32xf32, #tpu.memory_space<vmem>>, vector<1x1x32xf32>
    %971 = vector.shape_cast %970 : vector<1x1x32xf32> to vector<1x32xf32>
    %972 = vector.broadcast %971 : vector<1x32xf32> to vector<4x32xf32>
    %973 = arith.addf %969, %972 : vector<4x32xf32>
    %974 = arith.addf %932, %973 : vector<4x32xf32>
    %c0_483 = arith.constant 0 : index
    %c0_484 = arith.constant 0 : index
    %c0_485 = arith.constant 0 : index
    %975 = vector.load %arg12[%c0_483, %c0_484, %c0_485] : memref<2x1x32xf32, #tpu.memory_space<vmem>>, vector<1x1x32xf32>
    %976 = vector.shape_cast %975 : vector<1x1x32xf32> to vector<1x32xf32>
    %c0_486 = arith.constant 0 : index
    %c0_487 = arith.constant 0 : index
    %c0_488 = arith.constant 0 : index
    %977 = vector.load %arg13[%c0_486, %c0_487, %c0_488] : memref<2x1x32xf32, #tpu.memory_space<vmem>>, vector<1x1x32xf32>
    %978 = vector.shape_cast %977 : vector<1x1x32xf32> to vector<1x32xf32>
    %cst_489 = arith.constant dense<0.000000e+00> : vector<4xf32>
    %979 = vector.multi_reduction <add>, %974, %cst_489 [1] : vector<4x32xf32> to vector<4xf32>
    %980 = vector.shape_cast %979 : vector<4xf32> to vector<4x1xf32>
    %cst_490 = arith.constant 3.200000e+01 : f32
    %981 = vector.broadcast %cst_490 : f32 to vector<4x1xf32>
    %982 = arith.divf %980, %981 : vector<4x1xf32>
    %983 = vector.broadcast %982 : vector<4x1xf32> to vector<4x32xf32>
    %984 = arith.subf %974, %983 : vector<4x32xf32>
    %985 = arith.mulf %984, %984 : vector<4x32xf32>
    %cst_491 = arith.constant dense<0.000000e+00> : vector<4xf32>
    %986 = vector.multi_reduction <add>, %985, %cst_491 [1] : vector<4x32xf32> to vector<4xf32>
    %987 = vector.shape_cast %986 : vector<4xf32> to vector<4x1xf32>
    %cst_492 = arith.constant 3.200000e+01 : f32
    %988 = vector.broadcast %cst_492 : f32 to vector<4x1xf32>
    %989 = arith.divf %987, %988 : vector<4x1xf32>
    %990 = vector.broadcast %982 : vector<4x1xf32> to vector<4x32xf32>
    %991 = arith.subf %974, %990 : vector<4x32xf32>
    %cst_493 = arith.constant 9.99999974E-6 : f32
    %992 = vector.broadcast %cst_493 : f32 to vector<4x1xf32>
    %993 = arith.addf %989, %992 : vector<4x1xf32>
    %994 = math.rsqrt %993 : vector<4x1xf32>
    %995 = vector.broadcast %994 : vector<4x1xf32> to vector<4x32xf32>
    %996 = arith.mulf %991, %995 : vector<4x32xf32>
    %997 = vector.broadcast %976 : vector<1x32xf32> to vector<4x32xf32>
    %998 = arith.mulf %996, %997 : vector<4x32xf32>
    %999 = vector.broadcast %978 : vector<1x32xf32> to vector<4x32xf32>
    %1000 = arith.addf %998, %999 : vector<4x32xf32>
    %c0_494 = arith.constant 0 : index
    %c0_495 = arith.constant 0 : index
    %c0_496 = arith.constant 0 : index
    %1001 = vector.load %arg14[%c0_494, %c0_495, %c0_496] : memref<2x32x64xbf16, #tpu.memory_space<vmem>>, vector<1x32x64xbf16>
    %1002 = vector.shape_cast %1001 : vector<1x32x64xbf16> to vector<32x64xbf16>
    %1003 = arith.truncf %1000 : vector<4x32xf32> to vector<4x32xbf16>
    %cst_497 = arith.constant dense<0.000000e+00> : vector<4x64xf32>
    %1004 = tpu.matmul %1003, %1002, %cst_497 {dimension_numbers = #tpu.dot_dimension_numbers<[1], [0], [0], [1], [0, 0, 1, 1], [], []>} : vector<4x32xbf16>, vector<32x64xbf16>, vector<4x64xf32> -> vector<4x64xf32>
    %c0_498 = arith.constant 0 : index
    %c0_499 = arith.constant 0 : index
    %c0_500 = arith.constant 0 : index
    %1005 = vector.load %arg15[%c0_498, %c0_499, %c0_500] : memref<2x1x64xf32, #tpu.memory_space<vmem>>, vector<1x1x64xf32>
    %1006 = vector.shape_cast %1005 : vector<1x1x64xf32> to vector<1x64xf32>
    %1007 = vector.broadcast %1006 : vector<1x64xf32> to vector<4x64xf32>
    %1008 = arith.addf %1004, %1007 : vector<4x64xf32>
    %cst_501 = arith.constant 0.000000e+00 : f32
    %1009 = vector.broadcast %cst_501 : f32 to vector<4x64xf32>
    %1010 = arith.maximumf %1008, %1009 : vector<4x64xf32>
    %c0_502 = arith.constant 0 : index
    %c0_503 = arith.constant 0 : index
    %c0_504 = arith.constant 0 : index
    %1011 = vector.load %arg16[%c0_502, %c0_503, %c0_504] : memref<2x64x32xbf16, #tpu.memory_space<vmem>>, vector<1x64x32xbf16>
    %1012 = vector.shape_cast %1011 : vector<1x64x32xbf16> to vector<64x32xbf16>
    %1013 = arith.truncf %1010 : vector<4x64xf32> to vector<4x64xbf16>
    %cst_505 = arith.constant dense<0.000000e+00> : vector<4x32xf32>
    %1014 = tpu.matmul %1013, %1012, %cst_505 {dimension_numbers = #tpu.dot_dimension_numbers<[1], [0], [0], [1], [0, 0, 1, 1], [], []>} : vector<4x64xbf16>, vector<64x32xbf16>, vector<4x32xf32> -> vector<4x32xf32>
    %c0_506 = arith.constant 0 : index
    %c0_507 = arith.constant 0 : index
    %c0_508 = arith.constant 0 : index
    %1015 = vector.load %arg17[%c0_506, %c0_507, %c0_508] : memref<2x1x32xf32, #tpu.memory_space<vmem>>, vector<1x1x32xf32>
    %1016 = vector.shape_cast %1015 : vector<1x1x32xf32> to vector<1x32xf32>
    %1017 = vector.broadcast %1016 : vector<1x32xf32> to vector<4x32xf32>
    %1018 = arith.addf %1014, %1017 : vector<4x32xf32>
    %1019 = arith.addf %1000, %1018 : vector<4x32xf32>
    %c0_509 = arith.constant 0 : index
    %c0_510 = arith.constant 0 : index
    %c0_511 = arith.constant 0 : index
    %1020 = vector.load %arg18[%c0_509, %c0_510, %c0_511] : memref<2x1x32xf32, #tpu.memory_space<vmem>>, vector<1x1x32xf32>
    %1021 = vector.shape_cast %1020 : vector<1x1x32xf32> to vector<1x32xf32>
    %c0_512 = arith.constant 0 : index
    %c0_513 = arith.constant 0 : index
    %c0_514 = arith.constant 0 : index
    %1022 = vector.load %arg19[%c0_512, %c0_513, %c0_514] : memref<2x1x32xf32, #tpu.memory_space<vmem>>, vector<1x1x32xf32>
    %1023 = vector.shape_cast %1022 : vector<1x1x32xf32> to vector<1x32xf32>
    %cst_515 = arith.constant dense<0.000000e+00> : vector<4xf32>
    %1024 = vector.multi_reduction <add>, %1019, %cst_515 [1] : vector<4x32xf32> to vector<4xf32>
    %1025 = vector.shape_cast %1024 : vector<4xf32> to vector<4x1xf32>
    %cst_516 = arith.constant 3.200000e+01 : f32
    %1026 = vector.broadcast %cst_516 : f32 to vector<4x1xf32>
    %1027 = arith.divf %1025, %1026 : vector<4x1xf32>
    %1028 = vector.broadcast %1027 : vector<4x1xf32> to vector<4x32xf32>
    %1029 = arith.subf %1019, %1028 : vector<4x32xf32>
    %1030 = arith.mulf %1029, %1029 : vector<4x32xf32>
    %cst_517 = arith.constant dense<0.000000e+00> : vector<4xf32>
    %1031 = vector.multi_reduction <add>, %1030, %cst_517 [1] : vector<4x32xf32> to vector<4xf32>
    %1032 = vector.shape_cast %1031 : vector<4xf32> to vector<4x1xf32>
    %cst_518 = arith.constant 3.200000e+01 : f32
    %1033 = vector.broadcast %cst_518 : f32 to vector<4x1xf32>
    %1034 = arith.divf %1032, %1033 : vector<4x1xf32>
    %1035 = vector.broadcast %1027 : vector<4x1xf32> to vector<4x32xf32>
    %1036 = arith.subf %1019, %1035 : vector<4x32xf32>
    %cst_519 = arith.constant 9.99999974E-6 : f32
    %1037 = vector.broadcast %cst_519 : f32 to vector<4x1xf32>
    %1038 = arith.addf %1034, %1037 : vector<4x1xf32>
    %1039 = math.rsqrt %1038 : vector<4x1xf32>
    %1040 = vector.broadcast %1039 : vector<4x1xf32> to vector<4x32xf32>
    %1041 = arith.mulf %1036, %1040 : vector<4x32xf32>
    %1042 = vector.broadcast %1021 : vector<1x32xf32> to vector<4x32xf32>
    %1043 = arith.mulf %1041, %1042 : vector<4x32xf32>
    %1044 = vector.broadcast %1023 : vector<1x32xf32> to vector<4x32xf32>
    %1045 = arith.addf %1043, %1044 : vector<4x32xf32>
    %c1_520 = arith.constant 1 : index
    %c0_521 = arith.constant 0 : index
    %c0_522 = arith.constant 0 : index
    %1046 = vector.load %arg8[%c1_520, %c0_521, %c0_522] : memref<2x32x96xbf16, #tpu.memory_space<vmem>>, vector<1x32x96xbf16>
    %1047 = vector.shape_cast %1046 : vector<1x32x96xbf16> to vector<32x96xbf16>
    %1048 = arith.truncf %1045 : vector<4x32xf32> to vector<4x32xbf16>
    %cst_523 = arith.constant dense<0.000000e+00> : vector<4x96xf32>
    %1049 = tpu.matmul %1048, %1047, %cst_523 {dimension_numbers = #tpu.dot_dimension_numbers<[1], [0], [0], [1], [0, 0, 1, 1], [], []>} : vector<4x32xbf16>, vector<32x96xbf16>, vector<4x96xf32> -> vector<4x96xf32>
    %c1_524 = arith.constant 1 : index
    %c0_525 = arith.constant 0 : index
    %c0_526 = arith.constant 0 : index
    %1050 = vector.load %arg9[%c1_524, %c0_525, %c0_526] : memref<2x1x96xf32, #tpu.memory_space<vmem>>, vector<1x1x96xf32>
    %1051 = vector.shape_cast %1050 : vector<1x1x96xf32> to vector<1x96xf32>
    %1052 = vector.broadcast %1051 : vector<1x96xf32> to vector<4x96xf32>
    %1053 = arith.addf %1049, %1052 : vector<4x96xf32>
    %1054 = vector.extract_strided_slice %1053 {offsets = [0, 0], sizes = [4, 32], strides = [1, 1]} : vector<4x96xf32> to vector<4x32xf32>
    %cst_527 = arith.constant 0.353553385 : f32
    %1055 = vector.broadcast %cst_527 : f32 to vector<4x32xf32>
    %1056 = arith.mulf %1054, %1055 : vector<4x32xf32>
    %1057 = vector.shape_cast %1056 : vector<4x32xf32> to vector<4x4x8xf32>
    %1058 = tpu.transpose %1057, [1, 0, 2] : vector<4x4x8xf32> -> vector<4x4x8xf32>
    %1059 = vector.extract_strided_slice %1053 {offsets = [0, 32], sizes = [4, 32], strides = [1, 1]} : vector<4x96xf32> to vector<4x32xf32>
    %1060 = vector.shape_cast %1059 : vector<4x32xf32> to vector<4x4x8xf32>
    %1061 = tpu.transpose %1060, [1, 0, 2] : vector<4x4x8xf32> -> vector<4x4x8xf32>
    %1062 = vector.extract_strided_slice %1053 {offsets = [0, 64], sizes = [4, 32], strides = [1, 1]} : vector<4x96xf32> to vector<4x32xf32>
    %1063 = vector.shape_cast %1062 : vector<4x32xf32> to vector<4x4x8xf32>
    %1064 = tpu.transpose %1063, [1, 0, 2] : vector<4x4x8xf32> -> vector<4x4x8xf32>
    "tpu.trace_start"() <{level = 10 : i32, message = "nqd,nkd->nqk"}> : () -> ()
    %cst_528 = arith.constant dense<0.000000e+00> : vector<4x4x4xf32>
    %1065 = tpu.matmul %1058, %1061, %cst_528 {dimension_numbers = #tpu.dot_dimension_numbers<[2], [2], [1], [1], [0, 0, 0, 1, 1, 1], [0], [0]>} : vector<4x4x8xf32>, vector<4x4x8xf32>, vector<4x4x4xf32> -> vector<4x4x4xf32>
    "tpu.trace_stop"() : () -> ()
    %cst_529 = arith.constant dense<0xFF800000> : vector<4x4xf32>
    %1066 = vector.multi_reduction <maximumf>, %1065, %cst_529 [2] : vector<4x4x4xf32> to vector<4x4xf32>
    %1067 = vector.shape_cast %1066 : vector<4x4xf32> to vector<4x4x1xf32>
    %1068 = vector.broadcast %1067 : vector<4x4x1xf32> to vector<4x4x4xf32>
    %1069 = arith.subf %1065, %1068 : vector<4x4x4xf32>
    %1070 = math.exp %1069 : vector<4x4x4xf32>
    %cst_530 = arith.constant dense<0.000000e+00> : vector<4x4xf32>
    %1071 = vector.multi_reduction <add>, %1070, %cst_530 [2] : vector<4x4x4xf32> to vector<4x4xf32>
    %1072 = vector.shape_cast %1071 : vector<4x4xf32> to vector<4x4x1xf32>
    %1073 = tpu.reciprocal %1072 {approx = true} : vector<4x4x1xf32> -> vector<4x4x1xf32>
    %1074 = vector.broadcast %1073 : vector<4x4x1xf32> to vector<4x4x4xf32>
    %1075 = arith.mulf %1070, %1074 : vector<4x4x4xf32>
    "tpu.trace_start"() <{level = 10 : i32, message = "nqk,nkd->nqd"}> : () -> ()
    %cst_531 = arith.constant dense<0.000000e+00> : vector<4x4x8xf32>
    %1076 = tpu.matmul %1075, %1064, %cst_531 {dimension_numbers = #tpu.dot_dimension_numbers<[2], [1], [1], [2], [0, 0, 0, 1, 1, 2], [0], [0]>} : vector<4x4x4xf32>, vector<4x4x8xf32>, vector<4x4x8xf32> -> vector<4x4x8xf32>
    "tpu.trace_stop"() : () -> ()
    %1077 = tpu.transpose %1076, [1, 0, 2] : vector<4x4x8xf32> -> vector<4x4x8xf32>
    %1078 = vector.shape_cast %1077 : vector<4x4x8xf32> to vector<4x32xf32>
    %c1_532 = arith.constant 1 : index
    %c0_533 = arith.constant 0 : index
    %c0_534 = arith.constant 0 : index
    %1079 = vector.load %arg10[%c1_532, %c0_533, %c0_534] : memref<2x32x32xbf16, #tpu.memory_space<vmem>>, vector<1x32x32xbf16>
    %1080 = vector.shape_cast %1079 : vector<1x32x32xbf16> to vector<32x32xbf16>
    %1081 = arith.truncf %1078 : vector<4x32xf32> to vector<4x32xbf16>
    %cst_535 = arith.constant dense<0.000000e+00> : vector<4x32xf32>
    %1082 = tpu.matmul %1081, %1080, %cst_535 {dimension_numbers = #tpu.dot_dimension_numbers<[1], [0], [0], [1], [0, 0, 1, 1], [], []>} : vector<4x32xbf16>, vector<32x32xbf16>, vector<4x32xf32> -> vector<4x32xf32>
    %c1_536 = arith.constant 1 : index
    %c0_537 = arith.constant 0 : index
    %c0_538 = arith.constant 0 : index
    %1083 = vector.load %arg11[%c1_536, %c0_537, %c0_538] : memref<2x1x32xf32, #tpu.memory_space<vmem>>, vector<1x1x32xf32>
    %1084 = vector.shape_cast %1083 : vector<1x1x32xf32> to vector<1x32xf32>
    %1085 = vector.broadcast %1084 : vector<1x32xf32> to vector<4x32xf32>
    %1086 = arith.addf %1082, %1085 : vector<4x32xf32>
    %1087 = arith.addf %1045, %1086 : vector<4x32xf32>
    %c1_539 = arith.constant 1 : index
    %c0_540 = arith.constant 0 : index
    %c0_541 = arith.constant 0 : index
    %1088 = vector.load %arg12[%c1_539, %c0_540, %c0_541] : memref<2x1x32xf32, #tpu.memory_space<vmem>>, vector<1x1x32xf32>
    %1089 = vector.shape_cast %1088 : vector<1x1x32xf32> to vector<1x32xf32>
    %c1_542 = arith.constant 1 : index
    %c0_543 = arith.constant 0 : index
    %c0_544 = arith.constant 0 : index
    %1090 = vector.load %arg13[%c1_542, %c0_543, %c0_544] : memref<2x1x32xf32, #tpu.memory_space<vmem>>, vector<1x1x32xf32>
    %1091 = vector.shape_cast %1090 : vector<1x1x32xf32> to vector<1x32xf32>
    %cst_545 = arith.constant dense<0.000000e+00> : vector<4xf32>
    %1092 = vector.multi_reduction <add>, %1087, %cst_545 [1] : vector<4x32xf32> to vector<4xf32>
    %1093 = vector.shape_cast %1092 : vector<4xf32> to vector<4x1xf32>
    %cst_546 = arith.constant 3.200000e+01 : f32
    %1094 = vector.broadcast %cst_546 : f32 to vector<4x1xf32>
    %1095 = arith.divf %1093, %1094 : vector<4x1xf32>
    %1096 = vector.broadcast %1095 : vector<4x1xf32> to vector<4x32xf32>
    %1097 = arith.subf %1087, %1096 : vector<4x32xf32>
    %1098 = arith.mulf %1097, %1097 : vector<4x32xf32>
    %cst_547 = arith.constant dense<0.000000e+00> : vector<4xf32>
    %1099 = vector.multi_reduction <add>, %1098, %cst_547 [1] : vector<4x32xf32> to vector<4xf32>
    %1100 = vector.shape_cast %1099 : vector<4xf32> to vector<4x1xf32>
    %cst_548 = arith.constant 3.200000e+01 : f32
    %1101 = vector.broadcast %cst_548 : f32 to vector<4x1xf32>
    %1102 = arith.divf %1100, %1101 : vector<4x1xf32>
    %1103 = vector.broadcast %1095 : vector<4x1xf32> to vector<4x32xf32>
    %1104 = arith.subf %1087, %1103 : vector<4x32xf32>
    %cst_549 = arith.constant 9.99999974E-6 : f32
    %1105 = vector.broadcast %cst_549 : f32 to vector<4x1xf32>
    %1106 = arith.addf %1102, %1105 : vector<4x1xf32>
    %1107 = math.rsqrt %1106 : vector<4x1xf32>
    %1108 = vector.broadcast %1107 : vector<4x1xf32> to vector<4x32xf32>
    %1109 = arith.mulf %1104, %1108 : vector<4x32xf32>
    %1110 = vector.broadcast %1089 : vector<1x32xf32> to vector<4x32xf32>
    %1111 = arith.mulf %1109, %1110 : vector<4x32xf32>
    %1112 = vector.broadcast %1091 : vector<1x32xf32> to vector<4x32xf32>
    %1113 = arith.addf %1111, %1112 : vector<4x32xf32>
    %c1_550 = arith.constant 1 : index
    %c0_551 = arith.constant 0 : index
    %c0_552 = arith.constant 0 : index
    %1114 = vector.load %arg14[%c1_550, %c0_551, %c0_552] : memref<2x32x64xbf16, #tpu.memory_space<vmem>>, vector<1x32x64xbf16>
    %1115 = vector.shape_cast %1114 : vector<1x32x64xbf16> to vector<32x64xbf16>
    %1116 = arith.truncf %1113 : vector<4x32xf32> to vector<4x32xbf16>
    %cst_553 = arith.constant dense<0.000000e+00> : vector<4x64xf32>
    %1117 = tpu.matmul %1116, %1115, %cst_553 {dimension_numbers = #tpu.dot_dimension_numbers<[1], [0], [0], [1], [0, 0, 1, 1], [], []>} : vector<4x32xbf16>, vector<32x64xbf16>, vector<4x64xf32> -> vector<4x64xf32>
    %c1_554 = arith.constant 1 : index
    %c0_555 = arith.constant 0 : index
    %c0_556 = arith.constant 0 : index
    %1118 = vector.load %arg15[%c1_554, %c0_555, %c0_556] : memref<2x1x64xf32, #tpu.memory_space<vmem>>, vector<1x1x64xf32>
    %1119 = vector.shape_cast %1118 : vector<1x1x64xf32> to vector<1x64xf32>
    %1120 = vector.broadcast %1119 : vector<1x64xf32> to vector<4x64xf32>
    %1121 = arith.addf %1117, %1120 : vector<4x64xf32>
    %cst_557 = arith.constant 0.000000e+00 : f32
    %1122 = vector.broadcast %cst_557 : f32 to vector<4x64xf32>
    %1123 = arith.maximumf %1121, %1122 : vector<4x64xf32>
    %c1_558 = arith.constant 1 : index
    %c0_559 = arith.constant 0 : index
    %c0_560 = arith.constant 0 : index
    %1124 = vector.load %arg16[%c1_558, %c0_559, %c0_560] : memref<2x64x32xbf16, #tpu.memory_space<vmem>>, vector<1x64x32xbf16>
    %1125 = vector.shape_cast %1124 : vector<1x64x32xbf16> to vector<64x32xbf16>
    %1126 = arith.truncf %1123 : vector<4x64xf32> to vector<4x64xbf16>
    %cst_561 = arith.constant dense<0.000000e+00> : vector<4x32xf32>
    %1127 = tpu.matmul %1126, %1125, %cst_561 {dimension_numbers = #tpu.dot_dimension_numbers<[1], [0], [0], [1], [0, 0, 1, 1], [], []>} : vector<4x64xbf16>, vector<64x32xbf16>, vector<4x32xf32> -> vector<4x32xf32>
    %c1_562 = arith.constant 1 : index
    %c0_563 = arith.constant 0 : index
    %c0_564 = arith.constant 0 : index
    %1128 = vector.load %arg17[%c1_562, %c0_563, %c0_564] : memref<2x1x32xf32, #tpu.memory_space<vmem>>, vector<1x1x32xf32>
    %1129 = vector.shape_cast %1128 : vector<1x1x32xf32> to vector<1x32xf32>
    %1130 = vector.broadcast %1129 : vector<1x32xf32> to vector<4x32xf32>
    %1131 = arith.addf %1127, %1130 : vector<4x32xf32>
    %1132 = arith.addf %1113, %1131 : vector<4x32xf32>
    %c1_565 = arith.constant 1 : index
    %c0_566 = arith.constant 0 : index
    %c0_567 = arith.constant 0 : index
    %1133 = vector.load %arg18[%c1_565, %c0_566, %c0_567] : memref<2x1x32xf32, #tpu.memory_space<vmem>>, vector<1x1x32xf32>
    %1134 = vector.shape_cast %1133 : vector<1x1x32xf32> to vector<1x32xf32>
    %c1_568 = arith.constant 1 : index
    %c0_569 = arith.constant 0 : index
    %c0_570 = arith.constant 0 : index
    %1135 = vector.load %arg19[%c1_568, %c0_569, %c0_570] : memref<2x1x32xf32, #tpu.memory_space<vmem>>, vector<1x1x32xf32>
    %1136 = vector.shape_cast %1135 : vector<1x1x32xf32> to vector<1x32xf32>
    %cst_571 = arith.constant dense<0.000000e+00> : vector<4xf32>
    %1137 = vector.multi_reduction <add>, %1132, %cst_571 [1] : vector<4x32xf32> to vector<4xf32>
    %1138 = vector.shape_cast %1137 : vector<4xf32> to vector<4x1xf32>
    %cst_572 = arith.constant 3.200000e+01 : f32
    %1139 = vector.broadcast %cst_572 : f32 to vector<4x1xf32>
    %1140 = arith.divf %1138, %1139 : vector<4x1xf32>
    %1141 = vector.broadcast %1140 : vector<4x1xf32> to vector<4x32xf32>
    %1142 = arith.subf %1132, %1141 : vector<4x32xf32>
    %1143 = arith.mulf %1142, %1142 : vector<4x32xf32>
    %cst_573 = arith.constant dense<0.000000e+00> : vector<4xf32>
    %1144 = vector.multi_reduction <add>, %1143, %cst_573 [1] : vector<4x32xf32> to vector<4xf32>
    %1145 = vector.shape_cast %1144 : vector<4xf32> to vector<4x1xf32>
    %cst_574 = arith.constant 3.200000e+01 : f32
    %1146 = vector.broadcast %cst_574 : f32 to vector<4x1xf32>
    %1147 = arith.divf %1145, %1146 : vector<4x1xf32>
    %1148 = vector.broadcast %1140 : vector<4x1xf32> to vector<4x32xf32>
    %1149 = arith.subf %1132, %1148 : vector<4x32xf32>
    %cst_575 = arith.constant 9.99999974E-6 : f32
    %1150 = vector.broadcast %cst_575 : f32 to vector<4x1xf32>
    %1151 = arith.addf %1147, %1150 : vector<4x1xf32>
    %1152 = math.rsqrt %1151 : vector<4x1xf32>
    %1153 = vector.broadcast %1152 : vector<4x1xf32> to vector<4x32xf32>
    %1154 = arith.mulf %1149, %1153 : vector<4x32xf32>
    %1155 = vector.broadcast %1134 : vector<1x32xf32> to vector<4x32xf32>
    %1156 = arith.mulf %1154, %1155 : vector<4x32xf32>
    %1157 = vector.broadcast %1136 : vector<1x32xf32> to vector<4x32xf32>
    %1158 = arith.addf %1156, %1157 : vector<4x32xf32>
    %c0_576 = arith.constant 0 : index
    %c0_577 = arith.constant 0 : index
    %c0_578 = arith.constant 0 : index
    %1159 = vector.load %arg20[%c0_576, %c0_577, %c0_578] : memref<1x4x32xf32, #tpu.memory_space<vmem>>, vector<1x4x32xf32>
    %1160 = vector.shape_cast %1159 : vector<1x4x32xf32> to vector<4x32xf32>
    %1161 = arith.mulf %1158, %1160 : vector<4x32xf32>
    %1162 = vector.shape_cast %1161 : vector<4x32xf32> to vector<1x4x32xf32>
    %cst_579 = arith.constant dense<0.000000e+00> : vector<1xf32>
    %1163 = vector.multi_reduction <add>, %1162, %cst_579 [1, 2] : vector<1x4x32xf32> to vector<1xf32>
    %1164 = vector.shape_cast %1163 : vector<1xf32> to vector<1x1x1xf32>
    %1165 = vector.extract %1164[0, 0, 0] : f32 from vector<1x1x1xf32>
    %1166 = vector.broadcast %1165 : f32 to vector<1x1xf32>
    %c0_580 = arith.constant 0 : index
    %c0_581 = arith.constant 0 : index
    %1167 = vector.load %arg21[%c0_580, %c0_581] : memref<1x1xf32, #tpu.memory_space<vmem>>, vector<1x1xf32>
    %1168 = arith.addf %1166, %1167 : vector<1x1xf32>
    %c0_582 = arith.constant 0 : index
    %c0_583 = arith.constant 0 : index
    %c0_584 = arith.constant 0 : index
    %1169 = vector.load %arg22[%c0_582, %c0_583, %c0_584] : memref<1x1x1xf32, #tpu.memory_space<vmem>>, vector<1x1x1xf32>
    %1170 = vector.shape_cast %1169 : vector<1x1x1xf32> to vector<1x1xf32>
    %1171 = vector.shape_cast %1168 : vector<1x1xf32> to vector<1x1x1xf32>
    tpu.vector_store %arg22[%c0_582, %c0_583, %c0_584], %1171 {strides = array<i32>} : memref<1x1x1xf32, #tpu.memory_space<vmem>>, vector<1x1x1xf32>,
    return
  }
  func.func @transform_0(%arg0: i32) -> (i32, i32, i32, i32, i32) {
    %c0_i32 = arith.constant 0 : i32
    %c0_i32_0 = arith.constant 0 : i32
    %c0_i32_1 = arith.constant 0 : i32
    %c0_i32_2 = arith.constant 0 : i32
    %c0_i32_3 = arith.constant 0 : i32
    return %arg0, %c0_i32, %c0_i32_0, %c0_i32_1, %c0_i32_2 : i32, i32, i32, i32, i32
  }
  func.func @transform_1(%arg0: i32) -> (i32, i32) {
    %c0_i32 = arith.constant 0 : i32
    %c0_i32_0 = arith.constant 0 : i32
    %c0_i32_1 = arith.constant 0 : i32
    return %c0_i32, %c0_i32_0 : i32, i32
  }
  func.func @transform_2(%arg0: i32) -> i32 {
    %c0_i32 = arith.constant 0 : i32
    %c0_i32_0 = arith.constant 0 : i32
    return %c0_i32 : i32
  }
  func.func @transform_3(%arg0: i32) -> (i32, i32) {
    %c0_i32 = arith.constant 0 : i32
    %c0_i32_0 = arith.constant 0 : i32
    %c0_i32_1 = arith.constant 0 : i32
    return %c0_i32, %c0_i32_0 : i32, i32
  }
  func.func @transform_4(%arg0: i32) -> i32 {
    %c0_i32 = arith.constant 0 : i32
    %c0_i32_0 = arith.constant 0 : i32
    return %c0_i32 : i32
  }
  func.func @transform_5(%arg0: i32) -> (i32, i32) {
    %c0_i32 = arith.constant 0 : i32
    %c0_i32_0 = arith.constant 0 : i32
    %c0_i32_1 = arith.constant 0 : i32
    return %c0_i32, %c0_i32_0 : i32, i32
  }
  func.func @transform_6(%arg0: i32) -> (i32, i32) {
    %c0_i32 = arith.constant 0 : i32
    %c0_i32_0 = arith.constant 0 : i32
    %c0_i32_1 = arith.constant 0 : i32
    return %c0_i32, %c0_i32_0 : i32, i32
  }
  func.func @transform_7(%arg0: i32) -> (i32, i32, i32) {
    %c0_i32 = arith.constant 0 : i32
    %c0_i32_0 = arith.constant 0 : i32
    %c0_i32_1 = arith.constant 0 : i32
    %c0_i32_2 = arith.constant 0 : i32
    return %c0_i32, %c0_i32_0, %c0_i32_1 : i32, i32, i32
  }
  func.func @transform_8(%arg0: i32) -> (i32, i32, i32) {
    %c0_i32 = arith.constant 0 : i32
    %c0_i32_0 = arith.constant 0 : i32
    %c0_i32_1 = arith.constant 0 : i32
    %c0_i32_2 = arith.constant 0 : i32
    return %c0_i32, %c0_i32_0, %c0_i32_1 : i32, i32, i32
  }
  func.func @transform_9(%arg0: i32) -> (i32, i32, i32) {
    %c0_i32 = arith.constant 0 : i32
    %c0_i32_0 = arith.constant 0 : i32
    %c0_i32_1 = arith.constant 0 : i32
    %c0_i32_2 = arith.constant 0 : i32
    return %c0_i32, %c0_i32_0, %c0_i32_1 : i32, i32, i32
  }
  func.func @transform_10(%arg0: i32) -> (i32, i32, i32) {
    %c0_i32 = arith.constant 0 : i32
    %c0_i32_0 = arith.constant 0 : i32
    %c0_i32_1 = arith.constant 0 : i32
    %c0_i32_2 = arith.constant 0 : i32
    return %c0_i32, %c0_i32_0, %c0_i32_1 : i32, i32, i32
  }
  func.func @transform_11(%arg0: i32) -> (i32, i32, i32) {
    %c0_i32 = arith.constant 0 : i32
    %c0_i32_0 = arith.constant 0 : i32
    %c0_i32_1 = arith.constant 0 : i32
    %c0_i32_2 = arith.constant 0 : i32
    return %c0_i32, %c0_i32_0, %c0_i32_1 : i32, i32, i32
  }
  func.func @transform_12(%arg0: i32) -> (i32, i32, i32) {
    %c0_i32 = arith.constant 0 : i32
    %c0_i32_0 = arith.constant 0 : i32
    %c0_i32_1 = arith.constant 0 : i32
    %c0_i32_2 = arith.constant 0 : i32
    return %c0_i32, %c0_i32_0, %c0_i32_1 : i32, i32, i32
  }
  func.func @transform_13(%arg0: i32) -> (i32, i32, i32) {
    %c0_i32 = arith.constant 0 : i32
    %c0_i32_0 = arith.constant 0 : i32
    %c0_i32_1 = arith.constant 0 : i32
    %c0_i32_2 = arith.constant 0 : i32
    return %c0_i32, %c0_i32_0, %c0_i32_1 : i32, i32, i32
  }
  func.func @transform_14(%arg0: i32) -> (i32, i32, i32) {
    %c0_i32 = arith.constant 0 : i32
    %c0_i32_0 = arith.constant 0 : i32
    %c0_i32_1 = arith.constant 0 : i32
    %c0_i32_2 = arith.constant 0 : i32
    return %c0_i32, %c0_i32_0, %c0_i32_1 : i32, i32, i32
  }
  func.func @transform_15(%arg0: i32) -> (i32, i32, i32) {
    %c0_i32 = arith.constant 0 : i32
    %c0_i32_0 = arith.constant 0 : i32
    %c0_i32_1 = arith.constant 0 : i32
    %c0_i32_2 = arith.constant 0 : i32
    return %c0_i32, %c0_i32_0, %c0_i32_1 : i32, i32, i32
  }
  func.func @transform_16(%arg0: i32) -> (i32, i32, i32) {
    %c0_i32 = arith.constant 0 : i32
    %c0_i32_0 = arith.constant 0 : i32
    %c0_i32_1 = arith.constant 0 : i32
    %c0_i32_2 = arith.constant 0 : i32
    return %c0_i32, %c0_i32_0, %c0_i32_1 : i32, i32, i32
  }
  func.func @transform_17(%arg0: i32) -> (i32, i32, i32) {
    %c0_i32 = arith.constant 0 : i32
    %c0_i32_0 = arith.constant 0 : i32
    %c0_i32_1 = arith.constant 0 : i32
    %c0_i32_2 = arith.constant 0 : i32
    return %c0_i32, %c0_i32_0, %c0_i32_1 : i32, i32, i32
  }
  func.func @transform_18(%arg0: i32) -> (i32, i32, i32) {
    %c0_i32 = arith.constant 0 : i32
    %c0_i32_0 = arith.constant 0 : i32
    %c0_i32_1 = arith.constant 0 : i32
    %c0_i32_2 = arith.constant 0 : i32
    return %c0_i32, %c0_i32_0, %c0_i32_1 : i32, i32, i32
  }
  func.func @transform_19(%arg0: i32) -> (i32, i32, i32) {
    %c0_i32 = arith.constant 0 : i32
    %c0_i32_0 = arith.constant 0 : i32
    %c0_i32_1 = arith.constant 0 : i32
    %c0_i32_2 = arith.constant 0 : i32
    return %c0_i32, %c0_i32_0, %c0_i32_1 : i32, i32, i32
  }
  func.func @transform_20(%arg0: i32) -> (i32, i32) {
    %c0_i32 = arith.constant 0 : i32
    %c0_i32_0 = arith.constant 0 : i32
    %c0_i32_1 = arith.constant 0 : i32
    return %c0_i32, %c0_i32_0 : i32, i32
  }
  func.func @transform_21(%arg0: i32) -> (i32, i32, i32) {
    %c0_i32 = arith.constant 0 : i32
    %c0_i32_0 = arith.constant 0 : i32
    %c0_i32_1 = arith.constant 0 : i32
    return %arg0, %c0_i32, %c0_i32_0 : i32, i32, i32
  }
}

</mosaic_0001>

<bundles_post_ra>
// kernel: _lambda_.1
= control target key start
LH: loop header
LB: loop body
LE: loop exit
PB: predicated region body
PF: predicated region fallthrough
CT: control target
= control target key end

     0   :  { %s12374_s0 = inlined_call_operand.vmem [shape: f32[2,16,4,5,5], index: 0, kind: input, shape index: {}]   ;;  %s12375_s1 = inlined_call_operand.vmem [shape: f32[4,9], index: 1, kind: input, shape index: {}]   ;;  %s12376_s2 = inlined_call_operand.vmem [shape: f32[4], index: 2, kind: input, shape index: {}]   ;;  %s12377_s3 = inlined_call_operand.vmem [shape: f32[4,9], index: 3, kind: input, shape index: {}]   ;;  %s12378_s4 = inlined_call_operand.<no memory space> [shape: f32[1], index: 4, kind: input, shape index: {}]   ;;  %s12379_s5 = inlined_call_operand.vmem [shape: bf16[16,32], index: 5, kind: input, shape index: {}]   ;;  %s12380_s6 = inlined_call_operand.vmem [shape: f32[1,32], index: 6, kind: input, shape index: {}]   ;;  %s12381_s7 = inlined_call_operand.vmem [shape: bf16[2,32,96], index: 7, kind: input, shape index: {}]   ;;  %s12382_s8 = inlined_call_operand.vmem [shape: f32[2,1,96], index: 8, kind: input, shape index: {}]   ;;  %s12383_s9 = inlined_call_operand.vmem [shape: bf16[2,32,32], index: 9, kind: input, shape index: {}]   ;;  %s12384_s10 = inlined_call_operand.vmem [shape: f32[2,1,32], index: 10, kind: input, shape index: {}]   ;;  %s12385_s11 = inlined_call_operand.vmem [shape: f32[2,1,32], index: 11, kind: input, shape index: {}]   ;;  %s12386_s12 = inlined_call_operand.vmem [shape: f32[2,1,32], index: 12, kind: input, shape index: {}]   ;;  %s12387_s13 = inlined_call_operand.vmem [shape: bf16[2,32,64], index: 13, kind: input, shape index: {}]   ;;  %s12388_s14 = inlined_call_operand.vmem [shape: f32[2,1,64], index: 14, kind: input, shape index: {}]   ;;  %s12389_s15 = inlined_call_operand.vmem [shape: bf16[2,64,32], index: 15, kind: input, shape index: {}]   ;;  %s12390_s16 = inlined_call_operand.vmem [shape: f32[2,1,32], index: 16, kind: input, shape index: {}]   ;;  %s12391_s17 = inlined_call_operand.vmem [shape: f32[2,1,32], index: 17, kind: input, shape index: {}]   ;;  %s12392_s18 = inlined_call_operand.vmem [shape: f32[2,1,32], index: 18, kind: input, shape index: {}]   ;;  %s12393_s19 = inlined_call_operand.vmem [shape: f32[1,4,32], index: 19, kind: input, shape index: {}]   ;;  %s12394_s20 = inlined_call_operand.<no memory space> [shape: f32[1,1], index: 20, kind: input, shape index: {}]   ;;  %s12395_s21 = inlined_call_operand.vmem [shape: f32[2,1,1], index: 21, kind: output, shape index: {}]  }
   0x1   :  { %12682 = sst [smem:[#allocation182_spill]] %s12374_s0  ;;  %v27_v0 = vstv %s12394_s20 }
   0x2   :  { %12683 = sst [smem:[#allocation183_spill]] %s12375_s1  ;;  %28 = vst [vmem:[#allocation3] sm:$0x1] %v27_v0 }
   0x3   :  { %12684 = sst [smem:[#allocation184_spill]] %s12376_s2 }
   0x4   :  { %12685 = sst [smem:[#allocation185_spill]] %s12377_s3 }
   0x5   :  { %12686 = sst [smem:[#allocation186_spill]] %s12378_s4 }
   0x6   :  { %12687 = sst [smem:[#allocation187_spill]] %s12379_s5  ;;  %s12688_s26 = sld [smem:[#allocation186_spill]] }
   0xc   :  { %26 = sst [smem:[#allocation2]] %s12688_s26 }
   0xd   :  { %29 = vsyncpa [#allocation5], 0 }
   0xe   :  { %30 = vsyncpa [#allocation7], 0  ;;  %s7951_s28 = smov 0  }
   0xf LB: > { %s7957_s29 = sadd.s32 4294967295, %s7814_s28   ;;  %p7079_p0 = scmp.ge.s32.totalorder %s7814_s28, 1  ;;  %s7814_s28 = sphi %s7951_s28, %s36_s28  }
  0x10   : > { %p513_p1 = scmp.lt.s32.totalorder %s7814_s28, 3  ;;  %s12689_s4 = sld [smem:[#allocation184_spill]] }
  0x11   : > { %p12396_p3 = scmp.eq.s32.totalorder %s7957_s29, 0  ;;  %s12691_s1 = sld [smem:[#allocation183_spill]] }
  0x12   : > { %p7964_p2 = pnand %p7079_p0, %p513_p1  ;;  %s12692_s26 = sld [smem:[#allocation185_spill]] }
  0x14   : > { %s12690_s5 = scalar_select %p7964_p2, 1, 0 }
  0x15   : > { %p7575_p4 = pneg %p7964_p2 }
  0x16   : > { %s537_s30 = sshll.u32 %s12689_s4, 4  ;;  %s538_s30 = int_to_ptr.vmem [resolvable:$true] %s537_s30 }
  0x17   : > { %s526_s24 = sshll.u32 %s12691_s1, 4  ;;  %p7979_p5 = pnand %p12396_p3, %p7575_p4  ;;  %s527_s24 = int_to_ptr.vmem [resolvable:$true] %s526_s24 }
  0x18   : > { %s548_s27 = sshll.u32 %s12692_s26, 4  ;;  %s7755_s20 = scalar_lea.vmem %s538_s30, 16  ;;  %s7983_s27 = int_to_ptr.vmem [resolvable:$true] %s548_s27 }
  0x19   : > { %p7756_p6 = scmp.ne.s32.totalorder %s538_s30, %s7755_s20  ;;  %p7757_p7 = pneg %p7979_p5 }
  0x1a   : > { %p7763_p10 = scmp.lt.s32.totalorder %s538_s30, %s538_s30  ;;  %p7764_p11 = scmp.lt.s32.totalorder %s7755_s20, %s7755_s20 }
  0x1b   : > { %p7758_p8 = pnand %p7757_p7, %p7756_p6 }
  0x1c   : > { %p7765_p12 = por %p7764_p11, %p7763_p10 }
  0x1d   : > { %p7759_p9 = pneg %p7758_p8 }
  0x1f   : > { %p7766_p13 = pnand %p7765_p12, %p7759_p9 }
  0x21   : > { %7769 = shalt.err (!%p7766_p13)
}
  0x22   : > { %s7816_s0 = smov [#allocation6]   ;;  %s7770_s4 = scalar_lea.vmem %s527_s24, 64 }
  0x23   : > { %7581 = dma.vmem_to_smem (!%p7979_p5), %s538_s30, 16, %s7816_s0, [#allocation7]  }
  0x24   : > { %p7771_p0 = scmp.ne.s32.totalorder %s527_s24, %s7770_s4  ;;  %p7778_p3 = scmp.lt.s32.totalorder %s527_s24, %s527_s24 }
  0x25   : > { %p7779_p2 = scmp.lt.s32.totalorder %s7770_s4, %s7770_s4 }
  0x26   : > { %p7773_p1 = pnand %p7771_p0, %p7757_p7 }
  0x27   : > { %p7780_p6 = por %p7779_p2, %p7778_p3 }
  0x28   : > { %p7774_p4 = pneg %p7773_p1 }
  0x2a   : > { %p7781_p8 = pnand %p7780_p6, %p7774_p4 }
  0x2c   : > { %7784 = shalt.err (!%p7781_p8)
}
  0x2d   : > { %s7817_s22 = smov [#allocation4]   ;;  %s7785_s30 = scalar_lea.vmem %s7983_s27, 64 }
  0x2e   : > { %7578 = dma.vmem_to_smem (!%p7979_p5), %s527_s24, 64, %s7817_s22, [#allocation5]  }
  0x2f   : > { %p7786_p9 = scmp.ne.s32.totalorder %s7983_s27, %s7785_s30  ;;  %p7793_p12 = scmp.lt.s32.totalorder %s7983_s27, %s7983_s27 }
  0x30   : > { %p7794_p13 = scmp.lt.s32.totalorder %s7785_s30, %s7785_s30 }
  0x31   : > { %p7788_p10 = pnand %p7786_p9, %p7757_p7 }
  0x32   : > { %p7795_p2 = por %p7794_p13, %p7793_p12 }
  0x33   : > { %p7789_p11 = pneg %p7788_p10 }
  0x35   : > { %p7796_p3 = pnand %p7795_p2, %p7789_p11 }
  0x37   : > { %7799 = shalt.err (!%p7796_p3)
}
  0x38   : > { %s7818_s23 = smov [#allocation8]   ;;  %p12694_p0 = scmp.ne.s32.totalorder %s12690_s5, 0 }
  0x39   : > { %7584 = dma.vmem_to_smem (!%p7979_p5), %s7983_s27, 64, %s7818_s23, [#allocation7]  }
  0x3a   : > { %620 = sbr.rel (%p12694_p0) target bundleno = 6679 (0x1a17), region = 104 }
  0x41   : > { %p12695_p1 = scmp.eq.s32.totalorder %s7957_s29, 0 }
  0x43   : > { %7805 = dma.done.wait (%p12695_p1), [#allocation5], 64   ;;  %p12696_p7 = pmov %p12695_p1 }
  0x44   : > { %p12697_p4 = pmov %p12695_p1 }
  0x45   : > { %7807 = vsyncadd (%p12696_p7), [#allocation5], 4294967232 }
  0x46   : > { %7809 = dma.done.wait (%p12697_p4), [#allocation7], 80   ;;  %p12698_p6 = pmov %p12695_p1 }
  0x48   : > { %7811 = vsyncadd (%p12698_p6), [#allocation7], 4294967216 }
  0x49   : > { %634 = sfence }
  0x4a   : > { %p687_p8 = scmp.lt.s32.totalorder %s7957_s29, 1  ;;  %s7151_s1 = sld [smem:[#allocation4 + $0x2]]  ;;  %vm883_vm0 = vcmask 1040384   ;;  %vm904_vm1 = vcmask 7168   ;;  %vm7824_vm2 = vmmov 0   ;;  %vm4245_vm3 = vcmask 31744  }
  0x4b   : > { %s7160_s24 = sld [smem:[#allocation4 + $0x82]]  ;;  %s7819_s3 = smov 127   ;;  %vm4247_vm4 = vcmask 64512   ;;  %vm4249_vm5 = vcmask 97280   ;;  %vm4267_vm6 = vcmask 130048   ;;  %vm4335_vm7 = vcmask 261120  }
  0x4c   : > { %s13496_s29 = smov (!%p687_p8, %s7957_s29), 1  ;;  %s12699_s26 = sld [smem:[#allocation182_spill]]  ;;  %vm4929_vm8 = vcmask 27648   ;;  %vm4977_vm9 = vcmask 1043456   ;;  %vm5361_vm10 = vcmask 195584   ;;  %vm5433_vm11 = vcmask 257024  }
  0x4d   : > { %s7340_s5 = sshll.u32 %s13496_s29, 9  ;;  %s7170_s20 = sld [smem:[#allocation4 + $0x102]]  ;;  %vm5570_vm12 = vcmask 523264   ;;  %vm6997_vm13 = vcmask 0  }
  0x4e   : > { %s7154_s0 = sld [smem:[#allocation4 + $0x5]]  ;;  %s7180_s4 = sld [smem:[#allocation4 + $0x182]] }
  0x4f   : > { %s7157_s22 = sld [smem:[#allocation4 + $0x8]]  ;;  %s7163_s30 = sld [smem:[#allocation4 + $0x85]] }
  0x50   : > { %v8030_v2 = vstv %s7151_s1  ;;  %s7166_s23 = sld [smem:[#allocation4 + $0x88]]  ;;  %s8155_s2 = sld [smem:[#allocation4 + $0x185]] }
  0x51   : > { %12700 = vst [vmem:[#allocation11_spill] sm:$0xff] %v8030_v2  ;;  %v8051_v10 = vstv %s7160_s24  ;;  %s8067_s1 = sld [smem:[#allocation4 + $0x108]]  ;;  %s8089_s24 = sld [smem:[#allocation4 + $0x105]] }
  0x52   : > { %s8025_s27 = scalar_lea.vmem %s12699_s26, %s7340_s5  ;;  %12701 = vst [vmem:[#allocation12_spill] sm:$0xff] %v8051_v10  ;;  %s8091_s5 = sld [smem:[#allocation4 + $0x188]] }
  0x53   : > { %v8028_v1 = vld [vmem:[%s8025_s27 + $0x110] sm:$0x1f]  ;;  %v8033_v3 = vld [vmem:[%s8025_s27 + $0x100] sm:$0x1f]  ;;  %v8036_v4 = vld [vmem:[%s8025_s27 + $0x118] sm:$0x1f]  ;;  %v8065_v15 = vstv %s7170_s20 }
  0x54   : > { %v2551_v5 = vmul.f32 %v8028_v1, %v8030_v2  ;;  %v2549_v6 = vmul.f32 %v8033_v3, %v8030_v2  ;;  %v8043_v7 = vld [vmem:[%s8025_s27 + $0x108] sm:$0x1f]  ;;  %v2552_v8 = vmul.f32 %v8036_v4, %v8030_v2  ;;  %v2737_v12 = vmul.f32 %v8033_v3, %v8051_v10  ;;  %12702 = vst [vmem:[#allocation13_spill] sm:$0xff] %v8065_v15  ;;  %v8073_v17 = vld [vmem:[%s8025_s27 + $0x180] sm:$0x1f]  ;;  %s8190_s25 = sld [smem:[#allocation4]] }
  0x55   : > { %v2550_v9 = vmul.f32 %v8043_v7, %v8030_v2  ;;  %v2738_v11 = vmul.f32 %v8043_v7, %v8051_v10  ;;  %v2740_v13 = vmul.f32 %v8036_v4, %v8051_v10  ;;  %v2739_v14 = vmul.f32 %v8028_v1, %v8051_v10  ;;  %v8070_v16 = vld [vmem:[%s8025_s27 + $0x188] sm:$0x1f]  ;;  %12704 = vst [vmem:[#allocation15_spill] sm:$0xff] %v8073_v17  ;;  %v8084_v21 = vld [vmem:[%s8025_s27 + $0x198] sm:$0x1f]  ;;  %s8206_s26 = sld [smem:[#allocation4 + $0x1]] }
  0x56   : > { %2561 = vrot.lane.b32.xlu1 %v2551_v5, %s7819_s3  ;;  %2557 = vrot.lane.b32.xlu0 %v2549_v6, %s7819_s3  ;;  %12703 = vst [vmem:[#allocation14_spill] sm:$0xff] %v8070_v16  ;;  %v2926_v18 = vmul.f32 %v8043_v7, %v8065_v15  ;;  %v2925_v19 = vmul.f32 %v8033_v3, %v8065_v15  ;;  %v8081_v20 = vstv %s7154_s0  ;;  %12706 = vst [vmem:[#allocation17_spill] sm:$0xff] %v8084_v21  ;;  %v8087_v22 = vld [vmem:[%s8025_s27 + $0x190] sm:$0x1f]  ;;  %s8208_s20 = sld [smem:[#allocation4 + $0x3]]  ;;  %s8220_s0 = sld [smem:[#allocation4 + $0x80]] }
  0x57   : > { %12705 = vst [vmem:[#allocation16_spill] sm:$0xff] %v8081_v20  ;;  %12707 = vst [vmem:[#allocation18_spill] sm:$0xff] %v8087_v22  ;;  %v2928_v23 = vmul.f32 %v8036_v4, %v8065_v15  ;;  %v8095_v24 = vstv %s7180_s4  ;;  %v8098_v25 = vld [vmem:[%s8025_s27 + $0x8] sm:$0x1f]  ;;  %v2927_v26 = vmul.f32 %v8028_v1, %v8065_v15  ;;  %v2590_v27 = vmul.f32 %v8070_v16, %v8081_v20  ;;  %v8109_v30 = vld [vmem:[%s8025_s27] sm:$0x1f] }
  0x58   : > { %12708 = vst [vmem:[#allocation19_spill] sm:$0xff] %v8095_v24  ;;  %v2589_v28 = vmul.f32 %v8073_v17, %v8081_v20  ;;  %v8106_v29 = vstv %s7157_s22  ;;  %v8112_v31 = vld [vmem:[%s8025_s27 + $0x18] sm:$0x1f]  ;;  %v8115_v32 = vld [vmem:[%s8025_s27 + $0x10] sm:$0x1f]  ;;  %v2592_v33 = vmul.f32 %v8084_v21, %v8081_v20  ;;  %v2591_v34 = vmul.f32 %v8087_v22, %v8081_v20  ;;  %s8222_s4 = sld [smem:[#allocation4 + $0x81]] }
  0x59   : > { %12709 = vst [vmem:[#allocation20_spill] sm:$0xff] %v8106_v29  ;;  %v8123_v35 = vstv %s7163_s30  ;;  %v8125_v36 = vstv %s7166_s23  ;;  %v8129_v37 = vmul.f32 %v8043_v7, %v8095_v24  ;;  %v8133_v38 = vmul.f32 %v8033_v3, %v8095_v24  ;;  %s8228_s22 = sld [smem:[#allocation4 + $0x83]]  ;;  %s8245_s30 = sld [smem:[#allocation4 + $0x100]]  ;;  %v8297_v61 = vld [vmem:[%s8025_s27 + $0x140] sm:$0x1f] }
  0x5a   : > { %2563 = vrot.lane.b32.xlu1 %v2552_v8, %s7819_s3  ;;  %2559 = vrot.lane.b32.xlu0 %v2550_v9, %s7819_s3  ;;  %12710 = vst [vmem:[#allocation21_spill] sm:$0xff] %v8123_v35  ;;  %12711 = vst [vmem:[#allocation22_spill] sm:$0xff] %v8125_v36  ;;  %v8137_v39 = vmul.f32 %v8030_v2, %v8098_v25  ;;  %v8141_v40 = vmul.f32 %v8030_v2, %v8109_v30  ;;  %v8158_v44 = vstv %s8067_s1  ;;  %v8300_v60 = vld [vmem:[%s8025_s27 + $0x160] sm:$0x1f]  ;;  %s8382_s23 = sld [smem:[#allocation4 + $0x101]]  ;;  %s8445_s1 = sld [smem:[#allocation4 + $0x103]] }
  0x5b   : > { %v8145_v41 = vmul.f32 %v8036_v4, %v8095_v24  ;;  %v8149_v42 = vmul.f32 %v8106_v29, %v8098_v25  ;;  %v8153_v43 = vmul.f32 %v8106_v29, %v8109_v30  ;;  %12714 = vst [vmem:[#allocation25_spill] sm:$0xff] %v8158_v44  ;;  %v8162_v45 = vmul.f32 %v8106_v29, %v8112_v31  ;;  %v8318_v0 = vld [vmem:[%s8025_s27 + $0x158] sm:$0x1f] }
  0x5c   : > { %12712 = vst [vmem:[#allocation23_spill] sm:$0xff] %v8137_v39  ;;  %12713 = vst [vmem:[#allocation24_spill] sm:$0xff] %v8141_v40  ;;  %v8166_v46 = vmul.f32 %v8106_v29, %v8115_v32  ;;  %v8170_v47 = vmul.f32 %v8125_v36, %v8098_v25  ;;  %v8174_v48 = vmul.f32 %v8125_v36, %v8109_v30  ;;  %v8193_v52 = vstv %s8089_s24  ;;  %s8469_s24 = sld [smem:[#allocation4 + $0x6]] }
  0x5d   : > { %v8180_v49 = vmul.f32 %v8028_v1, %v8095_v24  ;;  %v8184_v50 = vmul.f32 %v8070_v16, %v8123_v35  ;;  %v8188_v51 = vmul.f32 %v8125_v36, %v8112_v31  ;;  %12718 = vst [vmem:[#allocation29_spill] sm:$0xff] %v8193_v52  ;;  %v8197_v53 = vmul.f32 %v8125_v36, %v8115_v32 }
  0x5e   : > { %2747 = vrot.lane.b32.xlu1 %v2738_v11, %s7819_s3  ;;  %2745 = vrot.lane.b32.xlu0 %v2737_v12, %s7819_s3  ;;  %12715 = vst [vmem:[#allocation26_spill] sm:$0xff] %v8170_v47  ;;  %12716 = vst [vmem:[#allocation27_spill] sm:$0xff] %v8174_v48  ;;  %v8201_v54 = vmul.f32 %v8158_v44, %v8098_v25  ;;  %v8204_v55 = vstv %s8091_s5  ;;  %v8214_v58 = vmul.f32 %v8158_v44, %v8109_v30  ;;  %v8321_v12 = vld [vmem:[%s8025_s27 + $0x178] sm:$0x1f]  ;;  %s8506_s5 = sld [smem:[#allocation4 + $0x4]] }
  0x5f   : > { %12717 = vst [vmem:[#allocation28_spill] sm:$0xff] %v8188_v51  ;;  %12719 = vst [vmem:[#allocation30_spill] sm:$0xff] %v8197_v53  ;;  %v8218_v59 = vmul.f32 %v8158_v44, %v8112_v31  ;;  %v8235_v5 = vmul.f32 %v8158_v44, %v8115_v32  ;;  %v8239_v6 = vmul.f32 %v8204_v55, %v8098_v25  ;;  %v8294_v62 = vstv %s8190_s25  ;;  %v8407_v53 = vld [vmem:[%s8025_s27 + $0x1c8] sm:$0x1f]  ;;  %s8530_s25 = sld [smem:[#allocation4 + $0x181]] }
  0x60   : > { %12720 = vst [vmem:[#allocation31_spill] sm:$0xff] %v8201_v54  ;;  %12721 = vst [vmem:[#allocation32_spill] sm:$0xff] %v8204_v55  ;;  %v8243_v8 = vmul.f32 %v8204_v55, %v8109_v30  ;;  %v8249_v9 = vmul.f32 %v8073_v17, %v8123_v35  ;;  %v8253_v11 = vmul.f32 %v8084_v21, %v8123_v35  ;;  %v8315_v63 = vstv %s8206_s26  ;;  %v8410_v51 = vld [vmem:[%s8025_s27 + $0x88] sm:$0x1f]  ;;  %s8569_s26 = sld [smem:[#allocation4 + $0x183]] }
  0x61   : > { %12722 = vst [vmem:[#allocation33_spill] sm:$0xff] %v8214_v58  ;;  %12723 = vst [vmem:[#allocation34_spill] sm:$0xff] %v8218_v59  ;;  %v8329_v40 = vmul.f32 %v8204_v55, %v8112_v31  ;;  %v8333_v39 = vmul.f32 %v8204_v55, %v8115_v32  ;;  %v8351_v59 = vmul.f32 %v8051_v10, %v8098_v25  ;;  %v8362_v55 = vld [vmem:[%s8025_s27 + $0x148] sm:$0x1f]  ;;  %v8396_v54 = vstv %s8220_s0  ;;  %s8657_s0 = sld [smem:[#allocation4 + $0x84]] }
  0x62   : > { %2751 = vrot.lane.b32.xlu1 %v2740_v13, %s7819_s3  ;;  %2749 = vrot.lane.b32.xlu0 %v2739_v14, %s7819_s3  ;;  %12724 = vst [vmem:[#allocation35_spill] sm:$0xff] %v8235_v5  ;;  %12725 = vst [vmem:[#allocation36_spill] sm:$0xff] %v8239_v6  ;;  %v8259_v14 = vmul.f32 %v8087_v22, %v8123_v35  ;;  %v8280_v13 = vmul.f32 %v8087_v22, %v8193_v52  ;;  %v8340_v6 = vld [vmem:[%s8025_s27 + $0x1d0] sm:$0x1f]  ;;  %v8343_v5 = vld [vmem:[%s8025_s27 + $0x1c0] sm:$0x1f] }
  0x63   : > { %12726 = vst [vmem:[#allocation37_spill] sm:$0xff] %v8243_v8  ;;  %12728 = vst [vmem:[#allocation39_spill] sm:$0xff] %v8294_v62  ;;  %v8337_v8 = vmul.f32 %v8030_v2, %v8112_v31  ;;  %v8365_v58 = vld [vmem:[%s8025_s27 + $0x168] sm:$0x1f]  ;;  %v8416_v44 = vstv %s8222_s4  ;;  %v8428_v47 = vmul.f32 %v8065_v15, %v8112_v31  ;;  %v8432_v36 = vmul.f32 %v8065_v15, %v8115_v32  ;;  %s8698_s4 = sld [smem:[#allocation4 + $0x106]] }
  0x64   : > { %12729 = vst [vmem:[#allocation40_spill] sm:$0xff] %v8315_v63  ;;  %12730 = vst [vmem:[#allocation41_spill] sm:$0xff] %v8318_v0 }
  0x65   : > { %12732 = vst [vmem:[#allocation43_spill] sm:$0xff] %v8329_v40  ;;  %12733 = vst [vmem:[#allocation44_spill] sm:$0xff] %v8337_v8  ;;  %v8359_v8 = vmul.f32 %v8051_v10, %v8112_v31 }
  0x66   : > { %2935 = vrot.lane.b32.xlu1 %v2926_v18, %s7819_s3  ;;  %2933 = vrot.lane.b32.xlu0 %v2925_v19, %s7819_s3  ;;  %v8262_v18 = vstv %s8155_s2  ;;  %v8286_v19 = vld [vmem:[%s8025_s27 + $0x170] sm:$0x1f]  ;;  %12735 = vst [vmem:[#allocation46_spill] sm:$0xff] %v8351_v59  ;;  %12738 = vst [vmem:[#allocation49_spill] sm:$0xff] %v8362_v55  ;;  %s8528_s2 = sld [smem:[#allocation4 + $0x180]] }
  0x67   : > { %12727 = vst [vmem:[#allocation38_spill] sm:$0xff] %v8262_v18  ;;  %v8304_v57 = vmul.f32 %v8070_v16, %v8262_v18  ;;  %v8325_v56 = vmul.f32 %v8087_v22, %v8262_v18  ;;  %v8347_v22 = vmul.f32 %v8030_v2, %v8115_v32  ;;  %12737 = vst [vmem:[#allocation48_spill] sm:$0xff] %v8359_v8  ;;  %v8376_v59 = vstv %s8208_s20  ;;  %v8413_v2 = vld [vmem:[%s8025_s27 + $0x80] sm:$0x1f]  ;;  %s8626_s20 = sld [smem:[#allocation4 + $0x86]] }
  0x68   : > { %12740 = vst [vmem:[#allocation51_spill] sm:$0xff] %v8376_v59  ;;  %12743 = vst [vmem:[#allocation54_spill] sm:$0xff] %v8396_v54  ;;  %v8420_v48 = vmul.f32 %v8340_v6, %v8376_v59 }
  0x69   : > { %12731 = vst [vmem:[#allocation42_spill] sm:$0xff] %v8325_v56  ;;  %12734 = vst [vmem:[#allocation45_spill] sm:$0xff] %v8347_v22  ;;  %v2543_v22 = vmul.f32 %v8286_v19, %v8315_v63 }
  0x6a   : > { %2939 = vrot.lane.b32.xlu1 %v2928_v23, %s7819_s3  ;;  %2937 = vrot.lane.b32.xlu0 %v2927_v26, %s7819_s3  ;;  %v8268_v26 = vmul.f32 %v8070_v16, %v8193_v52  ;;  %v8283_v23 = vld [vmem:[%s8025_s27 + $0x150] sm:$0x1f]  ;;  %v2540_v16 = vmul.f32 %v8318_v0, %v8294_v62  ;;  %12745 = vst [vmem:[#allocation56_spill] sm:$0xff] %v8416_v44  ;;  %12746 = vst [vmem:[#allocation57_spill] sm:$0xff] %v8420_v48 }
  0x6b   : > { %v2539_v8 = vmul.f32 %v8283_v23, %v8294_v62  ;;  %12748 = vst [vmem:[#allocation59_spill] sm:$0xff] %v8428_v47  ;;  %12749 = vst [vmem:[#allocation60_spill] sm:$0xff] %v8432_v36  ;;  %v2542_v47 = vmul.f32 %v8365_v58, %v8315_v63 }
  0x6d   : > { %v8439_v56 = vadd.f32 %v2543_v22, %v2539_v8  ;;  %v2730_v22 = vmul.f32 %v8365_v58, %v8416_v44 }
  0x6e   : > { %2599 = vrot.lane.b32.xlu1 %v2590_v27, %s7819_s3  ;;  %2597 = vrot.lane.b32.xlu0 %v2589_v28, %s7819_s3  ;;  %v8272_v27 = vmul.f32 %v8073_v17, %v8193_v52  ;;  %v8276_v28 = vmul.f32 %v8084_v21, %v8193_v52 }
  0x6f   : > { %12750 = vst [vmem:[#allocation61_spill] sm:$0xff] %v8439_v56  ;;  %v2725_v56 = vmul.f32 %v8297_v61, %v8396_v54 }
  0x72   : > { %2603 = vrot.lane.b32.xlu1 %v2592_v33, %s7819_s3  ;;  %2601 = vrot.lane.b32.xlu0 %v2591_v34, %s7819_s3  ;;  %v8308_v33 = vmul.f32 %v8073_v17, %v8262_v18  ;;  %v8312_v34 = vmul.f32 %v8084_v21, %v8262_v18  ;;  %v8355_v21 = vmul.f32 %v8051_v10, %v8109_v30 }
  0x73   : > { %v8400_v17 = vmul.f32 %v8065_v15, %v8109_v30 }
  0x74   : > { %12736 = vst [vmem:[#allocation47_spill] sm:$0xff] %v8355_v21  ;;  %v8373_v21 = vmul.f32 %v8051_v10, %v8115_v32  ;;  %v8393_v10 = vld [vmem:[%s8025_s27 + $0x1d8] sm:$0x1f] }
  0x75   : > { %12742 = vst [vmem:[#allocation53_spill] sm:$0xff] %v8393_v10  ;;  %12744 = vst [vmem:[#allocation55_spill] sm:$0xff] %v8400_v17  ;;  %v8424_v17 = vmul.f32 %v8343_v5, %v8376_v59  ;;  %v8460_v48 = vmul.f32 %v8393_v10, %v8376_v59 }
  0x76   : > { %3123 = vrot.lane.b32.xlu1 %v8129_v37, %s7819_s3  ;;  %3121 = vrot.lane.b32.xlu0 %v8133_v38, %s7819_s3  ;;  %12739 = vst [vmem:[#allocation50_spill] sm:$0xff] %v8373_v21  ;;  %v8386_v37 = vmul.f32 %v8065_v15, %v8098_v25  ;;  %v2537_v38 = vmul.f32 %v8297_v61, %v8294_v62 }
  0x77   : > { %v2541_v21 = vmul.f32 %v8300_v60, %v8315_v63  ;;  %12747 = vst [vmem:[#allocation58_spill] sm:$0xff] %v8424_v17  ;;  %v2538_v17 = vmul.f32 %v8362_v55, %v8294_v62  ;;  %12754 = vst [vmem:[#allocation65_spill] sm:$0xff] %v8460_v48  ;;  %v8484_v48 = vld [vmem:[%s8025_s27 + $0x90] sm:$0x1f] }
  0x78   : > { %12741 = vst [vmem:[#allocation52_spill] sm:$0xff] %v8386_v37  ;;  %v2544_v37 = vmul.f32 %v8321_v12, %v8315_v63 }
  0x79   : > { %v8447_v15 = vadd.f32 %v2541_v21, %v2537_v38  ;;  %v2729_v21 = vmul.f32 %v8300_v60, %v8416_v44  ;;  %v8467_v38 = vld [vmem:[%s8025_s27 + $0x98] sm:$0x1f]  ;;  %v8493_v36 = vadd.f32 %v2542_v47, %v2538_v17  ;;  %v2728_v17 = vmul.f32 %v8318_v0, %v8396_v54 }
  0x7a   : > { %3127 = vrot.lane.b32.xlu1 %v8145_v41, %s7819_s3  ;;  %3125 = vrot.lane.b32.xlu0 %v8180_v49, %s7819_s3  ;;  %v8450_v41 = vstv %s8228_s22  ;;  %v2726_v49 = vmul.f32 %v8362_v55, %v8396_v54  ;;  %v8456_v8 = vadd.f32 %v2544_v37, %v2540_v16  ;;  %v8477_v16 = vmul.f32 %v8410_v51, %v8081_v20  ;;  %s8721_s22 = sld [smem:[#allocation4 + $0x104]] }
  0x7b   : > { %12751 = vst [vmem:[#allocation62_spill] sm:$0xff] %v8447_v15  ;;  %12752 = vst [vmem:[#allocation63_spill] sm:$0xff] %v8450_v41  ;;  %v8473_v15 = vmul.f32 %v8407_v53, %v8376_v59  ;;  %v8481_v37 = vmul.f32 %v8413_v2, %v8081_v20  ;;  %v2732_v47 = vmul.f32 %v8321_v12, %v8416_v44 }
  0x7c   : > { %12753 = vst [vmem:[#allocation64_spill] sm:$0xff] %v8456_v8  ;;  %12756 = vst [vmem:[#allocation67_spill] sm:$0xff] %v8477_v16  ;;  %v8487_v8 = vstv %s8245_s30  ;;  %v8501_v16 = vmul.f32 %v8343_v5, %v8450_v41  ;;  %v8508_v40 = vadd.f32 %v2730_v22, %v2726_v49  ;;  %v2727_v49 = vmul.f32 %v8283_v23, %v8396_v54  ;;  %s8760_s30 = sld [smem:[#allocation4 + $0x7]] }
  0x7d   : > { %12755 = vst [vmem:[#allocation66_spill] sm:$0xff] %v8473_v15  ;;  %12757 = vst [vmem:[#allocation68_spill] sm:$0xff] %v8481_v37  ;;  %v8497_v15 = vmul.f32 %v8407_v53, %v8450_v41  ;;  %v8504_v37 = vstv %s8382_s23  ;;  %v2731_v22 = vmul.f32 %v8286_v19, %v8416_v44  ;;  %s8835_s23 = sld [smem:[#allocation6]] }
  0x7e   : > { %12758 = vst [vmem:[#allocation69_spill] sm:$0xff] %v8487_v8  ;;  %2787 = vrot.lane.b32.xlu1 %v8184_v50, %s7819_s3  ;;  %2785 = vrot.lane.b32.xlu0 %v8249_v9, %s7819_s3  ;;  %12759 = vst [vmem:[#allocation70_spill] sm:$0xff] %v8493_v36  ;;  %v8512_v50 = vmul.f32 %v8467_v38, %v8081_v20  ;;  %v8518_v9 = vadd.f32 %v2729_v21, %v2725_v56 }
  0x7f   : > { %12760 = vst [vmem:[#allocation71_spill] sm:$0xff] %v8497_v15  ;;  %12761 = vst [vmem:[#allocation72_spill] sm:$0xff] %v8501_v16  ;;  %v8522_v16 = vmul.f32 %v8484_v48, %v8081_v20  ;;  %v8534_v15 = vmul.f32 %v8393_v10, %v8450_v41  ;;  %v8538_v56 = vmul.f32 %v8340_v6, %v8450_v41 }
  0x80   : > { %12762 = vst [vmem:[#allocation73_spill] sm:$0xff] %v8504_v37  ;;  %12763 = vst [vmem:[#allocation74_spill] sm:$0xff] %v8508_v40  ;;  %v2914_v21 = vmul.f32 %v8362_v55, %v8487_v8  ;;  %v8553_v40 = vstv %s8445_s1  ;;  %v2917_v36 = vmul.f32 %v8300_v60, %v8504_v37  ;;  %v2915_v41 = vmul.f32 %v8283_v23, %v8487_v8  ;;  %s8837_s1 = sld [smem:[#allocation4 + $0x186]] }
  0x81   : > { %12764 = vst [vmem:[#allocation75_spill] sm:$0xff] %v8512_v50  ;;  %12765 = vst [vmem:[#allocation76_spill] sm:$0xff] %v8518_v9  ;;  %v2918_v9 = vmul.f32 %v8365_v58, %v8504_v37  ;;  %v8571_v50 = vadd.f32 %v2731_v22, %v2727_v49  ;;  %v8587_v44 = vmul.f32 %v8407_v53, %v8553_v40 }
  0x82   : > { %12766 = vst [vmem:[#allocation77_spill] sm:$0xff] %v8522_v16  ;;  %12767 = vst [vmem:[#allocation78_spill] sm:$0xff] %v8534_v15  ;;  %2791 = vrot.lane.b32.xlu1 %v8253_v11, %s7819_s3  ;;  %2789 = vrot.lane.b32.xlu0 %v8259_v14, %s7819_s3  ;;  %v8550_v15 = vmul.f32 %v8095_v24, %v8098_v25  ;;  %v8559_v16 = vadd.f32 %v2732_v47, %v2728_v17  ;;  %v8578_v47 = vstv %s8469_s24  ;;  %s8852_s24 = sld [smem:[#allocation4 + $0x184]] }
  0x83   : > { %12768 = vst [vmem:[#allocation79_spill] sm:$0xff] %v8538_v56  ;;  %12770 = vst [vmem:[#allocation81_spill] sm:$0xff] %v8553_v40  ;;  %v2913_v56 = vmul.f32 %v8297_v61, %v8487_v8  ;;  %v8563_v11 = vmul.f32 %v8095_v24, %v8109_v30  ;;  %v2916_v14 = vmul.f32 %v8318_v0, %v8487_v8  ;;  %v8604_v8 = vld [vmem:[%s8025_s27 + $0x40] sm:$0x1f] }
  0x84   : > { %12769 = vst [vmem:[#allocation80_spill] sm:$0xff] %v8550_v15  ;;  %12771 = vst [vmem:[#allocation82_spill] sm:$0xff] %v8559_v16  ;;  %v2920_v15 = vmul.f32 %v8321_v12, %v8504_v37  ;;  %v2919_v17 = vmul.f32 %v8286_v19, %v8504_v37  ;;  %v8581_v16 = vld [vmem:[%s8025_s27 + $0x48] sm:$0x1f]  ;;  %v8591_v49 = vmul.f32 %v8343_v5, %v8553_v40  ;;  %v8601_v37 = vld [vmem:[%s8025_s27 + $0x1e0] sm:$0x1f] }
  0x85   : > { %12772 = vst [vmem:[#allocation83_spill] sm:$0xff] %v8563_v11  ;;  %12773 = vst [vmem:[#allocation84_spill] sm:$0xff] %v8571_v50  ;;  %v8583_v11 = vadd.f32 %v2918_v9, %v2914_v21  ;;  %v8595_v22 = vmul.f32 %v8095_v24, %v8112_v31  ;;  %v8598_v50 = vld [vmem:[%s8025_s27 + $0x1e8] sm:$0x1f]  ;;  %v8610_v9 = vadd.f32 %v2917_v36, %v2913_v56 }
  0x86   : > { %12774 = vst [vmem:[#allocation85_spill] sm:$0xff] %v8578_v47  ;;  %12776 = vst [vmem:[#allocation87_spill] sm:$0xff] %v8587_v44  ;;  %2975 = vrot.lane.b32.xlu1 %v8268_v26, %s7819_s3  ;;  %2973 = vrot.lane.b32.xlu0 %v8272_v27, %s7819_s3  ;;  %v8614_v21 = vmul.f32 %v8095_v24, %v8115_v32  ;;  %v8621_v44 = vstv %s8506_s5  ;;  %v8628_v26 = vadd.f32 %v2920_v15, %v2916_v14  ;;  %v8643_v24 = vld [vmem:[%s8025_s27 + $0x50] sm:$0x1f]  ;;  %s8968_s5 = sld [smem:[#allocation4 + $0x87]] }
  0x87   : > { %12775 = vst [vmem:[#allocation86_spill] sm:$0xff] %v8583_v11  ;;  %12777 = vst [vmem:[#allocation88_spill] sm:$0xff] %v8591_v49  ;;  %v8618_v49 = vmul.f32 %v8393_v10, %v8553_v40  ;;  %v8624_v11 = vld [vmem:[%s8025_s27 + $0x58] sm:$0x1f]  ;;  %v8632_v36 = vmul.f32 %v8340_v6, %v8553_v40  ;;  %v8636_v27 = vmul.f32 %v8410_v51, %v8123_v35  ;;  %v8652_v14 = vstv %s8528_s2  ;;  %s9042_s2 = sld [smem:[#allocation6 + $0x1]] }
  0x88   : > { %12778 = vst [vmem:[#allocation89_spill] sm:$0xff] %v8595_v22  ;;  %12779 = vst [vmem:[#allocation90_spill] sm:$0xff] %v8610_v9  ;;  %v8640_v56 = vmul.f32 %v8581_v16, %v8578_v47  ;;  %v8649_v15 = vmul.f32 %v8604_v8, %v8578_v47  ;;  %v8665_v9 = vmul.f32 %v8598_v50, %v8621_v44  ;;  %v8702_v22 = vstv %s8569_s26  ;;  %s9227_s26 = sld [smem:[#allocation6 + $0x2]] }
  0x89   : > { %12780 = vst [vmem:[#allocation91_spill] sm:$0xff] %v8614_v21  ;;  %12781 = vst [vmem:[#allocation92_spill] sm:$0xff] %v8618_v49  ;;  %v8645_v49 = vadd.f32 %v2919_v17, %v2915_v41  ;;  %v8669_v41 = vmul.f32 %v8601_v37, %v8621_v44  ;;  %v8672_v17 = vld [vmem:[%s8025_s27 + $0x1f8] sm:$0x1f]  ;;  %v8696_v21 = vmul.f32 %v8643_v24, %v8578_v47 }
  0x8a   : > { %12782 = vst [vmem:[#allocation93_spill] sm:$0xff] %v8621_v44  ;;  %12783 = vst [vmem:[#allocation94_spill] sm:$0xff] %v8628_v26  ;;  %v8655_v26 = vstv %s8530_s25  ;;  %2979 = vrot.lane.b32.xlu1 %v8276_v28, %s7819_s3  ;;  %2977 = vrot.lane.b32.xlu0 %v8280_v13, %s7819_s3  ;;  %v3102_v13 = vmul.f32 %v8362_v55, %v8652_v14  ;;  %v8719_v28 = vmul.f32 %v8410_v51, %v8193_v52  ;;  %s9198_s25 = sld [smem:[#allocation4 + $0x107]] }
  0x8b   : > { %12784 = vst [vmem:[#allocation95_spill] sm:$0xff] %v8632_v36  ;;  %12785 = vst [vmem:[#allocation96_spill] sm:$0xff] %v8636_v27  ;;  %v8661_v36 = vmul.f32 %v8413_v2, %v8123_v35  ;;  %v8679_v27 = vld [vmem:[%s8025_s27 + $0x1f0] sm:$0x1f] }
  0x8c   : > { %12786 = vst [vmem:[#allocation97_spill] sm:$0xff] %v8640_v56  ;;  %12787 = vst [vmem:[#allocation98_spill] sm:$0xff] %v8645_v49  ;;  %v8676_v49 = vmul.f32 %v8624_v11, %v8578_v47  ;;  %v8715_v40 = vmul.f32 %v8679_v27, %v8621_v44  ;;  %v8771_v56 = vstv %s8657_s0  ;;  %s9354_s0 = sld [smem:[#allocation6 + $0x3]] }
  0x8d   : > { %12788 = vst [vmem:[#allocation99_spill] sm:$0xff] %v8649_v15  ;;  %12789 = vst [vmem:[#allocation100_spill] sm:$0xff] %v8652_v14  ;;  %v3105_v15 = vmul.f32 %v8300_v60, %v8655_v26 }
  0x8e   : > { %12790 = vst [vmem:[#allocation101_spill] sm:$0xff] %v8655_v26  ;;  %12791 = vst [vmem:[#allocation102_spill] sm:$0xff] %v8661_v36  ;;  %v8688_v36 = vmul.f32 %v8467_v38, %v8123_v35 }
  0x8f   : > { %12792 = vst [vmem:[#allocation103_spill] sm:$0xff] %v8665_v9  ;;  %12793 = vst [vmem:[#allocation104_spill] sm:$0xff] %v8669_v41  ;;  %v8692_v41 = vmul.f32 %v8484_v48, %v8123_v35  ;;  %v3106_v9 = vmul.f32 %v8365_v58, %v8655_v26  ;;  %v8726_v58 = vmul.f32 %v8413_v2, %v8193_v52 }
  0x90   : > { %12794 = vst [vmem:[#allocation105_spill] sm:$0xff] %v8676_v49  ;;  %12795 = vst [vmem:[#allocation106_spill] sm:$0xff] %v8688_v36  ;;  %v3101_v36 = vmul.f32 %v8297_v61, %v8652_v14  ;;  %v8741_v49 = vmul.f32 %v8407_v53, %v8702_v22 }
  0x91   : > { %12796 = vst [vmem:[#allocation107_spill] sm:$0xff] %v8692_v41  ;;  %12797 = vst [vmem:[#allocation108_spill] sm:$0xff] %v8696_v21  ;;  %v8711_v41 = vmul.f32 %v8672_v17, %v8621_v44  ;;  %v8750_v60 = vadd.f32 %v3106_v9, %v3102_v13  ;;  %v3103_v9 = vmul.f32 %v8283_v23, %v8652_v14 }
  0x92   : > { %12798 = vst [vmem:[#allocation109_spill] sm:$0xff] %v8702_v22  ;;  %12800 = vst [vmem:[#allocation111_spill] sm:$0xff] %v8715_v40  ;;  %v8748_v40 = vstv %s8626_s20  ;;  %v3107_v13 = vmul.f32 %v8286_v19, %v8655_v26  ;;  %v12816_v19 = vrot.slane %v8162_v45, 1  ;;  %s9276_s20 = sld [smem:[#allocation4 + $0x187]] }
  0x93   : > { %12799 = vst [vmem:[#allocation110_spill] sm:$0xff] %v8711_v41  ;;  %12801 = vst [vmem:[#allocation112_spill] sm:$0xff] %v8719_v28  ;;  %v12803_v41 = vrot.slane %v8149_v42, 1  ;;  %v12804_v28 = vrot.slane %v8153_v43, 1  ;;  %v8754_v42 = vmul.f32 %v8467_v38, %v8193_v52  ;;  %v3104_v43 = vmul.f32 %v8318_v0, %v8652_v14 }
  0x94   : > { %12802 = vst [vmem:[#allocation113_spill] sm:$0xff] %v8726_v58  ;;  %12805 = vst [vmem:[#allocation114_spill] sm:$0xff] %v8741_v49  ;;  %v8745_v58 = vmul.f32 %v8343_v5, %v8702_v22  ;;  %v8777_v49 = vmul.f32 %v8393_v10, %v8702_v22  ;;  %v8785_v21 = vmul.f32 %v8581_v16, %v8748_v40 }
  0x95   : > { %2667 = vrot.lane.b32.xlu1 %v12803_v41, %s7819_s3  ;;  %2665 = vrot.lane.b32.xlu0 %v12804_v28, %s7819_s3  ;;  %12807 = vst [vmem:[#allocation116_spill] sm:$0xff] %v8748_v40  ;;  %12808 = vst [vmem:[#allocation117_spill] sm:$0xff] %v8750_v60  ;;  %v3108_v41 = vmul.f32 %v8321_v12, %v8655_v26  ;;  %v8764_v28 = vmul.f32 %v8484_v48, %v8193_v52 }
  0x96   : > { %12806 = vst [vmem:[#allocation115_spill] sm:$0xff] %v8745_v58  ;;  %12809 = vst [vmem:[#allocation118_spill] sm:$0xff] %v8754_v42  ;;  %v8773_v58 = vadd.f32 %v3105_v15, %v3101_v36  ;;  %v8781_v12 = vmul.f32 %v8340_v6, %v8702_v22  ;;  %v12817_v36 = vrot.slane %v8166_v46, 1  ;;  %v8795_v15 = vmul.f32 %v8043_v7, %v8106_v29 }
  0x97   : > { %12810 = vst [vmem:[#allocation119_spill] sm:$0xff] %v8764_v28  ;;  %12811 = vst [vmem:[#allocation120_spill] sm:$0xff] %v8771_v56  ;;  %v8799_v22 = vmul.f32 %v8604_v8, %v8748_v40  ;;  %v8808_v45 = vadd.f32 %v3108_v41, %v3104_v43  ;;  %v8812_v46 = vmul.f32 %v8033_v3, %v8106_v29  ;;  %v8833_v41 = vstv %s8721_s22  ;;  %s7192_s22 = sld [smem:[#allocation8 + $0x81]] }
  0x98   : > { %12812 = vst [vmem:[#allocation121_spill] sm:$0xff] %v8773_v58  ;;  %12813 = vst [vmem:[#allocation122_spill] sm:$0xff] %v8777_v49  ;;  %v8806_v49 = vstv %s8698_s4  ;;  %v8822_v26 = vadd.f32 %v3107_v13, %v3103_v9  ;;  %v8826_v14 = vmul.f32 %v8036_v4, %v8106_v29  ;;  %v8830_v43 = vmul.f32 %v8643_v24, %v8748_v40  ;;  %s7820_s4 = smov 1  }
  0x99   : > { %12814 = vst [vmem:[#allocation123_spill] sm:$0xff] %v8781_v12  ;;  %12815 = vst [vmem:[#allocation124_spill] sm:$0xff] %v8785_v21  ;;  %2671 = vrot.lane.b32.xlu1 %v12816_v19, %s7819_s3  ;;  %2669 = vrot.lane.b32.xlu0 %v12817_v36, %s7819_s3  ;;  %v8803_v12 = vmul.f32 %v8624_v11, %v8748_v40  ;;  %v8816_v19 = vmul.f32 %v8598_v50, %v8771_v56  ;;  %v8881_v21 = vld [vmem:[%s8025_s27 + $0x68] sm:$0x1f] }
  0x9a   : > { %12818 = vst [vmem:[#allocation125_spill] sm:$0xff] %v8795_v15  ;;  %12819 = vst [vmem:[#allocation126_spill] sm:$0xff] %v8799_v22  ;;  %v8820_v36 = vmul.f32 %v8601_v37, %v8771_v56  ;;  %v8842_v9 = vmul.f32 %v8028_v1, %v8106_v29  ;;  %v8846_v13 = vmul.f32 %v8672_v17, %v8771_v56 }
  0x9b   : > { %12820 = vst [vmem:[#allocation127_spill] sm:$0xff] %v8803_v12  ;;  %12821 = vst [vmem:[#allocation128_spill] sm:$0xff] %v8806_v49  ;;  %v8862_v58 = vmul.f32 %v8679_v27, %v8771_v56  ;;  %v8866_v60 = vmul.f32 %v8604_v8, %v8806_v49  ;;  %v8889_v22 = vmul.f32 %v8413_v2, %v8262_v18 }
  0x9c   : > { %12822 = vst [vmem:[#allocation129_spill] sm:$0xff] %v8808_v45  ;;  %12823 = vst [vmem:[#allocation130_spill] sm:$0xff] %v8812_v46  ;;  %v8884_v45 = vstv %s8760_s30  ;;  %v8905_v12 = vmul.f32 %v8467_v38, %v8262_v18  ;;  %v8909_v2 = vmul.f32 %v8484_v48, %v8262_v18  ;;  %v12847_v46 = vld [vmem:[#allocation42_spill] sm:$0xff]  ;;  %v8925_v48 = vmul.f32 %v8679_v27, %v8833_v41  ;;  %s7193_s30 = sld [smem:[#allocation8 + $0x101]] }
  0x9d   : > { %12824 = vst [vmem:[#allocation131_spill] sm:$0xff] %v8816_v19  ;;  %12825 = vst [vmem:[#allocation132_spill] sm:$0xff] %v8820_v36  ;;  %3163 = vrot.lane.b32.xlu1 %v8304_v57, %s7819_s3  ;;  %3161 = vrot.lane.b32.xlu0 %v8308_v33, %s7819_s3  ;;  %v8874_v57 = vmul.f32 %v8624_v11, %v8806_v49  ;;  %v8878_v33 = vmul.f32 %v8643_v24, %v8806_v49 }
  0x9e   : > { %12826 = vst [vmem:[#allocation133_spill] sm:$0xff] %v8822_v26  ;;  %12827 = vst [vmem:[#allocation134_spill] sm:$0xff] %v8826_v14  ;;  %v8850_v26 = vmul.f32 %v8581_v16, %v8806_v49  ;;  %v8900_v14 = vld [vmem:[%s8025_s27 + $0x60] sm:$0x1f]  ;;  %v1945_v19 = vmul.f32 %v8033_v3, %v8294_v62 }
  0x9f   : > { %12828 = vst [vmem:[#allocation135_spill] sm:$0xff] %v8830_v43  ;;  %12829 = vst [vmem:[#allocation136_spill] sm:$0xff] %v8833_v41  ;;  %v8913_v43 = vmul.f32 %v8672_v17, %v8833_v41  ;;  %v12880_v49 = vld [vmem:[#allocation30_spill] sm:$0xff] }
  0xa0   : > { %12830 = vst [vmem:[#allocation137_spill] sm:$0xff] %v8842_v9  ;;  %12831 = vst [vmem:[#allocation138_spill] sm:$0xff] %v8846_v13  ;;  %v8870_v9 = vmul.f32 %v8410_v51, %v8262_v18  ;;  %v8893_v51 = vmul.f32 %v8598_v50, %v8833_v41  ;;  %v12881_v52 = vrot.slane %v12880_v49, 1 }
  0xa1   : > { %12832 = vst [vmem:[#allocation139_spill] sm:$0xff] %v8850_v26  ;;  %12833 = vst [vmem:[#allocation140_spill] sm:$0xff] %v8862_v58  ;;  %3167 = vrot.lane.b32.xlu1 %v8312_v34, %s7819_s3  ;;  %3165 = vrot.lane.b32.xlu0 %v12847_v46, %s7819_s3  ;;  %v12849_v26 = vld [vmem:[#allocation22_spill] sm:$0xff]  ;;  %v8936_v34 = vld [vmem:[%s8025_s27 + $0x128] sm:$0x1f] }
  0xa2   : > { %12834 = vst [vmem:[#allocation141_spill] sm:$0xff] %v8866_v60  ;;  %12835 = vst [vmem:[#allocation142_spill] sm:$0xff] %v8870_v9  ;;  %v8897_v9 = vmul.f32 %v8601_v37, %v8833_v41  ;;  %v8929_v18 = vmul.f32 %v8043_v7, %v12849_v26  ;;  %v8942_v38 = vmul.f32 %v8033_v3, %v12849_v26  ;;  %v12864_v58 = vld [vmem:[#allocation27_spill] sm:$0xff] }
  0xa3   : > { %12836 = vst [vmem:[#allocation143_spill] sm:$0xff] %v8874_v57  ;;  %12837 = vst [vmem:[#allocation144_spill] sm:$0xff] %v8878_v33  ;;  %v8946_v60 = vmul.f32 %v8900_v14, %v8884_v45  ;;  %v8959_v15 = vmul.f32 %v8036_v4, %v12849_v26  ;;  %v8972_v33 = vmul.f32 %v8028_v1, %v12849_v26  ;;  %v8975_v57 = vstv %s8852_s24  ;;  %s7195_s24 = sld [smem:[#allocation8 + $0x2]] }
  0xa4   : > { %12838 = vst [vmem:[#allocation145_spill] sm:$0xff] %v8881_v21  ;;  %12839 = vst [vmem:[#allocation146_spill] sm:$0xff] %v8884_v45  ;;  %v12865_v13 = vrot.slane %v12864_v58, 1  ;;  %v9016_v42 = vmul.f32 %v8601_v37, %v8975_v57 }
  0xa5   : > { %12840 = vst [vmem:[#allocation147_spill] sm:$0xff] %v8889_v22  ;;  %12841 = vst [vmem:[#allocation148_spill] sm:$0xff] %v8893_v51  ;;  %v8916_v22 = vld [vmem:[%s8025_s27 + $0x78] sm:$0x1f] }
  0xa6   : > { %12842 = vst [vmem:[#allocation149_spill] sm:$0xff] %v8897_v9  ;;  %12843 = vst [vmem:[#allocation150_spill] sm:$0xff] %v8900_v14  ;;  %v8963_v46 = vmul.f32 %v8916_v22, %v8884_v45  ;;  %v12862_v9 = vld [vmem:[#allocation26_spill] sm:$0xff]  ;;  %2853 = vrot.lane.b32.xlu0 %v12865_v13, %s7819_s3 }
  0xa7   : > { %12844 = vst [vmem:[#allocation151_spill] sm:$0xff] %v8905_v12  ;;  %12845 = vst [vmem:[#allocation152_spill] sm:$0xff] %v8909_v2  ;;  %v8933_v2 = vmul.f32 %v8881_v21, %v8884_v45  ;;  %v8966_v12 = vstv %s8837_s1  ;;  %v12863_v51 = vrot.slane %v12862_v9, 1  ;;  %v12867_v9 = vld [vmem:[#allocation25_spill] sm:$0xff]  ;;  %s3289_s1 = sld [smem:[#allocation8]] }
  0xa8   : > { %12846 = vst [vmem:[#allocation153_spill] sm:$0xff] %v8913_v43  ;;  %12848 = vst [vmem:[#allocation42_spill] sm:$0xff] %v8925_v48  ;;  %v8949_v48 = vld [vmem:[%s8025_s27 + $0x70] sm:$0x1f]  ;;  %v8955_v43 = vstv %s8835_s23  ;;  %v9003_v58 = vmul.f32 %v8033_v3, %v12867_v9  ;;  %v9007_v13 = vmul.f32 %v8581_v16, %v8966_v12  ;;  %v9031_v36 = vmul.f32 %v8028_v1, %v12867_v9  ;;  %s7194_s23 = sld [smem:[#allocation8 + $0x181]] }
  0xa9   : > { %12850 = vst [vmem:[#allocation154_spill] sm:$0xff] %v8929_v18  ;;  %12851 = vst [vmem:[#allocation155_spill] sm:$0xff] %v8933_v2  ;;  %v8952_v18 = vld [vmem:[%s8025_s27 + $0x120] sm:$0x1f]  ;;  %2855 = vrot.lane.b32.xlu1 %v12863_v51, %s7819_s3  ;;  %v8999_v51 = vmul.f32 %v8043_v7, %v12867_v9  ;;  %v9012_v2 = vmul.f32 %v8598_v50, %v8975_v57 }
  0xaa   : > { %12852 = vst [vmem:[#allocation156_spill] sm:$0xff] %v8936_v34  ;;  %12853 = vst [vmem:[#allocation157_spill] sm:$0xff] %v8942_v38  ;;  %v1946_v38 = vmul.f32 %v8043_v7, %v8294_v62  ;;  %v1949_v28 = vmul.f32 %v8952_v18, %v8315_v63  ;;  %2857 = vrot.lane.b32.xlu0 %v12881_v52, %s7819_s3 }
  0xab   : > { %12854 = vst [vmem:[#allocation158_spill] sm:$0xff] %v8946_v60  ;;  %12855 = vst [vmem:[#allocation159_spill] sm:$0xff] %v8949_v48  ;;  %v9023_v60 = vld [vmem:[%s8025_s27 + $0x138] sm:$0x1f] }
  0xac   : > { %12856 = vst [vmem:[#allocation160_spill] sm:$0xff] %v8955_v43  ;;  %12857 = vst [vmem:[#allocation161_spill] sm:$0xff] %v8959_v15  ;;  %v1950_v15 = vmul.f32 %v8936_v34, %v8315_v63  ;;  %v1952_v52 = vmul.f32 %v9023_v60, %v8315_v63  ;;  %v12890_v43 = vld [vmem:[#allocation31_spill] sm:$0xff] }
  0xad   : > { %12858 = vst [vmem:[#allocation162_spill] sm:$0xff] %v8963_v46  ;;  %12859 = vst [vmem:[#allocation163_spill] sm:$0xff] %v8966_v12 }
  0xae   : > { %12860 = vst [vmem:[#allocation164_spill] sm:$0xff] %v8972_v33  ;;  %12861 = vst [vmem:[#allocation165_spill] sm:$0xff] %v8975_v57  ;;  %v8990_v33 = vmul.f32 %v8949_v48, %v8884_v45  ;;  %v1954_v50 = vadd.f32 %v1950_v15, %v1946_v38  ;;  %v1948_v38 = vmul.f32 %v8036_v4, %v8294_v62 }
  0xaf   : > { %12868 = vst [vmem:[#allocation27_spill] sm:$0xff] %v8999_v51  ;;  %12869 = vst [vmem:[#allocation166_spill] sm:$0xff] %v9003_v58  ;;  %v9020_v51 = vmul.f32 %v8604_v8, %v8966_v12  ;;  %v9027_v58 = vmul.f32 %v8036_v4, %v12867_v9 }
  0xb0   : > { %12866 = vst [vmem:[#allocation26_spill] sm:$0xff] %v8990_v33  ;;  %12870 = vst [vmem:[#allocation167_spill] sm:$0xff] %v9007_v13  ;;  %v12888_v13 = vld [vmem:[#allocation14_spill] sm:$0xff]  ;;  %v12889_v33 = vld [vmem:[#allocation15_spill] sm:$0xff]  ;;  %v1956_v26 = vadd.f32 %v1952_v52, %v1948_v38 }
  0xb1   : > { %12871 = vst [vmem:[#allocation168_spill] sm:$0xff] %v9012_v2  ;;  %12872 = vst [vmem:[#allocation169_spill] sm:$0xff] %v9016_v42  ;;  %v12877_v2 = vld [vmem:[#allocation11_spill] sm:$0xff]  ;;  %v12878_v42 = vld [vmem:[#allocation28_spill] sm:$0xff]  ;;  %v1965_v9 = vmul.f32 %v12889_v33, %v8376_v59 }
  0xb2   : > { %12873 = vst [vmem:[#allocation170_spill] sm:$0xff] %v9020_v51  ;;  %12874 = vst [vmem:[#allocation171_spill] sm:$0xff] %v9023_v60  ;;  %v1958_v37 = vmul.f32 %v8362_v55, %v12877_v2  ;;  %v12879_v46 = vrot.slane %v12878_v42, 1  ;;  %v1957_v15 = vmul.f32 %v8297_v61, %v12877_v2  ;;  %v9051_v42 = vmul.f32 %v8672_v17, %v8975_v57  ;;  %v12894_v38 = vld [vmem:[#allocation32_spill] sm:$0xff]  ;;  %v9112_v51 = vld [vmem:[%s8025_s27 + $0x1b8] sm:$0x1f] }
  0xb3   : > { %12875 = vst [vmem:[#allocation172_spill] sm:$0xff] %v9027_v58  ;;  %12876 = vst [vmem:[#allocation173_spill] sm:$0xff] %v9031_v36  ;;  %v1953_v58 = vadd.f32 %v1949_v28, %v1945_v19  ;;  %v1960_v49 = vmul.f32 %v8318_v0, %v12877_v2  ;;  %v9058_v28 = vld [vmem:[%s8025_s27 + $0x130] sm:$0x1f]  ;;  %v9062_v19 = vmul.f32 %v8624_v11, %v8966_v12  ;;  %v9073_v36 = vstv %s8968_s5  ;;  %v9087_v0 = vld [vmem:[%s8025_s27 + $0x1a8] sm:$0x1f] }
  0xb4   : > { %2859 = vrot.lane.b32.xlu1 %v12879_v46, %s7819_s3  ;;  %12882 = vst [vmem:[#allocation28_spill] sm:$0xff] %v9051_v42  ;;  %12883 = vst [vmem:[#allocation30_spill] sm:$0xff] %v9058_v28  ;;  %v9066_v46 = vmul.f32 %v8679_v27, %v8975_v57  ;;  %v9070_v17 = vmul.f32 %v8643_v24, %v8966_v12  ;;  %v1962_v41 = vadd.f32 %v1958_v37, %v1954_v50  ;;  %v12892_v57 = vld [vmem:[#allocation33_spill] sm:$0xff]  ;;  %s7188_s5 = sld [smem:[#allocation8 + $0x80]] }
  0xb5   : > { %12884 = vst [vmem:[#allocation174_spill] sm:$0xff] %v9062_v19  ;;  %12887 = vst [vmem:[#allocation177_spill] sm:$0xff] %v9073_v36  ;;  %v1966_v42 = vmul.f32 %v12888_v13, %v8376_v59  ;;  %v12891_v27 = vrot.slane %v12890_v43, 1  ;;  %v1961_v50 = vadd.f32 %v1957_v15, %v1953_v58  ;;  %v1947_v37 = vmul.f32 %v8028_v1, %v8294_v62  ;;  %v12897_v58 = vld [vmem:[#allocation17_spill] sm:$0xff] }
  0xb6   : > { %12885 = vst [vmem:[#allocation175_spill] sm:$0xff] %v9066_v46  ;;  %12886 = vst [vmem:[#allocation176_spill] sm:$0xff] %v9070_v17  ;;  %v12893_v46 = vrot.slane %v12892_v57, 1  ;;  %v1951_v60 = vmul.f32 %v9058_v28, %v8315_v63  ;;  %v9095_v52 = vmul.f32 %v8043_v7, %v12894_v38  ;;  %v9099_v43 = vmul.f32 %v8033_v3, %v12894_v38  ;;  %v9102_v57 = vld [vmem:[%s8025_s27 + $0x1a0] sm:$0x1f] }
  0xb7   : > { %v1968_v15 = vmul.f32 %v12897_v58, %v8376_v59  ;;  %v9109_v12 = vmul.f32 %v8881_v21, %v9073_v36  ;;  %12899 = vst [vmem:[#allocation33_spill] sm:$0xff] %v9112_v51  ;;  %v1959_v63 = vmul.f32 %v8283_v23, %v12877_v2  ;;  %v1974_v58 = vmul.f32 %v9087_v0, %v8621_v44 }
  0xb8   : > { %3043 = vrot.lane.b32.xlu1 %v12891_v27, %s7819_s3  ;;  %3041 = vrot.lane.b32.xlu0 %v12893_v46, %s7819_s3  ;;  %12895 = vst [vmem:[#allocation14_spill] sm:$0xff] %v9095_v52  ;;  %12896 = vst [vmem:[#allocation15_spill] sm:$0xff] %v9099_v43  ;;  %v1964_v46 = vadd.f32 %v1960_v49, %v1956_v26  ;;  %v1955_v52 = vadd.f32 %v1951_v60, %v1947_v37  ;;  %v12901_v27 = vld [vmem:[#allocation34_spill] sm:$0xff]  ;;  %v12903_v60 = vld [vmem:[#allocation35_spill] sm:$0xff]  ;;  %v9130_v2 = vstv %s9042_s2  ;;  %s11368_s2 = sld [smem:[#allocation8 + $0x100]] }
  0xb9   : > { %12898 = vst [vmem:[#allocation31_spill] sm:$0xff] %v9109_v12  ;;  %v9119_v26 = vmul.f32 %v8900_v14, %v9073_v36  ;;  %v1970_v49 = vadd.f32 %v1966_v42, %v1962_v41  ;;  %v12902_v19 = vrot.slane %v12901_v27, 1  ;;  %v12904_v37 = vrot.slane %v12903_v60, 1  ;;  %12905 = vst [vmem:[#allocation34_spill] sm:$0xff] %v9130_v2  ;;  %v12913_v12 = vld [vmem:[#allocation36_spill] sm:$0xff] }
  0xba   : > { %v9134_v43 = vmul.f32 %v8036_v4, %v12894_v38  ;;  %v1969_v41 = vadd.f32 %v1965_v9, %v1961_v50  ;;  %v1973_v42 = vmul.f32 %v9102_v57, %v8621_v44  ;;  %v9140_v17 = vmul.f32 %v8028_v1, %v12894_v38  ;;  %v12910_v1 = vld [vmem:[#allocation18_spill] sm:$0xff]  ;;  %v9165_v38 = vld [vmem:[%s8025_s27 + $0x1b0] sm:$0x1f] }
  0xbb   : > { %12900 = vst [vmem:[#allocation17_spill] sm:$0xff] %v9119_v26  ;;  %v1972_v27 = vadd.f32 %v1968_v15, %v1964_v46  ;;  %v1976_v60 = vmul.f32 %v9112_v51, %v8621_v44  ;;  %v9151_v9 = vmul.f32 %v8949_v48, %v9073_v36  ;;  %v1963_v50 = vadd.f32 %v1959_v63, %v1955_v52  ;;  %v12915_v52 = vld [vmem:[#allocation37_spill] sm:$0xff] }
  0xbc   : > { %3047 = vrot.lane.b32.xlu1 %v12902_v19, %s7819_s3  ;;  %3045 = vrot.lane.b32.xlu0 %v12904_v37, %s7819_s3  ;;  %12906 = vst [vmem:[#allocation35_spill] sm:$0xff] %v9134_v43  ;;  %12907 = vst [vmem:[#allocation178_spill] sm:$0xff] %v9140_v17  ;;  %v9144_v19 = vmul.f32 %v8916_v22, %v9073_v36  ;;  %v1967_v37 = vmul.f32 %v12910_v1, %v8376_v59  ;;  %v9156_v17 = vld [vmem:[%s8025_s27 + $0x28] sm:$0x1f]  ;;  %v12914_v63 = vrot.slane %v12913_v12, 1 }
  0xbd   : > { %12909 = vst [vmem:[#allocation180_spill] sm:$0xff] %v9151_v9  ;;  %12911 = vst [vmem:[#allocation18_spill] sm:$0xff] %v9156_v17  ;;  %v1978_v43 = vadd.f32 %v1974_v58, %v1970_v49  ;;  %v1982_v46 = vmul.f32 %v8407_v53, %v8081_v20  ;;  %v1990_v15 = vmul.f32 %v8578_v47, %v8098_v25  ;;  %v12916_v1 = vrot.slane %v12915_v52, 1  ;;  %v9175_v58 = vld [vmem:[%s8025_s27 + $0x20] sm:$0x1f]  ;;  %v12919_v52 = vld [vmem:[#allocation56_spill] sm:$0xff] }
  0xbe   : > { %12908 = vst [vmem:[#allocation179_spill] sm:$0xff] %v9144_v19  ;;  %v1981_v4 = vmul.f32 %v8343_v5, %v8081_v20  ;;  %12912 = vst [vmem:[#allocation181_spill] sm:$0xff] %v9165_v38  ;;  %v1977_v59 = vadd.f32 %v1973_v42, %v1969_v41  ;;  %v1989_v62 = vmul.f32 %v8578_v47, %v8109_v30  ;;  %v9182_v48 = vld [vmem:[%s8025_s27 + $0x38] sm:$0x1f]  ;;  %v12920_v49 = vld [vmem:[#allocation12_spill] sm:$0xff] }
  0xbf   : > { %12917 = vst [vmem:[#allocation36_spill] sm:$0xff] %v9175_v58  ;;  %v1984_v2 = vmul.f32 %v8393_v10, %v8081_v20  ;;  %12918 = vst [vmem:[#allocation37_spill] sm:$0xff] %v9182_v48  ;;  %v1980_v51 = vadd.f32 %v1976_v60, %v1972_v27  ;;  %v1992_v12 = vmul.f32 %v8578_v47, %v8112_v31  ;;  %v1998_v60 = vrot.slane %v1990_v15, 1 }
  0xc0   : > { %3231 = vrot.lane.b32.xlu1 %v12914_v63, %s7819_s3  ;;  %3229 = vrot.lane.b32.xlu0 %v12916_v1, %s7819_s3  ;;  %v2094_v63 = vmul.f32 %v8043_v7, %v8396_v54  ;;  %v2098_v1 = vmul.f32 %v8936_v34, %v12919_v52  ;;  %v2010_v41 = vmul.f32 %v9156_v17, %v8884_v45  ;;  %v12921_v34 = vld [vmem:[#allocation43_spill] sm:$0xff] }
  0xc1   : > { %v1971_v42 = vadd.f32 %v1967_v37, %v1963_v50  ;;  %v1975_v30 = vmul.f32 %v9165_v38, %v8621_v44  ;;  %v2106_v26 = vmul.f32 %v8362_v55, %v12920_v49  ;;  %v1986_v27 = vadd.f32 %v1982_v46, %v1978_v43 }
  0xc2   : > { %v2009_v31 = vmul.f32 %v9175_v58, %v8884_v45  ;;  %v2102_v7 = vadd.f32 %v2098_v1, %v2094_v63  ;;  %v12922_v10 = vrot.slane %v12921_v34, 1  ;;  %v12923_v50 = vrot.slane %v8333_v39, 1  ;;  %v9215_v34 = vld [vmem:[%s8025_s27 + $0x30] sm:$0x1f] }
  0xc3   : > { %v2030_v37 = vmul.f32 %v8581_v16, %v8106_v29  ;;  %v1985_v44 = vadd.f32 %v1981_v4, %v1977_v59  ;;  %v1997_v43 = vrot.slane %v1989_v62, 1  ;;  %v2012_v46 = vmul.f32 %v9182_v48, %v8884_v45 }
  0xc4   : > { %3235 = vrot.lane.b32.xlu1 %v12922_v10, %s7819_s3  ;;  %3233 = vrot.lane.b32.xlu0 %v12923_v50, %s7819_s3  ;;  %v1988_v15 = vadd.f32 %v1984_v2, %v1980_v51  ;;  %v2000_v55 = vrot.slane %v1992_v12, 1  ;;  %v1983_v63 = vmul.f32 %v8340_v6, %v8081_v20  ;;  %v1991_v10 = vmul.f32 %v8578_v47, %v8115_v32  ;;  %v12924_v50 = vld [vmem:[#allocation63_spill] sm:$0xff]  ;;  %v12926_v32 = vld [vmem:[#allocation24_spill] sm:$0xff] }
  0xc5   : > { %v1979_v39 = vadd.f32 %v1975_v30, %v1971_v42  ;;  %v2110_v1 = vadd.f32 %v2106_v26, %v2102_v7  ;;  %v2114_v38 = vmul.f32 %v12888_v13, %v12924_v50  ;;  %v2093_v59 = vmul.f32 %v8033_v3, %v8396_v54  ;;  %v12925_v12 = vld [vmem:[#allocation23_spill] sm:$0xff] }
  0xc6   : > { %v2006_v62 = vadd.f32 %v1998_v60, %v1986_v27  ;;  %v2018_v4 = vrot.slane %v2010_v41, 1  ;;  %v2017_v2 = vrot.slane %v2009_v31, 1  ;;  %v2029_v51 = vmul.f32 %v8604_v8, %v8106_v29 }
  0xc7   : > { %v2020_v26 = vrot.slane %v2012_v46, 1  ;;  %v2032_v13 = vmul.f32 %v8624_v11, %v8106_v29  ;;  %v2097_v3 = vmul.f32 %v8952_v18, %v12919_v52  ;;  %v2105_v41 = vmul.f32 %v8297_v61, %v12920_v49 }
  0xc8   : > { %1327 = vrot.lane.b32.xlu1 %v12925_v12, %s7819_s3  ;;  %1325 = vrot.lane.b32.xlu0 %v12926_v32, %s7819_s3  ;;  %v2005_v42 = vadd.f32 %v1997_v43, %v1985_v44  ;;  %v2008_v30 = vadd.f32 %v2000_v55, %v1988_v15  ;;  %v1999_v27 = vrot.slane %v1991_v10, 1  ;;  %v2011_v60 = vmul.f32 %v9215_v34, %v8884_v45  ;;  %v12928_v44 = vld [vmem:[#allocation44_spill] sm:$0xff]  ;;  %v12929_v55 = vld [vmem:[#allocation45_spill] sm:$0xff] }
  0xc9   : > { %v1987_v31 = vadd.f32 %v1983_v63, %v1979_v39  ;;  %v2118_v7 = vadd.f32 %v2114_v38, %v2110_v1  ;;  %v2122_v46 = vmul.f32 %v9087_v0, %v8771_v56  ;;  %v2101_v12 = vadd.f32 %v2097_v3, %v2093_v59 }
  0xca   : > { %v2038_v20 = vrot.slane %v2030_v37, 1  ;;  %v9241_v47 = vstv %s9198_s25  ;;  %v2113_v61 = vmul.f32 %v12889_v33, %v12924_v50  ;;  %v2026_v38 = vadd.f32 %v2018_v4, %v2006_v62  ;;  %v9258_v4 = vld [vmem:[%s8025_s27 + $0x118] sm:$0x1f]  ;;  %s11414_s25 = sld [smem:[#allocation8 + $0x180]] }
  0xcb   : > { %12927 = vst [vmem:[#allocation43_spill] sm:$0xff] %v9241_v47  ;;  %v2037_v43 = vrot.slane %v2029_v51, 1  ;;  %v2040_v15 = vrot.slane %v2032_v13, 1  ;;  %v2109_v63 = vadd.f32 %v2105_v41, %v2101_v12  ;;  %v2025_v10 = vadd.f32 %v2017_v2, %v2005_v42  ;;  %12930 = vst [vmem:[#allocation23_spill] sm:$0xff] %v9258_v4  ;;  %v12931_v51 = vld [vmem:[#allocation171_spill] sm:$0xff]  ;;  %v12932_v13 = vld [vmem:[#allocation46_spill] sm:$0xff] }
  0xcc   : > { %1331 = vrot.lane.b32.xlu1 %v12928_v44, %s7819_s3  ;;  %1329 = vrot.lane.b32.xlu0 %v12929_v55, %s7819_s3  ;;  %v2028_v39 = vadd.f32 %v2020_v26, %v2008_v30  ;;  %v2019_v37 = vrot.slane %v2011_v60, 1  ;;  %v2031_v1 = vmul.f32 %v8643_v24, %v8106_v29  ;;  %v2007_v59 = vadd.f32 %v1999_v27, %v1987_v31  ;;  %v12933_v41 = vld [vmem:[#allocation47_spill] sm:$0xff] }
  0xcd   : > { %v2126_v33 = vadd.f32 %v2122_v46, %v2118_v7  ;;  %v2130_v3 = vmul.f32 %v8407_v53, %v8123_v35  ;;  %v2138_v44 = vmul.f32 %v8748_v40, %v8098_v25  ;;  %v2117_v55 = vadd.f32 %v2113_v61, %v2109_v63  ;;  %v12936_v46 = vld [vmem:[#allocation41_spill] sm:$0xff]  ;;  %v12944_v25 = vld [vmem:[#allocation22_spill] sm:$0xff] }
  0xce   : > { %v2121_v62 = vmul.f32 %v9102_v57, %v8771_v56  ;;  %v2096_v2 = vmul.f32 %v9258_v4, %v8396_v54  ;;  %v2100_v26 = vmul.f32 %v12931_v51, %v12919_v52  ;;  %v2046_v42 = vadd.f32 %v2038_v20, %v2026_v38 }
  0xcf   : > { %v9270_v30 = vstv %s9227_s26  ;;  %v9274_v27 = vmul.f32 %v8881_v21, %v9241_v47  ;;  %v2045_v60 = vadd.f32 %v2037_v43, %v2025_v10  ;;  %v2039_v31 = vrot.slane %v2031_v1, 1  ;;  %v9285_v10 = vld [vmem:[%s8025_s27] sm:$0x1f]  ;;  %s11469_s26 = sld [smem:[#allocation8 + $0x82]] }
  0xd0   : > { %1487 = vrot.lane.b32.xlu1 %v12932_v13, %s7819_s3  ;;  %1485 = vrot.lane.b32.xlu0 %v12933_v41, %s7819_s3  ;;  %12934 = vst [vmem:[#allocation24_spill] sm:$0xff] %v9270_v30  ;;  %v2104_v7 = vadd.f32 %v2100_v26, %v2096_v2  ;;  %v2108_v12 = vmul.f32 %v12936_v46, %v12920_v49  ;;  %v2146_v13 = vrot.slane %v2138_v44, 1  ;;  %12937 = vst [vmem:[#allocation45_spill] sm:$0xff] %v9285_v10  ;;  %v12938_v2 = vld [vmem:[#allocation48_spill] sm:$0xff]  ;;  %v9308_v26 = vld [vmem:[%s8025_s27 + $0x198] sm:$0x1f] }
  0xd1   : > { %12935 = vst [vmem:[#allocation44_spill] sm:$0xff] %v9274_v27  ;;  %v2048_v61 = vadd.f32 %v2040_v15, %v2028_v39  ;;  %v2027_v63 = vadd.f32 %v2019_v37, %v2007_v59  ;;  %v2158_v20 = vmul.f32 %v9156_v17, %v9073_v36  ;;  %v2134_v38 = vadd.f32 %v2130_v3, %v2126_v33  ;;  %v12939_v15 = vld [vmem:[#allocation50_spill] sm:$0xff]  ;;  %v9299_v59 = vld [vmem:[%s8025_s27 + $0x110] sm:$0x1f] }
  0xd2   : > { %v2125_v41 = vadd.f32 %v2121_v62, %v2117_v55  ;;  %v2129_v43 = vmul.f32 %v8343_v5, %v8123_v35  ;;  %v2137_v1 = vmul.f32 %v9285_v10, %v8748_v40  ;;  %v9296_v37 = vmul.f32 %v8900_v14, %v9241_v47  ;;  %12941 = vst [vmem:[#allocation46_spill] sm:$0xff] %v9299_v59  ;;  %v12942_v3 = vld [vmem:[#allocation160_spill] sm:$0xff] }
  0xd3   : > { %v2095_v5 = vmul.f32 %v9299_v59, %v8396_v54  ;;  %v2099_v33 = vmul.f32 %v9058_v28, %v12919_v52  ;;  %v2050_v44 = vadd.f32 %v2046_v42, %v12942_v3  ;;  %v2049_v55 = vadd.f32 %v2045_v60, %v12942_v3  ;;  %12943 = vst [vmem:[#allocation47_spill] sm:$0xff] %v9308_v26  ;;  %v12945_v60 = vld [vmem:[#allocation52_spill] sm:$0xff]  ;;  %v12952_v54 = vld [vmem:[#allocation59_spill] sm:$0xff] }
  0xd4   : > { %1491 = vrot.lane.b32.xlu1 %v12938_v2, %s7819_s3  ;;  %1489 = vrot.lane.b32.xlu0 %v12939_v15, %s7819_s3  ;;  %12940 = vst [vmem:[#allocation171_spill] sm:$0xff] %v9296_v37  ;;  %v2112_v62 = vadd.f32 %v2108_v12, %v2104_v7  ;;  %v2116_v46 = vmul.f32 %v9308_v26, %v12924_v50  ;;  %v2166_v39 = vrot.slane %v2158_v20, 1  ;;  %v2145_v52 = vrot.slane %v2137_v1, 1  ;;  %v12946_v7 = vld [vmem:[#allocation55_spill] sm:$0xff]  ;;  %v9333_v1 = vpop.permute.xlu1 %2561  ;;  %v12953_v37 = vld [vmem:[#allocation60_spill] sm:$0xff] }
  0xd5   : > { %v2052_v2 = vadd.f32 %v2048_v61, %v12942_v3  ;;  %v2047_v15 = vadd.f32 %v2039_v31, %v2027_v63  ;;  %v2178_v32 = vmul.f32 %v8581_v16, %v12944_v25  ;;  %v2154_v29 = vadd.f32 %v2146_v13, %v2134_v38 }
  0xd6   : > { %v2133_v45 = vadd.f32 %v2129_v43, %v2125_v41  ;;  %v2157_v42 = vmul.f32 %v9175_v58, %v9073_v36  ;;  %v9324_v31 = vmul.f32 %v8916_v22, %v9241_v47  ;;  %v2103_v61 = vadd.f32 %v2099_v33, %v2095_v5  ;;  %v12949_v41 = vld [vmem:[#allocation33_spill] sm:$0xff]  ;;  %v12950_v5 = vld [vmem:[#allocation159_spill] sm:$0xff] }
  0xd7   : > { %v2107_v63 = vmul.f32 %v8283_v23, %v12920_v49  ;;  %v2054_v13 = vmax.f32 %v2050_v44, 0.0  ;;  %v9329_v20 = vstv %s9276_s20  ;;  %v2120_v38 = vadd.f32 %v2116_v46, %v2112_v62  ;;  %s7197_s20 = sld [smem:[#allocation8 + $0x102]] }
  0xd8   : > { %1647 = vrot.lane.b32.xlu1 %v12945_v60, %s7819_s3  ;;  %1645 = vrot.lane.b32.xlu0 %v12946_v7, %s7819_s3  ;;  %12947 = vst [vmem:[#allocation41_spill] sm:$0xff] %v9324_v31  ;;  %12948 = vst [vmem:[#allocation48_spill] sm:$0xff] %v9329_v20  ;;  %v2124_v43 = vmul.f32 %v12949_v41, %v8771_v56  ;;  %v9335_v60 = vpop.permute.xlu0 %2557  ;;  %v2053_v7 = vmax.f32 %v2049_v55, 0.0  ;;  %v2051_v12 = vadd.f32 %v2047_v15, %v12942_v3 }
  0xd9   : > { %v9340_v33 = vmul.f32 %v12950_v5, %v9241_v47  ;;  %v2186_v23 = vrot.slane %v2178_v32, 1  ;;  %v2056_v44 = vmax.f32 %v2052_v2, 0.0  ;;  %v2174_v62 = vadd.f32 %v2166_v39, %v2154_v29  ;;  %v9350_v32 = vld [vmem:[%s8025_s27 + $0x190] sm:$0x1f] }
  0xda   : > { %v2153_v46 = vadd.f32 %v2145_v52, %v2133_v45  ;;  %v2165_v49 = vrot.slane %v2157_v42, 1  ;;  %v2177_v15 = vmul.f32 %v8604_v8, %v12944_v25  ;;  %v2111_v27 = vadd.f32 %v2107_v63, %v2103_v61  ;;  %12954 = vst [vmem:[#allocation52_spill] sm:$0xff] %v9350_v32  ;;  %v12955_v45 = vld [vmem:[#allocation53_spill] sm:$0xff]  ;;  %v9368_v61 = vpop.permute.xlu1 %2563 }
  0xdb   : > { %12951 = vst [vmem:[#allocation50_spill] sm:$0xff] %v9340_v33  ;;  %v2115_v2 = vmul.f32 %v9350_v32, %v12924_v50  ;;  %v2128_v29 = vadd.f32 %v2124_v43, %v2120_v38  ;;  %v9359_v52 = vld [vmem:[%s8025_s27 + $0x18] sm:$0x1f]  ;;  %v2062_v55 = vrot.slane %v2054_v13, 7  ;;  %v2055_v50 = vmax.f32 %v2051_v12, 0.0 }
  0xdc   : > { %1651 = vrot.lane.b32.xlu1 %v12952_v54, %s7819_s3  ;;  %1649 = vrot.lane.b32.xlu0 %v12953_v37, %s7819_s3  ;;  %v2132_v54 = vmul.f32 %v12955_v45, %v8123_v35  ;;  %12956 = vst [vmem:[#allocation55_spill] sm:$0xff] %v9359_v52  ;;  %v2140_v39 = vmul.f32 %v9359_v52, %v8748_v40  ;;  %v9364_v37 = vld [vmem:[%s8025_s27 + $0x108] sm:$0x1f]  ;;  %v12958_v8 = vld [vmem:[#allocation69_spill] sm:$0xff]  ;;  %v9370_v63 = vpop.permute.xlu0 %2559  ;;  %v2061_v3 = vrot.slane %v2053_v7, 7  ;;  %v2064_v9 = vrot.slane %v2056_v44, 7 }
  0xdd   : > { %12957 = vst [vmem:[#allocation33_spill] sm:$0xff] %v9364_v37  ;;  %v2242_v42 = vmul.f32 %v9364_v37, %v12958_v8  ;;  %v12959_v43 = vld [vmem:[#allocation73_spill] sm:$0xff]  ;;  %v12960_v45 = vld [vmem:[#allocation156_spill] sm:$0xff]  ;;  %v2194_v19 = vadd.f32 %v2186_v23, %v2174_v62  ;;  %v2173_v32 = vadd.f32 %v2165_v49, %v2153_v46  ;;  %v12961_v52 = vld [vmem:[#allocation67_spill] sm:$0xff]  ;;  %v2185_v28 = vrot.slane %v2177_v15, 1 }
  0xde   : > { %v2246_v31 = vmul.f32 %v12960_v45, %v12959_v43  ;;  %v12962_v37 = vld [vmem:[#allocation68_spill] sm:$0xff]  ;;  %v2119_v59 = vadd.f32 %v2115_v2, %v2111_v27  ;;  %v12963_v12 = vld [vmem:[#allocation181_spill] sm:$0xff]  ;;  %v2136_v33 = vadd.f32 %v2132_v54, %v2128_v29  ;;  %v2148_v45 = vrot.slane %v2140_v39, 1  ;;  %v9385_v62 = vpop.permute.xlu1 %2747  ;;  %v12970_v54 = vld [vmem:[#allocation34_spill] sm:$0xff] }
  0xdf   : > { %v2123_v13 = vmul.f32 %v12963_v12, %v8771_v56  ;;  %v2160_v7 = vmul.f32 %v9182_v48, %v9073_v36  ;;  %v12964_v49 = vld [vmem:[#allocation13_spill] sm:$0xff]  ;;  %v9391_v27 = vmul.f32 %v8881_v21, %v9329_v20  ;;  %v9398_v15 = vld [vmem:[%s8025_s27 + $0x188] sm:$0x1f]  ;;  %v2198_v39 = vadd.f32 %v2194_v19, %v12970_v54 }
  0xe0   : > { %1367 = vrot.lane.b32.xlu1 %v12961_v52, %s7819_s3  ;;  %1365 = vrot.lane.b32.xlu0 %v12962_v37, %s7819_s3  ;;  %v2250_v38 = vadd.f32 %v2246_v31, %v2242_v42  ;;  %v12965_v23 = vld [vmem:[#allocation49_spill] sm:$0xff]  ;;  %v9387_v46 = vpop.permute.xlu0 %2745  ;;  %v2063_v52 = vrot.slane %v2055_v50, 7  ;;  %v9395_v31 = vmul.f32 %v8900_v14, %v9329_v20  ;;  %12968 = vst [vmem:[#allocation60_spill] sm:$0xff] %v9398_v15  ;;  %v12972_v56 = vld [vmem:[#allocation75_spill] sm:$0xff]  ;;  %v9420_v14 = vsel %vm883_vm0, 0.0, %v2061_v3 }
  0xe1   : > { %v2254_v44 = vmul.f32 %v12965_v23, %v12964_v49  ;;  %12966 = vst [vmem:[#allocation159_spill] sm:$0xff] %v9391_v27  ;;  %v12969_v2 = vld [vmem:[#allocation81_spill] sm:$0xff]  ;;  %v2180_v37 = vmul.f32 %v8624_v11, %v12944_v25  ;;  %v2131_v50 = vmul.f32 %v8340_v6, %v8123_v35  ;;  %v2193_v19 = vadd.f32 %v2185_v28, %v2173_v32  ;;  %v9473_v27 = vld [vmem:[%s8025_s27 + $0x140] sm:$0x1f] }
  0xe2   : > { %12967 = vst [vmem:[#allocation59_spill] sm:$0xff] %v9395_v31  ;;  %v2262_v29 = vmul.f32 %v9398_v15, %v12969_v2  ;;  %v9408_v42 = vld [vmem:[%s8025_s27 + $0x10] sm:$0x1f]  ;;  %v9417_v15 = vsel %vm883_vm0, 0.0, %v2062_v55  ;;  %v2127_v48 = vadd.f32 %v2123_v13, %v2119_v59  ;;  %12975 = vst [vmem:[#allocation68_spill] sm:$0xff] %v9420_v14  ;;  %v9423_v6 = vstv %s9354_s0  ;;  %s7198_s0 = sld [smem:[#allocation8 + $0x182]] }
  0xe3   : > { %12971 = vst [vmem:[#allocation53_spill] sm:$0xff] %v9408_v42  ;;  %v2139_v23 = vmul.f32 %v9408_v42, %v8748_v40  ;;  %v12973_v12 = vld [vmem:[#allocation77_spill] sm:$0xff]  ;;  %12974 = vst [vmem:[#allocation67_spill] sm:$0xff] %v9417_v15  ;;  %v2258_v11 = vadd.f32 %v2254_v44, %v2250_v38  ;;  %v2156_v35 = vadd.f32 %v2148_v45, %v2136_v33  ;;  %v2168_v21 = vrot.slane %v2160_v7, 1  ;;  %v9425_v40 = vpop.permute.xlu1 %2751  ;;  %v12979_v59 = vld [vmem:[#allocation136_spill] sm:$0xff] }
  0xe4   : > { %1371 = vrot.lane.b32.xlu1 %v12972_v56, %s7819_s3  ;;  %1369 = vrot.lane.b32.xlu0 %v12973_v12, %s7819_s3  ;;  %12976 = vst [vmem:[#allocation49_spill] sm:$0xff] %v9423_v6  ;;  %v9427_v42 = vpop.permute.xlu0 %2749  ;;  %v9430_v56 = vsel %vm883_vm0, 0.0, %v2064_v9  ;;  %v9433_v55 = vsel %vm883_vm0, 0.0, %v2063_v52  ;;  %v2270_v3 = vmul.f32 %v9087_v0, %v12979_v59  ;;  %v2202_v32 = vmax.f32 %v2198_v39, 0.0  ;;  %v12980_v12 = vld [vmem:[#allocation80_spill] sm:$0xff]  ;;  %v12981_v9 = vld [vmem:[#allocation83_spill] sm:$0xff] }
  0xe5   : > { %12977 = vst [vmem:[#allocation75_spill] sm:$0xff] %v9430_v56  ;;  %12978 = vst [vmem:[#allocation77_spill] sm:$0xff] %v9433_v55  ;;  %v2266_v28 = vadd.f32 %v2262_v29, %v2258_v11  ;;  %v2188_v45 = vrot.slane %v2180_v37, 1  ;;  %v2197_v13 = vadd.f32 %v2193_v19, %v12970_v54  ;;  %v2135_v7 = vadd.f32 %v2131_v50, %v2127_v48  ;;  %v12982_v29 = vld [vmem:[#allocation61_spill] sm:$0xff]  ;;  %v12983_v11 = vld [vmem:[#allocation62_spill] sm:$0xff] }
  0xe6   : > { %v2147_v44 = vrot.slane %v2139_v23, 1  ;;  %v2159_v52 = vmul.f32 %v9215_v34, %v9073_v36  ;;  %v2571_v39 = vadd.f32 %v9333_v1, %v12982_v29  ;;  %v2569_v37 = vadd.f32 %v9335_v60, %v12983_v11  ;;  %v9451_v38 = vld [vmem:[%s8025_s27 + $0x100] sm:$0x1f]  ;;  %v12984_v23 = vld [vmem:[#allocation29_spill] sm:$0xff]  ;;  %v9462_v36 = vld [vmem:[%s8025_s27 + $0x8] sm:$0x1f] }
  0xe7   : > { %v2176_v33 = vadd.f32 %v2168_v21, %v2156_v35  ;;  %v2274_v50 = vadd.f32 %v2270_v3, %v2266_v28  ;;  %v2278_v19 = vmul.f32 %v8407_v53, %v12984_v23  ;;  %12985 = vst [vmem:[#allocation80_spill] sm:$0xff] %v9462_v36  ;;  %v12986_v1 = vld [vmem:[#allocation128_spill] sm:$0xff]  ;;  %v2245_v35 = vmul.f32 %v8952_v18, %v12959_v43  ;;  %v12988_v28 = vld [vmem:[#allocation70_spill] sm:$0xff]  ;;  %v12989_v6 = vld [vmem:[#allocation89_spill] sm:$0xff] }
  0xe8   : > { %1807 = vrot.lane.b32.xlu1 %v12980_v12, %s7819_s3  ;;  %1805 = vrot.lane.b32.xlu0 %v12981_v9, %s7819_s3  ;;  %v2241_v12 = vmul.f32 %v9451_v38, %v12958_v8  ;;  %v9455_v9 = vpop.permute.xlu1 %2935  ;;  %v9457_v48 = vpop.permute.xlu0 %2933  ;;  %v2286_v29 = vmul.f32 %v9462_v36, %v12986_v1  ;;  %v12987_v21 = vld [vmem:[#allocation64_spill] sm:$0xff]  ;;  %v2210_v11 = vrot.slane %v2202_v32, 7  ;;  %v2179_v31 = vmul.f32 %v8643_v24, %v12944_v25  ;;  %v12990_v18 = vld [vmem:[#allocation91_spill] sm:$0xff]  ;;  %v12993_v15 = vld [vmem:[#allocation58_spill] sm:$0xff] }
  0xe9   : > { %v2572_v60 = vadd.f32 %v9368_v61, %v12987_v21  ;;  %v2253_v53 = vmul.f32 %v9473_v27, %v12964_v49  ;;  %v2570_v3 = vadd.f32 %v9370_v63, %v12988_v28  ;;  %v2155_v55 = vadd.f32 %v2147_v44, %v2135_v7  ;;  %v12991_v21 = vld [vmem:[#allocation57_spill] sm:$0xff] }
  0xea   : > { %v2167_v61 = vrot.slane %v2159_v52, 1  ;;  %v2249_v32 = vadd.f32 %v2245_v35, %v2241_v12  ;;  %v2579_v24 = vadd.f32 %v12991_v21, %v2571_v39  ;;  %v2201_v25 = vmax.f32 %v2197_v13, 0.0  ;;  %v12996_v13 = vld [vmem:[#allocation65_spill] sm:$0xff]  ;;  %v12997_v39 = vld [vmem:[#allocation66_spill] sm:$0xff]  ;;  %v12998_v12 = vld [vmem:[#allocation96_spill] sm:$0xff] }
  0xeb   : > { %v2196_v56 = vadd.f32 %v2188_v45, %v2176_v33  ;;  %v9486_v14 = vmul.f32 %v8916_v22, %v9329_v20  ;;  %v2577_v63 = vadd.f32 %v12993_v15, %v2569_v37  ;;  %v2282_v36 = vadd.f32 %v2278_v19, %v2274_v50  ;;  %v9503_v45 = vld [vmem:[%s8025_s27 + $0x180] sm:$0x1f] }
  0xec   : > { %1811 = vrot.lane.b32.xlu1 %v12989_v6, %s7819_s3  ;;  %1809 = vrot.lane.b32.xlu0 %v12990_v18, %s7819_s3  ;;  %v9489_v28 = vpop.permute.xlu1 %2939  ;;  %v9491_v6 = vpop.permute.xlu0 %2937  ;;  %v2294_v18 = vrot.slane %v2286_v29, 1  ;;  %v2306_v7 = vmul.f32 %v9156_v17, %v9241_v47  ;;  %v9496_v44 = vsel %vm883_vm0, 0.0, %v2210_v11  ;;  %v9500_v33 = vmul.f32 %v12950_v5, %v9329_v20  ;;  %v12999_v50 = vld [vmem:[#allocation102_spill] sm:$0xff]  ;;  %v13056_v17 = vld [vmem:[#allocation153_spill] sm:$0xff] }
  0xed   : > { %12992 = vst [vmem:[#allocation83_spill] sm:$0xff] %v9486_v14  ;;  %12994 = vst [vmem:[#allocation61_spill] sm:$0xff] %v9496_v44  ;;  %v2257_v22 = vadd.f32 %v2253_v53, %v2249_v32  ;;  %v2261_v15 = vmul.f32 %v9503_v45, %v12969_v2  ;;  %v2580_v52 = vadd.f32 %v12996_v13, %v2572_v60  ;;  %v2187_v29 = vrot.slane %v2179_v31, 1  ;;  %v13000_v53 = vld [vmem:[#allocation25_spill] sm:$0xff]  ;;  %v13001_v60 = vld [vmem:[#allocation104_spill] sm:$0xff] }
  0xee   : > { %12995 = vst [vmem:[#allocation62_spill] sm:$0xff] %v9500_v33  ;;  %v2578_v37 = vadd.f32 %v12997_v39, %v2570_v3  ;;  %v2175_v19 = vadd.f32 %v2167_v61, %v2155_v55  ;;  %v2209_v5 = vrot.slane %v2201_v25, 7  ;;  %v2200_v35 = vadd.f32 %v2196_v56, %v12970_v54  ;;  %v13002_v39 = vld [vmem:[#allocation111_spill] sm:$0xff]  ;;  %v13003_v25 = vld [vmem:[#allocation74_spill] sm:$0xff]  ;;  %v13004_v61 = vld [vmem:[#allocation76_spill] sm:$0xff] }
  0xef   : > { %v2326_v32 = vmul.f32 %v8581_v16, %v13000_v53  ;;  %v9520_v3 = vadd.f32 %v13001_v60, %v2577_v63  ;;  %v2302_v55 = vadd.f32 %v2294_v18, %v2282_v36  ;;  %v2314_v31 = vrot.slane %v2306_v7, 1  ;;  %v13005_v14 = vld [vmem:[#allocation103_spill] sm:$0xff]  ;;  %v13006_v60 = vld [vmem:[#allocation106_spill] sm:$0xff]  ;;  %v13023_v33 = vld [vmem:[#allocation88_spill] sm:$0xff] }
  0xf0   : > { %1527 = vrot.lane.b32.xlu1 %v12998_v12, %s7819_s3  ;;  %1525 = vrot.lane.b32.xlu0 %v12999_v50, %s7819_s3  ;;  %v9517_v21 = vpop.permute.xlu1 %2599  ;;  %v9522_v13 = vpop.permute.xlu0 %2597  ;;  %v9525_v12 = vadd.f32 %v13002_v39, %v2579_v24  ;;  %v2758_v56 = vadd.f32 %v9385_v62, %v13003_v25  ;;  %v2757_v50 = vadd.f32 %v9387_v46, %v13004_v61  ;;  %v13007_v24 = vld [vmem:[#allocation107_spill] sm:$0xff]  ;;  %v13008_v36 = vld [vmem:[#allocation110_spill] sm:$0xff] }
  0xf1   : > { %v2265_v11 = vadd.f32 %v2261_v15, %v2257_v22  ;;  %v2269_v16 = vmul.f32 %v9102_v57, %v12979_v59  ;;  %v9534_v63 = vadd.f32 %v13005_v14, %v2578_v37  ;;  %v9541_v18 = vadd.f32 %v13008_v36, %v2580_v52  ;;  %v13009_v7 = vld [vmem:[#allocation82_spill] sm:$0xff]  ;;  %v13010_v15 = vld [vmem:[#allocation84_spill] sm:$0xff] }
  0xf2   : > { %v2195_v62 = vadd.f32 %v2187_v29, %v2175_v19  ;;  %v2760_v22 = vadd.f32 %v9425_v40, %v13009_v7  ;;  %v2759_v14 = vadd.f32 %v9427_v42, %v13010_v15  ;;  %v2204_v37 = vmax.f32 %v2200_v35, 0.0  ;;  %v13011_v25 = vld [vmem:[#allocation86_spill] sm:$0xff]  ;;  %v13013_v29 = vld [vmem:[#allocation71_spill] sm:$0xff]  ;;  %v13016_v15 = vld [vmem:[#allocation112_spill] sm:$0xff] }
  0xf3   : > { %v2334_v39 = vrot.slane %v2326_v32, 1  ;;  %v2946_v61 = vadd.f32 %v9455_v9, %v13011_v25  ;;  %v2322_v19 = vadd.f32 %v2314_v31, %v2302_v55  ;;  %v2244_v40 = vmul.f32 %v9258_v4, %v12958_v8  ;;  %v9560_v35 = vld [vmem:[%s8025_s27 + $0x1c0] sm:$0x1f]  ;;  %v13015_v32 = vld [vmem:[#allocation72_spill] sm:$0xff]  ;;  %v13017_v55 = vld [vmem:[#allocation113_spill] sm:$0xff] }
  0xf4   : > { %1531 = vrot.lane.b32.xlu1 %v13006_v60, %s7819_s3  ;;  %1529 = vrot.lane.b32.xlu0 %v13007_v24, %s7819_s3  ;;  %v13012_v60 = vld [vmem:[#allocation90_spill] sm:$0xff]  ;;  %v9552_v44 = vpop.permute.xlu1 %2603  ;;  %v9554_v52 = vpop.permute.xlu0 %2601  ;;  %v2766_v36 = vadd.f32 %v13013_v29, %v2758_v56  ;;  %v2273_v42 = vadd.f32 %v2269_v16, %v2265_v11  ;;  %13014 = vst [vmem:[#allocation64_spill] sm:$0xff] %v9560_v35  ;;  %v9572_v31 = vsel %vm883_vm0, 0.0, %v2209_v5  ;;  %v2212_v46 = vrot.slane %v2204_v37, 7 }
  0xf5   : > { %v2945_v24 = vadd.f32 %v9457_v48, %v13012_v60  ;;  %v2277_v9 = vmul.f32 %v9560_v35, %v12984_v23  ;;  %v2285_v48 = vmul.f32 %v9285_v10, %v12986_v1  ;;  %v2765_v7 = vadd.f32 %v13015_v32, %v2757_v50  ;;  %13018 = vst [vmem:[#allocation70_spill] sm:$0xff] %v9572_v31  ;;  %v13019_v16 = vld [vmem:[#allocation78_spill] sm:$0xff]  ;;  %v13020_v60 = vld [vmem:[#allocation79_spill] sm:$0xff] }
  0xf6   : > { %v2199_v11 = vadd.f32 %v2195_v62, %v12970_v54  ;;  %v2248_v56 = vmul.f32 %v12931_v51, %v12959_v43  ;;  %v2768_v25 = vadd.f32 %v13019_v16, %v2760_v22  ;;  %v2767_v29 = vadd.f32 %v13020_v60, %v2759_v14  ;;  %v9580_v50 = vld [vmem:[%s8025_s27 + $0x158] sm:$0x1f]  ;;  %v13059_v35 = vld [vmem:[#allocation99_spill] sm:$0xff] }
  0xf7   : > { %13021 = vst [vmem:[#allocation89_spill] sm:$0xff] %v9580_v50  ;;  %v2256_v32 = vmul.f32 %v9580_v50, %v12964_v49  ;;  %v2953_v5 = vadd.f32 %v13023_v33, %v2945_v24  ;;  %v2342_v54 = vadd.f32 %v2334_v39, %v2322_v19  ;;  %v13024_v4 = vld [vmem:[#allocation94_spill] sm:$0xff]  ;;  %v2281_v14 = vadd.f32 %v2277_v9, %v2273_v42  ;;  %v13027_v33 = vld [vmem:[#allocation131_spill] sm:$0xff] }
  0xf8   : > { %1687 = vrot.lane.b32.xlu1 %v13016_v15, %s7819_s3  ;;  %1685 = vrot.lane.b32.xlu0 %v13017_v55, %s7819_s3  ;;  %v13022_v15 = vld [vmem:[#allocation87_spill] sm:$0xff]  ;;  %v9586_v31 = vpop.permute.xlu1 %3123  ;;  %v9588_v62 = vpop.permute.xlu0 %3121  ;;  %v2252_v51 = vadd.f32 %v2248_v56, %v2244_v40  ;;  %v2948_v22 = vadd.f32 %v9489_v28, %v13024_v4  ;;  %v2293_v37 = vrot.slane %v2285_v48, 1  ;;  %v2305_v16 = vmul.f32 %v9175_v58, %v9241_v47  ;;  %v13025_v60 = vld [vmem:[#allocation118_spill] sm:$0xff]  ;;  %v13029_v40 = vld [vmem:[#allocation132_spill] sm:$0xff] }
  0xf9   : > { %v2954_v55 = vadd.f32 %v13022_v15, %v2946_v61  ;;  %v13026_v61 = vld [vmem:[#allocation119_spill] sm:$0xff]  ;;  %v9599_v24 = vadd.f32 %v13027_v33, %v2766_v36  ;;  %v2203_v15 = vmax.f32 %v2199_v11, 0.0  ;;  %v2264_v4 = vmul.f32 %v9308_v26, %v12969_v2  ;;  %v13028_v28 = vld [vmem:[#allocation98_spill] sm:$0xff]  ;;  %v13035_v33 = vld [vmem:[#allocation92_spill] sm:$0xff] }
  0xfa   : > { %v2260_v39 = vadd.f32 %v2256_v32, %v2252_v51  ;;  %v2947_v19 = vadd.f32 %v9491_v6, %v13028_v28  ;;  %v9606_v42 = vadd.f32 %v13029_v40, %v2765_v7  ;;  %v13030_v9 = vld [vmem:[#allocation138_spill] sm:$0xff]  ;;  %v9612_v56 = vsel %vm883_vm0, 0.0, %v2212_v46  ;;  %v13032_v32 = vld [vmem:[#allocation140_spill] sm:$0xff]  ;;  %v13034_v6 = vld [vmem:[#allocation149_spill] sm:$0xff] }
  0xfb   : > { %v9609_v48 = vadd.f32 %v13030_v9, %v2768_v25  ;;  %13031 = vst [vmem:[#allocation91_spill] sm:$0xff] %v9612_v56  ;;  %v9619_v51 = vadd.f32 %v13032_v32, %v2767_v29  ;;  %v9625_v7 = vadd.f32 %v13034_v6, %v2953_v5  ;;  %v2346_v25 = vadd.f32 %v2342_v54, %v9270_v30  ;;  %v9630_v9 = vld [vmem:[%s8025_s27 + $0x40] sm:$0x1f]  ;;  %v13036_v29 = vld [vmem:[#allocation125_spill] sm:$0xff]  ;;  %v9639_v32 = vld [vmem:[%s8025_s27 + $0xc8] sm:$0x1f] }
  0xfc   : > { %1691 = vrot.lane.b32.xlu1 %v13025_v60, %s7819_s3  ;;  %1689 = vrot.lane.b32.xlu0 %v13026_v61, %s7819_s3  ;;  %v9614_v36 = vpop.permute.xlu1 %3127  ;;  %v9616_v11 = vpop.permute.xlu0 %3125  ;;  %v13033_v60 = vld [vmem:[#allocation148_spill] sm:$0xff]  ;;  %v2956_v28 = vadd.f32 %v13035_v33, %v2948_v22  ;;  %v2301_v46 = vadd.f32 %v2293_v37, %v2281_v14  ;;  %v2313_v40 = vrot.slane %v2305_v16, 1  ;;  %v2325_v56 = vmul.f32 %v9630_v9, %v13000_v53  ;;  %v13039_v14 = vld [vmem:[#allocation46_spill] sm:$0xff]  ;;  %v13040_v16 = vld [vmem:[#allocation95_spill] sm:$0xff] }
  0xfd   : > { %v9622_v61 = vadd.f32 %v13033_v60, %v2954_v55  ;;  %v13037_v55 = vld [vmem:[#allocation130_spill] sm:$0xff]  ;;  %v2211_v5 = vrot.slane %v2203_v15, 7  ;;  %13038 = vst [vmem:[#allocation57_spill] sm:$0xff] %v9639_v32  ;;  %v2268_v54 = vadd.f32 %v2264_v4, %v2260_v39  ;;  %v2272_v22 = vmul.f32 %v12949_v41, %v12979_v59  ;;  %v9649_v33 = vld [vmem:[%s8025_s27 + $0x48] sm:$0x1f] }
  0xfe   : > { %v2243_v37 = vmul.f32 %v13039_v14, %v12958_v8  ;;  %v2955_v60 = vadd.f32 %v13040_v16, %v2947_v19  ;;  %v2610_v6 = vadd.f32 %v9517_v21, %v9534_v63  ;;  %13041 = vst [vmem:[#allocation58_spill] sm:$0xff] %v9649_v33  ;;  %v2609_v41 = vadd.f32 %v9522_v13, %v9520_v3  ;;  %v13044_v19 = vld [vmem:[#allocation40_spill] sm:$0xff]  ;;  %v13045_v16 = vld [vmem:[#allocation145_spill] sm:$0xff]  ;;  %v13047_v58 = vld [vmem:[#allocation51_spill] sm:$0xff] }
  0xff   : > { %v2350_v14 = vmax.f32 %v2346_v25, 0.0  ;;  %v1310_v26 = vmul.f32 %v13045_v16, %v13044_v19  ;;  %v9664_v21 = vld [vmem:[%s8025_s27 + $0x150] sm:$0x1f]  ;;  %v2321_v50 = vadd.f32 %v2313_v40, %v2301_v46  ;;  %v9673_v3 = vld [vmem:[%s8025_s27 + $0x1d8] sm:$0x1f]  ;;  %v13053_v46 = vld [vmem:[#allocation55_spill] sm:$0xff]  ;;  %v9689_v20 = vadd.f32 %v13056_v17, %v2956_v28 }
 0x100   : > { %1407 = vrot.lane.b32.xlu1 %v13036_v29, %s7819_s3  ;;  %1405 = vrot.lane.b32.xlu0 %v13037_v55, %s7819_s3  ;;  %v13042_v29 = vld [vmem:[#allocation39_spill] sm:$0xff]  ;;  %v13043_v55 = vld [vmem:[#allocation30_spill] sm:$0xff]  ;;  %v9657_v4 = vpop.permute.xlu1 %2787  ;;  %v9659_v8 = vpop.permute.xlu0 %2785  ;;  %13046 = vst [vmem:[#allocation65_spill] sm:$0xff] %v9664_v21  ;;  %v2255_v63 = vmul.f32 %v9664_v21, %v12964_v49  ;;  %13049 = vst [vmem:[#allocation96_spill] sm:$0xff] %v9673_v3  ;;  %v2280_v13 = vmul.f32 %v9673_v3, %v12984_v23  ;;  %v9682_v49 = vsel %vm883_vm0, 0.0, %v2211_v5 }
 0x101   : > { %v1306_v15 = vmul.f32 %v9649_v33, %v13042_v29  ;;  %v2247_v39 = vmul.f32 %v13043_v55, %v12959_v43  ;;  %v2333_v33 = vrot.slane %v2325_v56, 1  ;;  %v9670_v55 = vmul.f32 %v9639_v32, %v13047_v58  ;;  %v13050_v25 = vld [vmem:[#allocation134_spill] sm:$0xff]  ;;  %v13051_v16 = vld [vmem:[#allocation137_spill] sm:$0xff]  ;;  %13052 = vst [vmem:[#allocation102_spill] sm:$0xff] %v9682_v49 }
 0x102   : > { %v2276_v56 = vadd.f32 %v2272_v22, %v2268_v54  ;;  %v2288_v40 = vmul.f32 %v13053_v46, %v12986_v1  ;;  %v13054_v43 = vld [vmem:[#allocation97_spill] sm:$0xff]  ;;  %v13057_v3 = vld [vmem:[#allocation42_spill] sm:$0xff]  ;;  %v13060_v5 = vrot.slane %v13059_v35, 1  ;;  %v1305_v17 = vmul.f32 %v9630_v9, %v13042_v29 }
 0x103   : > { %13048 = vst [vmem:[#allocation66_spill] sm:$0xff] %v9670_v55  ;;  %v2251_v55 = vadd.f32 %v2247_v39, %v2243_v37  ;;  %v13055_v32 = vrot.slane %v13054_v43, 1  ;;  %v9692_v10 = vadd.f32 %v13057_v3, %v2955_v60  ;;  %v2358_v37 = vrot.slane %v2350_v14, 7  ;;  %v9703_v39 = vld [vmem:[%s8025_s27 + $0xc0] sm:$0x1f] }
 0x104   : > { %1411 = vrot.lane.b32.xlu1 %v13050_v25, %s7819_s3  ;;  %1409 = vrot.lane.b32.xlu0 %v13051_v16, %s7819_s3  ;;  %v13058_v25 = vld [vmem:[#allocation52_spill] sm:$0xff]  ;;  %v2629_v49 = vadd.f32 %v13060_v5, %v2609_v41  ;;  %v9698_v54 = vpop.permute.xlu1 %2791  ;;  %v9700_v22 = vpop.permute.xlu0 %2789  ;;  %13061 = vst [vmem:[#allocation104_spill] sm:$0xff] %v9703_v39  ;;  %v2612_v28 = vadd.f32 %v9552_v44, %v9541_v18  ;;  %v13062_v35 = vld [vmem:[#allocation150_spill] sm:$0xff]  ;;  %v13063_v41 = vld [vmem:[#allocation117_spill] sm:$0xff] }
 0x105   : > { %v2630_v21 = vadd.f32 %v13055_v32, %v2610_v6  ;;  %v2263_v16 = vmul.f32 %v13058_v25, %v12969_v2  ;;  %v2259_v43 = vadd.f32 %v2255_v63, %v2251_v55  ;;  %v2611_v32 = vadd.f32 %v9554_v52, %v9525_v12  ;;  %v13064_v14 = vld [vmem:[#allocation142_spill] sm:$0xff]  ;;  %v13065_v5 = vld [vmem:[#allocation147_spill] sm:$0xff]  ;;  %v13066_v44 = vld [vmem:[#allocation37_spill] sm:$0xff] }
 0x106   : > { %v2341_v60 = vadd.f32 %v2333_v33, %v2321_v50  ;;  %v1309_v6 = vmul.f32 %v13062_v35, %v13044_v19  ;;  %v3134_v3 = vadd.f32 %v9586_v31, %v13063_v41  ;;  %v2284_v63 = vadd.f32 %v2280_v13, %v2276_v56  ;;  %v13069_v31 = vld [vmem:[#allocation181_spill] sm:$0xff]  ;;  %v13071_v56 = vld [vmem:[#allocation155_spill] sm:$0xff] }
 0x107   : > { %v2296_v55 = vrot.slane %v2288_v40, 1  ;;  %v2308_v18 = vmul.f32 %v13066_v44, %v9241_v47  ;;  %v9721_v2 = vadd.f32 %v1310_v26, %v1306_v15  ;;  %v9725_v12 = vmul.f32 %v9703_v39, %v13047_v58  ;;  %v13070_v33 = vld [vmem:[#allocation121_spill] sm:$0xff]  ;;  %v13073_v15 = vld [vmem:[#allocation158_spill] sm:$0xff] }
 0x108   : > { %1847 = vrot.lane.b32.xlu1 %v13064_v14, %s7819_s3  ;;  %1845 = vrot.lane.b32.xlu0 %v13065_v5, %s7819_s3  ;;  %v2267_v52 = vadd.f32 %v2263_v16, %v2259_v43  ;;  %v2271_v50 = vmul.f32 %v13069_v31, %v12979_v59  ;;  %v3133_v35 = vadd.f32 %v9588_v62, %v13070_v33  ;;  %v9731_v41 = vpop.permute.xlu1 %2975  ;;  %v9733_v13 = vpop.permute.xlu0 %2973  ;;  %v13072_v40 = vrot.slane %v13071_v56, 1  ;;  %v13076_v43 = vld [vmem:[#allocation105_spill] sm:$0xff]  ;;  %v13078_v62 = vld [vmem:[#allocation108_spill] sm:$0xff]  ;;  %v13081_v56 = vld [vmem:[#allocation114_spill] sm:$0xff] }
 0x109   : > { %13067 = vst [vmem:[#allocation111_spill] sm:$0xff] %v9721_v2  ;;  %13068 = vst [vmem:[#allocation74_spill] sm:$0xff] %v9725_v12  ;;  %v13074_v14 = vrot.slane %v13073_v15, 1  ;;  %v9744_v16 = vsel %vm883_vm0, 0.0, %v2358_v37  ;;  %v13077_v44 = vrot.slane %v13076_v43, 1  ;;  %v13079_v33 = vrot.slane %v13078_v62, 1 }
 0x10a   : > { %v9737_v26 = vadd.f32 %v13072_v40, %v2630_v21  ;;  %13075 = vst [vmem:[#allocation76_spill] sm:$0xff] %v9744_v16  ;;  %v2345_v12 = vadd.f32 %v2341_v60, %v9270_v30  ;;  %v9751_v2 = vadd.f32 %v1309_v6, %v1305_v17  ;;  %v3142_v21 = vadd.f32 %v13081_v56, %v3134_v3  ;;  %v13082_v40 = vld [vmem:[#allocation151_spill] sm:$0xff]  ;;  %v9764_v43 = vld [vmem:[%s8025_s27 + $0x1d0] sm:$0x1f] }
 0x10b   : > { %v9741_v5 = vadd.f32 %v13074_v14, %v2629_v49  ;;  %v2632_v31 = vadd.f32 %v13077_v44, %v2612_v28  ;;  %v2631_v59 = vadd.f32 %v13079_v33, %v2611_v32  ;;  %v13083_v49 = vld [vmem:[#allocation152_spill] sm:$0xff]  ;;  %v2304_v37 = vadd.f32 %v2296_v55, %v2284_v63  ;;  %v9759_v14 = vld [vmem:[%s8025_s27 + $0x58] sm:$0x1f]  ;;  %13085 = vst [vmem:[#allocation107_spill] sm:$0xff] %v9764_v43  ;;  %v13089_v33 = vld [vmem:[#allocation115_spill] sm:$0xff] }
 0x10c   : > { %13080 = vst [vmem:[#allocation103_spill] sm:$0xff] %v9751_v2  ;;  %1851 = vrot.lane.b32.xlu1 %v13082_v40, %s7819_s3  ;;  %1849 = vrot.lane.b32.xlu0 %v13083_v49, %s7819_s3  ;;  %v2316_v15 = vrot.slane %v2308_v18, 1  ;;  %13084 = vst [vmem:[#allocation106_spill] sm:$0xff] %v9759_v14  ;;  %v2328_v28 = vmul.f32 %v9759_v14, %v13000_v53  ;;  %v2275_v32 = vadd.f32 %v2271_v50, %v2267_v52  ;;  %v13086_v60 = vld [vmem:[#allocation53_spill] sm:$0xff]  ;;  %v13087_v3 = vld [vmem:[#allocation100_spill] sm:$0xff]  ;;  %v9777_v50 = vpop.permute.xlu1 %2979  ;;  %v9779_v40 = vpop.permute.xlu0 %2977 }
 0x10d   : > { %v2279_v17 = vmul.f32 %v9764_v43, %v12984_v23  ;;  %v2287_v6 = vmul.f32 %v13086_v60, %v12986_v1  ;;  %v13088_v44 = vld [vmem:[#allocation33_spill] sm:$0xff]  ;;  %v3141_v63 = vadd.f32 %v13089_v33, %v3133_v35  ;;  %v13093_v23 = vld [vmem:[#allocation156_spill] sm:$0xff]  ;;  %v2798_v1 = vadd.f32 %v9657_v4, %v9599_v24  ;;  %v13094_v35 = vld [vmem:[#allocation162_spill] sm:$0xff] }
 0x10e   : > { %v2390_v62 = vmul.f32 %v13088_v44, %v13087_v3  ;;  %v13090_v55 = vld [vmem:[#allocation129_spill] sm:$0xff]  ;;  %v2797_v44 = vadd.f32 %v9659_v8, %v9606_v42  ;;  %v13095_v33 = vrot.slane %v13094_v35, 1  ;;  %v2336_v43 = vrot.slane %v2328_v28, 1  ;;  %v9800_v4 = vld [vmem:[%s8025_s27 + $0x148] sm:$0x1f] }
 0x10f   : > { %v3136_v18 = vadd.f32 %v9614_v36, %v13090_v55  ;;  %v13091_v56 = vld [vmem:[#allocation133_spill] sm:$0xff]  ;;  %v13096_v36 = vld [vmem:[#allocation26_spill] sm:$0xff]  ;;  %13100 = vst [vmem:[#allocation110_spill] sm:$0xff] %v9800_v4  ;;  %v13101_v8 = vld [vmem:[#allocation19_spill] sm:$0xff]  ;;  %v2283_v35 = vadd.f32 %v2279_v17, %v2275_v32 }
 0x110   : > { %v3135_v52 = vadd.f32 %v9616_v11, %v13091_v56  ;;  %v13092_v49 = vld [vmem:[#allocation101_spill] sm:$0xff]  ;;  %v9789_v39 = vadd.f32 %v13095_v33, %v2632_v31  ;;  %v13097_v55 = vrot.slane %v13096_v36, 1  ;;  %v13098_v56 = vld [vmem:[#allocation154_spill] sm:$0xff]  ;;  %v2402_v42 = vmul.f32 %v9800_v4, %v13101_v8 }
 0x111   : > { %v2394_v2 = vmul.f32 %v13093_v23, %v13092_v49  ;;  %1567 = vrot.lane.b32.xlu1 %v13098_v56, %s7819_s3  ;;  %v13099_v60 = vld [vmem:[#allocation157_spill] sm:$0xff]  ;;  %v2349_v23 = vmax.f32 %v2345_v12, 0.0  ;;  %v2324_v31 = vadd.f32 %v2316_v15, %v2304_v37  ;;  %v2295_v33 = vrot.slane %v2287_v6, 1  ;;  %v13102_v36 = vld [vmem:[#allocation122_spill] sm:$0xff]  ;;  %v13103_v56 = vld [vmem:[#allocation123_spill] sm:$0xff]  ;;  %v9810_v12 = vpop.permute.xlu0 %2665 }
 0x112   : > { %v9793_v11 = vadd.f32 %v13097_v55, %v2631_v59  ;;  %1565 = vrot.lane.b32.xlu0 %v13099_v60, %s7819_s3  ;;  %v2307_v59 = vmul.f32 %v9215_v34, %v9241_v47  ;;  %v3144_v55 = vadd.f32 %v13102_v36, %v3136_v18  ;;  %v3143_v16 = vadd.f32 %v13103_v56, %v3135_v52  ;;  %v9808_v60 = vpop.permute.xlu1 %2667  ;;  %v13106_v37 = vld [vmem:[#allocation124_spill] sm:$0xff]  ;;  %v13108_v17 = vld [vmem:[#allocation126_spill] sm:$0xff]  ;;  %v13110_v18 = vld [vmem:[#allocation109_spill] sm:$0xff] }
 0x113   : > { %v2398_v24 = vadd.f32 %v2394_v2, %v2390_v62  ;;  %v13104_v2 = vld [vmem:[#allocation168_spill] sm:$0xff]  ;;  %v13105_v62 = vld [vmem:[#allocation169_spill] sm:$0xff]  ;;  %v13107_v15 = vrot.slane %v13106_v37, 1  ;;  %v13109_v34 = vrot.slane %v13108_v17, 1  ;;  %v2800_v56 = vadd.f32 %v9698_v54, %v9609_v48  ;;  %v13115_v17 = vld [vmem:[#allocation175_spill] sm:$0xff] }
 0x114   : > { %v9813_v28 = vadd.f32 %v13104_v2, %v3142_v21  ;;  %v9816_v4 = vadd.f32 %v13105_v62, %v3141_v63  ;;  %v13111_v36 = vld [vmem:[#allocation60_spill] sm:$0xff]  ;;  %v2799_v21 = vadd.f32 %v9700_v22, %v9619_v51  ;;  %v13112_v63 = vld [vmem:[#allocation161_spill] sm:$0xff]  ;;  %v2357_v2 = vrot.slane %v2349_v23, 7 }
 0x115   : > { %v2818_v32 = vadd.f32 %v13107_v15, %v2798_v1  ;;  %v2817_v6 = vadd.f32 %v13109_v34, %v2797_v44  ;;  %v2406_v47 = vadd.f32 %v2402_v42, %v2398_v24  ;;  %v2410_v52 = vmul.f32 %v13111_v36, %v13110_v18  ;;  %1571 = vrot.lane.b32.xlu1 %v13112_v63, %s7819_s3  ;;  %v13113_v1 = vld [vmem:[#allocation164_spill] sm:$0xff]  ;;  %v9841_v54 = vpop.permute.xlu0 %2669  ;;  %v9850_v34 = vld [vmem:[%s8025_s27 + $0xd8] sm:$0x1f] }
 0x116   : > { %1569 = vrot.lane.b32.xlu0 %v13113_v1, %s7819_s3  ;;  %v9833_v44 = vld [vmem:[%s8025_s27 + $0x50] sm:$0x1f]  ;;  %v2344_v42 = vadd.f32 %v2336_v43, %v2324_v31  ;;  %v2303_v62 = vadd.f32 %v2295_v33, %v2283_v35  ;;  %v2315_v37 = vrot.slane %v2307_v59, 1  ;;  %v2389_v48 = vmul.f32 %v9451_v38, %v13087_v3  ;;  %v9839_v51 = vpop.permute.xlu1 %2671  ;;  %13117 = vst [vmem:[#allocation84_spill] sm:$0xff] %v9850_v34  ;;  %v9855_v31 = vld [vmem:[%s8025_s27 + $0x120] sm:$0x1f] }
 0x117   : > { %v2327_v24 = vmul.f32 %v9833_v44, %v13000_v53  ;;  %v13114_v22 = vld [vmem:[#allocation28_spill] sm:$0xff]  ;;  %v9847_v23 = vadd.f32 %v13115_v17, %v3143_v16  ;;  %v1308_v43 = vmul.f32 %v9759_v14, %v13042_v29  ;;  %13118 = vst [vmem:[#allocation86_spill] sm:$0xff] %v9855_v31  ;;  %v2393_v38 = vmul.f32 %v9855_v31, %v13092_v49  ;;  %v13119_v35 = vld [vmem:[#allocation31_spill] sm:$0xff]  ;;  %v13123_v1 = vld [vmem:[#allocation165_spill] sm:$0xff] }
 0x118   : > { %v9844_v15 = vadd.f32 %v13114_v22, %v3144_v55  ;;  %v13120_v33 = vrot.slane %v13119_v35, 1  ;;  %v13121_v55 = vld [vmem:[#allocation17_spill] sm:$0xff]  ;;  %v2414_v16 = vadd.f32 %v2410_v52, %v2406_v47  ;;  %v2418_v22 = vmul.f32 %v9087_v0, %v13123_v1  ;;  %v13124_v17 = vld [vmem:[#allocation127_spill] sm:$0xff] }
 0x119   : > { %13116 = vst [vmem:[#allocation82_spill] sm:$0xff] %v9847_v23  ;;  %v13122_v36 = vrot.slane %v13121_v55, 1  ;;  %v13125_v53 = vrot.slane %v13124_v17, 1  ;;  %v13126_v14 = vld [vmem:[#allocation135_spill] sm:$0xff]  ;;  %v2335_v35 = vrot.slane %v2327_v24, 1  ;;  %v2348_v47 = vadd.f32 %v2344_v42, %v9270_v30 }
 0x11a   : > { %v9861_v59 = vadd.f32 %v13120_v33, %v2818_v32  ;;  %v13127_v23 = vrot.slane %v13126_v14, 1  ;;  %v13128_v31 = vld [vmem:[#allocation27_spill] sm:$0xff]  ;;  %v13129_v32 = vld [vmem:[#allocation166_spill] sm:$0xff]  ;;  %v2323_v52 = vadd.f32 %v2315_v37, %v2303_v62  ;;  %v2986_v14 = vadd.f32 %v9731_v41, %v9622_v61 }
 0x11b   : > { %v9865_v63 = vadd.f32 %v13122_v36, %v2817_v6  ;;  %v2820_v25 = vadd.f32 %v13125_v53, %v2800_v56  ;;  %1727 = vrot.lane.b32.xlu1 %v13128_v31, %s7819_s3  ;;  %1725 = vrot.lane.b32.xlu0 %v13129_v32, %s7819_s3  ;;  %v2397_v6 = vadd.f32 %v2393_v38, %v2389_v48  ;;  %v9879_v33 = vld [vmem:[%s8025_s27 + $0x78] sm:$0x1f]  ;;  %v9889_v56 = vpop.permute.xlu1 %3163  ;;  %v13133_v31 = vld [vmem:[#allocation163_spill] sm:$0xff]  ;;  %v13134_v38 = vld [vmem:[#allocation80_spill] sm:$0xff] }
 0x11c   : > { %v2819_v46 = vadd.f32 %v13127_v23, %v2799_v21  ;;  %13130 = vst [vmem:[#allocation90_spill] sm:$0xff] %v9879_v33  ;;  %v1312_v0 = vmul.f32 %v9879_v33, %v13044_v19  ;;  %v9885_v53 = vmul.f32 %v9850_v34, %v13047_v58  ;;  %v9891_v21 = vpop.permute.xlu0 %3161  ;;  %v1307_v24 = vmul.f32 %v9833_v44, %v13042_v29  ;;  %v7704_v23 = vld [vmem:[%s8025_s27 + $0x1c8] sm:$0x1f]  ;;  %v13132_v61 = vld [vmem:[#allocation38_spill] sm:$0xff]  ;;  %v9925_v34 = vld [vmem:[%s8025_s27 + $0x70] sm:$0x1f] }
 0x11d   : > { %v2401_v42 = vmul.f32 %v9473_v27, %v13101_v8  ;;  %v2409_v62 = vmul.f32 %v9503_v45, %v13110_v18  ;;  %v2985_v37 = vadd.f32 %v9733_v13, %v9625_v7  ;;  %v2422_v48 = vadd.f32 %v2418_v22, %v2414_v16  ;;  %v13135_v36 = vld [vmem:[#allocation172_spill] sm:$0xff]  ;;  %v13136_v27 = vld [vmem:[#allocation173_spill] sm:$0xff]  ;;  %v13137_v17 = vld [vmem:[#allocation179_spill] sm:$0xff]  ;;  %13142 = vst [vmem:[#allocation112_spill] sm:$0xff] %v9925_v34 }
 0x11e   : > { %13131 = vst [vmem:[#allocation71_spill] sm:$0xff] %v9885_v53  ;;  %v2426_v41 = vmul.f32 %v7704_v23, %v13132_v61  ;;  %v2434_v55 = vmul.f32 %v13134_v38, %v13133_v31  ;;  %v13138_v32 = vrot.slane %v13137_v17, 1  ;;  %v9914_v7 = vsel %vm883_vm0, 0.0, %v2357_v2  ;;  %v13139_v22 = vld [vmem:[#allocation180_spill] sm:$0xff]  ;;  %v13150_v53 = vld [vmem:[#allocation141_spill] sm:$0xff]  ;;  %v13208_v33 = vld [vmem:[#allocation91_spill] sm:$0xff] }
 0x11f   : > { %1731 = vrot.lane.b32.xlu1 %v13135_v36, %s7819_s3  ;;  %1729 = vrot.lane.b32.xlu0 %v13136_v27, %s7819_s3  ;;  %v2405_v13 = vadd.f32 %v2401_v42, %v2397_v6  ;;  %v2417_v16 = vmul.f32 %v9102_v57, %v13123_v1  ;;  %v13140_v23 = vrot.slane %v13139_v22, 1  ;;  %v2343_v29 = vadd.f32 %v2335_v35, %v2323_v52  ;;  %v9931_v27 = vpop.permute.xlu1 %3167  ;;  %v9936_v57 = vld [vmem:[%s8025_s27 + $0xd0] sm:$0x1f] }
 0x120   : > { %v9911_v45 = vadd.f32 %v13138_v32, %v2820_v25  ;;  %v9922_v36 = vadd.f32 %v1312_v0, %v1308_v43  ;;  %v1311_v25 = vmul.f32 %v9925_v34, %v13044_v19  ;;  %v2678_v2 = vadd.f32 %v9808_v60, %v9737_v26  ;;  %v9933_v6 = vpop.permute.xlu0 %3165  ;;  %13143 = vst [vmem:[#allocation113_spill] sm:$0xff] %v9936_v57  ;;  %v13145_v43 = vld [vmem:[#allocation45_spill] sm:$0xff]  ;;  %v13146_v0 = vld [vmem:[#allocation139_spill] sm:$0xff]  ;;  %v13148_v19 = vld [vmem:[#allocation48_spill] sm:$0xff] }
 0x121   : > { %v9920_v38 = vadd.f32 %v13140_v23, %v2819_v46  ;;  %v2413_v42 = vadd.f32 %v2409_v62, %v2405_v13  ;;  %v13144_v46 = vld [vmem:[#allocation64_spill] sm:$0xff]  ;;  %v2433_v52 = vmul.f32 %v13145_v43, %v13133_v31  ;;  %v13147_v17 = vrot.slane %v13146_v0, 1  ;;  %v13149_v26 = vld [vmem:[#allocation18_spill] sm:$0xff] }
 0x122   : > { %13141 = vst [vmem:[#allocation72_spill] sm:$0xff] %v9922_v36  ;;  %v2425_v35 = vmul.f32 %v13144_v46, %v13132_v61  ;;  %v2430_v22 = vadd.f32 %v2426_v41, %v2422_v48  ;;  %v2442_v23 = vrot.slane %v2434_v55, 1  ;;  %v2454_v60 = vmul.f32 %v13149_v26, %v13148_v19  ;;  %v13152_v13 = vld [vmem:[#allocation14_spill] sm:$0xff]  ;;  %v13153_v46 = vld [vmem:[#allocation15_spill] sm:$0xff]  ;;  %v13156_v55 = vld [vmem:[#allocation160_spill] sm:$0xff] }
 0x123   : > { %v3006_v32 = vadd.f32 %v13147_v17, %v2986_v14  ;;  %v13151_v36 = vrot.slane %v13150_v53, 1  ;;  %v2677_v62 = vadd.f32 %v9810_v12, %v9741_v5  ;;  %1887 = vrot.lane.b32.xlu1 %v13152_v13, %s7819_s3  ;;  %1885 = vrot.lane.b32.xlu0 %v13153_v46, %s7819_s3  ;;  %v2352_v43 = vmax.f32 %v2348_v47, 0.0  ;;  %v13155_v53 = vld [vmem:[#allocation36_spill] sm:$0xff]  ;;  %v9966_v47 = vpop.permute.xlu1 %2855  ;;  %v13158_v13 = vld [vmem:[#allocation58_spill] sm:$0xff] }
 0x124   : > { %v2421_v0 = vadd.f32 %v2417_v16, %v2413_v42  ;;  %v2347_v14 = vadd.f32 %v2343_v29, %v9270_v30  ;;  %v9957_v48 = vmul.f32 %v9936_v57, %v13047_v58  ;;  %v2441_v41 = vrot.slane %v2433_v52, 1  ;;  %v9968_v16 = vpop.permute.xlu0 %2853  ;;  %v13157_v26 = vld [vmem:[#allocation32_spill] sm:$0xff] }
 0x125   : > { %v3005_v34 = vadd.f32 %v13151_v36, %v2985_v37  ;;  %v2453_v37 = vmul.f32 %v13155_v53, %v13148_v19  ;;  %v2988_v5 = vadd.f32 %v9777_v50, %v9689_v20  ;;  %v2987_v12 = vadd.f32 %v9779_v40, %v9692_v10  ;;  %v13159_v50 = vld [vmem:[#allocation35_spill] sm:$0xff]  ;;  %v13160_v40 = vld [vmem:[#allocation178_spill] sm:$0xff] }
 0x126   : > { %13154 = vst [vmem:[#allocation78_spill] sm:$0xff] %v9957_v48  ;;  %v2682_v36 = vadd.f32 %v2678_v2, %v13156_v55  ;;  %v2429_v29 = vadd.f32 %v2425_v35, %v2421_v0  ;;  %v2680_v42 = vadd.f32 %v9839_v51, %v9789_v39  ;;  %v2450_v52 = vadd.f32 %v2442_v23, %v2430_v22 }
 0x127   : > { %v2462_v17 = vrot.slane %v2454_v60, 1  ;;  %v2474_v46 = vmul.f32 %v13158_v13, %v13157_v26  ;;  %v2681_v20 = vadd.f32 %v2677_v62, %v13156_v55  ;;  %v2679_v10 = vadd.f32 %v9841_v54, %v9793_v11  ;;  %1891 = vrot.lane.b32.xlu1 %v13159_v50, %s7819_s3  ;;  %1889 = vrot.lane.b32.xlu0 %v13160_v40, %s7819_s3  ;;  %v13162_v60 = vld [vmem:[#allocation143_spill] sm:$0xff]  ;;  %v9987_v11 = vpop.permute.xlu1 %2859  ;;  %v13164_v50 = vld [vmem:[#allocation44_spill] sm:$0xff] }
 0x128   : > { %v2360_v2 = vrot.slane %v2352_v43, 7  ;;  %v9981_v35 = vadd.f32 %v1311_v25, %v1307_v24  ;;  %v2351_v39 = vmax.f32 %v2347_v14, 0.0  ;;  %v2449_v51 = vadd.f32 %v2441_v41, %v2429_v29  ;;  %v9989_v54 = vpop.permute.xlu0 %2857  ;;  %v13166_v24 = vld [vmem:[#allocation171_spill] sm:$0xff]  ;;  %v13168_v14 = vld [vmem:[#allocation144_spill] sm:$0xff] }
 0x129   : > { %v2461_v22 = vrot.slane %v2453_v37, 1  ;;  %v2473_v23 = vmul.f32 %v9630_v9, %v13157_v26  ;;  %v13163_v62 = vrot.slane %v13162_v60, 1  ;;  %v2686_v53 = vmax.f32 %v2682_v36, 0.0 }
 0x12a   : > { %13161 = vst [vmem:[#allocation79_spill] sm:$0xff] %v9981_v35  ;;  %v13165_v58 = vrot.slane %v13164_v50, 1  ;;  %v13167_v25 = vrot.slane %v13166_v24, 1  ;;  %v13169_v41 = vrot.slane %v13168_v14, 1  ;;  %v2684_v29 = vadd.f32 %v2680_v42, %v13156_v55  ;;  %v13170_v50 = vld [vmem:[#allocation67_spill] sm:$0xff] }
 0x12b   : > { %v3008_v0 = vadd.f32 %v13163_v62, %v2988_v5  ;;  %v2470_v60 = vadd.f32 %v2462_v17, %v2450_v52  ;;  %v2482_v5 = vrot.slane %v2474_v46, 1  ;;  %v2685_v36 = vmax.f32 %v2681_v20, 0.0  ;;  %2079 = vrot.lane.b32.xlu1 %v13170_v50, %s7820_s4  ;;  %v10106_v35 = vld [vmem:[%s8025_s27 + $0x68] sm:$0x1f] }
 0x12c   : > { %v9993_v40 = vadd.f32 %v13165_v58, %v3006_v32  ;;  %v9997_v43 = vadd.f32 %v13167_v25, %v3005_v34  ;;  %v3007_v37 = vadd.f32 %v13169_v41, %v2987_v12  ;;  %v2683_v62 = vadd.f32 %v2679_v10, %v13156_v55  ;;  %v13171_v58 = vld [vmem:[#allocation68_spill] sm:$0xff]  ;;  %v13172_v32 = vld [vmem:[#allocation23_spill] sm:$0xff]  ;;  %v10014_v10 = vpop.permute.xlu1 %3043  ;;  %v10016_v24 = vpop.permute.xlu0 %3041  ;;  %v13173_v25 = vld [vmem:[#allocation41_spill] sm:$0xff]  ;;  %13206 = vst [vmem:[#allocation98_spill] sm:$0xff] %v10106_v35 }
 0x12d   : > { %2077 = vrot.lane.b32.xlu0 %v13171_v58, %s7820_s4  ;;  %v10008_v34 = vsel %vm883_vm0, 0.0, %v2360_v2  ;;  %v2392_v12 = vmul.f32 %v13172_v32, %v13087_v3  ;;  %v3174_v42 = vadd.f32 %v9889_v56, %v9813_v28  ;;  %v2359_v52 = vrot.slane %v2351_v39, 7  ;;  %v10023_v2 = vld [vmem:[%s8025_s27 + $0x138] sm:$0x1f] }
 0x12e   : > { %v2469_v17 = vadd.f32 %v2461_v22, %v2449_v51  ;;  %v2481_v46 = vrot.slane %v2473_v23, 1  ;;  %v2694_v20 = vrot.slane %v2686_v53, 7  ;;  %v13174_v14 = vrot.slane %v13173_v25, 1  ;;  %13175 = vst [vmem:[#allocation87_spill] sm:$0xff] %v10023_v2  ;;  %v13176_v58 = vld [vmem:[#allocation89_spill] sm:$0xff]  ;;  %v13177_v51 = vld [vmem:[#allocation50_spill] sm:$0xff] }
 0x12f   : > { %v2396_v50 = vmul.f32 %v10023_v2, %v13092_v49  ;;  %v2404_v28 = vmul.f32 %v13176_v58, %v13101_v8  ;;  %v2688_v56 = vmax.f32 %v2684_v29, 0.0  ;;  %v3173_v39 = vadd.f32 %v9891_v21, %v9816_v4  ;;  %v13179_v25 = vld [vmem:[#allocation75_spill] sm:$0xff] }
 0x130   : > { %v10020_v41 = vadd.f32 %v13174_v14, %v3008_v0  ;;  %v13178_v22 = vrot.slane %v13177_v51, 1  ;;  %v2490_v53 = vadd.f32 %v2482_v5, %v2470_v60  ;;  %v10035_v0 = vrot.slane %v2685_v36, 7  ;;  %2083 = vrot.lane.b32.xlu1 %v13179_v25, %s7820_s4  ;;  %v13180_v14 = vld [vmem:[#allocation77_spill] sm:$0xff]  ;;  %v13181_v29 = vld [vmem:[#allocation47_spill] sm:$0xff]  ;;  %v10050_v36 = vpop.permute.xlu1 %3047 }
 0x131   : > { %v2687_v32 = vmax.f32 %v2683_v62, 0.0  ;;  %2081 = vrot.lane.b32.xlu0 %v13180_v14, %s7820_s4  ;;  %v2400_v2 = vadd.f32 %v2396_v50, %v2392_v12  ;;  %v2412_v55 = vmul.f32 %v13181_v29, %v13110_v18  ;;  %v13182_v4 = vld [vmem:[#allocation167_spill] sm:$0xff]  ;;  %v10048_v60 = vsel %vm883_vm0, 0.0, %v2359_v52  ;;  %v10052_v62 = vpop.permute.xlu0 %3045  ;;  %v7707_v12 = vld [vmem:[%s8025_s27 + $0x1b8] sm:$0x1f] }
 0x132   : > { %v10033_v23 = vadd.f32 %v13178_v22, %v3007_v37  ;;  %v13183_v21 = vrot.slane %v13182_v4, 1  ;;  %v3176_v37 = vadd.f32 %v9931_v27, %v9844_v15  ;;  %v2489_v5 = vadd.f32 %v2481_v46, %v2469_v17  ;;  %v13184_v25 = vld [vmem:[#allocation55_spill] sm:$0xff]  ;;  %v13187_v27 = vld [vmem:[#allocation170_spill] sm:$0xff]  ;;  %v13190_v4 = vld [vmem:[#allocation49_spill] sm:$0xff] }
 0x133   : > { %v2408_v22 = vadd.f32 %v2404_v28, %v2400_v2  ;;  %v2420_v50 = vmul.f32 %v7707_v12, %v13123_v1  ;;  %v2436_v14 = vmul.f32 %v13184_v25, %v13133_v31  ;;  %v10061_v15 = vrot.slane %v2688_v56, 7  ;;  %v13189_v46 = vld [vmem:[#allocation82_spill] sm:$0xff]  ;;  %v13192_v28 = vld [vmem:[#allocation61_spill] sm:$0xff]  ;;  %v13194_v56 = vld [vmem:[#allocation96_spill] sm:$0xff] }
 0x134   : > { %v3194_v51 = vadd.f32 %v13183_v21, %v3174_v42  ;;  %v10059_v42 = vsel %vm883_vm0, 0.0, %v2694_v20  ;;  %v13188_v52 = vrot.slane %v13187_v27, 1  ;;  %v3175_v29 = vadd.f32 %v9933_v6, %v13189_v46  ;;  %2227 = vrot.lane.b32.xlu1 %v13192_v28, %s7820_s4  ;;  %v13193_v12 = vld [vmem:[#allocation70_spill] sm:$0xff] }
 0x135   : > { %13185 = vst [vmem:[#allocation88_spill] sm:$0xff] %v10059_v42  ;;  %13186 = vst [vmem:[#allocation94_spill] sm:$0xff] %v10061_v15  ;;  %v2494_v21 = vadd.f32 %v2490_v53, %v13190_v4  ;;  %v10068_v2 = vrot.slane %v2687_v32, 7  ;;  %2225 = vrot.lane.b32.xlu0 %v13193_v12, %s7820_s4  ;;  %v2416_v20 = vadd.f32 %v2412_v55, %v2408_v22  ;;  %v10077_v27 = vld [vmem:[%s8025_s27 + $0x38] sm:$0x1f]  ;;  %v2444_v12 = vrot.slane %v2436_v14, 1  ;;  %v10088_v55 = vpop.permute.xlu1 %3231  ;;  %v10090_v22 = vpop.permute.xlu0 %3229 }
 0x136   : > { %v3193_v17 = vadd.f32 %v13188_v52, %v3173_v39  ;;  %v2428_v25 = vmul.f32 %v13194_v56, %v13132_v61  ;;  %13195 = vst [vmem:[#allocation119_spill] sm:$0xff] %v10077_v27  ;;  %v2456_v6 = vmul.f32 %v10077_v27, %v13148_v19  ;;  %v13196_v39 = vld [vmem:[#allocation174_spill] sm:$0xff]  ;;  %v13198_v52 = vld [vmem:[#allocation159_spill] sm:$0xff]  ;;  %v2493_v28 = vadd.f32 %v2489_v5, %v13190_v4 }
 0x137   : > { %13191 = vst [vmem:[#allocation118_spill] sm:$0xff] %v10068_v2  ;;  %v13197_v53 = vrot.slane %v13196_v39, 1  ;;  %v13199_v46 = vrot.slane %v13198_v52, 1  ;;  %v2424_v56 = vadd.f32 %v2420_v50, %v2416_v20  ;;  %v13200_v2 = vld [vmem:[#allocation106_spill] sm:$0xff]  ;;  %v10097_v39 = vld [vmem:[%s8025_s27 + $0x130] sm:$0x1f] }
 0x138   : > { %v2476_v57 = vmul.f32 %v13200_v2, %v13157_v26  ;;  %v13201_v27 = vld [vmem:[#allocation46_spill] sm:$0xff]  ;;  %13202 = vst [vmem:[#allocation131_spill] sm:$0xff] %v10097_v39  ;;  %v2498_v14 = vmax.f32 %v2494_v21, 0.0  ;;  %v13207_v50 = vld [vmem:[#allocation56_spill] sm:$0xff]  ;;  %2231 = vrot.lane.b32.xlu1 %v13208_v33, %s7820_s4 }
 0x139   : > { %v3196_v32 = vadd.f32 %v13197_v53, %v3176_v37  ;;  %v10085_v58 = vadd.f32 %v13199_v46, %v3194_v51  ;;  %v2391_v48 = vmul.f32 %v13201_v27, %v13087_v3  ;;  %v2395_v51 = vmul.f32 %v10097_v39, %v13092_v49  ;;  %v13203_v37 = vld [vmem:[#allocation176_spill] sm:$0xff]  ;;  %v13205_v52 = vld [vmem:[#allocation54_spill] sm:$0xff]  ;;  %v10120_v2 = vpop.permute.xlu1 %3235  ;;  %v10122_v33 = vpop.permute.xlu0 %3233 }
 0x13a   : > { %v13204_v53 = vrot.slane %v13203_v37, 1  ;;  %v1466_v46 = vmul.f32 %v13158_v13, %v13205_v52  ;;  %v1470_v20 = vmul.f32 %v10106_v35, %v13207_v50  ;;  %v13209_v27 = vld [vmem:[#allocation102_spill] sm:$0xff]  ;;  %v2432_v39 = vadd.f32 %v2428_v25, %v2424_v56  ;;  %v13211_v25 = vld [vmem:[#allocation52_spill] sm:$0xff] }
 0x13b   : > { %2229 = vrot.lane.b32.xlu0 %v13209_v27, %s7820_s4  ;;  %v2464_v49 = vrot.slane %v2456_v6, 1  ;;  %v2399_v37 = vadd.f32 %v2395_v51, %v2391_v48  ;;  %v2865_v3 = vadd.f32 %v9968_v16, %v9865_v63  ;;  %v2497_v35 = vmax.f32 %v2493_v28, 0.0  ;;  %v7711_v6 = vld [vmem:[%s8025_s27 + $0x1b0] sm:$0x1f]  ;;  %v13212_v51 = vld [vmem:[#allocation59_spill] sm:$0xff]  ;;  %v13216_v16 = vld [vmem:[#allocation62_spill] sm:$0xff] }
 0x13c   : > { %v3195_v5 = vadd.f32 %v13204_v53, %v3175_v29  ;;  %v13210_v29 = vld [vmem:[#allocation65_spill] sm:$0xff]  ;;  %v2866_v53 = vadd.f32 %v9966_v47, %v9861_v59  ;;  %v2484_v13 = vrot.slane %v2476_v57, 1  ;;  %v2452_v15 = vadd.f32 %v2444_v12, %v2432_v39  ;;  %v13214_v47 = vld [vmem:[#allocation83_spill] sm:$0xff]  ;;  %v13218_v12 = vld [vmem:[#allocation76_spill] sm:$0xff] }
 0x13d   : > { %v2403_v21 = vmul.f32 %v13210_v29, %v13101_v8  ;;  %v2411_v48 = vmul.f32 %v13211_v25, %v13110_v18  ;;  %v2419_v56 = vmul.f32 %v7711_v6, %v13123_v1  ;;  %v13213_v8 = vrot.slane %v13212_v51, 1  ;;  %2375 = vrot.lane.b32.xlu1 %v13218_v12, %s7820_s4  ;;  %v13220_v25 = vld [vmem:[#allocation34_spill] sm:$0xff]  ;;  %v10152_v51 = vpop.permute.xlu1 %1327  ;;  %v13240_v1 = vld [vmem:[#allocation71_spill] sm:$0xff] }
 0x13e   : > { %v13215_v29 = vrot.slane %v13214_v47, 1  ;;  %v13217_v57 = vrot.slane %v13216_v16, 1  ;;  %v10134_v42 = vadd.f32 %v1470_v20, %v1466_v46  ;;  %v2506_v39 = vrot.slane %v2498_v14, 7  ;;  %v13221_v20 = vld [vmem:[#allocation63_spill] sm:$0xff]  ;;  %v13223_v14 = vld [vmem:[#allocation53_spill] sm:$0xff] }
 0x13f   : > { %v2407_v27 = vadd.f32 %v2403_v21, %v2399_v37  ;;  %v3213_v59 = vadd.f32 %v13213_v8, %v3193_v17  ;;  %2373 = vrot.lane.b32.xlu0 %v9914_v7, %s7820_s4  ;;  %v2472_v37 = vadd.f32 %v2464_v49, %v2452_v15  ;;  %v13219_v8 = vld [vmem:[#allocation107_spill] sm:$0xff]  ;;  %v2505_v46 = vrot.slane %v2497_v35, 7  ;;  %v10154_v7 = vpop.permute.xlu0 %1325 }
 0x140   : > { %v3216_v63 = vadd.f32 %v13215_v29, %v3196_v32  ;;  %v3215_v28 = vadd.f32 %v13217_v57, %v3195_v5  ;;  %v2427_v17 = vmul.f32 %v13219_v8, %v13132_v61  ;;  %v10143_v32 = vadd.f32 %v2866_v53, %v13220_v25  ;;  %v13222_v29 = vld [vmem:[#allocation57_spill] sm:$0xff] }
 0x141   : > { %v2415_v21 = vadd.f32 %v2411_v48, %v2407_v27  ;;  %v10146_v5 = vadd.f32 %v2865_v3, %v13220_v25  ;;  %v10150_v6 = vmul.f32 %v13222_v29, %v13221_v20  ;;  %v2492_v49 = vadd.f32 %v2484_v13, %v2472_v37  ;;  %v10159_v48 = vld [vmem:[%s8025_s27 + $0x30] sm:$0x1f]  ;;  %2379 = vrot.lane.b32.xlu1 %v10008_v34, %s7820_s4  ;;  %v10182_v57 = vpop.permute.xlu1 %1331 }
 0x142   : > { %v2435_v27 = vmul.f32 %v13223_v14, %v13133_v31  ;;  %v2455_v3 = vmul.f32 %v10159_v48, %v13148_v19  ;;  %v2868_v35 = vadd.f32 %v9987_v11, %v9911_v45  ;;  %v2867_v53 = vadd.f32 %v9989_v54, %v9920_v38 }
 0x143   : > { %v2423_v15 = vadd.f32 %v2419_v56, %v2415_v21  ;;  %v3054_v47 = vadd.f32 %v10014_v10, %v9993_v40  ;;  %v1465_v13 = vmul.f32 %v9630_v9, %v13205_v52  ;;  %2377 = vrot.lane.b32.xlu0 %v10048_v60, %s7820_s4  ;;  %v2496_v56 = vadd.f32 %v2492_v49, %v13190_v4  ;;  %v10184_v34 = vpop.permute.xlu0 %1329  ;;  %v10187_v60 = vld [vmem:[%s8025_s27 + $0x60] sm:$0x1f] }
 0x144   : > { %v2443_v45 = vrot.slane %v2435_v27, 1  ;;  %v2463_v11 = vrot.slane %v2455_v3, 1  ;;  %v3053_v38 = vadd.f32 %v10016_v24, %v9997_v43  ;;  %v3056_v54 = vadd.f32 %v10050_v36, %v10020_v41  ;;  %v13224_v3 = vld [vmem:[#allocation104_spill] sm:$0xff] }
 0x145   : > { %v2431_v16 = vadd.f32 %v2427_v17, %v2423_v15  ;;  %v2514_v40 = vsel %vm883_vm0, 0.0, %v2506_v39  ;;  %v2513_v10 = vsel %vm883_vm0, 0.0, %v2505_v46  ;;  %v1469_v12 = vmul.f32 %v10187_v60, %v13207_v50 }
 0x146   : > { %v2500_v37 = vmax.f32 %v2496_v56, 0.0  ;;  %v2475_v43 = vmul.f32 %v9833_v44, %v13157_v26  ;;  %v2872_v24 = vadd.f32 %v2868_v35, %v13220_v25  ;;  %v2871_v41 = vadd.f32 %v2867_v53, %v13220_v25  ;;  %2523 = vrot.lane.b32.xlu1 %v2514_v40, %s7820_s4  ;;  %v13237_v26 = vld [vmem:[#allocation98_spill] sm:$0xff] }
 0x147   : > { %v2451_v21 = vadd.f32 %v2443_v45, %v2431_v16  ;;  %v3058_v36 = vadd.f32 %v3054_v47, %v9270_v30  ;;  %v3055_v39 = vadd.f32 %v10052_v62, %v10033_v23  ;;  %v3242_v8 = vadd.f32 %v10088_v55, %v10085_v58  ;;  %2521 = vrot.lane.b32.xlu0 %v2513_v10, %s7820_s4  ;;  %v10211_v62 = vpop.permute.xlu1 %1487  ;;  %v10213_v55 = vpop.permute.xlu0 %1485 }
 0x148   : > { %v2508_v17 = vrot.slane %v2500_v37, 7  ;;  %v2483_v49 = vrot.slane %v2475_v43, 1  ;;  %v3057_v15 = vadd.f32 %v3053_v38, %v9270_v30  ;;  %v3060_v14 = vadd.f32 %v3056_v54, %v9270_v30 }
 0x149   : > { %v2471_v46 = vadd.f32 %v2463_v11, %v2451_v21  ;;  %v3241_v27 = vadd.f32 %v10090_v22, %v3213_v59  ;;  %v10207_v35 = vmul.f32 %v13224_v3, %v13221_v20  ;;  %v3244_v23 = vadd.f32 %v10120_v2, %v3216_v63 }
 0x14a   : > { %v3243_v58 = vadd.f32 %v10122_v33, %v3215_v28  ;;  %v2516_v53 = vsel %vm883_vm0, 0.0, %v2508_v17  ;;  %v2874_v56 = vmax.f32 %v10143_v32, 0.0  ;;  %v2873_v16 = vmax.f32 %v10146_v5, 0.0  ;;  %v13225_v17 = vld [vmem:[#allocation88_spill] sm:$0xff] }
 0x14b   : > { %v2491_v47 = vadd.f32 %v2483_v49, %v2471_v46  ;;  %v2876_v22 = vmax.f32 %v2872_v24, 0.0  ;;  %v2875_v59 = vmax.f32 %v2871_v41, 0.0  ;;  %v3062_v45 = vmax.f32 %v3058_v36, 0.0  ;;  %2527 = vrot.lane.b32.xlu1 %v2516_v53, %s7820_s4  ;;  %v10225_v10 = vpop.permute.xlu1 %1491  ;;  %v10227_v37 = vpop.permute.xlu0 %1489 }
 0x14c   : > { %v3059_v11 = vadd.f32 %v3055_v39, %v9270_v30  ;;  %v3246_v2 = vadd.f32 %v3242_v8, %v13190_v4  ;;  %v3061_v63 = vmax.f32 %v3057_v15, 0.0  ;;  %v3064_v28 = vmax.f32 %v3060_v14, 0.0  ;;  %v13226_v15 = vld [vmem:[#allocation94_spill] sm:$0xff] }
 0x14d   : > { %v2495_v33 = vadd.f32 %v2491_v47, %v13190_v4  ;;  %v3245_v38 = vadd.f32 %v3241_v27, %v13190_v4  ;;  %v1473_v54 = vadd.f32 %v1469_v12, %v1465_v13  ;;  %v3248_v32 = vadd.f32 %v3244_v23, %v13190_v4 }
 0x14e   : > { %v3247_v5 = vadd.f32 %v3243_v58, %v13190_v4  ;;  %v2701_v21 = vsel %vm883_vm0, 0.0, %v10035_v0  ;;  %v2882_v43 = vrot.slane %v2874_v56, 7  ;;  %v10231_v24 = vrot.slane %v2873_v16, 7  ;;  %v13227_v58 = vld [vmem:[#allocation111_spill] sm:$0xff] }
 0x14f   : > { %v2499_v40 = vmax.f32 %v2495_v33, 0.0  ;;  %v10233_v41 = vrot.slane %v2876_v22, 7  ;;  %v10235_v36 = vrot.slane %v2875_v59, 7  ;;  %v10237_v13 = vrot.slane %v3062_v45, 7  ;;  %2711 = vrot.lane.b32.xlu1 %v13225_v17, %s7820_s4  ;;  %v1648_v56 = vpop.permute.xlu1 %1647  ;;  %v1646_v16 = vpop.permute.xlu0 %1645  ;;  %v13228_v22 = vld [vmem:[#allocation106_spill] sm:$0xff]  ;;  %v13230_v33 = vld [vmem:[#allocation112_spill] sm:$0xff] }
 0x150   : > { %v3063_v12 = vmax.f32 %v3059_v11, 0.0  ;;  %v3250_v39 = vmax.f32 %v3246_v2, 0.0  ;;  %v10241_v46 = vrot.slane %v3061_v63, 7  ;;  %v10243_v49 = vrot.slane %v3064_v28, 7  ;;  %v13229_v45 = vld [vmem:[#allocation90_spill] sm:$0xff]  ;;  %v13233_v17 = vld [vmem:[#allocation79_spill] sm:$0xff] }
 0x151   : > { %v2507_v8 = vrot.slane %v2499_v40, 7  ;;  %v3249_v0 = vmax.f32 %v3245_v38, 0.0  ;;  %v2704_v14 = vsel %vm883_vm0, 0.0, %v13226_v15  ;;  %v3252_v27 = vmax.f32 %v3248_v32, 0.0  ;;  %v13231_v38 = vld [vmem:[#allocation103_spill] sm:$0xff] }
 0x152   : > { %v3251_v23 = vmax.f32 %v3247_v5, 0.0  ;;  %v1338_v53 = vadd.f32 %v10152_v51, %v13227_v58  ;;  %v1468_v59 = vmul.f32 %v13228_v22, %v13205_v52  ;;  %v1472_v11 = vmul.f32 %v13229_v45, %v13207_v50  ;;  %v13232_v5 = vld [vmem:[#allocation72_spill] sm:$0xff]  ;;  %v13234_v58 = vld [vmem:[#allocation69_spill] sm:$0xff] }
 0x153   : > { %v2515_v47 = vsel %vm883_vm0, 0.0, %v2507_v8  ;;  %v1467_v2 = vmul.f32 %v9833_v44, %v13205_v52  ;;  %v1471_v63 = vmul.f32 %v13230_v33, %v13207_v50  ;;  %v10259_v28 = vrot.slane %v3063_v12, 7  ;;  %2715 = vrot.lane.b32.xlu1 %v2704_v14, %s7820_s4  ;;  %v13236_v12 = vld [vmem:[#allocation73_spill] sm:$0xff]  ;;  %v10284_v14 = vpop.permute.xlu0 %1649  ;;  %v13241_v50 = vld [vmem:[#allocation84_spill] sm:$0xff] }
 0x154   : > { %2525 = vrot.lane.b32.xlu0 %v2515_v47, %s7820_s4  ;;  %v10261_v51 = vrot.slane %v3250_v39, 7  ;;  %v1337_v32 = vadd.f32 %v10154_v7, %v13231_v38  ;;  %v1340_v40 = vadd.f32 %v10182_v57, %v13232_v5  ;;  %v10268_v8 = vrot.slane %v3249_v0, 7  ;;  %v13235_v47 = vld [vmem:[#allocation58_spill] sm:$0xff]  ;;  %v1652_v0 = vpop.permute.xlu1 %1651 }
 0x155   : > { %v1339_v15 = vadd.f32 %v10184_v34, %v13233_v17  ;;  %v1626_v4 = vmul.f32 %v13235_v47, %v13234_v58  ;;  %v1630_v39 = vmul.f32 %v13237_v26, %v13236_v12  ;;  %v10276_v19 = vrot.slane %v3252_v27, 7  ;;  %v13238_v34 = vld [vmem:[#allocation66_spill] sm:$0xff] }
 0x156   : > { %v10278_v31 = vrot.slane %v3251_v23, 7  ;;  %v1625_v7 = vmul.f32 %v9630_v9, %v13234_v58  ;;  %v1629_v57 = vmul.f32 %v10187_v60, %v13236_v12  ;;  %v1346_v38 = vadd.f32 %v13238_v34, %v1338_v53  ;;  %v13239_v23 = vld [vmem:[#allocation74_spill] sm:$0xff] }
 0x157   : > { %v1476_v5 = vadd.f32 %v1472_v11, %v1468_v59  ;;  %v1475_v17 = vadd.f32 %v1471_v63, %v1467_v2  ;;  %v2890_v27 = vsel %vm883_vm0, 0.0, %v2882_v43  ;;  %v1345_v61 = vadd.f32 %v13239_v23, %v1337_v32  ;;  %v13242_v53 = vld [vmem:[#allocation78_spill] sm:$0xff]  ;;  %v13243_v43 = vld [vmem:[#allocation113_spill] sm:$0xff]  ;;  %v10315_v34 = vpop.permute.xlu0 %1365 }
 0x158   : > { %2709 = vrot.lane.b32.xlu0 %v2701_v21, %s7820_s4  ;;  %v10291_v30 = vadd.f32 %v13240_v1, %v1340_v40  ;;  %v1498_v25 = vadd.f32 %v10211_v62, %v10134_v42  ;;  %v1504_v52 = vmul.f32 %v13241_v50, %v13221_v20  ;;  %2899 = vrot.lane.b32.xlu1 %v2890_v27, %s7820_s4  ;;  %v10305_v1 = vld [vmem:[%s8025_s27 + $0xe8] sm:$0x1f]  ;;  %v13244_v32 = vld [vmem:[#allocation118_spill] sm:$0xff] }
 0x159   : > { %v10299_v59 = vadd.f32 %v13242_v53, %v1339_v15  ;;  %v1497_v21 = vadd.f32 %v10213_v55, %v1473_v54  ;;  %v1503_v11 = vmul.f32 %v13243_v43, %v13221_v20  ;;  %v1634_v2 = vadd.f32 %v1630_v39, %v1626_v4  ;;  %v10313_v15 = vpop.permute.xlu1 %1367  ;;  %v13245_v54 = vld [vmem:[#allocation81_spill] sm:$0xff] }
 0x15a   : > { %v1633_v63 = vadd.f32 %v1629_v57, %v1625_v7  ;;  %v2703_v42 = vsel %vm883_vm0, 0.0, %v13244_v32  ;;  %v1628_v62 = vmul.f32 %v13228_v22, %v13234_v58  ;;  %v1632_v40 = vmul.f32 %v13229_v45, %v13236_v12  ;;  %v10323_v7 = vld [vmem:[%s8025_s27 + $0xe0] sm:$0x1f] }
 0x15b   : > { %v1500_v55 = vadd.f32 %v10225_v10, %v1476_v5  ;;  %v1499_v4 = vadd.f32 %v10227_v37, %v1475_v17  ;;  %v1662_v39 = vmul.f32 %v13222_v29, %v13245_v54  ;;  %13246 = vst [vmem:[#allocation132_spill] sm:$0xff] %v10323_v7  ;;  %v2892_v57 = vsel %vm883_vm0, 0.0, %v10233_v41  ;;  %v13248_v37 = vld [vmem:[#allocation93_spill] sm:$0xff] }
 0x15c   : > { %2713 = vrot.lane.b32.xlu0 %v2703_v42, %s7820_s4  ;;  %v10328_v27 = vadd.f32 %v10150_v6, %v1498_v25  ;;  %v1627_v23 = vmul.f32 %v9833_v44, %v13234_v58  ;;  %v1631_v10 = vmul.f32 %v13230_v33, %v13236_v12  ;;  %v1350_v5 = vmul.f32 %v10305_v1, %v13248_v37  ;;  %v10345_v6 = vld [vmem:[%s8025_s27 + $0xf8] sm:$0x1f] }
 0x15d   : > { %2903 = vrot.lane.b32.xlu1 %v2892_v57, %s7820_s4  ;;  %v10338_v17 = vadd.f32 %v10207_v35, %v1497_v21  ;;  %v1658_v53 = vadd.f32 %v1648_v56, %v1634_v2  ;;  %v1661_v41 = vmul.f32 %v13224_v3, %v13245_v54  ;;  %v1664_v25 = vmul.f32 %v13241_v50, %v13245_v54  ;;  %v10351_v35 = vpop.permute.xlu1 %1371  ;;  %v10354_v56 = vld [vmem:[%s8025_s27 + $0xf0] sm:$0x1f]  ;;  %v10356_v21 = vpop.permute.xlu0 %1369 }
 0x15e   : > { %13247 = vst [vmem:[#allocation138_spill] sm:$0xff] %v10328_v27  ;;  %13250 = vst [vmem:[#allocation148_spill] sm:$0xff] %v10345_v6  ;;  %v1657_v32 = vadd.f32 %v1646_v16, %v1633_v63  ;;  %v1636_v42 = vadd.f32 %v1632_v40, %v1628_v62  ;;  %v2889_v12 = vsel %vm883_vm0, 0.0, %v10231_v24  ;;  %v1349_v57 = vmul.f32 %v10323_v7, %v13248_v37  ;;  %v13254_v40 = vld [vmem:[#allocation85_spill] sm:$0xff] }
 0x15f   : > { %13249 = vst [vmem:[#allocation140_spill] sm:$0xff] %v10338_v17  ;;  %13251 = vst [vmem:[#allocation149_spill] sm:$0xff] %v10354_v56  ;;  %v10358_v2 = vadd.f32 %v1504_v52, %v1500_v55  ;;  %v10360_v58 = vadd.f32 %v1503_v11, %v1499_v4  ;;  %v1663_v16 = vmul.f32 %v13243_v43, %v13245_v54  ;;  %v3078_v24 = vsel %vm883_vm0, 0.0, %v10237_v13  ;;  %v13255_v17 = vld [vmem:[#allocation110_spill] sm:$0xff] }
 0x160   : > { %2897 = vrot.lane.b32.xlu0 %v2889_v12, %s7820_s4  ;;  %v1635_v63 = vadd.f32 %v1631_v10, %v1627_v23  ;;  %v10367_v62 = vadd.f32 %v1350_v5, %v1346_v38  ;;  %v10371_v27 = vmul.f32 %v13255_v17, %v13254_v40  ;;  %v1352_v52 = vmul.f32 %v10345_v6, %v13248_v37  ;;  %v10379_v12 = vld [vmem:[%s8025_s27 + $0x140] sm:$0x1f] }
 0x161   : > { %13252 = vst [vmem:[#allocation92_spill] sm:$0xff] %v10358_v2  ;;  %13253 = vst [vmem:[#allocation125_spill] sm:$0xff] %v10360_v58  ;;  %3087 = vrot.lane.b32.xlu1 %v3078_v24, %s7820_s4  ;;  %v10376_v11 = vadd.f32 %v1662_v39, %v1658_v53  ;;  %v10383_v13 = vmul.f32 %v10379_v12, %v13254_v40  ;;  %v2891_v38 = vsel %vm883_vm0, 0.0, %v10235_v36  ;;  %v10391_v39 = vpop.permute.xlu1 %1807  ;;  %v10393_v5 = vpop.permute.xlu0 %1805  ;;  %v10396_v53 = vld [vmem:[%s8025_s27 + $0x8] sm:$0x1f]  ;;  %v13261_v36 = vld [vmem:[#allocation89_spill] sm:$0xff] }
 0x162   : > { %v1351_v55 = vmul.f32 %v10354_v56, %v13248_v37  ;;  %v10389_v4 = vadd.f32 %v1661_v41, %v1657_v32  ;;  %v1660_v23 = vadd.f32 %v1652_v0, %v1636_v42  ;;  %v1353_v10 = vadd.f32 %v1349_v57, %v1345_v61  ;;  %13258 = vst [vmem:[#allocation30_spill] sm:$0xff] %v10391_v39  ;;  %v13260_v24 = vld [vmem:[#allocation39_spill] sm:$0xff]  ;;  %v13263_v0 = vld [vmem:[#allocation65_spill] sm:$0xff]  ;;  %v13265_v42 = vld [vmem:[#allocation40_spill] sm:$0xff] }
 0x163   : > { %13256 = vst [vmem:[#allocation130_spill] sm:$0xff] %v10376_v11  ;;  %13259 = vst [vmem:[#allocation145_spill] sm:$0xff] %v10393_v5  ;;  %v778_v11 = vmul.f32 %v10396_v53, %v13260_v24  ;;  %v10403_v54 = vmul.f32 %v13261_v36, %v13254_v40  ;;  %v10407_v41 = vmul.f32 %v13263_v0, %v13254_v40  ;;  %v3080_v61 = vsel %vm883_vm0, 0.0, %v10243_v49  ;;  %v10412_v32 = vld [vmem:[%s8025_s27 + $0x28] sm:$0x1f] }
 0x164   : > { %13257 = vst [vmem:[#allocation95_spill] sm:$0xff] %v10389_v4  ;;  %2901 = vrot.lane.b32.xlu0 %v2891_v38, %s7820_s4  ;;  %v784_v57 = vmul.f32 %v10412_v32, %v13265_v42  ;;  %v1659_v4 = vadd.f32 %v10284_v14, %v1635_v63  ;;  %v10418_v38 = vadd.f32 %v1352_v52, %v10291_v30  ;;  %v3077_v36 = vsel %vm883_vm0, 0.0, %v10241_v46  ;;  %v10424_v0 = vld [vmem:[%s8025_s27 + $0xa8] sm:$0x1f] }
 0x165   : > { %13262 = vst [vmem:[#allocation134_spill] sm:$0xff] %v10403_v54  ;;  %13264 = vst [vmem:[#allocation137_spill] sm:$0xff] %v10407_v41  ;;  %3091 = vrot.lane.b32.xlu1 %v3080_v61, %s7820_s4  ;;  %v13266_v58 = vld [vmem:[#allocation11_spill] sm:$0xff]  ;;  %v10429_v2 = vadd.f32 %v1351_v55, %v10299_v59  ;;  %v13267_v5 = vld [vmem:[#allocation100_spill] sm:$0xff]  ;;  %v10438_v39 = vadd.f32 %v1664_v25, %v1660_v23  ;;  %v10444_v59 = vmul.f32 %v13222_v29, %v13110_v18  ;;  %v10446_v55 = vpop.permute.xlu1 %1811  ;;  %v10448_v6 = vpop.permute.xlu0 %1809 }
 0x166   : > { %v794_v49 = vmul.f32 %v13235_v47, %v13266_v58  ;;  %v1786_v14 = vmul.f32 %v13235_v47, %v13267_v5  ;;  %v788_v63 = vadd.f32 %v784_v57, %v778_v11  ;;  %v10434_v30 = vld [vmem:[%s8025_s27 + $0x88] sm:$0x1f]  ;;  %v13270_v61 = vld [vmem:[#allocation101_spill] sm:$0xff]  ;;  %13272 = vst [vmem:[#allocation42_spill] sm:$0xff] %v10446_v55  ;;  %13273 = vst [vmem:[#allocation99_spill] sm:$0xff] %v10448_v6 }
 0x167   : > { %v13268_v52 = vld [vmem:[#allocation51_spill] sm:$0xff]  ;;  %13269 = vst [vmem:[#allocation97_spill] sm:$0xff] %v10438_v39  ;;  %v1790_v56 = vmul.f32 %v13237_v26, %v13270_v61  ;;  %13271 = vst [vmem:[#allocation153_spill] sm:$0xff] %v10444_v59  ;;  %v3266_v26 = vsel %vm883_vm0, 0.0, %v10261_v51  ;;  %v814_v23 = vmul.f32 %v10424_v0, %v13248_v37  ;;  %v10465_v6 = vadd.f32 %v1663_v16, %v1659_v4  ;;  %v13276_v59 = vld [vmem:[#allocation16_spill] sm:$0xff] }
 0x168   : > { %v804_v46 = vmul.f32 %v10434_v30, %v13268_v52  ;;  %v10451_v47 = vld [vmem:[%s8025_s27] sm:$0x1f]  ;;  %3085 = vrot.lane.b32.xlu0 %v3077_v36, %s7820_s4  ;;  %v798_v25 = vadd.f32 %v794_v49, %v788_v63  ;;  %v1785_v55 = vmul.f32 %v9630_v9, %v13267_v5  ;;  %v1789_v36 = vmul.f32 %v10187_v60, %v13270_v61 }
 0x169   : > { %v777_v11 = vmul.f32 %v10451_v47, %v13260_v24  ;;  %v10461_v57 = vld [vmem:[%s8025_s27 + $0x20] sm:$0x1f]  ;;  %13275 = vst [vmem:[#allocation117_spill] sm:$0xff] %v10465_v6  ;;  %3275 = vrot.lane.b32.xlu1 %v3266_v26, %s7820_s4  ;;  %v793_v49 = vmul.f32 %v9630_v9, %v13266_v58  ;;  %v824_v41 = vmul.f32 %v13222_v29, %v13276_v59  ;;  %v3079_v26 = vsel %vm883_vm0, 0.0, %v10259_v28  ;;  %v10492_v9 = vpop.permute.xlu1 %1527 }
 0x16a   : > { %13274 = vst [vmem:[#allocation150_spill] sm:$0xff] %v10461_v57  ;;  %v783_v39 = vmul.f32 %v10461_v57, %v13265_v42  ;;  %v10473_v51 = vld [vmem:[%s8025_s27 + $0xa0] sm:$0x1f]  ;;  %v808_v63 = vadd.f32 %v804_v46, %v798_v25  ;;  %v10484_v54 = vadd.f32 %v1790_v56, %v1786_v14  ;;  %v10488_v60 = vmul.f32 %v13224_v3, %v13110_v18  ;;  %v10494_v46 = vpop.permute.xlu0 %1525  ;;  %v10500_v56 = vld [vmem:[%s8025_s27 + $0x108] sm:$0x1f] }
 0x16b   : > { %v10480_v4 = vld [vmem:[%s8025_s27 + $0x80] sm:$0x1f]  ;;  %13280 = vst [vmem:[#allocation181_spill] sm:$0xff] %v10492_v9  ;;  %13281 = vst [vmem:[#allocation121_spill] sm:$0xff] %v10494_v46  ;;  %v3268_v29 = vsel %vm883_vm0, 0.0, %v10276_v19  ;;  %v834_v14 = vmul.f32 %v10500_v56, %v13254_v40  ;;  %v813_v28 = vmul.f32 %v10473_v51, %v13248_v37  ;;  %v1378_v25 = vadd.f32 %v10313_v15, %v10367_v62 }
 0x16c   : > { %v787_v16 = vadd.f32 %v783_v39, %v777_v11  ;;  %13277 = vst [vmem:[#allocation142_spill] sm:$0xff] %v10480_v4  ;;  %v803_v6 = vmul.f32 %v10480_v4, %v13268_v52  ;;  %13278 = vst [vmem:[#allocation147_spill] sm:$0xff] %v10484_v54  ;;  %3089 = vrot.lane.b32.xlu0 %v3079_v26, %s7820_s4  ;;  %v818_v39 = vadd.f32 %v814_v23, %v808_v63  ;;  %v10515_v63 = vld [vmem:[%s8025_s27 + $0x128] sm:$0x1f]  ;;  %v13294_v54 = vld [vmem:[#allocation86_spill] sm:$0xff] }
 0x16d   : > { %13279 = vst [vmem:[#allocation37_spill] sm:$0xff] %v10488_v60  ;;  %v1377_v46 = vadd.f32 %v10315_v34, %v1353_v10  ;;  %v10509_v9 = vadd.f32 %v1789_v36, %v1785_v55  ;;  %v1788_v19 = vmul.f32 %v13228_v22, %v13267_v5  ;;  %3279 = vrot.lane.b32.xlu1 %v3268_v29, %s7820_s4  ;;  %13283 = vst [vmem:[#allocation158_spill] sm:$0xff] %v10515_v63  ;;  %v10523_v62 = vpop.permute.xlu1 %1531  ;;  %v13288_v36 = vld [vmem:[#allocation119_spill] sm:$0xff]  ;;  %v10545_v60 = vld [vmem:[%s8025_s27 + $0xb8] sm:$0x1f] }
 0x16e   : > { %v797_v11 = vadd.f32 %v793_v49, %v787_v16  ;;  %v828_v23 = vadd.f32 %v824_v41, %v818_v39  ;;  %v13284_v49 = vld [vmem:[#allocation146_spill] sm:$0xff]  ;;  %v823_v15 = vmul.f32 %v13224_v3, %v13276_v59  ;;  %v3265_v34 = vsel %vm883_vm0, 0.0, %v10268_v8  ;;  %13285 = vst [vmem:[#allocation105_spill] sm:$0xff] %v10523_v62  ;;  %v10525_v10 = vpop.permute.xlu0 %1529  ;;  %v13289_v8 = vld [vmem:[#allocation20_spill] sm:$0xff]  ;;  %13291 = vst [vmem:[#allocation152_spill] sm:$0xff] %v10545_v60 }
 0x16f   : > { %13282 = vst [vmem:[#allocation155_spill] sm:$0xff] %v10509_v9  ;;  %v844_v16 = vmul.f32 %v10515_v63, %v13284_v49  ;;  %13286 = vst [vmem:[#allocation108_spill] sm:$0xff] %v10525_v10  ;;  %v10528_v41 = vld [vmem:[%s8025_s27 + $0x18] sm:$0x1f]  ;;  %v786_v29 = vmul.f32 %v13288_v36, %v13265_v42  ;;  %v854_v39 = vmul.f32 %v13255_v17, %v13289_v8  ;;  %v10540_v62 = vld [vmem:[%s8025_s27 + $0x100] sm:$0x1f] }
 0x170   : > { %v807_v26 = vadd.f32 %v803_v6, %v797_v11  ;;  %13287 = vst [vmem:[#allocation114_spill] sm:$0xff] %v10528_v41  ;;  %v780_v55 = vmul.f32 %v10528_v41, %v13260_v24  ;;  %v796_v6 = vmul.f32 %v13228_v22, %v13266_v58  ;;  %3273 = vrot.lane.b32.xlu0 %v3265_v34, %s7820_s4  ;;  %13290 = vst [vmem:[#allocation151_spill] sm:$0xff] %v10540_v62 }
 0x171   : > { %v838_v3 = vadd.f32 %v834_v14, %v828_v23  ;;  %v833_v10 = vmul.f32 %v10540_v62, %v13254_v40  ;;  %v1792_v9 = vmul.f32 %v13229_v45, %v13270_v61  ;;  %v10551_v22 = vmul.f32 %v13241_v50, %v13110_v18  ;;  %v10554_v14 = vld [vmem:[%s8025_s27 + $0x98] sm:$0x1f] }
 0x172   : > { %v817_v11 = vadd.f32 %v813_v28, %v807_v26  ;;  %v790_v34 = vadd.f32 %v786_v29, %v780_v55  ;;  %13293 = vst [vmem:[#allocation115_spill] sm:$0xff] %v10554_v14  ;;  %v806_v17 = vmul.f32 %v10554_v14, %v13268_v52  ;;  %v1787_v28 = vmul.f32 %v9833_v44, %v13267_v5  ;;  %v10566_v29 = vpop.permute.xlu1 %1687 }
 0x173   : > { %13292 = vst [vmem:[#allocation33_spill] sm:$0xff] %v10551_v22  ;;  %v848_v23 = vadd.f32 %v844_v16, %v838_v3  ;;  %v843_v62 = vmul.f32 %v13294_v54, %v13284_v49  ;;  %v1791_v45 = vmul.f32 %v13230_v33, %v13270_v61  ;;  %v3267_v55 = vsel %vm883_vm0, 0.0, %v10278_v31  ;;  %13295 = vst [vmem:[#allocation129_spill] sm:$0xff] %v10566_v29  ;;  %v10568_v22 = vpop.permute.xlu0 %1685  ;;  %v10578_v3 = vld [vmem:[%s8025_s27 + $0x10] sm:$0x1f] }
 0x174   : > { %v827_v26 = vadd.f32 %v823_v15, %v817_v11  ;;  %13296 = vst [vmem:[#allocation133_spill] sm:$0xff] %v10568_v22  ;;  %v800_v14 = vadd.f32 %v796_v6, %v790_v34  ;;  %v816_v5 = vmul.f32 %v10545_v60, %v13248_v37  ;;  %3277 = vrot.lane.b32.xlu0 %v3267_v55, %s7820_s4  ;;  %v10597_v55 = vld [vmem:[%s8025_s27 + $0x118] sm:$0x1f]  ;;  %v10602_v61 = vld [vmem:[%s8025_s27 + $0x90] sm:$0x1f] }
 0x175   : > { %v858_v16 = vadd.f32 %v854_v39, %v848_v23  ;;  %v853_v33 = vmul.f32 %v10379_v12, %v13289_v8  ;;  %v826_v31 = vmul.f32 %v13241_v50, %v13276_v59  ;;  %v779_v6 = vmul.f32 %v10578_v3, %v13260_v24  ;;  %v13299_v23 = vld [vmem:[#allocation160_spill] sm:$0xff] }
 0x176   : > { %v837_v54 = vadd.f32 %v833_v10, %v827_v26  ;;  %v810_v15 = vadd.f32 %v806_v17, %v800_v14  ;;  %v785_v11 = vmul.f32 %v10159_v48, %v13265_v42  ;;  %v795_v39 = vmul.f32 %v9833_v44, %v13266_v58  ;;  %v10594_v17 = vld [vmem:[%s8025_s27 + $0xb0] sm:$0x1f]  ;;  %v10606_v58 = vpop.permute.xlu1 %1691 }
 0x177   : > { %v10587_v10 = vadd.f32 %v10371_v27, %v1378_v25  ;;  %v10590_v34 = vadd.f32 %v10383_v13, %v1377_v46  ;;  %v864_v50 = vadd.f32 %v13299_v23, %v858_v16  ;;  %v836_v24 = vmul.f32 %v10597_v55, %v13254_v40  ;;  %13300 = vst [vmem:[#allocation26_spill] sm:$0xff] %v10606_v58  ;;  %v10608_v27 = vpop.permute.xlu0 %1689  ;;  %v13302_v16 = vld [vmem:[#allocation87_spill] sm:$0xff] }
 0x178   : > { %v847_v14 = vadd.f32 %v843_v62, %v837_v54  ;;  %v820_v26 = vadd.f32 %v816_v5, %v810_v15  ;;  %v789_v42 = vadd.f32 %v785_v11, %v779_v6  ;;  %v805_v44 = vmul.f32 %v10602_v61, %v13268_v52  ;;  %13301 = vst [vmem:[#allocation154_spill] sm:$0xff] %v10608_v27  ;;  %v13303_v11 = vld [vmem:[#allocation120_spill] sm:$0xff] }
 0x179   : > { %13297 = vst [vmem:[#allocation156_spill] sm:$0xff] %v10587_v10  ;;  %13298 = vst [vmem:[#allocation162_spill] sm:$0xff] %v10590_v34  ;;  %v10610_v13 = vadd.f32 %v1792_v9, %v1788_v19  ;;  %v10614_v5 = vmul.f32 %v13243_v43, %v13110_v18  ;;  %v868_v46 = vmax.f32 %v864_v50, 0.0  ;;  %v846_v54 = vmul.f32 %v13302_v16, %v13284_v49  ;;  %v10626_v50 = vld [vmem:[%s8025_s27 + $0x158] sm:$0x1f] }
 0x17a   : > { %v857_v25 = vadd.f32 %v853_v33, %v847_v14  ;;  %v830_v62 = vadd.f32 %v826_v31, %v820_v26  ;;  %v799_v15 = vadd.f32 %v795_v39, %v789_v42  ;;  %v815_v52 = vmul.f32 %v10594_v17, %v13248_v37  ;;  %v13304_v14 = vld [vmem:[#allocation54_spill] sm:$0xff]  ;;  %v10671_v10 = vld [vmem:[%s8025_s27 + $0x150] sm:$0x1f] }
 0x17b   : > { %v10620_v6 = vadd.f32 %v1791_v45, %v1787_v28  ;;  %v1510_v9 = vmul.f32 %v10305_v1, %v13303_v11  ;;  %v876_v19 = vrot.slane %v868_v46, 7  ;;  %v856_v33 = vmul.f32 %v10626_v50, %v13289_v8  ;;  %v10639_v46 = vld [vmem:[%s8025_s27 + $0x110] sm:$0x1f]  ;;  %v13318_v18 = vld [vmem:[#allocation134_spill] sm:$0xff] }
 0x17c   : > { %v863_v27 = vadd.f32 %v13299_v23, %v857_v25  ;;  %v840_v34 = vadd.f32 %v836_v24, %v830_v62  ;;  %v809_v31 = vadd.f32 %v805_v44, %v799_v15  ;;  %v825_v39 = vmul.f32 %v13243_v43, %v13276_v59  ;;  %v13305_v59 = vld [vmem:[#allocation56_spill] sm:$0xff] }
 0x17d   : > { %v1380_v37 = vadd.f32 %v10351_v35, %v10418_v38  ;;  %v885_v28 = vsel %vm883_vm0, 0.0, %v876_v19  ;;  %v912_v26 = vmul.f32 %v10396_v53, %v13304_v14  ;;  %v835_v43 = vmul.f32 %v10639_v46, %v13254_v40  ;;  %v10645_v35 = vpop.permute.xlu1 %1407  ;;  %v10647_v38 = vpop.permute.xlu0 %1405  ;;  %v13309_v15 = vld [vmem:[#allocation12_spill] sm:$0xff] }
 0x17e   : > { %v867_v45 = vmax.f32 %v863_v27, 0.0  ;;  %894 = vrot.lane.b32.xlu1 %v885_v28, %s7820_s4  ;;  %v850_v24 = vadd.f32 %v846_v54, %v840_v34  ;;  %v819_v42 = vadd.f32 %v815_v52, %v809_v31  ;;  %v918_v44 = vmul.f32 %v10412_v32, %v13305_v59  ;;  %13306 = vst [vmem:[#allocation157_spill] sm:$0xff] %v10645_v35  ;;  %v13308_v34 = vld [vmem:[#allocation131_spill] sm:$0xff]  ;;  %v13311_v35 = vld [vmem:[#allocation116_spill] sm:$0xff] }
 0x17f   : > { %13307 = vst [vmem:[#allocation122_spill] sm:$0xff] %v10647_v38  ;;  %v1379_v27 = vadd.f32 %v10356_v21, %v10429_v2  ;;  %v845_v62 = vmul.f32 %v13308_v34, %v13284_v49  ;;  %v10654_v54 = vld [vmem:[%s8025_s27 + $0x48] sm:$0x1f]  ;;  %v938_v28 = vmul.f32 %v10434_v30, %v13221_v20  ;;  %v1509_v2 = vmul.f32 %v10323_v7, %v13303_v11 }
 0x180   : > { %v875_v25 = vrot.slane %v867_v45, 7  ;;  %v928_v40 = vmul.f32 %v10654_v54, %v13309_v15  ;;  %v860_v52 = vadd.f32 %v856_v33, %v850_v24  ;;  %v829_v19 = vadd.f32 %v825_v39, %v819_v42  ;;  %v10661_v38 = vld [vmem:[%s8025_s27 + $0x148] sm:$0x1f] }
 0x181   : > { %v922_v31 = vadd.f32 %v918_v44, %v912_v26  ;;  %13310 = vst [vmem:[#allocation123_spill] sm:$0xff] %v10661_v38  ;;  %v10665_v21 = vmul.f32 %v10661_v38, %v13311_v35  ;;  %v855_v33 = vmul.f32 %v10671_v10, %v13289_v8  ;;  %v948_v42 = vmul.f32 %v10424_v0, %v13303_v11  ;;  %v13313_v44 = vld [vmem:[#allocation138_spill] sm:$0xff]  ;;  %v10687_v49 = vld [vmem:[%s8025_s27 + $0xc8] sm:$0x1f]  ;;  %v13315_v8 = vld [vmem:[#allocation21_spill] sm:$0xff] }
 0x182   : > { %v884_v45 = vsel %vm883_vm0, 0.0, %v875_v25  ;;  %v866_v39 = vadd.f32 %v13299_v23, %v860_v52  ;;  %v839_v26 = vadd.f32 %v835_v43, %v829_v19  ;;  %v10680_v58 = vadd.f32 %v1510_v9, %v13313_v44  ;;  %v10695_v9 = vpop.permute.xlu1 %1411  ;;  %v10697_v44 = vpop.permute.xlu0 %1409 }
 0x183   : > { %13312 = vst [vmem:[#allocation168_spill] sm:$0xff] %v10665_v21  ;;  %892 = vrot.lane.b32.xlu0 %v884_v45, %s7820_s4  ;;  %v932_v24 = vadd.f32 %v928_v40, %v922_v31  ;;  %v10684_v25 = vmul.f32 %v10379_v12, %v13311_v35  ;;  %v958_v45 = vmul.f32 %v10687_v49, %v13315_v8  ;;  %13316 = vst [vmem:[#allocation124_spill] sm:$0xff] %v10695_v9 }
 0x184   : > { %v911_v43 = vmul.f32 %v10451_v47, %v13304_v14  ;;  %v870_v52 = vmax.f32 %v866_v39, 0.0  ;;  %v849_v40 = vadd.f32 %v845_v62, %v839_v26  ;;  %v917_v31 = vmul.f32 %v10461_v57, %v13305_v59  ;;  %13317 = vst [vmem:[#allocation126_spill] sm:$0xff] %v10697_v44  ;;  %v13321_v44 = vld [vmem:[#allocation137_spill] sm:$0xff] }
 0x185   : > { %13314 = vst [vmem:[#allocation169_spill] sm:$0xff] %v10684_v25  ;;  %v942_v19 = vadd.f32 %v938_v28, %v932_v24  ;;  %v10700_v22 = vadd.f32 %v13318_v18, %v1380_v37  ;;  %v968_v29 = vmul.f32 %v10500_v56, %v13311_v35  ;;  %v10705_v25 = vld [vmem:[%s8025_s27 + $0x40] sm:$0x1f]  ;;  %v937_v62 = vmul.f32 %v10480_v4, %v13221_v20  ;;  %v13323_v18 = vld [vmem:[#allocation140_spill] sm:$0xff] }
 0x186   : > { %13320 = vst [vmem:[#allocation161_spill] sm:$0xff] %v10705_v25  ;;  %v927_v39 = vmul.f32 %v10705_v25, %v13309_v15  ;;  %v878_v28 = vrot.slane %v870_v52, 7  ;;  %v859_v26 = vadd.f32 %v855_v33, %v849_v40  ;;  %v921_v9 = vadd.f32 %v917_v31, %v911_v43 }
 0x187   : > { %13319 = vst [vmem:[#allocation60_spill] sm:$0xff] %v10700_v22  ;;  %v952_v24 = vadd.f32 %v948_v42, %v942_v19  ;;  %v10712_v21 = vadd.f32 %v13321_v44, %v1379_v27  ;;  %v10715_v37 = vadd.f32 %v1509_v2, %v13323_v18  ;;  %v13324_v22 = vld [vmem:[#allocation177_spill] sm:$0xff]  ;;  %v947_v25 = vmul.f32 %v10473_v51, %v13303_v11  ;;  %v13325_v27 = vld [vmem:[#allocation22_spill] sm:$0xff] }
 0x188   : > { %v978_v7 = vmul.f32 %v10515_v63, %v13324_v22  ;;  %v887_v57 = vsel %vm883_vm0, 0.0, %v878_v28  ;;  %v865_v52 = vadd.f32 %v13299_v23, %v859_v26  ;;  %v931_v42 = vadd.f32 %v927_v39, %v921_v9  ;;  %v10727_v2 = vld [vmem:[%s8025_s27 + $0xc0] sm:$0x1f]  ;;  %v10736_v9 = vld [vmem:[%s8025_s27 + $0x58] sm:$0x1f]  ;;  %v10740_v39 = vpop.permute.xlu1 %1847  ;;  %v10742_v26 = vpop.permute.xlu0 %1845 }
 0x189   : > { %13322 = vst [vmem:[#allocation164_spill] sm:$0xff] %v10712_v21  ;;  %v962_v33 = vadd.f32 %v958_v45, %v952_v24  ;;  %898 = vrot.lane.b32.xlu1 %v887_v57, %s7820_s4  ;;  %v988_v43 = vmul.f32 %v10661_v38, %v13325_v27  ;;  %13326 = vst [vmem:[#allocation28_spill] sm:$0xff] %v10727_v2  ;;  %v957_v40 = vmul.f32 %v10727_v2, %v13315_v8  ;;  %v13330_v24 = vld [vmem:[#allocation148_spill] sm:$0xff] }
 0x18a   : > { %v914_v19 = vmul.f32 %v10528_v41, %v13304_v14  ;;  %v920_v31 = vmul.f32 %v13288_v36, %v13305_v59  ;;  %v869_v44 = vmax.f32 %v865_v52, 0.0  ;;  %v941_v45 = vadd.f32 %v937_v62, %v931_v42  ;;  %13327 = vst [vmem:[#allocation175_spill] sm:$0xff] %v10736_v9  ;;  %13328 = vst [vmem:[#allocation31_spill] sm:$0xff] %v10740_v39  ;;  %v13333_v39 = vld [vmem:[#allocation151_spill] sm:$0xff] }
 0x18b   : > { %v972_v28 = vadd.f32 %v968_v29, %v962_v33  ;;  %v930_v57 = vmul.f32 %v10736_v9, %v13309_v15  ;;  %13329 = vst [vmem:[#allocation17_spill] sm:$0xff] %v10742_v26  ;;  %v1512_v18 = vmul.f32 %v13330_v24, %v13303_v11  ;;  %v10748_v21 = vmul.f32 %v10626_v50, %v13311_v35  ;;  %v13332_v29 = vld [vmem:[#allocation115_spill] sm:$0xff]  ;;  %v13334_v26 = vld [vmem:[#allocation149_spill] sm:$0xff] }
 0x18c   : > { %v924_v36 = vadd.f32 %v920_v31, %v914_v19  ;;  %v940_v62 = vmul.f32 %v13332_v29, %v13221_v20  ;;  %v877_v52 = vrot.slane %v869_v44, 7  ;;  %v951_v42 = vadd.f32 %v947_v25, %v941_v45  ;;  %v13335_v45 = vld [vmem:[#allocation147_spill] sm:$0xff]  ;;  %v13336_v29 = vld [vmem:[#allocation30_spill] sm:$0xff] }
 0x18d   : > { %13331 = vst [vmem:[#allocation127_spill] sm:$0xff] %v10748_v21  ;;  %v982_v33 = vadd.f32 %v978_v7, %v972_v28  ;;  %v967_v23 = vmul.f32 %v13333_v39, %v13311_v35  ;;  %v1511_v9 = vmul.f32 %v13334_v26, %v13303_v11  ;;  %v10758_v24 = vmul.f32 %v10671_v10, %v13311_v35  ;;  %v10764_v28 = vld [vmem:[%s8025_s27 + $0x120] sm:$0x1f]  ;;  %v13338_v39 = vld [vmem:[#allocation145_spill] sm:$0xff] }
 0x18e   : > { %v934_v41 = vadd.f32 %v930_v57, %v924_v36  ;;  %v950_v19 = vmul.f32 %v10545_v60, %v13303_v11  ;;  %v886_v31 = vsel %vm883_vm0, 0.0, %v877_v52  ;;  %v961_v7 = vadd.f32 %v957_v40, %v951_v42  ;;  %v13337_v21 = vld [vmem:[#allocation155_spill] sm:$0xff]  ;;  %v10774_v36 = vld [vmem:[%s8025_s27 + $0xd8] sm:$0x1f] }
 0x18f   : > { %v992_v44 = vadd.f32 %v988_v43, %v982_v33  ;;  %v977_v25 = vmul.f32 %v10764_v28, %v13324_v22  ;;  %v1818_v26 = vadd.f32 %v13336_v29, %v13335_v45  ;;  %v1817_v2 = vadd.f32 %v13338_v39, %v13337_v21  ;;  %896 = vrot.lane.b32.xlu0 %v886_v31, %s7820_s4  ;;  %v13340_v40 = vld [vmem:[#allocation34_spill] sm:$0xff]  ;;  %v10783_v45 = vpop.permute.xlu1 %1851  ;;  %v10785_v21 = vpop.permute.xlu0 %1849 }
 0x190   : > { %v944_v57 = vadd.f32 %v940_v62, %v934_v41  ;;  %13339 = vst [vmem:[#allocation135_spill] sm:$0xff] %v10774_v36  ;;  %v960_v43 = vmul.f32 %v10774_v36, %v13315_v8  ;;  %v971_v33 = vadd.f32 %v967_v23, %v961_v7  ;;  %v987_v42 = vmul.f32 %v10379_v12, %v13325_v27  ;;  %v13343_v41 = vld [vmem:[#allocation92_spill] sm:$0xff] }
 0x191   : > { %v998_v52 = vadd.f32 %v13340_v40, %v992_v44  ;;  %v913_v29 = vmul.f32 %v10578_v3, %v13304_v14  ;;  %13341 = vst [vmem:[#allocation27_spill] sm:$0xff] %v10783_v45  ;;  %13342 = vst [vmem:[#allocation166_spill] sm:$0xff] %v10785_v21  ;;  %v10788_v39 = vadd.f32 %v1512_v18, %v13343_v41  ;;  %v13344_v44 = vld [vmem:[#allocation125_spill] sm:$0xff] }
 0x192   : > { %v954_v62 = vadd.f32 %v950_v19, %v944_v57  ;;  %v970_v31 = vmul.f32 %v10597_v55, %v13311_v35  ;;  %v919_v23 = vmul.f32 %v10159_v48, %v13305_v59  ;;  %v10795_v7 = vadd.f32 %v1511_v9, %v13344_v44  ;;  %v10798_v14 = vld [vmem:[%s8025_s27 + $0x50] sm:$0x1f] }
 0x193   : > { %v1002_v36 = vmax.f32 %v998_v52, 0.0  ;;  %v981_v60 = vadd.f32 %v977_v25, %v971_v33  ;;  %v929_v21 = vmul.f32 %v10798_v14, %v13309_v15  ;;  %v980_v19 = vmul.f32 %v13302_v16, %v13324_v22  ;;  %v13345_v59 = vld [vmem:[#allocation153_spill] sm:$0xff] }
 0x194   : > { %v964_v18 = vadd.f32 %v960_v43, %v954_v62  ;;  %v923_v57 = vadd.f32 %v919_v23, %v913_v29  ;;  %v939_v41 = vmul.f32 %v10602_v61, %v13221_v20  ;;  %v10807_v45 = vadd.f32 %v13345_v59, %v1818_v26  ;;  %v13347_v9 = vld [vmem:[#allocation37_spill] sm:$0xff]  ;;  %v13349_v29 = vld [vmem:[#allocation42_spill] sm:$0xff] }
 0x195   : > { %v10810_v52 = vadd.f32 %v13347_v9, %v1817_v2  ;;  %v1010_v25 = vrot.slane %v1002_v36, 7  ;;  %v991_v33 = vadd.f32 %v987_v42, %v981_v60  ;;  %v990_v15 = vmul.f32 %v10626_v50, %v13325_v27  ;;  %v10821_v23 = vld [vmem:[%s8025_s27 + $0xd0] sm:$0x1f]  ;;  %v10825_v2 = vpop.permute.xlu1 %1567  ;;  %v10827_v36 = vpop.permute.xlu0 %1565 }
 0x196   : > { %13346 = vst [vmem:[#allocation80_spill] sm:$0xff] %v10807_v45  ;;  %v974_v44 = vadd.f32 %v970_v31, %v964_v18  ;;  %v933_v43 = vadd.f32 %v929_v21, %v923_v57  ;;  %v949_v16 = vmul.f32 %v10594_v17, %v13303_v11  ;;  %v1820_v62 = vadd.f32 %v13349_v29, %v10610_v13  ;;  %v13352_v21 = vld [vmem:[#allocation69_spill] sm:$0xff]  ;;  %v13354_v57 = vld [vmem:[#allocation99_spill] sm:$0xff] }
 0x197   : > { %13348 = vst [vmem:[#allocation172_spill] sm:$0xff] %v10810_v52  ;;  %v1018_v20 = vsel %vm883_vm0, 0.0, %v1010_v25  ;;  %v997_v26 = vadd.f32 %v13340_v40, %v991_v33  ;;  %v959_v60 = vmul.f32 %v10821_v23, %v13315_v8  ;;  %13350 = vst [vmem:[#allocation173_spill] sm:$0xff] %v10825_v2  ;;  %v1044_v13 = vmul.f32 %v10396_v53, %v13352_v21  ;;  %v13353_v31 = vld [vmem:[#allocation73_spill] sm:$0xff]  ;;  %v13359_v52 = vld [vmem:[#allocation136_spill] sm:$0xff] }
 0x198   : > { %13351 = vst [vmem:[#allocation179_spill] sm:$0xff] %v10827_v36  ;;  %1027 = vrot.lane.b32.xlu1 %v1018_v20, %s7820_s4  ;;  %v984_v42 = vadd.f32 %v980_v19, %v974_v44  ;;  %v943_v11 = vadd.f32 %v939_v41, %v933_v43  ;;  %v1050_v18 = vmul.f32 %v10412_v32, %v13353_v31  ;;  %v13355_v25 = vld [vmem:[#allocation13_spill] sm:$0xff] }
 0x199   : > { %v1819_v59 = vadd.f32 %v13354_v57, %v10620_v6  ;;  %v1001_v9 = vmax.f32 %v997_v26, 0.0  ;;  %v969_v8 = vmul.f32 %v10639_v46, %v13311_v35  ;;  %v1060_v33 = vmul.f32 %v10654_v54, %v13355_v25  ;;  %v13356_v41 = vld [vmem:[#allocation81_spill] sm:$0xff] }
 0x19a   : > { %v994_v29 = vadd.f32 %v990_v15, %v984_v42  ;;  %v953_v20 = vadd.f32 %v949_v16, %v943_v11  ;;  %v1054_v19 = vadd.f32 %v1050_v18, %v1044_v13  ;;  %v1070_v44 = vmul.f32 %v10434_v30, %v13356_v41  ;;  %v13357_v43 = vld [vmem:[#allocation33_spill] sm:$0xff]  ;;  %v10860_v13 = vpop.permute.xlu1 %1571 }
 0x19b   : > { %v10843_v36 = vadd.f32 %v13357_v43, %v1820_v62  ;;  %v1670_v45 = vmul.f32 %v10305_v1, %v13359_v52  ;;  %v1009_v6 = vrot.slane %v1001_v9, 7  ;;  %v979_v26 = vmul.f32 %v13308_v34, %v13324_v22  ;;  %v13361_v62 = vld [vmem:[#allocation181_spill] sm:$0xff]  ;;  %13362 = vst [vmem:[#allocation45_spill] sm:$0xff] %v10860_v13  ;;  %v10862_v34 = vpop.permute.xlu0 %1569 }
 0x19c   : > { %v1000_v35 = vadd.f32 %v13340_v40, %v994_v29  ;;  %v963_v57 = vadd.f32 %v959_v60, %v953_v20  ;;  %v1064_v2 = vadd.f32 %v1060_v33, %v1054_v19  ;;  %v1080_v15 = vmul.f32 %v10424_v0, %v13359_v52  ;;  %13363 = vst [vmem:[#allocation139_spill] sm:$0xff] %v10862_v34  ;;  %v13364_v33 = vld [vmem:[#allocation29_spill] sm:$0xff]  ;;  %v13366_v29 = vld [vmem:[#allocation130_spill] sm:$0xff]  ;;  %v13367_v19 = vld [vmem:[#allocation128_spill] sm:$0xff] }
 0x19d   : > { %13358 = vst [vmem:[#allocation180_spill] sm:$0xff] %v10843_v36  ;;  %v10853_v16 = vadd.f32 %v10614_v5, %v1819_v59  ;;  %v1538_v42 = vadd.f32 %v13361_v62, %v10680_v58  ;;  %v1017_v11 = vsel %vm883_vm0, 0.0, %v1009_v6  ;;  %v989_v1 = vmul.f32 %v10671_v10, %v13325_v27  ;;  %v13365_v59 = vld [vmem:[#allocation121_spill] sm:$0xff] }
 0x19e   : > { %1025 = vrot.lane.b32.xlu0 %v1017_v11, %s7820_s4  ;;  %v1004_v60 = vmax.f32 %v1000_v35, 0.0  ;;  %v973_v18 = vadd.f32 %v969_v8, %v963_v57  ;;  %v1074_v9 = vadd.f32 %v1070_v44, %v1064_v2  ;;  %v1090_v5 = vmul.f32 %v10687_v49, %v13364_v33  ;;  %v13368_v8 = vld [vmem:[#allocation150_spill] sm:$0xff]  ;;  %v13369_v44 = vld [vmem:[#allocation132_spill] sm:$0xff]  ;;  %v13370_v57 = vld [vmem:[#allocation43_spill] sm:$0xff]  ;;  %v10895_v22 = vpop.permute.xlu1 %1727 }
 0x19f   : > { %13360 = vst [vmem:[#allocation64_spill] sm:$0xff] %v10853_v16  ;;  %v1537_v58 = vadd.f32 %v13365_v59, %v10715_v37  ;;  %v1674_v20 = vadd.f32 %v1670_v45, %v13366_v29  ;;  %v1100_v27 = vmul.f32 %v10500_v56, %v13367_v19  ;;  %v1043_v43 = vmul.f32 %v10451_v47, %v13352_v21  ;;  %v13371_v45 = vld [vmem:[#allocation161_spill] sm:$0xff] }
 0x1a0   : > { %v1012_v6 = vrot.slane %v1004_v60, 7  ;;  %v983_v62 = vadd.f32 %v979_v26, %v973_v18  ;;  %v1084_v11 = vadd.f32 %v1080_v15, %v1074_v9  ;;  %v1049_v2 = vmul.f32 %v13368_v8, %v13353_v31  ;;  %v13372_v18 = vld [vmem:[#allocation168_spill] sm:$0xff]  ;;  %v13374_v36 = vld [vmem:[#allocation25_spill] sm:$0xff]  ;;  %13375 = vst [vmem:[#allocation141_spill] sm:$0xff] %v10895_v22 }
 0x1a1   : > { %v1669_v35 = vmul.f32 %v13369_v44, %v13359_v52  ;;  %v1110_v37 = vmul.f32 %v10515_v63, %v13370_v57  ;;  %v1059_v59 = vmul.f32 %v13371_v45, %v13355_v25  ;;  %v1069_v29 = vmul.f32 %v10480_v4, %v13356_v41  ;;  %v13381_v22 = vld [vmem:[#allocation28_spill] sm:$0xff] }
 0x1a2   : > { %v1020_v16 = vsel %vm883_vm0, 0.0, %v1012_v6  ;;  %v993_v60 = vadd.f32 %v989_v1, %v983_v62  ;;  %v1094_v26 = vadd.f32 %v1090_v5, %v1084_v11  ;;  %v1053_v15 = vadd.f32 %v1049_v2, %v1043_v43  ;;  %v10897_v1 = vpop.permute.xlu0 %1725  ;;  %v13377_v62 = vld [vmem:[#allocation169_spill] sm:$0xff] }
 0x1a3   : > { %v10886_v9 = vadd.f32 %v13372_v18, %v1538_v42  ;;  %v1702_v44 = vmul.f32 %v10661_v38, %v13367_v19  ;;  %v1701_v34 = vmul.f32 %v10379_v12, %v13367_v19  ;;  %1031 = vrot.lane.b32.xlu1 %v1020_v16, %s7820_s4  ;;  %v1120_v13 = vmul.f32 %v10661_v38, %v13374_v36  ;;  %v13379_v16 = vld [vmem:[#allocation105_spill] sm:$0xff]  ;;  %v13380_v18 = vld [vmem:[#allocation95_spill] sm:$0xff] }
 0x1a4   : > { %13376 = vst [vmem:[#allocation14_spill] sm:$0xff] %v10897_v1  ;;  %v999_v5 = vadd.f32 %v13340_v40, %v993_v60  ;;  %v1104_v42 = vadd.f32 %v1100_v27, %v1094_v26  ;;  %v1063_v43 = vadd.f32 %v1059_v59, %v1053_v15  ;;  %v1079_v6 = vmul.f32 %v10473_v51, %v13359_v52  ;;  %v13382_v27 = vld [vmem:[#allocation114_spill] sm:$0xff]  ;;  %v13383_v60 = vld [vmem:[#allocation108_spill] sm:$0xff]  ;;  %v13384_v15 = vld [vmem:[#allocation129_spill] sm:$0xff] }
 0x1a5   : > { %13373 = vst [vmem:[#allocation18_spill] sm:$0xff] %v10886_v9  ;;  %v10903_v11 = vadd.f32 %v13377_v62, %v1537_v58  ;;  %v1540_v2 = vadd.f32 %v13379_v16, %v10788_v39  ;;  %v1673_v9 = vadd.f32 %v1669_v35, %v13380_v18  ;;  %v1089_v38 = vmul.f32 %v13381_v22, %v13364_v33  ;;  %v10916_v62 = vld [vmem:[%s8025_s27 + $0x38] sm:$0x1f]  ;;  %v13386_v35 = vld [vmem:[#allocation175_spill] sm:$0xff]  ;;  %v10930_v22 = vpop.permute.xlu1 %1731 }
 0x1a6   : > { %v1003_v63 = vmax.f32 %v999_v5, 0.0  ;;  %v1114_v1 = vadd.f32 %v1110_v37, %v1104_v42  ;;  %v1073_v4 = vadd.f32 %v1069_v29, %v1063_v43  ;;  %v1046_v59 = vmul.f32 %v13382_v27, %v13352_v21  ;;  %13385 = vst [vmem:[#allocation36_spill] sm:$0xff] %v10916_v62  ;;  %v13387_v29 = vld [vmem:[#allocation151_spill] sm:$0xff]  ;;  %13392 = vst [vmem:[#allocation178_spill] sm:$0xff] %v10930_v22 }
 0x1a7   : > { %13378 = vst [vmem:[#allocation15_spill] sm:$0xff] %v10903_v11  ;;  %v1539_v26 = vadd.f32 %v13383_v60, %v10795_v7  ;;  %v1698_v58 = vadd.f32 %v13384_v15, %v1674_v20  ;;  %v1052_v39 = vmul.f32 %v10916_v62, %v13353_v31  ;;  %v1062_v16 = vmul.f32 %v13386_v35, %v13355_v25  ;;  %v13388_v43 = vld [vmem:[#allocation127_spill] sm:$0xff]  ;;  %v13390_v7 = vld [vmem:[#allocation133_spill] sm:$0xff]  ;;  %v10932_v62 = vpop.permute.xlu0 %1729 }
 0x1a8   : > { %v1011_v18 = vrot.slane %v1003_v63, 7  ;;  %v1124_v5 = vadd.f32 %v1120_v13, %v1114_v1  ;;  %v1083_v37 = vadd.f32 %v1079_v6, %v1073_v4  ;;  %v1099_v42 = vmul.f32 %v13387_v29, %v13367_v19  ;;  %v13391_v15 = vld [vmem:[#allocation115_spill] sm:$0xff]  ;;  %13393 = vst [vmem:[#allocation143_spill] sm:$0xff] %v10932_v62  ;;  %v13394_v13 = vld [vmem:[#allocation24_spill] sm:$0xff] }
 0x1a9   : > { %v10925_v11 = vadd.f32 %v13388_v43, %v1540_v2  ;;  %v1697_v60 = vadd.f32 %v13390_v7, %v1673_v9  ;;  %v1056_v20 = vadd.f32 %v1052_v39, %v1046_v59  ;;  %v1072_v40 = vmul.f32 %v13391_v15, %v13356_v41  ;;  %v13397_v39 = vld [vmem:[#allocation152_spill] sm:$0xff] }
 0x1aa   : > { %v1019_v63 = vsel %vm883_vm0, 0.0, %v1011_v18  ;;  %v1130_v4 = vadd.f32 %v13394_v13, %v1124_v5  ;;  %v1093_v1 = vadd.f32 %v1089_v38, %v1083_v37  ;;  %v1109_v6 = vmul.f32 %v10764_v28, %v13370_v57  ;;  %v13398_v38 = vld [vmem:[#allocation135_spill] sm:$0xff] }
 0x1ab   : > { %13389 = vst [vmem:[#allocation35_spill] sm:$0xff] %v10925_v11  ;;  %v10939_v2 = vadd.f32 %v10758_v24, %v1539_v26  ;;  %v10941_v9 = vadd.f32 %v1702_v44, %v1698_v58  ;;  %1029 = vrot.lane.b32.xlu0 %v1019_v63, %s7820_s4  ;;  %v1066_v59 = vadd.f32 %v1062_v16, %v1056_v20  ;;  %v13400_v16 = vld [vmem:[#allocation148_spill] sm:$0xff] }
 0x1ac   : > { %v1082_v43 = vmul.f32 %v13397_v39, %v13359_v52  ;;  %v1134_v7 = vmax.f32 %v1130_v4, 0.0  ;;  %v1103_v62 = vadd.f32 %v1099_v42, %v1093_v1  ;;  %v1119_v18 = vmul.f32 %v10379_v12, %v13374_v36 }
 0x1ad   : > { %13395 = vst [vmem:[#allocation44_spill] sm:$0xff] %v10939_v2  ;;  %13396 = vst [vmem:[#allocation171_spill] sm:$0xff] %v10941_v9  ;;  %v1092_v5 = vmul.f32 %v13398_v38, %v13364_v33  ;;  %v1076_v37 = vadd.f32 %v1072_v40, %v1066_v59  ;;  %v1045_v24 = vmul.f32 %v10578_v3, %v13352_v21 }
 0x1ae   : > { %v1051_v44 = vmul.f32 %v10159_v48, %v13353_v31  ;;  %v1061_v26 = vmul.f32 %v10798_v14, %v13355_v25  ;;  %v10956_v58 = vadd.f32 %v1701_v34, %v1697_v60  ;;  %v1672_v42 = vmul.f32 %v13400_v16, %v13359_v52  ;;  %v10964_v48 = vpop.permute.xlu1 %1887  ;;  %v10966_v31 = vpop.permute.xlu0 %1885  ;;  %v13403_v34 = vld [vmem:[#allocation149_spill] sm:$0xff]  ;;  %v13404_v16 = vld [vmem:[#allocation100_spill] sm:$0xff] }
 0x1af   : > { %v1142_v20 = vrot.slane %v1134_v7, 7  ;;  %v1113_v63 = vadd.f32 %v1109_v6, %v1103_v62  ;;  %v1086_v4 = vadd.f32 %v1082_v43, %v1076_v37  ;;  %v1102_v40 = vmul.f32 %v10597_v55, %v13367_v19  ;;  %13401 = vst [vmem:[#allocation67_spill] sm:$0xff] %v10964_v48  ;;  %13402 = vst [vmem:[#allocation68_spill] sm:$0xff] %v10966_v31  ;;  %v10977_v43 = vld [vmem:[%s8025_s27 + $0x138] sm:$0x1f]  ;;  %v13407_v31 = vld [vmem:[#allocation19_spill] sm:$0xff] }
 0x1b0   : > { %13399 = vst [vmem:[#allocation144_spill] sm:$0xff] %v10956_v58  ;;  %v1055_v1 = vadd.f32 %v1051_v44, %v1045_v24  ;;  %v1071_v21 = vmul.f32 %v10602_v61, %v13356_v41  ;;  %v10970_v25 = vmul.f32 %v10626_v50, %v13367_v19  ;;  %v1671_v60 = vmul.f32 %v13403_v34, %v13359_v52 }
 0x1b1   : > { %v1150_v62 = vsel %vm883_vm0, 0.0, %v1142_v20  ;;  %v1123_v6 = vadd.f32 %v1119_v18, %v1113_v63  ;;  %v1096_v59 = vadd.f32 %v1092_v5, %v1086_v4  ;;  %v1112_v41 = vmul.f32 %v10977_v43, %v13370_v57  ;;  %v13405_v4 = vld [vmem:[#allocation101_spill] sm:$0xff] }
 0x1b2   : > { %1159 = vrot.lane.b32.xlu1 %v1150_v62, %s7820_s4  ;;  %v1065_v7 = vadd.f32 %v1061_v26, %v1055_v1  ;;  %v1081_v37 = vmul.f32 %v10594_v17, %v13359_v52  ;;  %v10985_v24 = vmul.f32 %v10671_v10, %v13367_v19  ;;  %v1122_v18 = vmul.f32 %v10626_v50, %v13374_v36  ;;  %v13406_v1 = vld [vmem:[#allocation97_spill] sm:$0xff] }
 0x1b3   : > { %v1129_v44 = vadd.f32 %v13394_v13, %v1123_v6  ;;  %v1176_v5 = vmul.f32 %v10396_v53, %v13404_v16  ;;  %v1106_v20 = vadd.f32 %v1102_v40, %v1096_v59  ;;  %v1091_v26 = vmul.f32 %v10821_v23, %v13364_v33  ;;  %v11003_v59 = vpop.permute.xlu1 %1891 }
 0x1b4   : > { %v1075_v63 = vadd.f32 %v1071_v21, %v1065_v7  ;;  %v1182_v52 = vmul.f32 %v10412_v32, %v13405_v4  ;;  %v1676_v34 = vadd.f32 %v1672_v42, %v13406_v1  ;;  %v1101_v6 = vmul.f32 %v10639_v46, %v13367_v19  ;;  %v13408_v21 = vld [vmem:[#allocation109_spill] sm:$0xff]  ;;  %13409 = vst [vmem:[#allocation23_spill] sm:$0xff] %v11003_v59  ;;  %v11005_v7 = vpop.permute.xlu0 %1889  ;;  %v13412_v1 = vld [vmem:[#allocation146_spill] sm:$0xff] }
 0x1b5   : > { %v1133_v62 = vmax.f32 %v1129_v44, 0.0  ;;  %v1192_v48 = vmul.f32 %v10654_v54, %v13407_v31  ;;  %v1116_v53 = vadd.f32 %v1112_v41, %v1106_v20  ;;  %v1202_v33 = vmul.f32 %v10434_v30, %v13408_v21  ;;  %13410 = vst [vmem:[#allocation41_spill] sm:$0xff] %v11005_v7  ;;  %v13411_v32 = vld [vmem:[#allocation117_spill] sm:$0xff]  ;;  %v11009_v44 = vld [vmem:[%s8025_s27 + $0x168] sm:$0x1f] }
 0x1b6   : > { %v1085_v58 = vadd.f32 %v1081_v37, %v1075_v63  ;;  %v1186_v40 = vadd.f32 %v1182_v52, %v1176_v5  ;;  %v1675_v42 = vadd.f32 %v1671_v60, %v13411_v32  ;;  %v1390_v19 = vmul.f32 %v11009_v44, %v13412_v1  ;;  %v11014_v54 = vld [vmem:[%s8025_s27 + $0x130] sm:$0x1f]  ;;  %v13414_v52 = vld [vmem:[#allocation26_spill] sm:$0xff] }
 0x1b7   : > { %v1141_v22 = vrot.slane %v1133_v62, 7  ;;  %v1111_v41 = vmul.f32 %v11014_v54, %v13370_v57  ;;  %v1126_v37 = vadd.f32 %v1122_v18, %v1116_v53  ;;  %v13413_v20 = vld [vmem:[#allocation165_spill] sm:$0xff]  ;;  %v11021_v7 = vadd.f32 %v13414_v52, %v1676_v34  ;;  %v11024_v60 = vld [vmem:[%s8025_s27 + $0x160] sm:$0x1f]  ;;  %v13416_v34 = vld [vmem:[#allocation156_spill] sm:$0xff] }
 0x1b8   : > { %v1095_v5 = vadd.f32 %v1091_v26, %v1085_v58  ;;  %v1196_v30 = vadd.f32 %v1192_v48, %v1186_v40  ;;  %v1212_v63 = vmul.f32 %v10424_v0, %v13413_v20  ;;  %v1389_v32 = vmul.f32 %v11024_v60, %v13412_v1  ;;  %v13415_v0 = vld [vmem:[#allocation38_spill] sm:$0xff] }
 0x1b9   : > { %v1149_v62 = vsel %vm883_vm0, 0.0, %v1141_v22  ;;  %v1121_v59 = vmul.f32 %v10671_v10, %v13374_v36  ;;  %v1132_v58 = vadd.f32 %v13394_v13, %v1126_v37  ;;  %v1222_v26 = vmul.f32 %v10687_v49, %v13415_v0  ;;  %v13417_v37 = vld [vmem:[#allocation163_spill] sm:$0xff]  ;;  %v11046_v49 = vpop.permute.xlu0 %2077 }
 0x1ba   : > { %1157 = vrot.lane.b32.xlu0 %v1149_v62, %s7820_s4  ;;  %v1105_v48 = vadd.f32 %v1101_v6, %v1095_v5  ;;  %v1206_v18 = vadd.f32 %v1202_v33, %v1196_v30  ;;  %v1394_v53 = vadd.f32 %v1390_v19, %v13416_v34  ;;  %v1175_v40 = vmul.f32 %v10451_v47, %v13404_v16  ;;  %v11044_v33 = vpop.permute.xlu1 %2079  ;;  %v13420_v19 = vld [vmem:[#allocation157_spill] sm:$0xff]  ;;  %v13421_v30 = vld [vmem:[#allocation162_spill] sm:$0xff] }
 0x1bb   : > { %v1181_v22 = vmul.f32 %v13368_v8, %v13405_v4  ;;  %v1191_v36 = vmul.f32 %v13371_v45, %v13407_v31  ;;  %v1136_v52 = vmax.f32 %v1132_v58, 0.0  ;;  %v1232_v6 = vmul.f32 %v10500_v56, %v13417_v37  ;;  %13418 = vst [vmem:[#allocation50_spill] sm:$0xff] %v11044_v33  ;;  %13419 = vst [vmem:[#allocation75_spill] sm:$0xff] %v11046_v49  ;;  %v13422_v8 = vld [vmem:[#allocation142_spill] sm:$0xff]  ;;  %v13426_v56 = vld [vmem:[#allocation123_spill] sm:$0xff] }
 0x1bc   : > { %v1115_v62 = vadd.f32 %v1111_v41, %v1105_v48  ;;  %v1216_v2 = vadd.f32 %v1212_v63, %v1206_v18  ;;  %v1418_v5 = vadd.f32 %v13420_v19, %v1394_v53  ;;  %v1393_v47 = vadd.f32 %v1389_v32, %v13421_v30  ;;  %v13423_v41 = vld [vmem:[#allocation48_spill] sm:$0xff]  ;;  %v13424_v63 = vld [vmem:[#allocation158_spill] sm:$0xff] }
 0x1bd   : > { %v1185_v34 = vadd.f32 %v1181_v22, %v1175_v40  ;;  %v1201_v9 = vmul.f32 %v13422_v8, %v13408_v21  ;;  %v1144_v11 = vrot.slane %v1136_v52, 7  ;;  %v1242_v48 = vmul.f32 %v13424_v63, %v13423_v41  ;;  %v13425_v18 = vld [vmem:[#allocation32_spill] sm:$0xff]  ;;  %v13430_v8 = vld [vmem:[#allocation154_spill] sm:$0xff] }
 0x1be   : > { %v1125_v45 = vadd.f32 %v1121_v59, %v1115_v62  ;;  %v1226_v58 = vadd.f32 %v1222_v26, %v1216_v2  ;;  %v1252_v57 = vmul.f32 %v13426_v56, %v13425_v18  ;;  %v1211_v49 = vmul.f32 %v10473_v51, %v13413_v20  ;;  %v13427_v2 = vld [vmem:[#allocation36_spill] sm:$0xff] }
 0x1bf   : > { %v1195_v33 = vadd.f32 %v1191_v36, %v1185_v34  ;;  %v1178_v32 = vmul.f32 %v13382_v27, %v13404_v16  ;;  %v1152_v53 = vsel %vm883_vm0, 0.0, %v1144_v11  ;;  %v1184_v59 = vmul.f32 %v13427_v2, %v13405_v4  ;;  %v13428_v26 = vld [vmem:[#allocation160_spill] sm:$0xff]  ;;  %v11074_v34 = vpop.permute.xlu1 %2083 }
 0x1c0   : > { %v1131_v40 = vadd.f32 %v13394_v13, %v1125_v45  ;;  %v1236_v22 = vadd.f32 %v1232_v6, %v1226_v58  ;;  %v11065_v52 = vadd.f32 %v1418_v5, %v13428_v26  ;;  %1163 = vrot.lane.b32.xlu1 %v1152_v53, %s7820_s4  ;;  %v13429_v62 = vld [vmem:[#allocation28_spill] sm:$0xff]  ;;  %v1194_v27 = vmul.f32 %v13386_v35, %v13407_v31  ;;  %v11076_v5 = vpop.permute.xlu0 %2081 }
 0x1c1   : > { %v1205_v36 = vadd.f32 %v1201_v9, %v1195_v33  ;;  %v1221_v51 = vmul.f32 %v13429_v62, %v13415_v0  ;;  %v1188_v30 = vadd.f32 %v1184_v59, %v1178_v32  ;;  %v1204_v6 = vmul.f32 %v13391_v15, %v13408_v21  ;;  %v13431_v9 = vld [vmem:[#allocation122_spill] sm:$0xff]  ;;  %v11097_v59 = vld [vmem:[%s8025_s27 + $0x170] sm:$0x1f] }
 0x1c2   : > { %v1135_v11 = vmax.f32 %v1131_v40, 0.0  ;;  %v1246_v19 = vadd.f32 %v1242_v48, %v1236_v22  ;;  %v1699_v45 = vadd.f32 %v13430_v8, %v1675_v42  ;;  %v1417_v33 = vadd.f32 %v13431_v9, %v1393_v47  ;;  %v11086_v40 = vld [vmem:[%s8025_s27 + $0x178] sm:$0x1f] }
 0x1c3   : > { %v1215_v58 = vadd.f32 %v1211_v49, %v1205_v36  ;;  %v1231_v35 = vmul.f32 %v13387_v29, %v13417_v37  ;;  %v1198_v48 = vadd.f32 %v1194_v27, %v1188_v30  ;;  %v1214_v32 = vmul.f32 %v13397_v39, %v13413_v20  ;;  %v13432_v22 = vld [vmem:[#allocation49_spill] sm:$0xff]  ;;  %v11110_v30 = vpop.permute.xlu1 %2227 }
 0x1c4   : > { %v1143_v63 = vrot.slane %v1135_v11, 7  ;;  %v1256_v53 = vadd.f32 %v1252_v57, %v1246_v19  ;;  %v1426_v15 = vmax.f32 %v11065_v52, 0.0  ;;  %v1392_v42 = vmul.f32 %v11086_v40, %v13412_v1 }
 0x1c5   : > { %v1225_v47 = vadd.f32 %v1221_v51, %v1215_v58  ;;  %v1241_v49 = vmul.f32 %v10764_v28, %v13423_v41  ;;  %v1208_v2 = vadd.f32 %v1204_v6, %v1198_v48  ;;  %v1224_v39 = vmul.f32 %v13398_v38, %v13415_v0  ;;  %v7749_v38 = vld [vmem:[%s8025_s27 + $0x30] sm:$0x1f] }
 0x1c6   : > { %v1151_v29 = vsel %vm883_vm0, 0.0, %v1143_v63  ;;  %v1262_v57 = vadd.f32 %v13432_v22, %v1256_v53  ;;  %v1391_v52 = vmul.f32 %v11097_v59, %v13412_v1  ;;  %v1251_v62 = vmul.f32 %v10379_v12, %v13425_v18  ;;  %v11112_v1 = vpop.permute.xlu0 %2225  ;;  %v13433_v6 = vld [vmem:[#allocation60_spill] sm:$0xff] }
 0x1c7   : > { %1161 = vrot.lane.b32.xlu0 %v1151_v29, %s7820_s4  ;;  %v1235_v36 = vadd.f32 %v1231_v35, %v1225_v47  ;;  %v1234_v28 = vmul.f32 %v10597_v55, %v13417_v37  ;;  %v1218_v27 = vadd.f32 %v1214_v32, %v1208_v2  ;;  %v1177_v11 = vmul.f32 %v10578_v3, %v13404_v16 }
 0x1c8   : > { %v1266_v51 = vmax.f32 %v1262_v57, 0.0  ;;  %v1183_v19 = vmul.f32 %v7749_v38, %v13405_v4  ;;  %v1396_v8 = vadd.f32 %v1392_v42, %v13433_v6  ;;  %v1244_v12 = vmul.f32 %v10977_v43, %v13423_v41  ;;  %v13434_v4 = vld [vmem:[#allocation124_spill] sm:$0xff] }
 0x1c9   : > { %v1245_v9 = vadd.f32 %v1241_v49, %v1235_v36  ;;  %v1193_v55 = vmul.f32 %v10798_v14, %v13407_v31  ;;  %v1228_v35 = vadd.f32 %v1224_v39, %v1218_v27  ;;  %v1203_v3 = vmul.f32 %v10602_v61, %v13408_v21  ;;  %v13435_v61 = vld [vmem:[#allocation164_spill] sm:$0xff]  ;;  %v13436_v49 = vld [vmem:[#allocation177_spill] sm:$0xff] }
 0x1ca   : > { %v1274_v58 = vrot.slane %v1266_v51, 7  ;;  %v1187_v63 = vadd.f32 %v1183_v19, %v1177_v11  ;;  %v1421_v16 = vadd.f32 %v1417_v33, %v13428_v26  ;;  %v1420_v53 = vadd.f32 %v13434_v4, %v1396_v8  ;;  %v11144_v39 = vpop.permute.xlu0 %2229  ;;  %v7750_v38 = vld [vmem:[%s8025_s27 + $0xe8] sm:$0x1f] }
 0x1cb   : > { %v1255_v48 = vadd.f32 %v1251_v62, %v1245_v9  ;;  %v1254_v32 = vmul.f32 %v10626_v50, %v13425_v18  ;;  %v1238_v43 = vadd.f32 %v1234_v28, %v1228_v35  ;;  %v1213_v14 = vmul.f32 %v10594_v17, %v13413_v20  ;;  %v13437_v62 = vld [vmem:[#allocation126_spill] sm:$0xff] }
 0x1cc   : > { %v1282_v42 = vsel %vm883_vm0, 0.0, %v1274_v58  ;;  %v1197_v47 = vadd.f32 %v1193_v55, %v1187_v63  ;;  %v11130_v31 = vadd.f32 %v10970_v25, %v11021_v7  ;;  %v1395_v21 = vadd.f32 %v1391_v52, %v13435_v61  ;;  %v11142_v7 = vpop.permute.xlu1 %2231  ;;  %v13439_v63 = vld [vmem:[#allocation173_spill] sm:$0xff] }
 0x1cd   : > { %1291 = vrot.lane.b32.xlu1 %v1282_v42, %s7820_s4  ;;  %v1261_v33 = vadd.f32 %v13432_v22, %v1255_v48  ;;  %v1550_v29 = vmul.f32 %v11009_v44, %v13436_v49  ;;  %v11138_v57 = vadd.f32 %v10985_v24, %v1699_v45  ;;  %v1248_v2 = vadd.f32 %v1244_v12, %v1238_v43 }
 0x1ce   : > { %v1207_v17 = vadd.f32 %v1203_v3, %v1197_v47  ;;  %v1223_v25 = vmul.f32 %v10821_v23, %v13415_v0  ;;  %v11146_v52 = vrot.slane %v1426_v15, 7  ;;  %v1425_v36 = vmax.f32 %v1421_v16, 0.0  ;;  %v7751_v0 = vld [vmem:[%s8025_s27 + $0xe0] sm:$0x1f]  ;;  %v11176_v42 = vpop.permute.xlu0 %2373  ;;  %v13440_v47 = vld [vmem:[#allocation80_spill] sm:$0xff] }
 0x1cf   : > { %v1419_v28 = vadd.f32 %v13437_v62, %v1395_v21  ;;  %v1265_v51 = vmax.f32 %v1261_v33, 0.0  ;;  %v1424_v27 = vadd.f32 %v1420_v53, %v13428_v26  ;;  %v1258_v24 = vadd.f32 %v1254_v32, %v1248_v2  ;;  %v13438_v15 = vld [vmem:[#allocation18_spill] sm:$0xff]  ;;  %v13442_v33 = vld [vmem:[#allocation172_spill] sm:$0xff] }
 0x1d0   : > { %v1217_v45 = vadd.f32 %v1213_v14, %v1207_v17  ;;  %v1233_v11 = vmul.f32 %v10639_v46, %v13417_v37  ;;  %v1830_v23 = vmul.f32 %v7750_v38, %v13413_v20  ;;  %v1829_v19 = vmul.f32 %v7751_v0, %v13413_v20  ;;  %v11174_v32 = vpop.permute.xlu1 %2375 }
 0x1d1   : > { %v1273_v6 = vrot.slane %v1265_v51, 7  ;;  %v1554_v8 = vadd.f32 %v1550_v29, %v13438_v15  ;;  %v1264_v9 = vadd.f32 %v13432_v22, %v1258_v24  ;;  %v1243_v55 = vmul.f32 %v11014_v54, %v13423_v41 }
 0x1d2   : > { %v1227_v12 = vadd.f32 %v1223_v25, %v1217_v45  ;;  %v1552_v58 = vmul.f32 %v11086_v40, %v13436_v49  ;;  %v11162_v35 = vrot.slane %v1425_v36, 7  ;;  %v1549_v16 = vmul.f32 %v11024_v60, %v13436_v49  ;;  %v13443_v25 = vld [vmem:[#allocation35_spill] sm:$0xff] }
 0x1d3   : > { %v1281_v46 = vsel %vm883_vm0, 0.0, %v1273_v6  ;;  %v1578_v3 = vadd.f32 %v13439_v63, %v1554_v8  ;;  %v11169_v4 = vadd.f32 %v1419_v28, %v13428_v26  ;;  %v1268_v53 = vmax.f32 %v1264_v9, 0.0  ;;  %v13441_v26 = vld [vmem:[#allocation43_spill] sm:$0xff]  ;;  %v7752_v28 = vld [vmem:[%s8025_s27 + $0xf8] sm:$0x1f] }
 0x1d4   : > { %1289 = vrot.lane.b32.xlu0 %v1281_v46, %s7820_s4  ;;  %v1237_v54 = vadd.f32 %v1233_v11, %v1227_v12  ;;  %v1253_v48 = vmul.f32 %v10671_v10, %v13425_v18  ;;  %v1428_v43 = vmax.f32 %v1424_v27, 0.0  ;;  %v1834_v14 = vadd.f32 %v1830_v23, %v13440_v47  ;;  %v13444_v36 = vld [vmem:[#allocation31_spill] sm:$0xff]  ;;  %v13445_v27 = vld [vmem:[#allocation34_spill] sm:$0xff]  ;;  %v13447_v23 = vld [vmem:[#allocation45_spill] sm:$0xff] }
 0x1d5   : > { %v1862_v61 = vmul.f32 %v13426_v56, %v13417_v37  ;;  %v1710_v21 = vmul.f32 %v11009_v44, %v13441_v26  ;;  %v1833_v29 = vadd.f32 %v1829_v19, %v13442_v33  ;;  %v1276_v2 = vrot.slane %v1268_v53, 7  ;;  %v13446_v45 = vld [vmem:[#allocation15_spill] sm:$0xff]  ;;  %v13450_v63 = vld [vmem:[#allocation17_spill] sm:$0xff] }
 0x1d6   : > { %v1247_v17 = vadd.f32 %v1243_v55, %v1237_v54  ;;  %v1556_v18 = vadd.f32 %v1552_v58, %v13443_v25  ;;  %v1858_v62 = vadd.f32 %v13444_v36, %v1834_v14  ;;  %v1832_v51 = vmul.f32 %v7752_v28, %v13413_v20  ;;  %v13448_v8 = vld [vmem:[#allocation179_spill] sm:$0xff]  ;;  %v11206_v54 = vpop.permute.xlu0 %2377  ;;  %v13452_v14 = vld [vmem:[#allocation141_spill] sm:$0xff] }
 0x1d7   : > { %v1582_v24 = vadd.f32 %v1578_v3, %v13445_v27  ;;  %v1553_v11 = vadd.f32 %v1549_v16, %v13446_v45  ;;  %v1284_v56 = vsel %vm883_vm0, 0.0, %v1276_v2  ;;  %v1551_v19 = vmul.f32 %v11097_v59, %v13436_v49  ;;  %v13449_v12 = vld [vmem:[#allocation171_spill] sm:$0xff]  ;;  %v11204_v49 = vpop.permute.xlu1 %2379 }
 0x1d8   : > { %v1257_v38 = vadd.f32 %v1253_v48, %v1247_v17  ;;  %v1580_v0 = vadd.f32 %v13447_v23, %v1556_v18  ;;  %v1436_v6 = vrot.slane %v1428_v43, 7  ;;  %v1427_v15 = vmax.f32 %v11169_v4, 0.0  ;;  %1295 = vrot.lane.b32.xlu1 %v1284_v56, %s7820_s4  ;;  %v7753_v58 = vld [vmem:[%s8025_s27 + $0x140] sm:$0x1f]  ;;  %v13451_v48 = vld [vmem:[#allocation180_spill] sm:$0xff] }
 0x1d9   : > { %v1577_v9 = vadd.f32 %v13448_v8, %v1553_v11  ;;  %v1714_v55 = vadd.f32 %v1710_v21, %v13449_v12  ;;  %v1861_v46 = vmul.f32 %v7753_v58, %v13417_v37  ;;  %v1857_v3 = vadd.f32 %v13450_v63, %v1833_v29  ;;  %v13453_v29 = vld [vmem:[#allocation44_spill] sm:$0xff]  ;;  %v13454_v36 = vld [vmem:[#allocation27_spill] sm:$0xff]  ;;  %v13456_v12 = vld [vmem:[#allocation178_spill] sm:$0xff] }
 0x1da   : > { %v1263_v16 = vadd.f32 %v13432_v22, %v1257_v38  ;;  %v1712_v53 = vmul.f32 %v11086_v40, %v13441_v26  ;;  %v1866_v4 = vadd.f32 %v1862_v61, %v1858_v62  ;;  %v1836_v43 = vadd.f32 %v1832_v51, %v13451_v48  ;;  %v7754_v38 = vld [vmem:[%s8025_s27 + $0xf0] sm:$0x1f]  ;;  %s7191_s27 = sld [smem:[#allocation8 + $0x1]] }
 0x1db   : > { %v1586_v47 = vmax.f32 %v1582_v24, 0.0  ;;  %v1738_v21 = vadd.f32 %v13452_v14, %v1714_v55  ;;  %v1584_v2 = vadd.f32 %v1580_v0, %v13445_v27  ;;  %v1555_v17 = vadd.f32 %v1551_v19, %v13453_v29  ;;  %v13455_v24 = vld [vmem:[#allocation139_spill] sm:$0xff]  ;;  %v11231_v58 = vpop.permute.xlu1 %2523 }
 0x1dc   : > { %v1267_v33 = vmax.f32 %v1263_v16, 0.0  ;;  %v1442_v25 = vsel %vm883_vm0, 0.0, %v11146_v52  ;;  %v1864_v18 = vmul.f32 %v10626_v50, %v13417_v37  ;;  %v1860_v28 = vadd.f32 %v13454_v36, %v1836_v43  ;;  %v13458_v43 = vld [vmem:[#allocation64_spill] sm:$0xff] }
 0x1dd   : > { %v1581_v61 = vadd.f32 %v1577_v9, %v13445_v27  ;;  %1451 = vrot.lane.b32.xlu1 %v1442_v25, %s7820_s4  ;;  %v1709_v62 = vmul.f32 %v11024_v60, %v13441_v26  ;;  %v1579_v45 = vadd.f32 %v13455_v24, %v1555_v17  ;;  %v1716_v11 = vadd.f32 %v1712_v53, %v11130_v31  ;;  %v11233_v31 = vpop.permute.xlu0 %2521  ;;  %v13460_v17 = vld [vmem:[#allocation67_spill] sm:$0xff] }
 0x1de   : > { %v1275_v51 = vrot.slane %v1267_v33, 7  ;;  %v1870_v52 = vmul.f32 %v11009_v44, %v13423_v41  ;;  %v1865_v56 = vadd.f32 %v1861_v46, %v1857_v3  ;;  %v1831_v50 = vmul.f32 %v7754_v38, %v13413_v20  ;;  %v13457_v46 = vld [vmem:[#allocation144_spill] sm:$0xff]  ;;  %v13463_v38 = vld [vmem:[#allocation23_spill] sm:$0xff] }
 0x1df   : > { %v1594_v23 = vrot.slane %v1586_v47, 7  ;;  %v1742_v0 = vadd.f32 %v1738_v21, %v13394_v13  ;;  %v1588_v8 = vmax.f32 %v1584_v2, 0.0  ;;  %v1444_v9 = vsel %vm883_vm0, 0.0, %v1436_v6  ;;  %v13459_v21 = vld [vmem:[#allocation14_spill] sm:$0xff] }
 0x1e0   : > { %v1283_v19 = vsel %vm883_vm0, 0.0, %v1275_v51  ;;  %v1740_v55 = vadd.f32 %v13456_v12, %v1716_v11  ;;  %v1435_v63 = vrot.slane %v1427_v15, 7  ;;  %v1868_v44 = vadd.f32 %v1864_v18, %v1860_v28 }
 0x1e1   : > { %1293 = vrot.lane.b32.xlu0 %v1283_v19, %s7820_s4  ;;  %v1713_v20 = vadd.f32 %v1709_v62, %v13457_v46  ;;  %1455 = vrot.lane.b32.xlu1 %v1444_v9, %s7820_s4  ;;  %v1711_v3 = vmul.f32 %v11097_v59, %v13441_v26  ;;  %v1585_v16 = vmax.f32 %v1581_v61, 0.0  ;;  %v1583_v6 = vadd.f32 %v1579_v45, %v13445_v27  ;;  %v11258_v62 = vpop.permute.xlu1 %2527  ;;  %v11260_v51 = vpop.permute.xlu0 %2525 }
 0x1e2   : > { %v1874_v53 = vadd.f32 %v1870_v52, %v1866_v4  ;;  %v1872_v48 = vmul.f32 %v11086_v40, %v13423_v41  ;;  %v1835_v47 = vadd.f32 %v1831_v50, %v13458_v43  ;;  %v1441_v15 = vsel %vm883_vm0, 0.0, %v11162_v35  ;;  %v13461_v4 = vld [vmem:[#allocation166_spill] sm:$0xff] }
 0x1e3   : > { %v1746_v14 = vmax.f32 %v1742_v0, 0.0  ;;  %v1737_v33 = vadd.f32 %v13459_v21, %v1713_v20  ;;  %v1596_v2 = vrot.slane %v1588_v8, 7  ;;  %v1744_v29 = vadd.f32 %v1740_v55, %v13394_v13 }
 0x1e4   : > { %v1602_v26 = vsel %vm883_vm0, 0.0, %v1594_v23  ;;  %v1898_v25 = vadd.f32 %v13460_v17, %v1874_v53  ;;  %v1863_v27 = vmul.f32 %v10671_v10, %v13417_v37  ;;  %v1715_v40 = vadd.f32 %v1711_v3, %v11138_v57  ;;  %v13462_v57 = vld [vmem:[#allocation143_spill] sm:$0xff] }
 0x1e5   : > { %1449 = vrot.lane.b32.xlu0 %v1441_v15, %s7820_s4  ;;  %1611 = vrot.lane.b32.xlu1 %v1602_v26, %s7820_s4  ;;  %v1869_v35 = vmul.f32 %v11024_v60, %v13423_v41  ;;  %v1859_v18 = vadd.f32 %v13461_v4, %v1835_v47  ;;  %v1593_v36 = vrot.slane %v1585_v16, 7  ;;  %v1587_v28 = vmax.f32 %v1583_v6, 0.0  ;;  %v11277_v16 = vpop.permute.xlu1 %2711  ;;  %v11279_v6 = vpop.permute.xlu0 %2709  ;;  %v13465_v15 = vld [vmem:[#allocation41_spill] sm:$0xff]  ;;  %v13466_v4 = vld [vmem:[#allocation50_spill] sm:$0xff] }
 0x1e6   : > { %v1876_v61 = vadd.f32 %v1872_v48, %v1868_v44  ;;  %v1754_v24 = vrot.slane %v1746_v14, 7  ;;  %v1741_v10 = vadd.f32 %v1737_v33, %v13394_v13  ;;  %v1443_v37 = vsel %vm883_vm0, 0.0, %v1435_v63  ;;  %v13464_v63 = vld [vmem:[#allocation68_spill] sm:$0xff] }
 0x1e7   : > { %v1739_v45 = vadd.f32 %v13462_v57, %v1715_v40  ;;  %v1748_v11 = vmax.f32 %v1744_v29, 0.0  ;;  %v1902_v52 = vadd.f32 %v1898_v25, %v13432_v22  ;;  %v1604_v60 = vsel %vm883_vm0, 0.0, %v1596_v2 }
 0x1e8   : > { %v1900_v50 = vadd.f32 %v13463_v38, %v1876_v61  ;;  %v1873_v23 = vadd.f32 %v1869_v35, %v1865_v56  ;;  %v1867_v0 = vadd.f32 %v1863_v27, %v1859_v18  ;;  %v1595_v19 = vrot.slane %v1587_v28, 7 }
 0x1e9   : > { %1453 = vrot.lane.b32.xlu0 %v1443_v37, %s7820_s4  ;;  %1615 = vrot.lane.b32.xlu1 %v1604_v60, %s7820_s4  ;;  %v1871_v8 = vmul.f32 %v11097_v59, %v13423_v41  ;;  %v1745_v9 = vmax.f32 %v1741_v10, 0.0  ;;  %v1743_v12 = vadd.f32 %v1739_v45, %v13394_v13  ;;  %v1601_v55 = vsel %vm883_vm0, 0.0, %v1593_v36  ;;  %v11289_v33 = vpop.permute.xlu1 %2715  ;;  %v11291_v2 = vpop.permute.xlu0 %2713 }
 0x1ea   : > { %v1897_v44 = vadd.f32 %v13464_v63, %v1873_v23  ;;  %v1756_v46 = vrot.slane %v1748_v11, 7  ;;  %v1906_v20 = vmax.f32 %v1902_v52, 0.0  ;;  %v1904_v3 = vadd.f32 %v1900_v50, %v13432_v22  ;;  %v13467_v50 = vld [vmem:[#allocation75_spill] sm:$0xff] }
 0x1eb   : > { %v1762_v56 = vsel %vm883_vm0, 0.0, %v1754_v24  ;;  %v1875_v41 = vadd.f32 %v1871_v8, %v1867_v0  ;;  %v1753_v13 = vrot.slane %v1745_v9, 7  ;;  %v1747_v59 = vmax.f32 %v1743_v12, 0.0 }
 0x1ec   : > { %v1901_v53 = vadd.f32 %v1897_v44, %v13432_v22  ;;  %v1603_v48 = vsel %vm883_vm0, 0.0, %v1595_v19  ;;  %v1914_v43 = vrot.slane %v1906_v20, 7  ;;  %v1908_v47 = vmax.f32 %v1904_v3, 0.0 }
 0x1ed   : > { %1609 = vrot.lane.b32.xlu0 %v1601_v55, %s7820_s4  ;;  %1771 = vrot.lane.b32.xlu1 %v1762_v56, %s7820_s4  ;;  %v1899_v14 = vadd.f32 %v13465_v15, %v1875_v41  ;;  %v1764_v21 = vsel %vm883_vm0, 0.0, %v1756_v46  ;;  %v1755_v29 = vrot.slane %v1747_v59, 7  ;;  %v1761_v26 = vsel %vm883_vm0, 0.0, %v1753_v13  ;;  %v11304_v10 = vpop.permute.xlu1 %2899 }
 0x1ee   : > { %v1905_v17 = vmax.f32 %v1901_v53, 0.0  ;;  %v1916_v25 = vrot.slane %v1908_v47, 7  ;;  %v1922_v40 = vsel %vm883_vm0, 0.0, %v1914_v43  ;;  %v3326_v35 = vstv %s7191_s27  ;;  %s7204_s27 = sld [smem:[#allocation8 + $0x84]] }
 0x1ef   : > { %v1903_v27 = vadd.f32 %v1899_v14, %v13432_v22  ;;  %v11300_v18 = vsel %vm904_vm1, 0.0, %v13466_v4  ;;  %v1763_v61 = vsel %vm883_vm0, 0.0, %v1755_v29  ;;  %v11306_v22 = vpop.permute.xlu0 %2897  ;;  %v11313_v45 = vsel %vm904_vm1, 0.0, %v11074_v34 }
 0x1f0   : > { %v1913_v36 = vrot.slane %v1905_v17, 7  ;;  %v1924_v24 = vsel %vm883_vm0, 0.0, %v1916_v25  ;;  %v3328_v37 = vmul.f32 %v3326_v35, %v11300_v18  ;;  %v3330_v38 = vmul.f32 %v3326_v35, %v11313_v45 }
 0x1f1   : > { %1613 = vrot.lane.b32.xlu0 %v1603_v48, %s7820_s4  ;;  %1775 = vrot.lane.b32.xlu1 %v1764_v21, %s7820_s4  ;;  %v1907_v28 = vmax.f32 %v1903_v27, 0.0  ;;  %v11318_v52 = vpop.permute.xlu1 %2903  ;;  %v11325_v23 = vsel %vm904_vm1, 0.0, %v13467_v50  ;;  %v3352_v0 = vstv %s7192_s22  ;;  %v11329_v34 = vsel %vm904_vm1, 0.0, %v11110_v30  ;;  %s7205_s22 = sld [smem:[#allocation8 + $0x104]] }
 0x1f2   : > { %v1921_v11 = vsel %vm883_vm0, 0.0, %v1913_v36  ;;  %v3327_v8 = vmul.f32 %v3326_v35, %v11325_v23  ;;  %v3354_v9 = vmul.f32 %v3352_v0, %v11329_v34  ;;  %v11338_v12 = vsel %vm904_vm1, 0.0, %v11076_v5 }
 0x1f3   : > { %v1915_v57 = vrot.slane %v1907_v28, 7  ;;  %v11320_v60 = vpop.permute.xlu0 %2901  ;;  %v11342_v55 = vsel %vm904_vm1, 0.0, %v11142_v7  ;;  %v3329_v44 = vmul.f32 %v3326_v35, %v11338_v12  ;;  %v11350_v20 = vsel %vm904_vm1, 0.0, %v11112_v1 }
 0x1f4   : > { %v3356_v46 = vmul.f32 %v3352_v0, %v11342_v55  ;;  %v3378_v5 = vstv %s7193_s30  ;;  %v11354_v7 = vsel %vm904_vm1, 0.0, %v11174_v32  ;;  %v3353_v41 = vmul.f32 %v3352_v0, %v11350_v20  ;;  %s7206_s30 = sld [smem:[#allocation8 + $0x184]] }
 0x1f5   : > { %1769 = vrot.lane.b32.xlu0 %v1761_v26, %s7820_s4  ;;  %1931 = vrot.lane.b32.xlu1 %v1922_v40, %s7820_s4  ;;  %v1923_v19 = vsel %vm883_vm0, 0.0, %v1915_v57  ;;  %v3088_v30 = vpop.permute.xlu1 %3087  ;;  %v3380_v13 = vmul.f32 %v3378_v5, %v11354_v7  ;;  %v11362_v1 = vsel %vm904_vm1, 0.0, %v11144_v39  ;;  %v11366_v32 = vsel %vm904_vm1, 0.0, %v11204_v49 }
 0x1f6   : > { %v11372_v59 = vsel %vm904_vm1, 0.0, %v11176_v42  ;;  %v11378_v53 = vsel %vm904_vm1, 0.0, %v11206_v54  ;;  %v11380_v39 = vstv %s7194_s23  ;;  %v11384_v49 = vsel %vm904_vm1, 0.0, %v11231_v58  ;;  %s7207_s23 = sld [smem:[#allocation8 + $0x5]] }
 0x1f7   : > { %v3086_v63 = vpop.permute.xlu0 %3085  ;;  %v3355_v48 = vmul.f32 %v3352_v0, %v11362_v1  ;;  %v3382_v43 = vmul.f32 %v3378_v5, %v11366_v32  ;;  %v11390_v42 = vsel %vm904_vm1, 0.0, %v11233_v31  ;;  %v3379_v47 = vmul.f32 %v3378_v5, %v11372_v59 }
 0x1f8   : > { %v11395_v54 = vsel %vm904_vm1, 0.0, %v11258_v62  ;;  %v3381_v21 = vmul.f32 %v3378_v5, %v11378_v53  ;;  %v3406_v58 = vmul.f32 %v11380_v39, %v11384_v49  ;;  %v3290_v29 = vstv %s3289_s1  ;;  %s7208_s1 = sld [smem:[#allocation8 + $0x85]] }
 0x1f9   : > { %1773 = vrot.lane.b32.xlu0 %v1763_v61, %s7820_s4  ;;  %1935 = vrot.lane.b32.xlu1 %v1924_v24, %s7820_s4  ;;  %v3092_v3 = vpop.permute.xlu1 %3091  ;;  %v11403_v31 = vsel %vm904_vm1, 0.0, %v11277_v16  ;;  %v3405_v62 = vmul.f32 %v11380_v39, %v11390_v42  ;;  %v11408_v26 = vstv %s7195_s24  ;;  %v3296_v17 = vstv %s7188_s5  ;;  %s7209_s24 = sld [smem:[#allocation8 + $0x105]] }
 0x1fa   : > { %v11412_v25 = vsel %vm904_vm1, 0.0, %v11304_v10  ;;  %v3408_v27 = vmul.f32 %v11380_v39, %v11395_v54  ;;  %v11420_v16 = vsel %vm904_vm1, 0.0, %v11260_v51  ;;  %v11424_v40 = vsel %vm904_vm1, 0.0, %v11279_v6  ;;  %s7210_s5 = sld [smem:[#allocation8 + $0x185]] }
 0x1fb   : > { %v3090_v56 = vpop.permute.xlu0 %3089  ;;  %13468 = vst [vmem:[#allocation77_spill] sm:$0xff] %v11424_v40  ;;  %v11428_v35 = vsel %vm904_vm1, 0.0, %v11289_v33  ;;  %v3292_v4 = vmul.f32 %v3290_v29, %v11403_v31  ;;  %v11433_v36 = vsel %vm904_vm1, 0.0, %v11306_v22  ;;  %v3306_v28 = vstv %s11368_s2  ;;  %s7215_s2 = sld [smem:[#allocation8 + $0x7]] }
 0x1fc   : > { %13469 = vst [vmem:[#allocation47_spill] sm:$0xff] %v11433_v36  ;;  %v11437_v61 = vsel %vm904_vm1, 0.0, %v3088_v30  ;;  %v3432_v51 = vmul.f32 %v11408_v26, %v11403_v31  ;;  %v3298_v6 = vmul.f32 %v3296_v17, %v11412_v25  ;;  %v11446_v33 = vsel %vm904_vm1, 0.0, %v11318_v52 }
 0x1fd   : > { %1929 = vrot.lane.b32.xlu0 %v1921_v11, %s7820_s4  ;;  %3337 = vrot.lane.b32.xlu1 %v3328_v37, %s7819_s3  ;;  %v3276_v15 = vpop.permute.xlu1 %3275  ;;  %13470 = vst [vmem:[#allocation167_spill] sm:$0xff] %v11446_v33  ;;  %v11450_v24 = vsel %vm904_vm1, 0.0, %v11320_v60  ;;  %v3291_v10 = vmul.f32 %v3290_v29, %v11424_v40  ;;  %v3294_v22 = vmul.f32 %v3290_v29, %v11428_v35  ;;  %v11456_v37 = vsel %vm904_vm1, 0.0, %v11291_v2 }
 0x1fe   : > { %13471 = vst [vmem:[#allocation55_spill] sm:$0xff] %v11456_v37  ;;  %v11459_v57 = vsel %vm904_vm1, 0.0, %v3086_v63  ;;  %v3297_v52 = vmul.f32 %v3296_v17, %v11433_v36  ;;  %v3308_v50 = vmul.f32 %v3306_v28, %v11437_v61  ;;  %v11464_v60 = vsel %vm904_vm1, 0.0, %v3092_v3 }
 0x1ff   : > { %v3274_v14 = vpop.permute.xlu0 %3273  ;;  %v11467_v0 = vsel %vm904_vm1, 0.0, %v3090_v56  ;;  %v3300_v2 = vmul.f32 %v3296_v17, %v11446_v33  ;;  %v3307_v30 = vmul.f32 %v3306_v28, %v11459_v57  ;;  %v3293_v5 = vmul.f32 %v3290_v29, %v11456_v37 }
 0x200   : > { %13472 = vst [vmem:[#allocation170_spill] sm:$0xff] %v11467_v0  ;;  %v3310_v3 = vmul.f32 %v3306_v28, %v11464_v60  ;;  %v3309_v56 = vmul.f32 %v3306_v28, %v11467_v0  ;;  %v3407_v28 = vmul.f32 %v11380_v39, %v11420_v16 }
 0x201   : > { %1933 = vrot.lane.b32.xlu0 %v1923_v19, %s7820_s4  ;;  %3341 = vrot.lane.b32.xlu1 %v3330_v38, %s7819_s3  ;;  %v3280_v11 = vpop.permute.xlu1 %3279  ;;  %v3299_v19 = vmul.f32 %v3296_v17, %v11450_v24  ;;  %s7203_s4 = sld [smem:[#allocation8 + $0x4]] }
 0x202   : > { %v11483_v63 = vsel %vm904_vm1, 0.0, %v3280_v11 }
 0x203   : > { %v3278_v38 = vpop.permute.xlu0 %3277  ;;  %13474 = vst [vmem:[#allocation61_spill] sm:$0xff] %v11483_v63 }
 0x205   : > { %3335 = vrot.lane.b32.xlu0 %v3327_v8, %s7819_s3  ;;  %3363 = vrot.lane.b32.xlu1 %v3354_v9, %s7819_s3  ;;  %v11474_v8 = vsel %vm904_vm1, 0.0, %v3276_v15  ;;  %v11477_v9 = vsel %vm904_vm1, 0.0, %v3274_v14  ;;  %v3304_v15 = vadd.f32 %v3300_v2, %v3294_v22  ;;  %v3456_v22 = vstv %s11469_s26  ;;  %s7217_s26 = sld [smem:[#allocation8 + $0x107]] }
 0x206   : > { %13473 = vst [vmem:[#allocation82_spill] sm:$0xff] %v11477_v9  ;;  %v3458_v39 = vmul.f32 %v3456_v22, %v11412_v25 }
 0x209   : > { %3339 = vrot.lane.b32.xlu0 %v3329_v44, %s7819_s3  ;;  %3367 = vrot.lane.b32.xlu1 %v3356_v46, %s7819_s3  ;;  %v11486_v44 = vsel %vm904_vm1, 0.0, %v3278_v38  ;;  %v3302_v46 = vadd.f32 %v3298_v6, %v3292_v4  ;;  %v3434_v6 = vmul.f32 %v11408_v26, %v11428_v35  ;;  %v3431_v38 = vmul.f32 %v11408_v26, %v11424_v40 }
 0x20a   : > { %13475 = vst [vmem:[#allocation70_spill] sm:$0xff] %v11486_v44 }
 0x20d   : > { %3361 = vrot.lane.b32.xlu0 %v3353_v41, %s7819_s3  ;;  %3389 = vrot.lane.b32.xlu1 %v3380_v13, %s7819_s3  ;;  %v3316_v41 = vstv %s11414_s25  ;;  %v3312_v13 = vadd.f32 %v3308_v50, %v3302_v46  ;;  %v3460_v50 = vmul.f32 %v3456_v22, %v11446_v33  ;;  %v3457_v46 = vmul.f32 %v3456_v22, %v11433_v36  ;;  %s7216_s25 = sld [smem:[#allocation8 + $0x87]] }
 0x20e   : > { %v3320_v14 = vmul.f32 %v3316_v41, %v11483_v63 }
 0x211   : > { %3365 = vrot.lane.b32.xlu0 %v3355_v48, %s7819_s3  ;;  %3393 = vrot.lane.b32.xlu1 %v3382_v43, %s7819_s3  ;;  %v3318_v48 = vmul.f32 %v3316_v41, %v11474_v8  ;;  %v3301_v43 = vadd.f32 %v3297_v52, %v3291_v10  ;;  %v3433_v52 = vmul.f32 %v11408_v26, %v11456_v37 }
 0x213   : > { %v11498_v29 = vadd.f32 %v3318_v48, %v3312_v13  ;;  %v3311_v17 = vadd.f32 %v3307_v30, %v3301_v43  ;;  %v893_v30 = vpop.permute.xlu0 %892  ;;  %v3508_v13 = vstv %s7198_s0  ;;  %s7219_s0 = sld [smem:[#allocation8 + $0x8]] }
 0x214   : > { %v3510_v43 = vmul.f32 %v3508_v13, %v11474_v8 }
 0x215   : > { %3387 = vrot.lane.b32.xlu0 %v3379_v47, %s7819_s3  ;;  %3415 = vrot.lane.b32.xlu1 %v3406_v58, %s7819_s3  ;;  %v3317_v47 = vmul.f32 %v3316_v41, %v11477_v9  ;;  %v3319_v58 = vmul.f32 %v3316_v41, %v11486_v44 }
 0x217   : > { %v11504_v10 = vadd.f32 %v3317_v47, %v3311_v17  ;;  %v897_v41 = vpop.permute.xlu0 %896  ;;  %v3512_v17 = vmul.f32 %v3508_v13, %v11483_v63  ;;  %v3950_v63 = vstv %s7215_s2  ;;  %s7213_s2 = sld [smem:[#allocation8 + $0x106]] }
 0x219   : > { %3391 = vrot.lane.b32.xlu0 %v3381_v21, %s7819_s3  ;;  %3419 = vrot.lane.b32.xlu1 %v3408_v27, %s7819_s3  ;;  %v3303_v21 = vadd.f32 %v3299_v19, %v3293_v5  ;;  %v3314_v27 = vadd.f32 %v3310_v3, %v3304_v15  ;;  %v3482_v19 = vstv %s7197_s20  ;;  %v3459_v3 = vmul.f32 %v3456_v22, %v11450_v24  ;;  %s7218_s20 = sld [smem:[#allocation8 + $0x187]] }
 0x21a   : > { %v3484_v5 = vmul.f32 %v3482_v19, %v11437_v61  ;;  %v3483_v48 = vmul.f32 %v3482_v19, %v11459_v57  ;;  %v3622_v15 = vstv %s7203_s4  ;;  %s7220_s4 = sld [smem:[#allocation8 + $0x88]] }
 0x21b   : > { %v3313_v4 = vadd.f32 %v3309_v56, %v3303_v21  ;;  %v11507_v11 = vadd.f32 %v3320_v14, %v3314_v27  ;;  %v3486_v56 = vmul.f32 %v3482_v19, %v11464_v60  ;;  %v1026_v21 = vpop.permute.xlu0 %1025 }
 0x21d   : > { %3413 = vrot.lane.b32.xlu0 %v3405_v62, %s7819_s3  ;;  %3441 = vrot.lane.b32.xlu1 %v3432_v51, %s7819_s3  ;;  %v11509_v62 = vadd.f32 %v3319_v58, %v3313_v4  ;;  %v895_v51 = vpop.permute.xlu1 %894  ;;  %v3485_v58 = vmul.f32 %v3482_v19, %v11467_v0  ;;  %v3980_v0 = vstv %s7216_s25  ;;  %s7214_s25 = sld [smem:[#allocation8 + $0x186]] }
 0x21e   : > { %v906_v14 = vsel %vm904_vm1, 0.0, %v895_v51 }
 0x21f   : > { %v3624_v27 = vmul.f32 %v3622_v15, %v906_v14 }
 0x221   : > { %3417 = vrot.lane.b32.xlu0 %v3407_v28, %s7819_s3  ;;  %3445 = vrot.lane.b32.xlu1 %v3434_v6, %s7819_s3  ;;  %v899_v2 = vpop.permute.xlu1 %898  ;;  %v3509_v6 = vmul.f32 %v3508_v13, %v11477_v9  ;;  %v3632_v22 = vrot.slane %v3624_v27, 1 }
 0x222   : > { %v908_v4 = vsel %vm904_vm1, 0.0, %v899_v2  ;;  %v3511_v2 = vmul.f32 %v3508_v13, %v11486_v44  ;;  %v3682_v13 = vstv %s7205_s22  ;;  %s11721_s22 = sld [smem:[#allocation8 + $0x3]] }
 0x223   : > { %v3626_v51 = vmul.f32 %v3622_v15, %v908_v4 }
 0x225   : > { %3439 = vrot.lane.b32.xlu0 %v3431_v38, %s7819_s3  ;;  %3467 = vrot.lane.b32.xlu1 %v3458_v39, %s7819_s3  ;;  %v1028_v26 = vpop.permute.xlu1 %1027  ;;  %v1030_v38 = vpop.permute.xlu0 %1029  ;;  %v905_v39 = vsel %vm904_vm1, 0.0, %v893_v30 }
 0x226   : > { %v3623_v19 = vmul.f32 %v3622_v15, %v905_v39 }
 0x229   : > { %3443 = vrot.lane.b32.xlu0 %v3433_v52, %s7819_s3  ;;  %3471 = vrot.lane.b32.xlu1 %v3460_v50, %s7819_s3  ;;  %v1032_v47 = vpop.permute.xlu1 %1031  ;;  %v3652_v52 = vstv %s7204_s27  ;;  %v1038_v50 = vsel %vm904_vm1, 0.0, %v1028_v26  ;;  %v3631_v26 = vrot.slane %v3623_v19, 1  ;;  %s7221_s27 = sld [smem:[#allocation8 + $0x108]] }
 0x22c   : > { %v1158_v30 = vpop.permute.xlu0 %1157 }
 0x22d   : > { %3465 = vrot.lane.b32.xlu0 %v3457_v46, %s7819_s3  ;;  %3493 = vrot.lane.b32.xlu1 %v3484_v5, %s7819_s3  ;;  %v1160_v28 = vpop.permute.xlu1 %1159  ;;  %v3634_v46 = vrot.slane %v3626_v51, 1  ;;  %v3654_v5 = vmul.f32 %v3652_v52, %v1038_v50 }
 0x22e   : > { %v1170_v27 = vsel %vm904_vm1, 0.0, %v1160_v28 }
 0x22f   : > { %v3662_v14 = vrot.slane %v3654_v5, 1  ;;  %v3712_v5 = vstv %s7206_s30  ;;  %s11725_s30 = sld [smem:[#allocation8 + $0x83]] }
 0x231   : > { %3469 = vrot.lane.b32.xlu0 %v3459_v3, %s7819_s3  ;;  %3497 = vrot.lane.b32.xlu1 %v3486_v56, %s7819_s3  ;;  %v907_v56 = vsel %vm904_vm1, 0.0, %v897_v41 }
 0x232   : > { %v1164_v3 = vpop.permute.xlu1 %1163 }
 0x233   : > { %v1172_v39 = vsel %vm904_vm1, 0.0, %v1164_v3 }
 0x235   : > { %3491 = vrot.lane.b32.xlu0 %v3483_v48, %s7819_s3  ;;  %3519 = vrot.lane.b32.xlu1 %v3510_v43, %s7819_s3  ;;  %v1040_v48 = vsel %vm904_vm1, 0.0, %v1032_v47  ;;  %v3625_v43 = vmul.f32 %v3622_v15, %v907_v56  ;;  %v1039_v15 = vsel %vm904_vm1, 0.0, %v1030_v38 }
 0x236   : > { %v3655_v28 = vmul.f32 %v3652_v52, %v1039_v15 }
 0x237   : > { %v3633_v47 = vrot.slane %v3625_v43, 1 }
 0x238   : > { %v3663_v38 = vrot.slane %v3655_v28, 1 }
 0x239   : > { %3495 = vrot.lane.b32.xlu0 %v3485_v58, %s7819_s3  ;;  %3523 = vrot.lane.b32.xlu1 %v3512_v17, %s7819_s3  ;;  %v3656_v58 = vmul.f32 %v3652_v52, %v1040_v48  ;;  %v1037_v17 = vsel %vm904_vm1, 0.0, %v1026_v21  ;;  %v1162_v51 = vpop.permute.xlu0 %1161 }
 0x23a   : > { %v3653_v4 = vmul.f32 %v3652_v52, %v1037_v17  ;;  %v1171_v52 = vsel %vm904_vm1, 0.0, %v1162_v51 }
 0x23b   : > { %v3685_v17 = vmul.f32 %v3682_v13, %v1171_v52 }
 0x23c   : > { %v3661_v21 = vrot.slane %v3653_v4, 1 }
 0x23d   : > { %3517 = vrot.lane.b32.xlu0 %v3509_v6, %s7819_s3  ;;  %3637 = vrot.lane.b32.xlu1 %v3632_v22, %s7819_s3  ;;  %v3664_v6 = vrot.slane %v3656_v58, 1  ;;  %v3684_v22 = vmul.f32 %v3682_v13, %v1170_v27  ;;  %v3693_v51 = vrot.slane %v3685_v17, 1 }
 0x23f   : > { %v1292_v41 = vpop.permute.xlu1 %1291  ;;  %v3692_v50 = vrot.slane %v3684_v22, 1  ;;  %v3742_v22 = vstv %s7207_s23  ;;  %s11741_s23 = sld [smem:[#allocation8 + $0x103]] }
 0x240   : > { %v1302_v56 = vsel %vm904_vm1, 0.0, %v1292_v41 }
 0x241   : > { %3521 = vrot.lane.b32.xlu0 %v3511_v2, %s7819_s3  ;;  %3641 = vrot.lane.b32.xlu1 %v3634_v46, %s7819_s3  ;;  %v3686_v2 = vmul.f32 %v3682_v13, %v1172_v39  ;;  %v1169_v46 = vsel %vm904_vm1, 0.0, %v1158_v30  ;;  %v3714_v43 = vmul.f32 %v3712_v5, %v1302_v56 }
 0x242   : > { %v3683_v3 = vmul.f32 %v3682_v13, %v1169_v46 }
 0x243   : > { %v3722_v27 = vrot.slane %v3714_v43, 1 }
 0x244   : > { %v3691_v58 = vrot.slane %v3683_v3, 1 }
 0x245   : > { %3635 = vrot.lane.b32.xlu0 %v3631_v26, %s7819_s3  ;;  %3667 = vrot.lane.b32.xlu1 %v3662_v14, %s7819_s3  ;;  %v3694_v26 = vrot.slane %v3686_v2, 1 }
 0x246   : > { %v1290_v48 = vpop.permute.xlu0 %1289 }
 0x247   : > { %v1301_v4 = vsel %vm904_vm1, 0.0, %v1290_v48 }
 0x248   : > { %v3713_v39 = vmul.f32 %v3712_v5, %v1301_v4 }
 0x249   : > { %3639 = vrot.lane.b32.xlu0 %v3633_v47, %s7819_s3  ;;  %3671 = vrot.lane.b32.xlu1 %v3664_v6, %s7819_s3 }
 0x24a   : > { %v1296_v19 = vpop.permute.xlu1 %1295  ;;  %v3721_v46 = vrot.slane %v3713_v39, 1 }
 0x24b   : > { %v1304_v30 = vsel %vm904_vm1, 0.0, %v1296_v19 }
 0x24c   : > { %v3716_v6 = vmul.f32 %v3712_v5, %v1304_v30 }
 0x24d   : > { %3665 = vrot.lane.b32.xlu0 %v3661_v21, %s7819_s3  ;;  %3697 = vrot.lane.b32.xlu1 %v3692_v50, %s7819_s3 }
 0x24e   : > { %v3724_v13 = vrot.slane %v3716_v6, 1 }
 0x24f   : > { %v1452_v14 = vpop.permute.xlu1 %1451 }
 0x250   : > { %v11570_v15 = vsel %vm904_vm1, 0.0, %v1452_v14  ;;  %v3772_v14 = vstv %s7208_s1  ;;  %s11751_s1 = sld [smem:[#allocation8 + $0x188]] }
 0x251   : > { %3669 = vrot.lane.b32.xlu0 %v3663_v38, %s7819_s3  ;;  %3701 = vrot.lane.b32.xlu1 %v3694_v26, %s7819_s3  ;;  %v3744_v2 = vmul.f32 %v3742_v22, %v11570_v15 }
 0x253   : > { %v1294_v41 = vpop.permute.xlu0 %1293  ;;  %v1456_v47 = vpop.permute.xlu1 %1455  ;;  %v3752_v3 = vrot.slane %v3744_v2, 1  ;;  %v3802_v2 = vstv %s7209_s24  ;;  %s11753_s24 = sld [smem:[#allocation8 + $0x183]] }
 0x254   : > { %v1303_v50 = vsel %vm904_vm1, 0.0, %v1294_v41  ;;  %v11577_v19 = vsel %vm904_vm1, 0.0, %v1456_v47 }
 0x255   : > { %3695 = vrot.lane.b32.xlu0 %v3691_v58, %s7819_s3  ;;  %3727 = vrot.lane.b32.xlu1 %v3722_v27, %s7819_s3  ;;  %v3715_v56 = vmul.f32 %v3712_v5, %v1303_v50  ;;  %v3746_v43 = vmul.f32 %v3742_v22, %v11577_v19 }
 0x257   : > { %v1450_v21 = vpop.permute.xlu0 %1449  ;;  %v1612_v28 = vpop.permute.xlu1 %1611  ;;  %v3723_v30 = vrot.slane %v3715_v56, 1  ;;  %v3754_v27 = vrot.slane %v3746_v43, 1 }
 0x258   : > { %v11581_v26 = vsel %vm904_vm1, 0.0, %v1450_v21  ;;  %v11586_v52 = vsel %vm904_vm1, 0.0, %v1612_v28 }
 0x259   : > { %3699 = vrot.lane.b32.xlu0 %v3693_v51, %s7819_s3  ;;  %3731 = vrot.lane.b32.xlu1 %v3724_v13, %s7819_s3  ;;  %v3743_v5 = vmul.f32 %v3742_v22, %v11581_v26  ;;  %v3774_v47 = vmul.f32 %v3772_v14, %v11586_v52 }
 0x25b   : > { %v1454_v48 = vpop.permute.xlu0 %1453  ;;  %v1616_v38 = vpop.permute.xlu1 %1615  ;;  %v3751_v6 = vrot.slane %v3743_v5, 1  ;;  %v3782_v28 = vrot.slane %v3774_v47, 1 }
 0x25c   : > { %v11591_v41 = vsel %vm904_vm1, 0.0, %v1454_v48  ;;  %v11596_v4 = vsel %vm904_vm1, 0.0, %v1616_v38 }
 0x25d   : > { %3725 = vrot.lane.b32.xlu0 %v3721_v46, %s7819_s3  ;;  %3757 = vrot.lane.b32.xlu1 %v3752_v3, %s7819_s3  ;;  %v3745_v51 = vmul.f32 %v3742_v22, %v11591_v41  ;;  %v3776_v50 = vmul.f32 %v3772_v14, %v11596_v4 }
 0x25f   : > { %v1610_v58 = vpop.permute.xlu0 %1609  ;;  %v1772_v17 = vpop.permute.xlu1 %1771  ;;  %v3753_v56 = vrot.slane %v3745_v51, 1  ;;  %v3784_v3 = vrot.slane %v3776_v50, 1 }
 0x260   : > { %v11601_v13 = vsel %vm904_vm1, 0.0, %v1610_v58  ;;  %v11606_v46 = vsel %vm904_vm1, 0.0, %v1772_v17 }
 0x261   : > { %3729 = vrot.lane.b32.xlu0 %v3723_v30, %s7819_s3  ;;  %3761 = vrot.lane.b32.xlu1 %v3754_v27, %s7819_s3  ;;  %v3773_v22 = vmul.f32 %v3772_v14, %v11601_v13  ;;  %v3804_v30 = vmul.f32 %v3802_v2, %v11606_v46 }
 0x263   : > { %v1614_v39 = vpop.permute.xlu0 %1613  ;;  %v1776_v21 = vpop.permute.xlu1 %1775  ;;  %v3781_v58 = vrot.slane %v3773_v22, 1 }
 0x264   : > { %v11611_v43 = vsel %vm904_vm1, 0.0, %v1614_v39  ;;  %v11616_v5 = vsel %vm904_vm1, 0.0, %v1776_v21 }
 0x265   : > { %3755 = vrot.lane.b32.xlu0 %v3751_v6, %s7819_s3  ;;  %3787 = vrot.lane.b32.xlu1 %v3782_v28, %s7819_s3  ;;  %13476 = vst [vmem:[#allocation96_spill] sm:$0xff] %v11611_v43  ;;  %v3775_v17 = vmul.f32 %v3772_v14, %v11611_v43  ;;  %v3812_v6 = vrot.slane %v3804_v30, 1  ;;  %v3806_v39 = vmul.f32 %v3802_v2, %v11616_v5  ;;  %v3832_v28 = vstv %s7210_s5  ;;  %s7211_s5 = sld [smem:[#allocation8 + $0x6]] }
 0x266   : > { %v3954_v43 = vmul.f32 %v3950_v63, %v11313_v45 }
 0x267   : > { %v1770_v48 = vpop.permute.xlu0 %1769  ;;  %v1932_v38 = vpop.permute.xlu1 %1931  ;;  %v3783_v50 = vrot.slane %v3775_v17, 1 }
 0x268   : > { %v11621_v51 = vsel %vm904_vm1, 0.0, %v1770_v48  ;;  %v11626_v21 = vsel %vm904_vm1, 0.0, %v1932_v38 }
 0x269   : > { %3759 = vrot.lane.b32.xlu0 %v3753_v56, %s7819_s3  ;;  %3791 = vrot.lane.b32.xlu1 %v3784_v3, %s7819_s3  ;;  %v3803_v14 = vmul.f32 %v3802_v2, %v11621_v51  ;;  %v3814_v3 = vrot.slane %v3806_v39, 1  ;;  %v3834_v30 = vmul.f32 %v3832_v28, %v11626_v21 }
 0x26b   : > { %v1774_v27 = vpop.permute.xlu0 %1773  ;;  %v1936_v47 = vpop.permute.xlu1 %1935  ;;  %v3811_v38 = vrot.slane %v3803_v14, 1  ;;  %v3842_v9 = vrot.slane %v3834_v30, 1 }
 0x26c   : > { %v11633_v48 = vsel %vm904_vm1, 0.0, %v1774_v27 }
 0x26d   : > { %3785 = vrot.lane.b32.xlu0 %v3781_v58, %s7819_s3  ;;  %3817 = vrot.lane.b32.xlu1 %v3812_v6, %s7819_s3  ;;  %13477 = vst [vmem:[#allocation174_spill] sm:$0xff] %v11633_v48  ;;  %v11638_v58 = vsel %vm904_vm1, 0.0, %v1936_v47  ;;  %v3805_v17 = vmul.f32 %v3802_v2, %v11633_v48 }
 0x26e   : > { %v3836_v27 = vmul.f32 %v3832_v28, %v11638_v58 }
 0x26f   : > { %v1930_v56 = vpop.permute.xlu0 %1929  ;;  %v11630_v22 = vpop.permute.xlu1 %3337  ;;  %v3813_v47 = vrot.slane %v3805_v17, 1 }
 0x270   : > { %v11645_v39 = vsel %vm904_vm1, 0.0, %v1930_v56  ;;  %v3844_v30 = vrot.slane %v3836_v27, 1 }
 0x271   : > { %3789 = vrot.lane.b32.xlu0 %v3783_v50, %s7819_s3  ;;  %3821 = vrot.lane.b32.xlu1 %v3814_v3, %s7819_s3  ;;  %13478 = vst [vmem:[#allocation159_spill] sm:$0xff] %v11645_v39  ;;  %v3833_v50 = vmul.f32 %v3832_v28, %v11645_v39  ;;  %v3952_v3 = vmul.f32 %v3950_v63, %v11300_v18 }
 0x272   : > { %v3951_v18 = vmul.f32 %v3950_v63, %v11325_v23 }
 0x273   : > { %v1934_v6 = vpop.permute.xlu0 %1933  ;;  %v11642_v44 = vpop.permute.xlu1 %3341  ;;  %v3960_v39 = vrot.slane %v3952_v3, 1  ;;  %v3953_v3 = vmul.f32 %v3950_v63, %v11338_v12 }
 0x274   : > { %v11657_v56 = vsel %vm904_vm1, 0.0, %v1934_v6  ;;  %v3959_v45 = vrot.slane %v3951_v18, 1 }
 0x275   : > { %3815 = vrot.lane.b32.xlu0 %v3811_v38, %s7819_s3  ;;  %3847 = vrot.lane.b32.xlu1 %v3842_v9, %s7819_s3  ;;  %v3841_v38 = vrot.slane %v3833_v50, 1  ;;  %v3835_v9 = vmul.f32 %v3832_v28, %v11657_v56  ;;  %v3962_v28 = vrot.slane %v3954_v43, 1  ;;  %v3982_v50 = vmul.f32 %v3980_v0, %v11329_v34 }
 0x276   : > { %v3961_v34 = vrot.slane %v3953_v3, 1  ;;  %v3981_v43 = vmul.f32 %v3980_v0, %v11350_v20 }
 0x277   : > { %v11651_v14 = vpop.permute.xlu0 %3335  ;;  %v11653_v2 = vpop.permute.xlu1 %3363  ;;  %v3843_v6 = vrot.slane %v3835_v9, 1  ;;  %v3990_v23 = vrot.slane %v3982_v50, 1  ;;  %v4010_v9 = vstv %s7217_s26  ;;  %s4189_s26 = sld [smem:[#allocation2]] }
 0x278   : > { %v4012_v63 = vmul.f32 %v4010_v9, %v11354_v7  ;;  %v4014_v20 = vmul.f32 %v4010_v9, %v11366_v32 }
 0x279   : > { %3819 = vrot.lane.b32.xlu0 %v3813_v47, %s7819_s3  ;;  %3851 = vrot.lane.b32.xlu1 %v3844_v30, %s7819_s3 }
 0x27a   : > { %v4020_v3 = vrot.slane %v4012_v63, 1 }
 0x27b   : > { %v11662_v17 = vpop.permute.xlu0 %3339  ;;  %v11664_v48 = vpop.permute.xlu1 %3367 }
 0x27d   : > { %3845 = vrot.lane.b32.xlu0 %v3841_v38, %s7819_s3  ;;  %3965 = vrot.lane.b32.xlu1 %v3960_v39, %s7819_s3  ;;  %v3984_v38 = vmul.f32 %v3980_v0, %v11342_v55  ;;  %v3989_v55 = vrot.slane %v3981_v43, 1 }
 0x27f   : > { %v11670_v27 = vpop.permute.xlu0 %3361  ;;  %v11672_v47 = vpop.permute.xlu1 %3389  ;;  %v3992_v12 = vrot.slane %v3984_v38, 1  ;;  %v4011_v38 = vmul.f32 %v4010_v9, %v11372_v59 }
 0x281   : > { %3849 = vrot.lane.b32.xlu0 %v3843_v6, %s7819_s3  ;;  %3969 = vrot.lane.b32.xlu1 %v3962_v28, %s7819_s3  ;;  %v3983_v28 = vmul.f32 %v3980_v0, %v11362_v1  ;;  %v4022_v1 = vrot.slane %v4014_v20, 1  ;;  %v4019_v32 = vrot.slane %v4011_v38, 1 }
 0x283   : > { %v11678_v30 = vpop.permute.xlu0 %3365  ;;  %v11680_v39 = vpop.permute.xlu1 %3393  ;;  %v3991_v7 = vrot.slane %v3983_v28, 1 }
 0x285   : > { %3963 = vrot.lane.b32.xlu0 %v3959_v45, %s7819_s3  ;;  %3995 = vrot.lane.b32.xlu1 %v3990_v23, %s7819_s3  ;;  %v4040_v23 = vstv %s7218_s20  ;;  %s7828_s20 = smov 112  }
 0x286   : > { %v4042_v0 = vmul.f32 %v4040_v23, %v11384_v49  ;;  %v4044_v28 = vmul.f32 %v4040_v23, %v11395_v54  ;;  %v4041_v20 = vmul.f32 %v4040_v23, %v11390_v42  ;;  %v4043_v54 = vmul.f32 %v4040_v23, %v11420_v16 }
 0x287   : > { %v11686_v6 = vpop.permute.xlu0 %3387  ;;  %v11688_v18 = vpop.permute.xlu1 %3415  ;;  %v11739_v23 = vstv %s7221_s27  ;;  %s12681_s27 = smov 8  }
 0x288   : > { %v4050_v59 = vrot.slane %v4042_v0, 1  ;;  %v3348_v0 = vadd.f32 %v11630_v22, %v11498_v29  ;;  %v4049_v42 = vrot.slane %v4041_v20, 1 }
 0x289   : > { %3967 = vrot.lane.b32.xlu0 %v3961_v34, %s7819_s3  ;;  %3999 = vrot.lane.b32.xlu1 %v3992_v12, %s7819_s3  ;;  %v4013_v12 = vmul.f32 %v4010_v9, %v11378_v53  ;;  %v4052_v53 = vrot.slane %v4044_v28, 1 }
 0x28a   : > { %v3374_v29 = vadd.f32 %v11653_v2, %v3348_v0 }
 0x28b   : > { %v11694_v50 = vpop.permute.xlu0 %3391  ;;  %v11696_v45 = vpop.permute.xlu1 %3419  ;;  %v4021_v49 = vrot.slane %v4013_v12, 1 }
 0x28c   : > { %v3400_v2 = vadd.f32 %v11672_v47, %v3374_v29  ;;  %v11783_v29 = vstv %s11725_s30  ;;  %s7827_s30 = smov 12  }
 0x28d   : > { %3993 = vrot.lane.b32.xlu0 %v3989_v55, %s7819_s3  ;;  %4025 = vrot.lane.b32.xlu1 %v4020_v3, %s7819_s3  ;;  %v4070_v3 = vstv %s7219_s0  ;;  %s7829_s0 = smov 120  }
 0x28e   : > { %v4072_v9 = vmul.f32 %v4070_v3, %v11403_v31  ;;  %v4074_v12 = vmul.f32 %v4070_v3, %v11428_v35  ;;  %v11737_v16 = vmul.f32 %v4070_v3, %v11456_v37  ;;  %v3426_v47 = vadd.f32 %v11688_v18, %v3400_v2 }
 0x28f   : > { %v11702_v34 = vpop.permute.xlu0 %3413  ;;  %v11704_v43 = vpop.permute.xlu1 %3441 }
 0x290   : > { %v4082_v37 = vrot.slane %v4074_v12, 1 }
 0x291   : > { %3997 = vrot.lane.b32.xlu0 %v3991_v7, %s7819_s3  ;;  %4029 = vrot.lane.b32.xlu1 %v4022_v1, %s7819_s3  ;;  %v4100_v1 = vstv %s7220_s4  ;;  %s13492_s4 = sld [smem:[#allocation187_spill]] }
 0x292   : > { %v4102_v22 = vmul.f32 %v4100_v1, %v11412_v25  ;;  %v11746_v20 = vmul.f32 %v4100_v1, %v11433_v36  ;;  %v11761_v36 = vmul.f32 %v4100_v1, %v11450_v24 }
 0x293   : > { %v11710_v63 = vpop.permute.xlu0 %3417  ;;  %v11712_v55 = vpop.permute.xlu1 %3445 }
 0x295   : > { %4023 = vrot.lane.b32.xlu0 %v4019_v32, %s7819_s3  ;;  %4055 = vrot.lane.b32.xlu1 %v4050_v59, %s7819_s3  ;;  %v4071_v32 = vmul.f32 %v4070_v3, %v11424_v40  ;;  %v4051_v3 = vrot.slane %v4043_v54, 1 }
 0x297   : > { %v11718_v7 = vpop.permute.xlu0 %3439  ;;  %v3468_v38 = vpop.permute.xlu1 %3467  ;;  %v4079_v0 = vrot.slane %v4071_v32, 1  ;;  %v4110_v32 = vrot.slane %v4102_v22, 1  ;;  %v11810_v22 = vstv %s11753_s24 }
 0x299   : > { %4027 = vrot.lane.b32.xlu0 %v4021_v49, %s7819_s3  ;;  %4059 = vrot.lane.b32.xlu1 %v4052_v53, %s7819_s3  ;;  %v4080_v49 = vrot.slane %v4072_v9, 1  ;;  %v11749_v53 = vmul.f32 %v4100_v1, %v11446_v33  ;;  %v3350_v9 = vadd.f32 %v11642_v44, %v11507_v11  ;;  %v11765_v33 = vmul.f32 %v11739_v23, %v11437_v61 }
 0x29a   : > { %v11771_v44 = vstv %s11721_s22  ;;  %s7826_s22 = smov 4  }
 0x29b   : > { %v11732_v59 = vpop.permute.xlu0 %3443  ;;  %v11734_v28 = vpop.permute.xlu1 %3471  ;;  %v3376_v11 = vadd.f32 %v11664_v48, %v3350_v9  ;;  %v4112_v12 = vrot.slane %v11749_v53, 1  ;;  %v3347_v48 = vadd.f32 %v11651_v14, %v11504_v10  ;;  %v4140_v53 = vrot.slane %v11765_v33, 1 }
 0x29c   : > { %v3536_v9 = vmul.f32 %v11771_v44, %v11570_v15  ;;  %v11799_v14 = vstv %s11741_s23  ;;  %v3558_v33 = vmul.f32 %v11783_v29, %v11586_v52  ;;  %v3349_v15 = vadd.f32 %v11662_v17, %v11509_v62 }
 0x29d   : > { %4053 = vrot.lane.b32.xlu0 %v4049_v42, %s7819_s3  ;;  %4085 = vrot.lane.b32.xlu1 %v4080_v49, %s7819_s3  ;;  %v4081_v42 = vrot.slane %v11737_v16, 1  ;;  %v11779_v49 = vmul.f32 %v11739_v23, %v11459_v57  ;;  %v3402_v18 = vadd.f32 %v11680_v39, %v3376_v11  ;;  %v3452_v16 = vadd.f32 %v11704_v43, %v3426_v47 }
 0x29e   : > { %v3373_v39 = vadd.f32 %v11670_v27, %v3347_v48  ;;  %v11805_v47 = vstv %s11751_s1  ;;  %v3544_v48 = vrot.slane %v3536_v9, 1  ;;  %v3538_v52 = vmul.f32 %v11771_v44, %v11577_v19  ;;  %s694_s1 = scalar_lea.vmem %s12395_s21, %s13496_s29 }
 0x29f   : > { %v11767_v40 = vpop.permute.xlu0 %3465  ;;  %v3494_v54 = vpop.permute.xlu1 %3493  ;;  %v3428_v43 = vadd.f32 %v11696_v45, %v3402_v18  ;;  %v4139_v11 = vrot.slane %v11779_v49, 1  ;;  %v3580_v18 = vmul.f32 %v11799_v14, %v11606_v46  ;;  %v3375_v62 = vadd.f32 %v11678_v30, %v3349_v15 }
 0x2a0   : > { %v3399_v1 = vadd.f32 %v11686_v6, %v3373_v39  ;;  %v3560_v19 = vmul.f32 %v11783_v29, %v11596_v4  ;;  %v3602_v46 = vmul.f32 %v11810_v22, %v11626_v21  ;;  %v3546_v9 = vrot.slane %v3538_v52, 1 }
 0x2a1   : > { %4057 = vrot.lane.b32.xlu0 %v4051_v3, %s7819_s3  ;;  %4089 = vrot.lane.b32.xlu1 %v4082_v37, %s7819_s3  ;;  %v11794_v3 = vmul.f32 %v11739_v23, %v11464_v60  ;;  %v3478_v37 = vadd.f32 %v3468_v38, %v3452_v16  ;;  %v3454_v27 = vadd.f32 %v11712_v55, %v3428_v43  ;;  %v3588_v39 = vrot.slane %v3580_v18, 1 }
 0x2a2   : > { %v3425_v17 = vadd.f32 %v11702_v34, %v3399_v1  ;;  %v3401_v30 = vadd.f32 %v11694_v50, %v3375_v62  ;;  %v3582_v4 = vmul.f32 %v11799_v14, %v11616_v5  ;;  %v13479_v15 = vrot.slane %v11746_v20, 1 }
 0x2a3   : > { %v3470_v2 = vpop.permute.xlu0 %3469  ;;  %v3498_v10 = vpop.permute.xlu1 %3497  ;;  %v3504_v45 = vadd.f32 %v3494_v54, %v3478_v37  ;;  %v4142_v38 = vrot.slane %v11794_v3, 1  ;;  %v3480_v6 = vadd.f32 %v11734_v28, %v3454_v27  ;;  %v11828_v54 = vmul.f32 %v11805_v47, %v11474_v8 }
 0x2a4   : > { %v3451_v34 = vadd.f32 %v11718_v7, %v3425_v17  ;;  %v3535_v3 = vmul.f32 %v11771_v44, %v11581_v26  ;;  %v3604_v26 = vmul.f32 %v11810_v22, %v11638_v58  ;;  %v3590_v52 = vrot.slane %v3582_v4, 1 }
 0x2a5   : > { %4083 = vrot.lane.b32.xlu0 %v4079_v0, %s7819_s3  ;;  %4115 = vrot.lane.b32.xlu1 %v4110_v32, %s7819_s3  ;;  %v3566_v32 = vrot.slane %v3558_v33, 1  ;;  %v3506_v1 = vadd.f32 %v3498_v10, %v3480_v6  ;;  %v3557_v10 = vmul.f32 %v11783_v29, %v11601_v13  ;;  %v3610_v33 = vrot.slane %v3602_v46, 1  ;;  %v13481_v6 = vld [vmem:[#allocation96_spill] sm:$0xff] }
 0x2a6   : > { %v3477_v50 = vadd.f32 %v11767_v40, %v3451_v34  ;;  %v3537_v13 = vmul.f32 %v11771_v44, %v11591_v41  ;;  %v3612_v41 = vrot.slane %v3604_v26, 1  ;;  %v13483_v44 = vld [vmem:[#allocation159_spill] sm:$0xff] }
 0x2a7   : > { %v3492_v0 = vpop.permute.xlu0 %3491  ;;  %v3520_v16 = vpop.permute.xlu1 %3519  ;;  %v3565_v17 = vrot.slane %v3557_v10, 1 }
 0x2a8   : > { %v3530_v55 = vadd.f32 %v3520_v16, %v3504_v45  ;;  %v3503_v27 = vadd.f32 %v3492_v0, %v3477_v50  ;;  %v3543_v45 = vrot.slane %v3535_v3, 1  ;;  %v13480_v0 = vld [vmem:[#allocation170_spill] sm:$0xff] }
 0x2a9   : > { %4087 = vrot.lane.b32.xlu0 %v4081_v42, %s7819_s3  ;;  %4119 = vrot.lane.b32.xlu1 %v4112_v12, %s7819_s3  ;;  %v3427_v42 = vadd.f32 %v11710_v63, %v3401_v30  ;;  %v3568_v12 = vrot.slane %v3560_v19, 1  ;;  %v4170_v30 = vrot.slane %v11828_v54, 1  ;;  %v3603_v54 = vmul.f32 %v11810_v22, %v11657_v56 }
 0x2aa   : > { %v3552_v28 = vadd.f32 %v3544_v48, %v3530_v55  ;;  %v3579_v48 = vmul.f32 %v11799_v14, %v11621_v51  ;;  %v3559_v55 = vmul.f32 %v11783_v29, %v13481_v6  ;;  %v13482_v51 = vrot.slane %v11761_v36, 1 }
 0x2ab   : > { %v3496_v43 = vpop.permute.xlu0 %3495  ;;  %v3524_v21 = vpop.permute.xlu1 %3523  ;;  %v3453_v5 = vadd.f32 %v11732_v59, %v3427_v42  ;;  %v3611_v49 = vrot.slane %v3603_v54, 1 }
 0x2ac   : > { %v3574_v37 = vadd.f32 %v3566_v32, %v3552_v28  ;;  %v3532_v7 = vadd.f32 %v3524_v21, %v3506_v1  ;;  %v3601_v32 = vmul.f32 %v11810_v22, %v13483_v44  ;;  %v3545_v1 = vrot.slane %v3537_v13, 1  ;;  %v13487_v22 = vld [vmem:[#allocation70_spill] sm:$0xff] }
 0x2ad   : > { %4113 = vrot.lane.b32.xlu0 %v13479_v15, %s7819_s3  ;;  %4145 = vrot.lane.b32.xlu1 %v4140_v53, %s7819_s3  ;;  %v3479_v20 = vadd.f32 %v3470_v2, %v3453_v5  ;;  %v4133_v53 = vmul.f32 %v11739_v23, %v13480_v0  ;;  %v13484_v23 = vld [vmem:[#allocation61_spill] sm:$0xff]  ;;  %v3587_v29 = vrot.slane %v3579_v48, 1 }
 0x2ae   : > { %v3554_v63 = vadd.f32 %v3546_v9, %v3532_v7  ;;  %v3596_v40 = vadd.f32 %v3588_v39, %v3574_v37  ;;  %v4164_v34 = vmul.f32 %v11805_v47, %v13484_v23  ;;  %v13485_v9 = vld [vmem:[#allocation174_spill] sm:$0xff] }
 0x2af   : > { %v3518_v58 = vpop.permute.xlu0 %3517  ;;  %v11857_v18 = vpop.permute.xlu1 %3637  ;;  %v3505_v2 = vadd.f32 %v3496_v43, %v3479_v20  ;;  %v3581_v36 = vmul.f32 %v11799_v14, %v13485_v9  ;;  %v3567_v43 = vrot.slane %v3559_v55, 1  ;;  %v4141_v37 = vrot.slane %v4133_v53, 1  ;;  %v13486_v7 = vld [vmem:[#allocation82_spill] sm:$0xff] }
 0x2b0   : > { %v3529_v16 = vadd.f32 %v3518_v58, %v3503_v27  ;;  %v3576_v62 = vadd.f32 %v3568_v12, %v3554_v63  ;;  %v11859_v59 = vadd.f32 %v3610_v33, %v3596_v40  ;;  %v4161_v14 = vmul.f32 %v11805_v47, %v13486_v7 }
 0x2b1   : > { %4117 = vrot.lane.b32.xlu0 %v13482_v51, %s7819_s3  ;;  %4149 = vrot.lane.b32.xlu1 %v4142_v38, %s7819_s3  ;;  %v3609_v38 = vrot.slane %v3601_v32, 1  ;;  %v4172_v33 = vrot.slane %v4164_v34, 1  ;;  %v3589_v26 = vrot.slane %v3581_v36, 1  ;;  %v4163_v27 = vmul.f32 %v11805_v47, %v13487_v22 }
 0x2b2   : > { %v3551_v19 = vadd.f32 %v3543_v45, %v3529_v16  ;;  %v3598_v46 = vadd.f32 %v3590_v52, %v3576_v62  ;;  %v4169_v56 = vrot.slane %v4161_v14, 1  ;;  %v7821_v16 = vmov 0.0  }
 0x2b3   : > { %v3522_v28 = vpop.permute.xlu0 %3521  ;;  %v3642_v3 = vpop.permute.xlu1 %3641  ;;  %v4171_v13 = vrot.slane %v4163_v27, 1  ;;  %7403 = vmatprep.subr.bf16.mxu0 %v7821_v16  ;;  %7417 = vmatprep.subr.mxu1 %v7821_v16  ;;  %v3928_v27 = vstv %s7214_s25  ;;  %s13494_s25 = smov 24  }
 0x2b4   : > { %v3573_v39 = vadd.f32 %v3565_v17, %v3551_v19  ;;  %v3531_v4 = vadd.f32 %v3522_v28, %v3505_v2  ;;  %v3620_v21 = vadd.f32 %v3612_v41, %v3598_v46  ;;  %v3648_v2 = vadd.f32 %v11857_v18, %v11859_v59  ;;  %7405 = vmatprep.mubr.msk.bf16.mxu0 %vm7824_vm2, %v7821_v16 }
 0x2b5   : > { %4143 = vrot.lane.b32.xlu0 %v4139_v11, %s7819_s3  ;;  %4175 = vrot.lane.b32.xlu1 %v4170_v30, %s7819_s3  ;;  %v11894_v59 = vstv %s7213_s2  ;;  %s12680_s2 = smov 24  }
 0x2b6   : > { %v3553_v42 = vadd.f32 %v3545_v1, %v3531_v4  ;;  %v3595_v50 = vadd.f32 %v3587_v29, %v3573_v39  ;;  %v3650_v34 = vadd.f32 %v3642_v3, %v3620_v21  ;;  %v3862_v39 = vstv %s7211_s5  ;;  %7419 = vmatprep.mubr.msk.f32.mxu1 %vm7824_vm2, %v7821_v16 }
 0x2b7   : > { %v3636_v10 = vpop.permute.xlu0 %3635  ;;  %v3668_v12 = vpop.permute.xlu1 %3667  ;;  %v3864_v3 = vmul.f32 %v3862_v39, %v11403_v31  ;;  %v13488_v31 = vld [vmem:[#allocation77_spill] sm:$0xff] }
 0x2b8   : > { %v3575_v15 = vadd.f32 %v3567_v43, %v3553_v42  ;;  %v3617_v5 = vadd.f32 %v3609_v38, %v3595_v50  ;;  %v3678_v30 = vadd.f32 %v3668_v12, %v3648_v2 }
 0x2b9   : > { %4147 = vrot.lane.b32.xlu0 %v4141_v37, %s7819_s3  ;;  %4179 = vrot.lane.b32.xlu1 %v4172_v33, %s7819_s3 }
 0x2ba   : > { %v3597_v11 = vadd.f32 %v3589_v26, %v3575_v15  ;;  %v3647_v4 = vadd.f32 %v3636_v10, %v3617_v5  ;;  %v3908_v10 = vmul.f32 %v11894_v59, %v11437_v61  ;;  %v3930_v61 = vmul.f32 %v3928_v27, %v11474_v8 }
 0x2bb   : > { %v3640_v63 = vpop.permute.xlu0 %3639  ;;  %v3672_v40 = vpop.permute.xlu1 %3671 }
 0x2bc   : > { %v3619_v45 = vadd.f32 %v3611_v49, %v3597_v11  ;;  %v3680_v9 = vadd.f32 %v3672_v40, %v3650_v34 }
 0x2bd   : > { %4173 = vrot.lane.b32.xlu0 %v4169_v56, %s7819_s3 }
 0x2be   : > { %v3649_v21 = vadd.f32 %v3640_v63, %v3619_v45  ;;  %v3863_v63 = vmul.f32 %v3862_v39, %v13488_v31  ;;  %v13489_v45 = vld [vmem:[#allocation167_spill] sm:$0xff]  ;;  %v3931_v31 = vmul.f32 %v3928_v27, %v13487_v22 }
 0x2bf   : > { %v3666_v48 = vpop.permute.xlu0 %3665  ;;  %v3698_v52 = vpop.permute.xlu1 %3697 }
 0x2c0   : > { %v3708_v1 = vadd.f32 %v3698_v52, %v3678_v30  ;;  %v3677_v50 = vadd.f32 %v3666_v48, %v3647_v4  ;;  %v3866_v52 = vmul.f32 %v3862_v39, %v11428_v35  ;;  %v3910_v35 = vmul.f32 %v11894_v59, %v11464_v60 }
 0x2c1   : > { %4177 = vrot.lane.b32.xlu0 %v4171_v13, %s7819_s3  ;;  %s7212_s3 = sld [smem:[#allocation8 + $0x86]]  ;;  %v3872_v13 = vrot.slane %v3864_v3, 1 }
 0x2c3   : > { %v3670_v58 = vpop.permute.xlu0 %3669  ;;  %v3702_v20 = vpop.permute.xlu1 %3701 }
 0x2c4   : > { %v3710_v43 = vadd.f32 %v3702_v20, %v3680_v9  ;;  %v3679_v5 = vadd.f32 %v3670_v58, %v3649_v21  ;;  %v13490_v58 = vld [vmem:[#allocation47_spill] sm:$0xff]  ;;  %v3918_v21 = vrot.slane %v3910_v35, 1 }
 0x2c7   : > { %v3696_v62 = vpop.permute.xlu0 %3695  ;;  %v3728_v53 = vpop.permute.xlu1 %3727  ;;  %v3884_v42 = vstv %s7212_s3  ;;  %s7833_s3 = smov 16  }
 0x2c8   : > { %v3738_v36 = vadd.f32 %v3728_v53, %v3708_v1  ;;  %v3707_v12 = vadd.f32 %v3696_v62, %v3677_v50  ;;  %v3886_v33 = vmul.f32 %v3884_v42, %v11412_v25  ;;  %v3888_v20 = vmul.f32 %v3884_v42, %v13489_v45 }
 0x2c9   : > { %v3874_v1 = vrot.slane %v3866_v52, 1  ;;  %v3871_v50 = vrot.slane %v3863_v63, 1  ;;  %v3887_v3 = vmul.f32 %v3884_v42, %v11450_v24 }
 0x2ca   : > { %v3894_v53 = vrot.slane %v3886_v33, 1 }
 0x2cb   : > { %v3700_v47 = vpop.permute.xlu0 %3699  ;;  %v3732_v17 = vpop.permute.xlu1 %3731  ;;  %v3895_v24 = vrot.slane %v3887_v3, 1 }
 0x2cc   : > { %v3740_v37 = vadd.f32 %v3732_v17, %v3710_v43  ;;  %v3709_v25 = vadd.f32 %v3700_v47, %v3679_v5  ;;  %v3896_v47 = vrot.slane %v3888_v20, 1 }
 0x2cf   : > { %v3726_v6 = vpop.permute.xlu0 %3725  ;;  %v3758_v55 = vpop.permute.xlu1 %3757 }
 0x2d0   : > { %v3768_v38 = vadd.f32 %v3758_v55, %v3738_v36  ;;  %v3737_v11 = vadd.f32 %v3726_v6, %v3707_v12  ;;  %v3885_v6 = vmul.f32 %v3884_v42, %v13490_v58 }
 0x2d3   : > { %v3730_v41 = vpop.permute.xlu0 %3729  ;;  %v3762_v51 = vpop.permute.xlu1 %3761 }
 0x2d4   : > { %v3770_v26 = vadd.f32 %v3762_v51, %v3740_v37  ;;  %v3739_v2 = vadd.f32 %v3730_v41, %v3709_v25  ;;  %v3932_v41 = vmul.f32 %v3928_v27, %v13484_v23  ;;  %v13491_v37 = vld [vmem:[#allocation55_spill] sm:$0xff] }
 0x2d5   : > { %v3865_v60 = vmul.f32 %v3862_v39, %v13491_v37 }
 0x2d6   : > { %v3940_v23 = vrot.slane %v3932_v41, 1 }
 0x2d7   : > { %v3756_v44 = vpop.permute.xlu0 %3755  ;;  %v3788_v32 = vpop.permute.xlu1 %3787  ;;  %v3873_v39 = vrot.slane %v3865_v60, 1 }
 0x2d8   : > { %v3798_v14 = vadd.f32 %v3788_v32, %v3768_v38  ;;  %v3767_v62 = vadd.f32 %v3756_v44, %v3737_v11  ;;  %v3916_v32 = vrot.slane %v3908_v10, 1  ;;  %v3907_v44 = vmul.f32 %v11894_v59, %v11459_v57 }
 0x2d9   : > { %v3938_v38 = vrot.slane %v3930_v61, 1  ;;  %v3893_v57 = vrot.slane %v3885_v6, 1 }
 0x2db   : > { %v3760_v19 = vpop.permute.xlu0 %3759  ;;  %v3792_v46 = vpop.permute.xlu1 %3791 }
 0x2dc   : > { %v3800_v40 = vadd.f32 %v3792_v46, %v3770_v26  ;;  %v3769_v9 = vadd.f32 %v3760_v19, %v3739_v2 }
 0x2df   : > { %v3786_v29 = vpop.permute.xlu0 %3785  ;;  %v3818_v28 = vpop.permute.xlu1 %3817 }
 0x2e0   : > { %v3828_v15 = vadd.f32 %v3818_v28, %v3798_v14  ;;  %v3797_v46 = vadd.f32 %v3786_v29, %v3767_v62 }
 0x2e3   : > { %v3790_v54 = vpop.permute.xlu0 %3789  ;;  %v3822_v18 = vpop.permute.xlu1 %3821 }
 0x2e4   : > { %v3830_v17 = vadd.f32 %v3822_v18, %v3800_v40  ;;  %v3799_v29 = vadd.f32 %v3790_v54, %v3769_v9  ;;  %v3909_v54 = vmul.f32 %v11894_v59, %v13480_v0 }
 0x2e7   : > { %v3816_v49 = vpop.permute.xlu0 %3815  ;;  %v3848_v56 = vpop.permute.xlu1 %3847 }
 0x2e8   : > { %v3858_v48 = vadd.f32 %v3848_v56, %v3828_v15  ;;  %v3827_v36 = vadd.f32 %v3816_v49, %v3797_v46  ;;  %v3929_v15 = vmul.f32 %v3928_v27, %v13486_v7  ;;  %v3915_v49 = vrot.slane %v3907_v44, 1 }
 0x2e9   : > { %v3917_v7 = vrot.slane %v3909_v54, 1 }
 0x2ea   : > { %v3880_v51 = vadd.f32 %v3872_v13, %v3858_v48  ;;  %v3937_v52 = vrot.slane %v3929_v15, 1 }
 0x2eb   : > { %v3820_v55 = vpop.permute.xlu0 %3819  ;;  %v3852_v30 = vpop.permute.xlu1 %3851 }
 0x2ec   : > { %v3902_v34 = vadd.f32 %v3894_v53, %v3880_v51  ;;  %v3860_v28 = vadd.f32 %v3852_v30, %v3830_v17  ;;  %v3829_v19 = vadd.f32 %v3820_v55, %v3799_v29  ;;  %v3939_v53 = vrot.slane %v3931_v31, 1 }
 0x2ee   : > { %v3882_v8 = vadd.f32 %v3874_v1, %v3860_v28  ;;  %v3924_v43 = vadd.f32 %v3916_v32, %v3902_v34 }
 0x2ef   : > { %v3846_v4 = vpop.permute.xlu0 %3845  ;;  %v3966_v14 = vpop.permute.xlu1 %3965 }
 0x2f0   : > { %v3857_v18 = vadd.f32 %v3846_v4, %v3827_v36  ;;  %v3904_v12 = vadd.f32 %v3896_v47, %v3882_v8  ;;  %v3946_v33 = vadd.f32 %v3938_v38, %v3924_v43 }
 0x2f2   : > { %v3879_v26 = vadd.f32 %v3871_v50, %v3857_v18  ;;  %v3926_v5 = vadd.f32 %v3918_v21, %v3904_v12  ;;  %v3976_v28 = vadd.f32 %v3966_v14, %v3946_v33 }
 0x2f3   : > { %v3850_v10 = vpop.permute.xlu0 %3849  ;;  %v3970_v40 = vpop.permute.xlu1 %3969 }
 0x2f4   : > { %v3901_v11 = vadd.f32 %v3893_v57, %v3879_v26  ;;  %v3859_v56 = vadd.f32 %v3850_v10, %v3829_v19  ;;  %v3948_v42 = vadd.f32 %v3940_v23, %v3926_v5 }
 0x2f6   : > { %v3881_v13 = vadd.f32 %v3873_v39, %v3859_v56  ;;  %v3923_v48 = vadd.f32 %v3915_v49, %v3901_v11  ;;  %v3978_v36 = vadd.f32 %v3970_v40, %v3948_v42  ;;  %v4190_v39 = vstv %s4189_s26 }
 0x2f7   : > { %v3964_v63 = vpop.permute.xlu0 %3963  ;;  %v3996_v25 = vpop.permute.xlu1 %3995 }
 0x2f8   : > { %v3903_v45 = vadd.f32 %v3895_v24, %v3881_v13  ;;  %v3945_v20 = vadd.f32 %v3937_v52, %v3923_v48  ;;  %v4006_v9 = vadd.f32 %v3996_v25, %v3976_v28 }
 0x2fa   : > { %v3925_v62 = vadd.f32 %v3917_v7, %v3903_v45  ;;  %v3975_v29 = vadd.f32 %v3964_v63, %v3945_v20  ;;  %v7822_v7 = vmov 1983009808   ;;  %v4203_v20 = vlaneseq }
 0x2fb   : > { %v3968_v17 = vpop.permute.xlu0 %3967  ;;  %v4000_v59 = vpop.permute.xlu1 %3999  ;;  %v4201_v45 = vunpack.c.l.s4 %v7822_v7 }
 0x2fc   : > { %v3947_v0 = vadd.f32 %v3939_v53, %v3925_v62  ;;  %v4008_v38 = vadd.f32 %v4000_v59, %v3978_v36  ;;  %v7618_v36 = vld [vmem:[%s13492_s4] sm:$0xff]   ;;  %s7830_s4 = smov 96  }
 0x2fd   : > { %7404 = vmatpush3.bf16.msra.mxu0 %v7618_v36 }
 0x2fe   : > { %v3977_v57 = vadd.f32 %v3968_v17, %v3947_v0  ;;  %7409 = vmatprep.subr.bf16.mxu0 %v7821_v16 }
 0x2ff   : > { %v3994_v55 = vpop.permute.xlu0 %3993  ;;  %v4026_v51 = vpop.permute.xlu1 %4025 }
 0x300   : > { %v4036_v4 = vadd.f32 %v4026_v51, %v4006_v9  ;;  %v4005_v60 = vadd.f32 %v3994_v55, %v3975_v29  ;;  %v4202_v51 = vunpack.c.0.s8 %v4201_v45 }
 0x303   : > { %v3998_v61 = vpop.permute.xlu0 %3997  ;;  %v4030_v58 = vpop.permute.xlu1 %4029 }
 0x304   : > { %v4038_v50 = vadd.f32 %v4030_v58, %v4008_v38  ;;  %v4007_v15 = vadd.f32 %v3998_v61, %v3977_v57  ;;  %v4204_v61 = vshrl.u32 %v4203_v20, 7 }
 0x307   : > { %v4024_v6 = vpop.permute.xlu0 %4023  ;;  %v4056_v32 = vpop.permute.xlu1 %4055 }
 0x308   : > { %v4066_v41 = vadd.f32 %v4056_v32, %v4036_v4  ;;  %v4035_v14 = vadd.f32 %v4024_v6, %v4005_v60 }
 0x30b   : > { %v4028_v2 = vpop.permute.xlu0 %4027  ;;  %v4060_v46 = vpop.permute.xlu1 %4059 }
 0x30c   : > { %v4068_v21 = vadd.f32 %v4060_v46, %v4038_v50  ;;  %v4037_v54 = vadd.f32 %v4028_v2, %v4007_v15  ;;  %v7823_v46 = vmov 1934713408  }
 0x30f   : > { %v4054_v30 = vpop.permute.xlu0 %4053  ;;  %v4086_v22 = vpop.permute.xlu1 %4085 }
 0x310   : > { %v4096_v18 = vadd.f32 %v4086_v22, %v4066_v41  ;;  %v4065_v49 = vadd.f32 %v4054_v30, %v4035_v14  ;;  %v4218_v30 = vunpack.c.l.s4 %v7823_v46  ;;  %v11916_v22 = vsub.s32 %v4202_v51, %v4204_v61  ;;  %v7620_v14 = vld [vmem:[%s12381_s7 + $0x8] sm:$0xff]  }
 0x313   : > { %v4058_v27 = vpop.permute.xlu0 %4057  ;;  %v4090_v35 = vpop.permute.xlu1 %4089 }
 0x314   : > { %v4098_v33 = vadd.f32 %v4090_v35, %v4068_v21  ;;  %v4067_v24 = vadd.f32 %v4058_v27, %v4037_v54 }
 0x317   : > { %v4084_v34 = vpop.permute.xlu0 %4083  ;;  %v4116_v1 = vpop.permute.xlu1 %4115 }
 0x318   : > { %v4126_v12 = vadd.f32 %v4116_v1, %v4096_v18  ;;  %v4095_v11 = vadd.f32 %v4084_v34, %v4065_v49  ;;  %v4219_v1 = vunpack.c.0.s8 %v4218_v30 }
 0x31a   : > { %v11920_v9 = vsub.s32 %v4219_v1, %v4204_v61 }
 0x31b   : > { %v4088_v47 = vpop.permute.xlu0 %4087  ;;  %v4120_v44 = vpop.permute.xlu1 %4119 }
 0x31c   : > { %v4128_v5 = vadd.f32 %v4120_v44, %v4098_v33  ;;  %v4097_v31 = vadd.f32 %v4088_v47, %v4067_v24  ;;  %v7223_v33 = vld [vmem:[%s12380_s6] ss:$0 sm:$0xff] }
 0x31f   : > { %v4114_v8 = vpop.permute.xlu0 %4113  ;;  %v4146_v43 = vpop.permute.xlu1 %4145 }
 0x320   : > { %v4156_v19 = vadd.f32 %v4146_v43, %v4126_v12  ;;  %v4125_v42 = vadd.f32 %v4114_v8, %v4095_v11  ;;  %v7619_v12 = vld [vmem:[%s12381_s7] sm:$0xff]  }
 0x323   : > { %v4118_v37 = vpop.permute.xlu0 %4117  ;;  %v4150_v3 = vpop.permute.xlu1 %4149 }
 0x324   : > { %v4158_v56 = vadd.f32 %v4150_v3, %v4128_v5  ;;  %v4127_v53 = vadd.f32 %v4118_v37, %v4097_v31 }
 0x327   : > { %v4144_v26 = vpop.permute.xlu0 %4143  ;;  %v4176_v10 = vpop.permute.xlu1 %4175 }
 0x328   : > { %v4186_v23 = vadd.f32 %v4176_v10, %v4156_v19  ;;  %v4155_v63 = vadd.f32 %v4144_v26, %v4125_v42 }
 0x32a   : > { %v4192_v48 = vadd.f32 %v4190_v39, %v4186_v23  ;;  %v7226_v23 = vld [vmem:[%s12382_s8] ss:$0 sm:$0xff] }
 0x32b   : > { %v4148_v40 = vpop.permute.xlu0 %4147  ;;  %v4180_v13 = vpop.permute.xlu1 %4179 }
 0x32c   : > { %v4188_v52 = vadd.f32 %v4180_v13, %v4158_v56  ;;  %v4196_v0 = vmax.f32 %v4192_v48, 0.0  ;;  %v4157_v55 = vadd.f32 %v4148_v40, %v4127_v53 }
 0x32e   : > { %v4194_v62 = vadd.f32 %v4190_v39, %v4188_v52 }
 0x32f   : > { %v4174_v25 = vpop.permute.xlu0 %4173 }
 0x330   : > { %v4185_v17 = vadd.f32 %v4174_v25, %v4155_v63  ;;  %v4198_v59 = vmax.f32 %v4194_v62, 0.0 }
 0x332   : > { %v4207_v58 = vcombine.low %v4196_v0, %v4198_v59  ;;  %v4191_v32 = vadd.f32 %v4190_v39, %v4185_v17 }
 0x333   : > { %v4178_v6 = vpop.permute.xlu0 %4177 }
 0x334   : > { %v4187_v2 = vadd.f32 %v4178_v6, %v4157_v55  ;;  %v4195_v35 = vmax.f32 %v4191_v32, 0.0  ;;  %v4214_v28 = vrot.slane %v4207_v58, %v11916_v22 }
 0x336   : > { %v4193_v27 = vadd.f32 %v4190_v39, %v4187_v2 }
 0x338   : > { %v4197_v34 = vmax.f32 %v4193_v27, 0.0 }
 0x33a   : > { %v4199_v47 = vcombine.low %v4195_v35, %v4197_v34 }
 0x33c   : > { %v4206_v44 = vrot.slane %v4199_v47, %v11916_v22 }
 0x33e   : > { %v4215_v4 = vcombine.low %v4206_v44, %v4214_v28  ;;  %v4216_v8 = vcombine.high %v4206_v44, %v4214_v28 }
 0x340   : > { %v4230_v43 = vrot.slane %v4216_v8, %v11920_v9  ;;  %v4223_v38 = vrot.slane %v4215_v4, %v11920_v9 }
 0x342   : > { %4238 = vrot.lane.b32.xlu1 %v4230_v43, %s12681_s27  ;;  %v4231_v41 = vcombine.high %v4223_v38, %v7821_v16  ;;  %v4232_v29 = vcombine.high %v4230_v43, %v7821_v16 }
 0x344   : > { %4234 = vrot.lane.b32.xlu0 %v4231_v41, %s7826_s22  ;;  %s7831_s22 = smov 104  }
 0x348   : > { %4242 = vrot.lane.b32.xlu0 %v4232_v29, %s7827_s30  ;;  %s7832_s30 = smov 64  }
 0x3b4   : > { %v4239_v37 = vpop.permute.xlu1 %4238 }
 0x3b6   : > { %v4235_v50 = vpop.permute.xlu0 %4234 }
 0x3b7   : > { %v4246_v18 = vsel %vm4245_vm3, %v4223_v38, %v4235_v50 }
 0x3b8   : > { %v4248_v60 = vsel %vm4247_vm4, %v4246_v18, %v4239_v37 }
 0x3ba   : > { %v4243_v3 = vpop.permute.xlu0 %4242 }
 0x3bb   : > { %v4250_v21 = vsel %vm4249_vm5, %v4248_v60, %v4243_v3 }
 0x3bc   : > { %v4253_v57 = vpack.c.bf16 %v4250_v21, %v4250_v21 }
 0x3be   : > { %7406 = vmatmul.mubr.msk.bf16.vlgmr.msra.gmra.mrb[0].mxu0 %vm4267_vm6, %v4253_v57 }
 0x3bf   : > { %7410 = vmatpush3.bf16.msra.mxu0 %v7619_v12  ;;  %7413 = vmatprep.mubr.msk.bf16.mxu0 %vm7824_vm2, %v7821_v16 }
 0x3c0   : > { %7411 = vmatprep.subr.bf16.mxu0 %v7821_v16 }
 0x3c3   : > { %7412 = vmatpush3.bf16.msra.mxu0 %v7620_v14 }
 0x3c4   : > { %7422 = vmatprep.subr.mxu0 %v7821_v16 }
 0x491   : > { %v4305_v19 = vpop.f32.mrb[0].mxu0 }
 0x492   : > { %v11951_v26 = vadd.f32 %v7223_v33, %v4305_v19  ;;  %v7407_v15 = vpop.f32.mrb[1].mxu0 }
 0x493   : > { %v4308_v49 = vpop.f32.mrb[2].mxu0 }
 0x494   : > { %v4315_v10 = vpack.c.bf16 %v11951_v26, %v11951_v26  ;;  %v7408_v5 = vpop.f32.mrb[3].mxu0 }
 0x496   : > { %7414 = vmatmul.mubr.msk.bf16.vlgmr.msra.gmra.mrb[4].mxu0 %vm4335_vm7, %v4315_v10 }
 0x497   : > { %7424 = vmatprep.mubr.msk.f32.mxu0 %vm7824_vm2, %v7821_v16 }
 0x569   : > { %v4373_v54 = vpop.f32.mrb[4].mxu0 }
 0x56a   : > { %v11961_v11 = vadd.f32 %v7226_v23, %v4373_v54  ;;  %v7415_v39 = vpop.f32.mrb[5].mxu0 }
 0x56b   : > { %v4376_v56 = vpop.f32.mrb[6].mxu0 }
 0x56c   : > { %4461 = vrot.lane.b32.xlu0 %v11961_v11, %s7828_s20  ;;  %4459 = vrot.lane.b32.xlu1 %v11961_v11, %s7829_s0  ;;  %v7416_v40 = vpop.f32.mrb[7].mxu0  ;;  %v4379_v24 = vmul.f32 0.35355338, %v11961_v11 }
 0x570   : > { %4465 = vrot.lane.b32.xlu0 %v11961_v11, %s7830_s4  ;;  %4463 = vrot.lane.b32.xlu1 %v11961_v11, %s7831_s22 }
 0x574   : > { %4381 = vrot.lane.b32.xlu0 %v4379_v24, %s7829_s0 }
 0x5de   : > { %v11973_v42 = vpop.permute.xlu0 %4461  ;;  %v11975_v13 = vpop.permute.xlu1 %4459 }
 0x5df   : > { %4467 = vrot.lane.b32.xlu1 %v11975_v13, %s7830_s4  ;;  %4469 = vrot.lane.b32.xlu0 %v11973_v42, %s7830_s4 }
 0x5e2   : > { %v11981_v48 = vpop.permute.xlu1 %4463  ;;  %v4466_v52 = vpop.permute.xlu0 %4465 }
 0x5e3   : > { %4471 = vrot.lane.b32.xlu1 %v11981_v48, %s7830_s4  ;;  %4387 = vrot.lane.b32.xlu0 %v4379_v24, %s7831_s22 }
 0x5e6   : > { %v4382_v31 = vpop.permute.xlu0 %4381 }
 0x5e7   : > { %4384 = vrot.lane.b32.xlu1 %v4379_v24, %s7828_s20 }
 0x651   : > { %v4468_v63 = vpop.permute.xlu1 %4467  ;;  %v4470_v7 = vpop.permute.xlu0 %4469 }
 0x652   : > { %v4477_v45 = vcombine.low %v4466_v52, %v4470_v7 }
 0x654   : > { %v4484_v53 = vrot.slane %v4477_v45, %v11916_v22 }
 0x655   : > { %v4472_v20 = vpop.permute.xlu1 %4471  ;;  %v4388_v25 = vpop.permute.xlu0 %4387 }
 0x656   : > { %v4485_v62 = vcombine.low %v4468_v63, %v4472_v20  ;;  %v4398_v0 = vcombine.low %v4382_v31, %v4388_v25 }
 0x658   : > { %v4492_v17 = vrot.slane %v4485_v62, %v11916_v22  ;;  %v4405_v32 = vrot.slane %v4398_v0, %v11916_v22 }
 0x659   : > { %v4385_v59 = vpop.permute.xlu1 %4384 }
 0x65a   : > { %v4493_v55 = vcombine.low %v4484_v53, %v4492_v17  ;;  %v4494_v51 = vcombine.high %v4484_v53, %v4492_v17  ;;  %v4390_v61 = vcombine.low %v4379_v24, %v4385_v59 }
 0x65c   : > { %v4501_v58 = vrot.slane %v4493_v55, %v11920_v9  ;;  %v4508_v6 = vrot.slane %v4494_v51, %v11920_v9  ;;  %v4397_v2 = vrot.slane %v4390_v61, %v11916_v22 }
 0x65e   : > { %v4511_v46 = vcombine.low %v4501_v58, %v4508_v6  ;;  %v7231_v30 = vcombine.high %v4501_v58, %v4508_v6  ;;  %v4406_v27 = vcombine.low %v4397_v2, %v4405_v32  ;;  %v4407_v35 = vcombine.high %v4397_v2, %v4405_v32 }
 0x660   : > { %v4414_v34 = vrot.slane %v4406_v27, %v11920_v9  ;;  %v4421_v1 = vrot.slane %v4407_v35, %v11920_v9  ;;  %v4518_v28 = vrot.slane %v4511_v46, %v11916_v22  ;;  %v4526_v47 = vrot.slane %v7231_v30, %v11916_v22 }
 0x662   : > { %v4424_v44 = vcombine.low %v4414_v34, %v4421_v1  ;;  %v7230_v36 = vcombine.high %v4414_v34, %v4421_v1  ;;  %v4527_v4 = vcombine.low %v4518_v28, %v4526_v47  ;;  %v4528_v8 = vcombine.high %v4518_v28, %v4526_v47 }
 0x664   : > { %v4431_v43 = vrot.slane %v4424_v44, %v11916_v22  ;;  %v4439_v38 = vrot.slane %v7230_v36, %v11916_v22  ;;  %v4535_v41 = vrot.slane %v4527_v4, %v11920_v9  ;;  %v4542_v37 = vrot.slane %v4528_v8, %v11920_v9 }
 0x666   : > { %v4441_v29 = vcombine.high %v4431_v43, %v4439_v38  ;;  %v4543_v50 = vcombine.high %v4535_v41, %v7821_v16  ;;  %7418 = vmatpush3.xpose.msk.msra.mxu1 %vm4247_vm4, %v4535_v41  ;;  %v4440_v18 = vcombine.low %v4431_v43, %v4439_v38  ;;  %v4544_v12 = vcombine.high %v4542_v37, %v7821_v16 }
 0x667   : > { %7427 = vmatprep.subr.mxu1 %v7821_v16 }
 0x668   : > { %7423 = vmatpush3.xpose.msk.msra.mxu0 %vm4247_vm4, %v4543_v50  ;;  %v4448_v60 = vrot.slane %v4440_v18, %v11920_v9  ;;  %v4455_v21 = vrot.slane %v4441_v29, %v11920_v9 }
 0x669   : > { %7432 = vmatprep.subr.mxu0 %v7821_v16 }
 0x66a   : > { %v4456_v3 = vcombine.high %v4448_v60, %v7821_v16  ;;  %7420 = vmatmul.mubr.msk.f32.vlgmr.msra.gmra.mrb[0].mxu1 %vm4247_vm4, %v4448_v60  ;;  %v4457_v57 = vcombine.high %v4455_v21, %v7821_v16 }
 0x66b   : > { %7428 = vmatpush3.xpose.msk.msra.mxu1 %vm4247_vm4, %v4542_v37  ;;  %7429 = vmatprep.mubr.msk.f32.mxu1 %vm7824_vm2, %v7821_v16 }
 0x66c   : > { %7425 = vmatmul.mubr.msk.f32.vlgmr.msra.gmra.mrb[8].mxu0 %vm4247_vm4, %v4456_v3  ;;  %7437 = vmatprep.subr.mxu1 %v7821_v16 }
 0x66d   : > { %7433 = vmatpush3.xpose.msk.msra.mxu0 %vm4247_vm4, %v4544_v12  ;;  %7434 = vmatprep.mubr.msk.f32.mxu0 %vm7824_vm2, %v7821_v16 }
 0x66e   : > { %7430 = vmatmul.mubr.msk.f32.vlgmr.msra.gmra.mrb[2].mxu1 %vm4247_vm4, %v4455_v21  ;;  %7442 = vmatprep.subr.mxu0 %v7821_v16 }
 0x66f   : > { %7439 = vmatprep.mubr.msk.f32.mxu1 %vm7824_vm2, %v7821_v16 }
 0x670   : > { %7435 = vmatmul.mubr.msk.f32.vlgmr.msra.gmra.mrb[10].mxu0 %vm4247_vm4, %v4457_v57 }
 0x671   : > { %7444 = vmatprep.mubr.msk.f32.mxu0 %vm7824_vm2, %v7821_v16 }
 0x73d   : > { %v4697_v14 = vpop.f32.mrb[0].mxu1 }
 0x73e   : > { %v7421_v33 = vpop.f32.mrb[1].mxu1  ;;  %v4930_v19 = vsel %vm4929_vm8, %v4697_v14, -inf }
 0x73f   : > { %4931 = vmax.xlane.f32.xlu1 %v4930_v19  ;;  %v4773_v15 = vpop.f32.mrb[8].mxu0 }
 0x740   : > { %v7426_v49 = vpop.f32.mrb[9].mxu0  ;;  %v4933_v10 = vsel %vm4929_vm8, %v4773_v15, -inf }
 0x741   : > { %v4849_v5 = vpop.f32.mrb[2].mxu1  ;;  %4934 = vmax.xlane.f32.xlu0 %v4933_v10 }
 0x742   : > { %v7431_v23 = vpop.f32.mrb[3].mxu1  ;;  %v4936_v56 = vsel %vm4929_vm8, %v4849_v5, -inf }
 0x743   : > { %v4925_v54 = vpop.f32.mrb[10].mxu0 }
 0x744   : > { %v7436_v39 = vpop.f32.mrb[11].mxu0  ;;  %v4939_v40 = vsel %vm4929_vm8, %v4925_v54, -inf }
 0x745   : > { %4937 = vmax.xlane.f32.xlu0 %v4936_v56  ;;  %4940 = vmax.xlane.f32.xlu1 %v4939_v40 }
 0x756   : > { %4547 = vrot.lane.b32.xlu1 %v11975_v13, %s7832_s30 }
 0x75b   : > { %4545 = vrot.lane.b32.xlu0 %v11961_v11, %s7832_s30 }
 0x7cc   : > { %v4932_v24 = vpop.xlane.xlu1 %4931 }
 0x7cd   : > { %v4942_v52 = vsub.f32 %v4697_v14, %v4932_v24 }
 0x7ce   : > { %v4935_v31 = vpop.xlane.xlu0 %4934 }
 0x7cf   : > { %v4946_v63 = vmul.f32 1.442695, %v4942_v52  ;;  %v4943_v7 = vsub.f32 %v4773_v15, %v4935_v31 }
 0x7d1   : > { %7639 = vpow2.f32 %v4946_v63  ;;  %v4948_v45 = vmul.f32 1.442695, %v4943_v7 }
 0x7d2   : > { %v4938_v20 = vpop.xlane.xlu0 %4937  ;;  %v4941_v25 = vpop.xlane.xlu1 %4940 }
 0x7d3   : > { %7641 = vpow2.f32 %v4948_v45  ;;  %v4944_v62 = vsub.f32 %v4849_v5, %v4938_v20  ;;  %v4945_v53 = vsub.f32 %v4925_v54, %v4941_v25 }
 0x7d5   : > { %v4950_v17 = vmul.f32 1.442695, %v4944_v62  ;;  %v4952_v0 = vmul.f32 1.442695, %v4945_v53  ;;  %v7621_v62 = vld [vmem:[%s12383_s9] sm:$0xff]  }
 0x7d6   : > { %v4546_v32 = vpop.permute.xlu0 %4545  ;;  %v4548_v2 = vpop.permute.xlu1 %4547 }
 0x7d7   : > { %7643 = vpow2.f32 %v4950_v17 }
 0x7d8   : > { %7645 = vpow2.f32 %v4952_v0 }
 0x7db   : > { %v7640_v13 = vpop.eup %7639 }
 0x7dc   : > { %v4954_v59 = vsel %vm4929_vm8, %v7640_v13, 0.0 }
 0x7dd   : > { %v7642_v11 = vpop.eup %7641  ;;  %4955 = vadd.xlane.f32.xlu0 %v4954_v59 }
 0x7de   : > { %v4957_v55 = vsel %vm4929_vm8, %v7642_v11, 0.0 }
 0x7df   : > { %4958 = vadd.xlane.f32.xlu1 %v4957_v55  ;;  %v7622_v55 = vld [vmem:[%s12383_s9 + $0x8] sm:$0xff]  }
 0x7e1   : > { %v7644_v51 = vpop.eup %7643 }
 0x7e2   : > { %v7646_v61 = vpop.eup %7645  ;;  %v4960_v58 = vsel %vm4929_vm8, %v7644_v51, 0.0 }
 0x7e3   : > { %4961 = vadd.xlane.f32.xlu0 %v4960_v58  ;;  %v4963_v6 = vsel %vm4929_vm8, %v7646_v61, 0.0 }
 0x7e4   : > { %4964 = vadd.xlane.f32.xlu1 %v4963_v6 }
 0x7f5   : > { %4549 = vrot.lane.b32.xlu1 %v11973_v42, %s7832_s30 }
 0x7f9   : > { %4551 = vrot.lane.b32.xlu0 %v11981_v48, %s7832_s30 }
 0x86a   : > { %v4956_v46 = vpop.xlane.xlu0 %4955 }
 0x86b   : > { %7647 = vrcp.f32 %v4956_v46 }
 0x86c   : > { %v4959_v30 = vpop.xlane.xlu1 %4958 }
 0x86d   : > { %7649 = vrcp.f32 %v4959_v30 }
 0x870   : > { %v4962_v27 = vpop.xlane.xlu0 %4961 }
 0x871   : > { %v4965_v35 = vpop.xlane.xlu1 %4964  ;;  %7651 = vrcp.f32 %v4962_v27 }
 0x872   : > { %7653 = vrcp.f32 %v4965_v35 }
 0x874   : > { %v4552_v34 = vpop.permute.xlu0 %4551 }
 0x875   : > { %v4565_v1 = vcombine.low %v4548_v2, %v4552_v34  ;;  %v4550_v28 = vpop.permute.xlu1 %4549  ;;  %v7648_v50 = vpop.eup %7647 }
 0x876   : > { %v4557_v47 = vcombine.low %v4546_v32, %v4550_v28  ;;  %v4970_v12 = vmul.f32 %v7648_v50, %v7640_v13 }
 0x877   : > { %v4572_v44 = vrot.slane %v4565_v1, %v11916_v22  ;;  %v7650_v60 = vpop.eup %7649 }
 0x878   : > { %v4564_v36 = vrot.slane %v4557_v47, %v11916_v22  ;;  %v4971_v33 = vmul.f32 %v7650_v60, %v7642_v11  ;;  %v7250_v47 = vld [vmem:[%s12384_s10] ss:$0 sm:$0xff] }
 0x879   : > { %v7625_v60 = vld [vmem:[%s12389_s15] sm:$0xff]  }
 0x87a   : > { %v4573_v42 = vcombine.low %v4564_v36, %v4572_v44  ;;  %v4574_v4 = vcombine.high %v4564_v36, %v4572_v44 }
 0x87b   : > { %v7652_v57 = vpop.eup %7651 }
 0x87c   : > { %v4581_v48 = vrot.slane %v4573_v42, %v11920_v9  ;;  %v4588_v8 = vrot.slane %v4574_v4, %v11920_v9  ;;  %v7654_v19 = vpop.eup %7653  ;;  %v4972_v49 = vmul.f32 %v7652_v57, %v7644_v51 }
 0x87d   : > { %v4973_v10 = vmul.f32 %v7654_v19, %v7646_v61 }
 0x87e   : > { %v4591_v43 = vcombine.low %v4581_v48, %v4588_v8  ;;  %v7232_v38 = vcombine.high %v4581_v48, %v4588_v8 }
 0x880   : > { %v4598_v41 = vrot.slane %v4591_v43, %v11916_v22  ;;  %v4606_v29 = vrot.slane %v7232_v38, %v11916_v22 }
 0x882   : > { %v4607_v18 = vcombine.low %v4598_v41, %v4606_v29  ;;  %v4608_v37 = vcombine.high %v4598_v41, %v4606_v29 }
 0x884   : > { %v4615_v3 = vrot.slane %v4607_v18, %v11920_v9  ;;  %v4622_v21 = vrot.slane %v4608_v37, %v11920_v9  ;;  %v7623_v37 = vld [vmem:[%s12387_s13] sm:$0xff]  }
 0x886   : > { %7438 = vmatpush3.msk.msra.mxu1 %vm4977_vm9, %v4615_v3  ;;  %v4623_v14 = vcombine.high %v4615_v3, %v7821_v16  ;;  %v4624_v15 = vcombine.high %v4622_v21, %v7821_v16  ;;  %v7626_v3 = vld [vmem:[%s12389_s15 + $0x8] sm:$0xff]  }
 0x887   : > { %7440 = vmatmul.mubr.msk.f32.vlgmr.msra.gmra.mrb[4].mxu1 %vm4245_vm3, %v4970_v12  ;;  %7447 = vmatprep.subr.mxu1 %v7821_v16 }
 0x888   : > { %7443 = vmatpush3.msk.msra.mxu0 %vm4977_vm9, %v4623_v14  ;;  %7448 = vmatpush3.msk.msra.mxu1 %vm4977_vm9, %v4622_v21 }
 0x889   : > { %7445 = vmatmul.mubr.msk.f32.vlgmr.msra.gmra.mrb[12].mxu0 %vm4245_vm3, %v4971_v33  ;;  %7452 = vmatprep.subr.mxu0 %v7821_v16  ;;  %v7254_v33 = vld [vmem:[%s12385_s11] ss:$0 sm:$0xff] }
 0x88a   : > { %7449 = vmatprep.mubr.msk.f32.mxu1 %vm7824_vm2, %v7821_v16  ;;  %7453 = vmatpush3.msk.msra.mxu0 %vm4977_vm9, %v4624_v15  ;;  %v7255_v15 = vld [vmem:[%s12386_s12] ss:$0 sm:$0xff] }
 0x88b   : > { %7450 = vmatmul.mubr.msk.f32.vlgmr.msra.gmra.mrb[6].mxu1 %vm4245_vm3, %v4972_v49  ;;  %7454 = vmatprep.mubr.msk.f32.mxu0 %vm7824_vm2, %v7821_v16 }
 0x88c   : > { %7457 = vmatprep.subr.bf16.mxu1 %v7821_v16  ;;  %7461 = vmatprep.mubr.msk.bf16.mxu1 %vm7824_vm2, %v7821_v16 }
 0x88d   : > { %7455 = vmatmul.mubr.msk.f32.vlgmr.msra.gmra.mrb[14].mxu0 %vm4245_vm3, %v4973_v10  ;;  %7465 = vmatprep.subr.bf16.mxu0 %v7821_v16 }
 0x88e   : > { %7469 = vmatprep.mubr.msk.bf16.mxu0 %vm7824_vm2, %v7821_v16  ;;  %7458 = vmatpush3.bf16.msra.mxu1 %v7621_v62 }
 0x88f   : > { %7459 = vmatprep.subr.bf16.mxu1 %v7821_v16  ;;  %7466 = vmatpush3.bf16.msra.mxu0 %v7623_v37 }
 0x890   : > { %7467 = vmatprep.subr.bf16.mxu0 %v7821_v16 }
 0x892   : > { %7460 = vmatpush3.bf16.msra.mxu1 %v7622_v55 }
 0x893   : > { %7473 = vmatprep.subr.bf16.mxu1 %v7821_v16 }
 0x95a   : > { %v5047_v5 = vpop.f32.mrb[4].mxu1 }
 0x95b   : > { %v7441_v23 = vpop.f32.mrb[5].mxu1 }
 0x95c   : > { %v5123_v54 = vpop.f32.mrb[12].mxu0  ;;  %v7627_v23 = vld [vmem:[%s12389_s15 + $0x10] sm:$0xff]  }
 0x95d   : > { %v7446_v39 = vpop.f32.mrb[13].mxu0 }
 0x95e   : > { %v5199_v56 = vpop.f32.mrb[6].mxu1  ;;  %v7256_v39 = vld [vmem:[%s12388_s14] ss:$0 sm:$0xff] }
 0x95f   : > { %v5279_v40 = vcombine.low %v5047_v5, %v5199_v56  ;;  %v7451_v24 = vpop.f32.mrb[7].mxu1 }
 0x960   : > { %v5275_v52 = vpop.f32.mrb[14].mxu0 }
 0x961   : > { %v5287_v31 = vcombine.low %v5123_v54, %v5275_v52  ;;  %v7456_v63 = vpop.f32.mrb[15].mxu0  ;;  %v5286_v7 = vrot.slane %v5279_v40, %v11916_v22  ;;  %v7628_v54 = vld [vmem:[%s12389_s15 + $0x18] sm:$0xff]  }
 0x963   : > { %v5294_v45 = vrot.slane %v5287_v31, %v11916_v22 }
 0x965   : > { %v5295_v20 = vcombine.low %v5286_v7, %v5294_v45  ;;  %v5296_v25 = vcombine.high %v5286_v7, %v5294_v45  ;;  %v7260_v45 = vld [vmem:[%s12390_s16] ss:$0 sm:$0xff] }
 0x967   : > { %v5303_v53 = vrot.slane %v5295_v20, %v11920_v9  ;;  %v5310_v17 = vrot.slane %v5296_v25, %v11920_v9 }
 0x969   : > { %v5313_v0 = vcombine.low %v5303_v53, %v5310_v17  ;;  %v7249_v13 = vcombine.high %v5303_v53, %v5310_v17 }
 0x96b   : > { %v5320_v59 = vrot.slane %v5313_v0, %v11916_v22  ;;  %v5328_v11 = vrot.slane %v7249_v13, %v11916_v22 }
 0x96d   : > { %v5330_v51 = vcombine.high %v5320_v59, %v5328_v11  ;;  %v5329_v61 = vcombine.low %v5320_v59, %v5328_v11 }
 0x96f   : > { %v5344_v58 = vrot.slane %v5330_v51, %v11920_v9  ;;  %v5337_v6 = vrot.slane %v5329_v61, %v11920_v9 }
 0x971   : > { %5352 = vrot.lane.b32.xlu0 %v5344_v58, %s7833_s3  ;;  %v5345_v32 = vcombine.high %v5337_v6, %v7821_v16  ;;  %v5346_v2 = vcombine.high %v5344_v58, %v7821_v16  ;;  %v7629_v58 = vld [vmem:[%s12381_s7 + $0x10] sm:$0xff]  }
 0x973   : > { %5348 = vrot.lane.b32.xlu1 %v5345_v32, %s12681_s27 }
 0x977   : > { %5356 = vrot.lane.b32.xlu1 %v5346_v2, %s12680_s2 }
 0x9e3   : > { %v5353_v27 = vpop.permute.xlu0 %5352 }
 0x9e5   : > { %v5349_v46 = vpop.permute.xlu1 %5348 }
 0x9e6   : > { %v5359_v30 = vsel %vm4247_vm4, %v5337_v6, %v5349_v46  ;;  %v7630_v6 = vld [vmem:[%s12381_s7 + $0x18] sm:$0xff]  }
 0x9e7   : > { %v5360_v35 = vsel %vm4267_vm6, %v5359_v30, %v5353_v27  ;;  %v7266_v27 = vld [vmem:[%s12391_s17] ss:$0 sm:$0xff] }
 0x9e9   : > { %v5357_v34 = vpop.permute.xlu1 %5356 }
 0x9ea   : > { %v5362_v1 = vsel %vm5361_vm10, %v5360_v35, %v5357_v34  ;;  %v7267_v34 = vld [vmem:[%s12392_s18] ss:$0 sm:$0xff] }
 0x9eb   : > { %v5367_v28 = vpack.c.bf16 %v5362_v1, %v5362_v1 }
 0x9ed   : > { %7462 = vmatmul.mubr.msk.bf16.vlgmr.msra.gmra.mrb[8].mxu1 %vm4335_vm7, %v5367_v28 }
 0x9ee   : > { %7481 = vmatprep.mubr.msk.bf16.mxu1 %vm7824_vm2, %v7821_v16  ;;  %7474 = vmatpush3.bf16.msra.mxu1 %v7625_v60 }
 0x9ef   : > { %7475 = vmatprep.subr.bf16.mxu1 %v7821_v16 }
 0x9f2   : > { %7476 = vmatpush3.bf16.msra.mxu1 %v7626_v3 }
 0x9f3   : > { %7477 = vmatprep.subr.bf16.mxu1 %v7821_v16 }
 0x9f6   : > { %7478 = vmatpush3.bf16.msra.mxu1 %v7627_v23 }
 0x9f7   : > { %7479 = vmatprep.subr.bf16.mxu1 %v7821_v16 }
 0x9fa   : > { %7480 = vmatpush3.bf16.msra.mxu1 %v7628_v54 }
 0x9fb   : > { %7503 = vmatprep.subr.mxu1 %v7821_v16 }
 0xac0   : > { %v5424_v44 = vpop.f32.mrb[8].mxu1 }
 0xac1   : > { %v5425_v36 = vadd.f32 %v7250_v47, %v5424_v44  ;;  %v7463_v42 = vpop.f32.mrb[9].mxu1  ;;  %v7273_v44 = vld [vmem:[%s12382_s8 + $0x1] ss:$0 sm:$0xff] }
 0xac2   : > { %v5427_v4 = vpop.f32.mrb[10].mxu1 }
 0xac3   : > { %v5430_v48 = vadd.f32 %v5425_v36, %v11951_v26  ;;  %v7464_v8 = vpop.f32.mrb[11].mxu1  ;;  %v7624_v26 = vld [vmem:[%s12387_s13 + $0x8] sm:$0xff]  }
 0xac4   : > { %7468 = vmatpush3.bf16.msra.mxu0 %v7624_v26 }
 0xac5   : > { %v5434_v43 = vsel %vm5433_vm11, %v5430_v48, 0.0  ;;  %7485 = vmatprep.subr.bf16.mxu0 %v7821_v16 }
 0xac6   : > { %5435 = vadd.xlane.f32.xlu0 %v5434_v43 }
 0xb53   : > { %v5436_v38 = vpop.xlane.xlu0 %5435 }
 0xb54   : > { %v5438_v41 = vmul.f32 0.03125, %v5436_v38 }
 0xb56   : > { %v5439_v29 = vsub.f32 %v5430_v48, %v5438_v41 }
 0xb58   : > { %v5440_v50 = vmul.f32 %v5439_v29, %v5439_v29 }
 0xb5a   : > { %v5441_v18 = vsel %vm5433_vm11, %v5440_v50, 0.0 }
 0xb5b   : > { %5442 = vadd.xlane.f32.xlu1 %v5441_v18 }
 0xbe8   : > { %v5443_v21 = vpop.xlane.xlu1 %5442 }
 0xbe9   : > { %v5444_v12 = vmul.f32 0.03125, %v5443_v21 }
 0xbeb   : > { %v5445_v57 = vadd.f32 1e-05, %v5444_v12 }
 0xbed   : > { %7655 = vrsqrt.f32 %v5445_v57 }
 0xbf7   : > { %v7656_v14 = vpop.eup %7655 }
 0xbf8   : > { %v5447_v19 = vmul.f32 %v7656_v14, %v5439_v29 }
 0xbfa   : > { %v5454_v49 = vmul.f32 %v7254_v33, %v5447_v19 }
 0xbfc   : > { %v5461_v10 = vadd.f32 %v7255_v15, %v5454_v49 }
 0xbfe   : > { %v5466_v5 = vpack.c.bf16 %v5461_v10, %v5461_v10 }
 0xc00   : > { %7470 = vmatmul.mubr.msk.bf16.vlgmr.msra.gmra.mrb[16].mxu0 %vm4335_vm7, %v5466_v5 }
 0xc01   : > { %7489 = vmatprep.mubr.msk.bf16.mxu0 %vm7824_vm2, %v7821_v16  ;;  %7486 = vmatpush3.bf16.msra.mxu0 %v7629_v58 }
 0xc02   : > { %7487 = vmatprep.subr.bf16.mxu0 %v7821_v16 }
 0xc05   : > { %7488 = vmatpush3.bf16.msra.mxu0 %v7630_v6 }
 0xc06   : > { %7493 = vmatprep.subr.mxu0 %v7821_v16 }
 0xcd3   : > { %v5523_v56 = vpop.f32.mrb[16].mxu0 }
 0xcd4   : > { %v5524_v40 = vadd.f32 %v7256_v39, %v5523_v56  ;;  %v7471_v24 = vpop.f32.mrb[17].mxu0 }
 0xcd5   : > { %v5526_v52 = vpop.f32.mrb[18].mxu0 }
 0xcd6   : > { %v5529_v31 = vmax.f32 %v5524_v40, 0.0  ;;  %v7472_v63 = vpop.f32.mrb[19].mxu0 }
 0xcd8   : > { %v5538_v7 = vpack.c.bf16 %v5529_v31, %v5529_v31 }
 0xcda   : > { %7482 = vmatmul.mubr.msk.bf16.vlgmr.msra.gmra.mrb[12].mxu1 %vm5570_vm12, %v5538_v7 }
 0xcdb   : > { %7505 = vmatprep.mubr.msk.f32.mxu1 %vm7824_vm2, %v7821_v16 }
 0xdad   : > { %v5608_v20 = vpop.f32.mrb[12].mxu1 }
 0xdae   : > { %v5609_v25 = vadd.f32 %v7260_v45, %v5608_v20  ;;  %v7483_v62 = vpop.f32.mrb[13].mxu1 }
 0xdaf   : > { %v5611_v53 = vpop.f32.mrb[14].mxu1 }
 0xdb0   : > { %v5614_v17 = vadd.f32 %v5609_v25, %v5461_v10  ;;  %v7484_v0 = vpop.f32.mrb[15].mxu1 }
 0xdb2   : > { %v5617_v13 = vsel %vm5433_vm11, %v5614_v17, 0.0 }
 0xdb3   : > { %5618 = vadd.xlane.f32.xlu0 %v5617_v13 }
 0xe40   : > { %v5619_v59 = vpop.xlane.xlu0 %5618 }
 0xe41   : > { %v5620_v11 = vmul.f32 0.03125, %v5619_v59 }
 0xe43   : > { %v5621_v55 = vsub.f32 %v5614_v17, %v5620_v11 }
 0xe45   : > { %v5622_v51 = vmul.f32 %v5621_v55, %v5621_v55 }
 0xe47   : > { %v5623_v61 = vsel %vm5433_vm11, %v5622_v51, 0.0 }
 0xe48   : > { %5624 = vadd.xlane.f32.xlu0 %v5623_v61 }
 0xed5   : > { %v5625_v32 = vpop.xlane.xlu0 %5624 }
 0xed6   : > { %v5626_v2 = vmul.f32 0.03125, %v5625_v32 }
 0xed8   : > { %v5627_v46 = vadd.f32 1e-05, %v5626_v2 }
 0xeda   : > { %7657 = vrsqrt.f32 %v5627_v46 }
 0xee4   : > { %v7658_v30 = vpop.eup %7657 }
 0xee5   : > { %v5629_v35 = vmul.f32 %v7658_v30, %v5621_v55 }
 0xee7   : > { %v5636_v1 = vmul.f32 %v7266_v27, %v5629_v35 }
 0xee9   : > { %v12164_v28 = vadd.f32 %v7267_v34, %v5636_v1 }
 0xeeb   : > { %v5649_v47 = vpack.c.bf16 %v12164_v28, %v12164_v28 }
 0xeed   : > { %7490 = vmatmul.mubr.msk.bf16.vlgmr.msra.gmra.mrb[20].mxu0 %vm4335_vm7, %v5649_v47 }
 0xeee   : > { %7495 = vmatprep.mubr.msk.f32.mxu0 %vm7824_vm2, %v7821_v16 }
 0xfc0   : > { %v5707_v36 = vpop.f32.mrb[20].mxu0 }
 0xfc1   : > { %v12174_v42 = vadd.f32 %v7273_v44, %v5707_v36  ;;  %v7491_v4 = vpop.f32.mrb[21].mxu0 }
 0xfc2   : > { %v5710_v48 = vpop.f32.mrb[22].mxu0 }
 0xfc3   : > { %5795 = vrot.lane.b32.xlu0 %v12174_v42, %s7828_s20  ;;  %5793 = vrot.lane.b32.xlu1 %v12174_v42, %s7829_s0  ;;  %v7492_v8 = vpop.f32.mrb[23].mxu0  ;;  %v5713_v43 = vmul.f32 0.35355338, %v12174_v42 }
 0xfc7   : > { %5797 = vrot.lane.b32.xlu1 %v12174_v42, %s7831_s22 }
 0xfcb   : > { %5799 = vrot.lane.b32.xlu1 %v12174_v42, %s7830_s4 }
 0xfcf   : > { %5715 = vrot.lane.b32.xlu1 %v5713_v43, %s7829_s0 }
0x1035   : > { %v12186_v38 = vpop.permute.xlu0 %5795  ;;  %v12188_v41 = vpop.permute.xlu1 %5793 }
0x1036   : > { %5801 = vrot.lane.b32.xlu0 %v12188_v41, %s7830_s4  ;;  %5803 = vrot.lane.b32.xlu1 %v12186_v38, %s7830_s4 }
0x1039   : > { %v12194_v29 = vpop.permute.xlu1 %5797 }
0x103a   : > { %5805 = vrot.lane.b32.xlu0 %v12194_v29, %s7830_s4  ;;  %5721 = vrot.lane.b32.xlu1 %v5713_v43, %s7831_s22 }
0x103d   : > { %v5800_v50 = vpop.permute.xlu1 %5799 }
0x103e   : > { %5718 = vrot.lane.b32.xlu0 %v5713_v43, %s7828_s20 }
0x1041   : > { %v5716_v18 = vpop.permute.xlu1 %5715 }
0x10a8   : > { %v5802_v37 = vpop.permute.xlu0 %5801  ;;  %v5804_v26 = vpop.permute.xlu1 %5803 }
0x10a9   : > { %v5811_v60 = vcombine.low %v5800_v50, %v5804_v26 }
0x10ab   : > { %v5818_v57 = vrot.slane %v5811_v60, %v11916_v22 }
0x10ac   : > { %v5806_v3 = vpop.permute.xlu0 %5805  ;;  %v5722_v21 = vpop.permute.xlu1 %5721 }
0x10ad   : > { %v5819_v12 = vcombine.low %v5802_v37, %v5806_v3  ;;  %v5732_v33 = vcombine.low %v5716_v18, %v5722_v21 }
0x10af   : > { %v5826_v14 = vrot.slane %v5819_v12, %v11916_v22  ;;  %v5739_v54 = vrot.slane %v5732_v33, %v11916_v22 }
0x10b0   : > { %v5719_v19 = vpop.permute.xlu0 %5718 }
0x10b1   : > { %v5827_v15 = vcombine.low %v5818_v57, %v5826_v14  ;;  %v5828_v49 = vcombine.high %v5818_v57, %v5826_v14  ;;  %v5724_v10 = vcombine.low %v5713_v43, %v5719_v19 }
0x10b3   : > { %v5835_v5 = vrot.slane %v5827_v15, %v11920_v9  ;;  %v5842_v23 = vrot.slane %v5828_v49, %v11920_v9  ;;  %v5731_v39 = vrot.slane %v5724_v10, %v11916_v22 }
0x10b5   : > { %v5845_v56 = vcombine.low %v5835_v5, %v5842_v23  ;;  %v7278_v40 = vcombine.high %v5835_v5, %v5842_v23  ;;  %v5740_v24 = vcombine.low %v5731_v39, %v5739_v54  ;;  %v5741_v52 = vcombine.high %v5731_v39, %v5739_v54 }
0x10b7   : > { %v5852_v31 = vrot.slane %v5845_v56, %v11916_v22  ;;  %v5860_v63 = vrot.slane %v7278_v40, %v11916_v22  ;;  %v5748_v7 = vrot.slane %v5740_v24, %v11920_v9  ;;  %v5755_v45 = vrot.slane %v5741_v52, %v11920_v9 }
0x10b9   : > { %v5861_v20 = vcombine.low %v5852_v31, %v5860_v63  ;;  %v5862_v25 = vcombine.high %v5852_v31, %v5860_v63  ;;  %v5758_v62 = vcombine.low %v5748_v7, %v5755_v45  ;;  %v7277_v53 = vcombine.high %v5748_v7, %v5755_v45 }
0x10bb   : > { %v5765_v17 = vrot.slane %v5758_v62, %v11916_v22  ;;  %v5773_v0 = vrot.slane %v7277_v53, %v11916_v22  ;;  %v5869_v13 = vrot.slane %v5861_v20, %v11920_v9  ;;  %v5876_v59 = vrot.slane %v5862_v25, %v11920_v9 }
0x10bd   : > { %v5774_v11 = vcombine.low %v5765_v17, %v5773_v0  ;;  %v5775_v55 = vcombine.high %v5765_v17, %v5773_v0  ;;  %7494 = vmatpush3.xpose.msk.msra.mxu0 %vm4247_vm4, %v5869_v13  ;;  %7504 = vmatpush3.xpose.msk.msra.mxu1 %vm4247_vm4, %v5876_v59  ;;  %v5877_v58 = vcombine.high %v5869_v13, %v7821_v16 }
0x10be   : > { %7498 = vmatprep.subr.mxu0 %v7821_v16  ;;  %7513 = vmatprep.subr.mxu1 %v7821_v16  ;;  %v5878_v32 = vcombine.high %v5876_v59, %v7821_v16 }
0x10bf   : > { %v5782_v51 = vrot.slane %v5774_v11, %v11920_v9  ;;  %v5789_v61 = vrot.slane %v5775_v55, %v11920_v9 }
0x10c1   : > { %7496 = vmatmul.mubr.msk.f32.vlgmr.msra.gmra.mrb[24].mxu0 %vm4247_vm4, %v5782_v51  ;;  %7506 = vmatmul.mubr.msk.f32.vlgmr.msra.gmra.mrb[16].mxu1 %vm4247_vm4, %v5789_v61  ;;  %v5790_v6 = vcombine.high %v5782_v51, %v7821_v16  ;;  %v5791_v2 = vcombine.high %v5789_v61, %v7821_v16 }
0x10c2   : > { %7499 = vmatpush3.xpose.msk.msra.mxu0 %vm4247_vm4, %v5877_v58  ;;  %7500 = vmatprep.mubr.msk.f32.mxu0 %vm7824_vm2, %v7821_v16 }
0x10c3   : > { %7508 = vmatprep.subr.mxu0 %v7821_v16  ;;  %7515 = vmatprep.mubr.msk.f32.mxu1 %vm7824_vm2, %v7821_v16 }
0x10c5   : > { %7501 = vmatmul.mubr.msk.f32.vlgmr.msra.gmra.mrb[26].mxu0 %vm4247_vm4, %v5790_v6 }
0x10c6   : > { %7509 = vmatpush3.xpose.msk.msra.mxu0 %vm4247_vm4, %v5878_v32  ;;  %7510 = vmatprep.mubr.msk.f32.mxu0 %vm7824_vm2, %v7821_v16 }
0x10c7   : > { %7518 = vmatprep.subr.mxu0 %v7821_v16 }
0x10c9   : > { %7511 = vmatmul.mubr.msk.f32.vlgmr.msra.gmra.mrb[28].mxu0 %vm4247_vm4, %v5791_v2 }
0x10ca   : > { %7520 = vmatprep.mubr.msk.f32.mxu0 %vm7824_vm2, %v7821_v16 }
0x1194   : > { %v6031_v46 = vpop.f32.mrb[24].mxu0  ;;  %v6183_v30 = vpop.f32.mrb[16].mxu1 }
0x1195   : > { %v7497_v27 = vpop.f32.mrb[25].mxu0  ;;  %v7507_v35 = vpop.f32.mrb[17].mxu1  ;;  %v6263_v34 = vsel %vm4929_vm8, %v6031_v46, -inf  ;;  %v6269_v44 = vsel %vm4929_vm8, %v6183_v30, -inf }
0x1196   : > { %6264 = vmax.xlane.f32.xlu0 %v6263_v34 }
0x1198   : > { %v6107_v1 = vpop.f32.mrb[26].mxu0 }
0x1199   : > { %v7502_v47 = vpop.f32.mrb[27].mxu0  ;;  %v6266_v36 = vsel %vm4929_vm8, %v6107_v1, -inf }
0x119a   : > { %6270 = vmax.xlane.f32.xlu0 %v6269_v44  ;;  %6267 = vmax.xlane.f32.xlu1 %v6266_v36 }
0x119c   : > { %v6259_v4 = vpop.f32.mrb[28].mxu0 }
0x119d   : > { %v7512_v48 = vpop.f32.mrb[29].mxu0  ;;  %v6272_v8 = vsel %vm4929_vm8, %v6259_v4, -inf }
0x119e   : > { %6273 = vmax.xlane.f32.xlu0 %v6272_v8 }
0x11ab   : > { %5879 = vrot.lane.b32.xlu1 %v12174_v42, %s7832_s30 }
0x1223   : > { %v6265_v43 = vpop.xlane.xlu0 %6264 }
0x1224   : > { %v6275_v50 = vsub.f32 %v6031_v46, %v6265_v43 }
0x1226   : > { %v6279_v18 = vmul.f32 1.442695, %v6275_v50 }
0x1227   : > { %v6271_v37 = vpop.xlane.xlu0 %6270  ;;  %v6268_v26 = vpop.xlane.xlu1 %6267 }
0x1228   : > { %7659 = vpow2.f32 %v6279_v18  ;;  %v6277_v60 = vsub.f32 %v6183_v30, %v6271_v37  ;;  %v6276_v3 = vsub.f32 %v6107_v1, %v6268_v26 }
0x122a   : > { %v6283_v21 = vmul.f32 1.442695, %v6277_v60  ;;  %v6281_v12 = vmul.f32 1.442695, %v6276_v3 }
0x122b   : > { %v6274_v57 = vpop.xlane.xlu0 %6273  ;;  %v5880_v39 = vpop.permute.xlu1 %5879 }
0x122c   : > { %7661 = vpow2.f32 %v6283_v21  ;;  %v6278_v14 = vsub.f32 %v6259_v4, %v6274_v57 }
0x122d   : > { %7663 = vpow2.f32 %v6281_v12  ;;  %v7631_v12 = vld [vmem:[%s12383_s9 + $0x10] sm:$0xff]  }
0x122e   : > { %v6285_v33 = vmul.f32 1.442695, %v6278_v14 }
0x1230   : > { %7665 = vpow2.f32 %v6285_v33 }
0x1232   : > { %v7660_v19 = vpop.eup %7659 }
0x1233   : > { %v6287_v15 = vsel %vm4929_vm8, %v7660_v19, 0.0 }
0x1234   : > { %6288 = vadd.xlane.f32.xlu1 %v6287_v15 }
0x1236   : > { %v7662_v42 = vpop.eup %7661 }
0x1237   : > { %v7664_v49 = vpop.eup %7663  ;;  %v6293_v10 = vsel %vm4929_vm8, %v7662_v42, 0.0 }
0x1238   : > { %6294 = vadd.xlane.f32.xlu1 %v6293_v10  ;;  %v6290_v5 = vsel %vm4929_vm8, %v7664_v49, 0.0 }
0x1239   : > { %6291 = vadd.xlane.f32.xlu0 %v6290_v5 }
0x123a   : > { %v7666_v23 = vpop.eup %7665 }
0x123b   : > { %v6296_v54 = vsel %vm4929_vm8, %v7666_v23, 0.0 }
0x123d   : > { %6297 = vadd.xlane.f32.xlu0 %v6296_v54 }
0x1249   : > { %5883 = vrot.lane.b32.xlu1 %v12186_v38, %s7832_s30 }
0x124d   : > { %5885 = vrot.lane.b32.xlu1 %v12194_v29, %s7832_s30 }
0x1253   : > { %5881 = vrot.lane.b32.xlu0 %v12188_v41, %s7832_s30  ;;  %s13493_s30 = smov 8  }
0x12c1   : > { %v6289_v56 = vpop.xlane.xlu1 %6288 }
0x12c2   : > { %7667 = vrcp.f32 %v6289_v56 }
0x12c5   : > { %v6295_v40 = vpop.xlane.xlu1 %6294 }
0x12c6   : > { %v6292_v24 = vpop.xlane.xlu0 %6291 }
0x12c7   : > { %7669 = vrcp.f32 %v6292_v24 }
0x12c8   : > { %7671 = vrcp.f32 %v6295_v40 }
0x12c9   : > { %v5884_v52 = vpop.permute.xlu1 %5883 }
0x12ca   : > { %v6298_v31 = vpop.xlane.xlu0 %6297  ;;  %v5891_v63 = vcombine.low %v5880_v39, %v5884_v52 }
0x12cb   : > { %7673 = vrcp.f32 %v6298_v31 }
0x12cc   : > { %v5898_v25 = vrot.slane %v5891_v63, %v11916_v22  ;;  %v7668_v11 = vpop.eup %7667 }
0x12cd   : > { %v5886_v7 = vpop.permute.xlu1 %5885  ;;  %v6303_v32 = vmul.f32 %v7668_v11, %v7660_v19  ;;  %v7633_v11 = vld [vmem:[%s12387_s13 + $0x10] sm:$0xff]  }
0x12ce   : > { %v5882_v45 = vpop.permute.xlu0 %5881 }
0x12cf   : > { %v5899_v20 = vcombine.low %v5882_v45, %v5886_v7  ;;  %v7302_v7 = vld [vmem:[%s12384_s10 + $0x1] ss:$0 sm:$0xff] }
0x12d1   : > { %v5906_v38 = vrot.slane %v5899_v20, %v11916_v22  ;;  %v7670_v61 = vpop.eup %7669 }
0x12d2   : > { %v7672_v2 = vpop.eup %7671  ;;  %v6304_v30 = vmul.f32 %v7670_v61, %v7664_v49  ;;  %v7632_v49 = vld [vmem:[%s12383_s9 + $0x18] sm:$0xff]  }
0x12d3   : > { %v5907_v29 = vcombine.low %v5898_v25, %v5906_v38  ;;  %v5908_v62 = vcombine.high %v5898_v25, %v5906_v38  ;;  %v6305_v34 = vmul.f32 %v7672_v2, %v7662_v42  ;;  %v7308_v2 = vld [vmem:[%s12385_s11 + $0x1] ss:$0 sm:$0xff] }
0x12d5   : > { %v5915_v41 = vrot.slane %v5907_v29, %v11920_v9  ;;  %v5922_v53 = vrot.slane %v5908_v62, %v11920_v9  ;;  %v7674_v27 = vpop.eup %7673 }
0x12d6   : > { %v6306_v1 = vmul.f32 %v7674_v27, %v7666_v23 }
0x12d7   : > { %v5925_v17 = vcombine.low %v5915_v41, %v5922_v53  ;;  %v7279_v0 = vcombine.high %v5915_v41, %v5922_v53 }
0x12d9   : > { %v5932_v13 = vrot.slane %v5925_v17, %v11916_v22  ;;  %v5940_v59 = vrot.slane %v7279_v0, %v11916_v22 }
0x12db   : > { %v5941_v55 = vcombine.low %v5932_v13, %v5940_v59  ;;  %v5942_v51 = vcombine.high %v5932_v13, %v5940_v59 }
0x12dd   : > { %v5949_v58 = vrot.slane %v5941_v55, %v11920_v9  ;;  %v5956_v6 = vrot.slane %v5942_v51, %v11920_v9  ;;  %v7635_v55 = vld [vmem:[%s12389_s15 + $0x20] sm:$0xff]   ;;  %v7636_v51 = vld [vmem:[%s12389_s15 + $0x28] sm:$0xff]  }
0x12df   : > { %7514 = vmatpush3.msk.msra.mxu1 %vm4977_vm9, %v5949_v58  ;;  %v5957_v46 = vcombine.high %v5949_v58, %v7821_v16  ;;  %v5958_v35 = vcombine.high %v5956_v6, %v7821_v16 }
0x12e0   : > { %7516 = vmatmul.mubr.msk.f32.vlgmr.msra.gmra.mrb[18].mxu1 %vm4245_vm3, %v6303_v32  ;;  %7523 = vmatprep.subr.mxu1 %v7821_v16 }
0x12e1   : > { %7519 = vmatpush3.msk.msra.mxu0 %vm4977_vm9, %v5957_v46  ;;  %7524 = vmatpush3.msk.msra.mxu1 %vm4977_vm9, %v5956_v6 }
0x12e2   : > { %7521 = vmatmul.mubr.msk.f32.vlgmr.msra.gmra.mrb[30].mxu0 %vm4245_vm3, %v6304_v30  ;;  %7528 = vmatprep.subr.mxu0 %v7821_v16  ;;  %v7309_v30 = vld [vmem:[%s12386_s12 + $0x1] ss:$0 sm:$0xff] }
0x12e3   : > { %7525 = vmatprep.mubr.msk.f32.mxu1 %vm7824_vm2, %v7821_v16  ;;  %7529 = vmatpush3.msk.msra.mxu0 %vm4977_vm9, %v5958_v35 }
0x12e4   : > { %7526 = vmatmul.mubr.msk.f32.vlgmr.msra.gmra.mrb[20].mxu1 %vm4245_vm3, %v6305_v34  ;;  %7530 = vmatprep.mubr.msk.f32.mxu0 %vm7824_vm2, %v7821_v16 }
0x12e5   : > { %7533 = vmatprep.subr.bf16.mxu1 %v7821_v16  ;;  %7537 = vmatprep.mubr.msk.bf16.mxu1 %vm7824_vm2, %v7821_v16 }
0x12e6   : > { %7531 = vmatmul.mubr.msk.f32.vlgmr.msra.gmra.mrb[32].mxu0 %vm4245_vm3, %v6306_v1  ;;  %7541 = vmatprep.subr.bf16.mxu0 %v7821_v16  ;;  %v7637_v1 = vld [vmem:[%s12389_s15 + $0x30] sm:$0xff]  }
0x12e7   : > { %7545 = vmatprep.mubr.msk.bf16.mxu0 %vm7824_vm2, %v7821_v16  ;;  %7534 = vmatpush3.bf16.msra.mxu1 %v7631_v12 }
0x12e8   : > { %7535 = vmatprep.subr.bf16.mxu1 %v7821_v16  ;;  %7542 = vmatpush3.bf16.msra.mxu0 %v7633_v11 }
0x12e9   : > { %7543 = vmatprep.subr.bf16.mxu0 %v7821_v16 }
0x12eb   : > { %7536 = vmatpush3.bf16.msra.mxu1 %v7632_v49 }
0x12ec   : > { %7549 = vmatprep.subr.bf16.mxu1 %v7821_v16 }
0x13b3   : > { %v6379_v47 = vpop.f32.mrb[18].mxu1 }
0x13b4   : > { %v7517_v44 = vpop.f32.mrb[19].mxu1 }
0x13b5   : > { %v6455_v36 = vpop.f32.mrb[30].mxu0  ;;  %v7315_v44 = vld [vmem:[%s12388_s14 + $0x1] ss:$0 sm:$0xff] }
0x13b6   : > { %v7522_v4 = vpop.f32.mrb[31].mxu0 }
0x13b7   : > { %v6531_v48 = vpop.f32.mrb[20].mxu1 }
0x13b8   : > { %v6611_v8 = vcombine.low %v6379_v47, %v6531_v48  ;;  %v7527_v43 = vpop.f32.mrb[21].mxu1  ;;  %v7638_v47 = vld [vmem:[%s12389_s15 + $0x38] sm:$0xff]  }
0x13b9   : > { %v6607_v50 = vpop.f32.mrb[32].mxu0 }
0x13ba   : > { %v6619_v18 = vcombine.low %v6455_v36, %v6607_v50  ;;  %v7532_v37 = vpop.f32.mrb[33].mxu0  ;;  %v6618_v26 = vrot.slane %v6611_v8, %v11916_v22 }
0x13bb   : > { %v7328_v37 = vld [vmem:[%s12390_s16 + $0x1] ss:$0 sm:$0xff] }
0x13bc   : > { %v6626_v60 = vrot.slane %v6619_v18, %v11916_v22 }
0x13be   : > { %v6627_v3 = vcombine.low %v6618_v26, %v6626_v60  ;;  %v6628_v21 = vcombine.high %v6618_v26, %v6626_v60 }
0x13c0   : > { %v6635_v57 = vrot.slane %v6627_v3, %v11920_v9  ;;  %v6642_v14 = vrot.slane %v6628_v21, %v11920_v9 }
0x13c2   : > { %v6645_v33 = vcombine.low %v6635_v57, %v6642_v14  ;;  %v7296_v19 = vcombine.high %v6635_v57, %v6642_v14 }
0x13c4   : > { %v6652_v15 = vrot.slane %v6645_v33, %v11916_v22  ;;  %v6660_v42 = vrot.slane %v7296_v19, %v11916_v22 }
0x13c6   : > { %v6662_v10 = vcombine.high %v6652_v15, %v6660_v42  ;;  %v6661_v5 = vcombine.low %v6652_v15, %v6660_v42 }
0x13c8   : > { %v6676_v23 = vrot.slane %v6662_v10, %v11920_v9  ;;  %v6669_v54 = vrot.slane %v6661_v5, %v11920_v9 }
0x13ca   : > { %6684 = vrot.lane.b32.xlu1 %v6676_v23, %s7833_s3  ;;  %v6677_v39 = vcombine.high %v6669_v54, %v7821_v16  ;;  %v6678_v22 = vcombine.high %v6676_v23, %v7821_v16 }
0x13cc   : > { %6680 = vrot.lane.b32.xlu0 %v6677_v39, %s13493_s30 }
0x13d0   : > { %6688 = vrot.lane.b32.xlu0 %v6678_v22, %s13494_s25  ;;  %v7337_v22 = vld [vmem:[%s12392_s18 + $0x1] ss:$0 sm:$0xff] }
0x143c   : > { %v6685_v24 = vpop.permute.xlu1 %6684 }
0x143e   : > { %v6681_v56 = vpop.permute.xlu0 %6680 }
0x143f   : > { %v6691_v40 = vsel %vm4247_vm4, %v6669_v54, %v6681_v56  ;;  %v7336_v54 = vld [vmem:[%s12391_s17 + $0x1] ss:$0 sm:$0xff] }
0x1440   : > { %v6692_v52 = vsel %vm4267_vm6, %v6691_v40, %v6685_v24  ;;  %v6982_v40 = vld [vmem:[%s12393_s19] sm:$0xf] }
0x1442   : > { %v6689_v31 = vpop.permute.xlu0 %6688 }
0x1443   : > { %v6693_v63 = vsel %vm5361_vm10, %v6692_v52, %v6689_v31 }
0x1444   : > { %v6699_v9 = vpack.c.bf16 %v6693_v63, %v6693_v63 }
0x1446   : > { %7538 = vmatmul.mubr.msk.bf16.vlgmr.msra.gmra.mrb[24].mxu1 %vm4335_vm7, %v6699_v9 }
0x1447   : > { %7557 = vmatprep.mubr.msk.bf16.mxu1 %vm7824_vm2, %v7821_v16  ;;  %7550 = vmatpush3.bf16.msra.mxu1 %v7635_v55 }
0x1448   : > { %7551 = vmatprep.subr.bf16.mxu1 %v7821_v16 }
0x144b   : > { %7552 = vmatpush3.bf16.msra.mxu1 %v7636_v51 }
0x144c   : > { %7553 = vmatprep.subr.bf16.mxu1 %v7821_v16 }
0x144f   : > { %7554 = vmatpush3.bf16.msra.mxu1 %v7637_v1 }
0x1450   : > { %7555 = vmatprep.subr.bf16.mxu1 %v7821_v16 }
0x1453   : > { %7556 = vmatpush3.bf16.msra.mxu1 %v7638_v47 }
0x1519   : > { %v6757_v45 = vpop.f32.mrb[24].mxu1 }
0x151a   : > { %v6758_v20 = vadd.f32 %v7302_v7, %v6757_v45  ;;  %v7539_v25 = vpop.f32.mrb[25].mxu1 }
0x151b   : > { %v6760_v38 = vpop.f32.mrb[26].mxu1 }
0x151c   : > { %v6763_v29 = vadd.f32 %v6758_v20, %v12164_v28  ;;  %v7540_v62 = vpop.f32.mrb[27].mxu1  ;;  %v7634_v28 = vld [vmem:[%s12387_s13 + $0x18] sm:$0xff]  }
0x151d   : > { %7544 = vmatpush3.bf16.msra.mxu0 %v7634_v28 }
0x151e   : > { %v6768_v41 = vsel %vm5433_vm11, %v6763_v29, 0.0 }
0x151f   : > { %6769 = vadd.xlane.f32.xlu1 %v6768_v41 }
0x15ac   : > { %v6770_v53 = vpop.xlane.xlu1 %6769 }
0x15ad   : > { %v6771_v17 = vmul.f32 0.03125, %v6770_v53 }
0x15af   : > { %v6772_v0 = vsub.f32 %v6763_v29, %v6771_v17  ;;  %v6995_v29 = vld [vmem:[#allocation3] sm:$0x1] }
0x15b1   : > { %v6773_v13 = vmul.f32 %v6772_v0, %v6772_v0 }
0x15b3   : > { %v6774_v59 = vsel %vm5433_vm11, %v6773_v13, 0.0 }
0x15b4   : > { %6775 = vadd.xlane.f32.xlu0 %v6774_v59 }
0x1641   : > { %v6776_v61 = vpop.xlane.xlu0 %6775 }
0x1642   : > { %v6777_v58 = vmul.f32 0.03125, %v6776_v61 }
0x1644   : > { %v6778_v6 = vadd.f32 1e-05, %v6777_v58 }
0x1646   : > { %7675 = vrsqrt.f32 %v6778_v6 }
0x1650   : > { %v7676_v32 = vpop.eup %7675 }
0x1651   : > { %v6780_v46 = vmul.f32 %v7676_v32, %v6772_v0 }
0x1653   : > { %v6787_v27 = vmul.f32 %v7308_v2, %v6780_v46 }
0x1655   : > { %v6794_v35 = vadd.f32 %v7309_v30, %v6787_v27 }
0x1657   : > { %v6800_v34 = vpack.c.bf16 %v6794_v35, %v6794_v35 }
0x1659   : > { %7546 = vmatmul.mubr.msk.bf16.vlgmr.msra.gmra.mrb[36].mxu0 %vm4335_vm7, %v6800_v34 }
0x172c   : > { %v6858_v36 = vpop.f32.mrb[36].mxu0 }
0x172d   : > { %v6859_v4 = vadd.f32 %v7315_v44, %v6858_v36  ;;  %v7547_v48 = vpop.f32.mrb[37].mxu0 }
0x172e   : > { %v6861_v8 = vpop.f32.mrb[38].mxu0 }
0x172f   : > { %v6864_v43 = vmax.f32 %v6859_v4, 0.0  ;;  %v7548_v50 = vpop.f32.mrb[39].mxu0 }
0x1731   : > { %v6874_v18 = vpack.c.bf16 %v6864_v43, %v6864_v43 }
0x1733   : > { %7558 = vmatmul.mubr.msk.bf16.vlgmr.msra.gmra.mrb[28].mxu1 %vm5570_vm12, %v6874_v18 }
0x1806   : > { %v6944_v26 = vpop.f32.mrb[28].mxu1 }
0x1807   : > { %v6945_v16 = vadd.f32 %v7328_v37, %v6944_v26  ;;  %v7559_v60 = vpop.f32.mrb[29].mxu1 }
0x1808   : > { %v6947_v3 = vpop.f32.mrb[30].mxu1 }
0x1809   : > { %v6950_v21 = vadd.f32 %v6945_v16, %v6794_v35  ;;  %v7560_v12 = vpop.f32.mrb[31].mxu1 }
0x180b   : > { %v6955_v57 = vsel %vm5433_vm11, %v6950_v21, 0.0 }
0x180c   : > { %6956 = vadd.xlane.f32.xlu0 %v6955_v57 }
0x1899   : > { %v6957_v14 = vpop.xlane.xlu0 %6956 }
0x189a   : > { %v6958_v33 = vmul.f32 0.03125, %v6957_v14 }
0x189c   : > { %v6959_v19 = vsub.f32 %v6950_v21, %v6958_v33 }
0x189e   : > { %v6960_v15 = vmul.f32 %v6959_v19, %v6959_v19 }
0x18a0   : > { %v6961_v42 = vsel %vm5433_vm11, %v6960_v15, 0.0 }
0x18a1   : > { %6962 = vadd.xlane.f32.xlu1 %v6961_v42 }
0x192e   : > { %v6963_v49 = vpop.xlane.xlu1 %6962 }
0x192f   : > { %v6964_v10 = vmul.f32 0.03125, %v6963_v49 }
0x1931   : > { %v6965_v5 = vadd.f32 1e-05, %v6964_v10 }
0x1933   : > { %7677 = vrsqrt.f32 %v6965_v5 }
0x193d   : > { %v7678_v23 = vpop.eup %7677 }
0x193e   : > { %v6967_v39 = vmul.f32 %v7678_v23, %v6959_v19 }
0x1940   : > { %v6974_v56 = vmul.f32 %v7336_v54, %v6967_v39 }
0x1942   : > { %v6981_v24 = vadd.f32 %v7337_v22, %v6974_v56 }
0x1944   : > { %v6983_v52 = vmul.f32 %v6982_v40, %v6981_v24 }
0x1946   : > { %v6984_v31 = vsel %vm5433_vm11, %v6983_v52, 0.0 }
0x1947   : > { %6985 = vadd.xlane.f32.xlu0 %v6984_v31 }
0x19d4   : > { %v6986_v63 = vpop.xlane.xlu0 %6985 }
0x19d5   : > { %v6987_v9 = vrot.slane %v6986_v63, 4 }
0x19d7   : > { %v6988_v7 = vadd.f32 %v6987_v9, %v6986_v63 }
0x19d9   : > { %v6989_v45 = vrot.slane %v6988_v7, 2 }
0x19db   : > { %v6990_v20 = vadd.f32 %v6989_v45, %v6988_v7 }
0x19dd   : > { %v6991_v25 = vrot.slane %v6990_v20, 1 }
0x19df   : > { %v6992_v38 = vadd.f32 %v6991_v25, %v6990_v20 }
0x19e1   : > { %7561 = vpush %v6992_v38 }
0x1a12   : > { %s7562_s3 = spop %7561 }
0x1a13   : > { %v6994_v62 = vstv %s7562_s3 }
0x1a14   : > { %v6996_v41 = vadd.f32 %v6995_v29, %v6994_v62 }
0x1a16   : > { %6998 = vst.msk [vmem:[%s694_s1] sm:$0x1] %vm6997_vm13, %v6996_v41 }
0x1a17 PF: > { %s36_s28 = sadd.s32 1, %s7814_s28  }
0x1a18   : > { %p33_p5 = scmp.ge.s32.totalorder %s36_s28, 4  }
0x1a1a   :  { %35 = sbr.rel (!%p33_p5) target bundleno = 15 (0xf), region = 174 }
0x1a21   :  { %7016 = vsyncpa [#allocation5], 1 }
0x1a22   :  { %7018 = vsyncpa [#allocation5 + $0x1], 1 }
0x1a23   :  { %7019 = vsyncpa [#allocation7], 1 }

</bundles_post_ra>
